<compile_context>
chip_gen: v6e
topology: v6e:2x2x1
jax: 0.10.0
libtpu: 0.0.40
codegen_flags: <defaults>
</compile_context>

<pallas_src>
import math
import functools

import jax
import jax.numpy as jnp
from jax import lax
from jax.experimental import pallas as pl
from jax.experimental.pallas import tpu as pltpu

# ---------------- scaled-down config (ratios follow resnet50 URVOS) ----------------
C1, C2, C3, C4, C5 = 4, 16, 32, 64, 128          # c1, r2, r3, r4, r5 channels
KEYDIM, VALDIM = 8, 32                           # KeyValue dims (128/512 scaled)
EMB, LANGD, HEADS = 32, 48, 8                    # CrossAtt emb / lang_dim / head_num
MDIM = 16                                        # decoder mdim
MULTI_DIM = EMB                                  # CrossAtt output channels
NUM_CLASSES = 2

IMG_MEAN = jnp.array([0.485, 0.456, 0.406], jnp.float32).reshape(1, 3, 1, 1)
IMG_STD = jnp.array([0.229, 0.224, 0.225], jnp.float32).reshape(1, 3, 1, 1)


def _round_up(x, m):
    return ((x + m - 1) // m) * m


# =====================================================================================
# Pallas kernels
# =====================================================================================
def _mm_kernel(a_ref, b_ref, bias_ref, o_ref, *, relu):
    acc = jnp.dot(a_ref[...], b_ref[...], preferred_element_type=jnp.float32)
    acc = acc + bias_ref[...]
    if relu:
        acc = jnp.maximum(acc, 0.0)
    o_ref[...] = acc


def pallas_matmul(a, b, bias=None, relu=False, tm=512):
    """(M,K) @ (K,N) + bias with optional fused relu, tiled over M.

    Perf: operands are cast to bf16 (MXU-native on v6e/v7x, f32 accumulate), tm=512 so
    large-M im2col matmuls run near the HBM roofline, and the last block is left partial
    (rows are independent, OOB writes are masked) instead of padding/slicing through HBM.
    """
    M, K = a.shape
    _, N = b.shape
    a = a.astype(jnp.bfloat16)
    b = b.astype(jnp.bfloat16)
    Mp = _round_up(M, 8)
    if Mp != M:                       # rare fallback; every call site here has M % 8 == 0
        a = jnp.pad(a, ((0, Mp - M), (0, 0)))
    if bias is None:
        bias = jnp.zeros((N,), jnp.float32)
    bias = bias.reshape(1, N).astype(jnp.float32)

    tm_eff = min(tm, Mp)
    out = pl.pallas_call(
        functools.partial(_mm_kernel, relu=relu),
        out_shape=jax.ShapeDtypeStruct((Mp, N), jnp.float32),
        grid=(pl.cdiv(Mp, tm_eff),),
        in_specs=[
            pl.BlockSpec((tm_eff, K), lambda i: (i, 0)),
            pl.BlockSpec((K, N), lambda i: (0, 0)),
            pl.BlockSpec((1, N), lambda i: (0, 0)),
        ],
        out_specs=pl.BlockSpec((tm_eff, N), lambda i: (i, 0)),
        compiler_params=pltpu.CompilerParams(dimension_semantics=("parallel",)),
    )(a, b, bias)
    return out if Mp == M else out[:M]


def mematt_pallas(mi, qi, mo, scale):
    """MemAtt core: p = softmax((mi @ qi) * scale, axis=THW); mem = mo @ p.
    mi:(B,THW,De)  qi:(B,De,HW)  mo:(B,Do,THW) -> mem:(B,Do,HW)

    Perf: the unused attention map is no longer written to HBM; HW is tiled (columns of the
    softmax are independent) so the resident (THW, t_hw) score block stays bounded even on
    v7x's 64 MiB VMEM; operands are bf16, accumulation f32.
    TODO(synk): for very large THW an online-softmax over a THW grid axis would be needed.
    """
    B, THW, De = mi.shape
    _, _, HW = qi.shape
    _, Do, _ = mo.shape
    t_hw = HW if HW <= 512 else 512
    grid_hw = pl.cdiv(HW, t_hw)

    mi = mi.astype(jnp.bfloat16)
    qi = qi.astype(jnp.bfloat16)
    mo = mo.astype(jnp.bfloat16)

    def kernel(mi_ref, qi_ref, mo_ref, mem_ref):
        s = jnp.dot(mi_ref[0], qi_ref[0], preferred_element_type=jnp.float32) * scale
        s = s - jnp.max(s, axis=0, keepdims=True)
        e = jnp.exp(s)
        p = e / jnp.sum(e, axis=0, keepdims=True)          # softmax over THW (torch dim=1)
        mem_ref[0] = jnp.dot(mo_ref[0], p.astype(jnp.bfloat16),
                             preferred_element_type=jnp.float32)

    return pl.pallas_call(
        kernel,
        out_shape=jax.ShapeDtypeStruct((B, Do, HW), jnp.float32),
        grid=(B, grid_hw),
        in_specs=[
            pl.BlockSpec((1, THW, De), lambda b, j: (b, 0, 0)),
            pl.BlockSpec((1, De, t_hw), lambda b, j: (b, 0, j)),
            pl.BlockSpec((1, Do, THW), lambda b, j: (b, 0, 0)),
        ],
        out_specs=pl.BlockSpec((1, Do, t_hw), lambda b, j: (b, 0, j)),
        compiler_params=pltpu.CompilerParams(
            dimension_semantics=("parallel", "parallel"),
            vmem_limit_bytes=48 * 1024 * 1024,
        ),
    )(mi, qi, mo)


def crossatt_pallas(q, k, v):
    """CrossAtt core. q,k,v: (B, HEADS, N, d) with N = L*H*W.
    att = softmax(q @ k^T over keys); out = att @ v  ->  (B, HEADS, N, d) f32.

    Perf: grid collapsed to (B,) (all heads batched per step -> per-step grid overhead is
    amortized and 2 parallel blocks remain for v7x's 2 TensorCores), canonical einsums so
    the MXU consumes operands in place (no XLU transposes), bf16 operands / f32 accumulate.
    """
    B, Hh, N, d = q.shape
    q = q.astype(jnp.bfloat16)
    k = k.astype(jnp.bfloat16)
    v = v.astype(jnp.bfloat16)

    def kernel(q_ref, k_ref, v_ref, o_ref):
        qb, kb, vb = q_ref[0], k_ref[0], v_ref[0]                       # (H, N, d)
        s = jnp.einsum('hnd,hmd->hnm', qb, kb, preferred_element_type=jnp.float32)
        s = s - jnp.max(s, axis=-1, keepdims=True)
        e = jnp.exp(s)
        att = e / jnp.sum(e, axis=-1, keepdims=True)                    # softmax over keys (torch dim=2)
        o_ref[0] = jnp.einsum('hnm,hmd->hnd', att.astype(vb.dtype), vb,
                              preferred_element_type=jnp.float32)

    return pl.pallas_call(
        kernel,
        out_shape=jax.ShapeDtypeStruct((B, Hh, N, d), jnp.float32),
        grid=(B,),
        in_specs=[pl.BlockSpec((1, Hh, N, d), lambda b: (b, 0, 0, 0))] * 3,
        out_specs=pl.BlockSpec((1, Hh, N, d), lambda b: (b, 0, 0, 0)),
        compiler_params=pltpu.CompilerParams(dimension_semantics=("parallel",)),
    )(q, k, v)


def softmax_channel_pallas(x):
    """F.softmax(x, dim=1) for NCHW x.

    Perf: lane-dense layout (B, C, H*W) with H*W on lanes, softmax over the C sublanes;
    no HBM transpose passes in the wrapper and no masked narrow stores.
    """
    B, C, H, W = x.shape
    HW = H * W
    x3 = x.reshape(B, C, HW).astype(jnp.float32)

    def kernel(x_ref, o_ref):
        v = x_ref[0]                                      # (C, HW)
        v = v - jnp.max(v, axis=0, keepdims=True)
        e = jnp.exp(v)
        o_ref[0] = e / jnp.sum(e, axis=0, keepdims=True)

    out = pl.pallas_call(
        kernel,
        out_shape=jax.ShapeDtypeStruct((B, C, HW), jnp.float32),
        grid=(B,),
        in_specs=[pl.BlockSpec((1, C, HW), lambda b: (b, 0, 0))],
        out_specs=pl.BlockSpec((1, C, HW), lambda b: (b, 0, 0)),
        compiler_params=pltpu.CompilerParams(dimension_semantics=("parallel",)),
    )(x3)
    return out.reshape(B, C, H, W)


# =====================================================================================
# Conv / Linear built on the Pallas matmul (im2col is glue)
# =====================================================================================
def conv2d(x, p, stride=1, padding=1, relu=False, channels_last=False):
    """NCHW conv using im2col + Pallas matmul. p = {'w': (Cout,Cin,kh,kw), 'b': (Cout,)|None}
    1x1/stride-1/no-pad convs skip patch extraction entirely (plain reshape)."""
    w, b = p['w'], p['b']
    Nb, C, H, W = x.shape
    Cout, Cin, kh, kw = w.shape
    Ho = (H + 2 * padding - kh) // stride + 1
    Wo = (W + 2 * padding - kw) // stride + 1
    if kh == 1 and kw == 1 and padding == 0 and stride == 1:
        patches = x.transpose(0, 2, 3, 1).reshape(Nb * H * W, C)
    else:
        xp = jnp.pad(x, ((0, 0), (0, 0), (padding, padding), (padding, padding)))
        cols = []
        for i in range(kh):
            for j in range(kw):
                cols.append(xp[:, :, i:i + stride * Ho:stride, j:j + stride * Wo:stride])
        patches = jnp.stack(cols, axis=2)                       # (Nb, C, kh*kw, Ho, Wo)
        patches = patches.transpose(0, 3, 4, 1, 2).reshape(Nb * Ho * Wo, C * kh * kw)
    wmat = w.reshape(Cout, Cin * kh * kw).T                     # (Cin*kh*kw, Cout)
    out = pallas_matmul(patches, wmat, b, relu=relu)
    out = out.reshape(Nb, Ho, Wo, Cout)
    return out if channels_last else out.transpose(0, 3, 1, 2)


def linear(x2d, p, relu=False):
    return pallas_matmul(x2d, p['w'].T, p['b'], relu=relu)


def batchnorm(x, p, eps=1e-5):
    g = p['gamma'][None, :, None, None]
    b = p['beta'][None, :, None, None]
    m = p['mean'][None, :, None, None]
    v = p['var'][None, :, None, None]
    return (x - m) * g / jnp.sqrt(v + eps) + b


def maxpool3x3s2(x):
    return lax.reduce_window(x, -jnp.inf, lax.max,
                             (1, 1, 3, 3), (1, 1, 2, 2),
                             ((0, 0), (0, 0), (1, 1), (1, 1)))


def upsample_bilinear(x, s):
    # TODO(synk): F.interpolate(..., mode='bilinear', align_corners=False) kept in JAX glue.
    N, C, H, W = x.shape
    return jax.image.resize(x, (N, C, H * s, W * s), method='bilinear')


def pad_divide_by(arrays, d, size):
    h, w = size
    new_h = h if h % d == 0 else h + d - h % d
    new_w = w if w % d == 0 else w + d - w % d
    lh, uh = (new_h - h) // 2, (new_h - h) - (new_h - h) // 2
    lw, uw = (new_w - w) // 2, (new_w - w) - (new_w - w) // 2
    out = []
    for a in arrays:
        pads = [(0, 0)] * (a.ndim - 2) + [(lh, uh), (lw, uw)]
        out.append(jnp.pad(a, pads))
    return out, (lw, uw, lh, uh)


# =====================================================================================
# Module forwards
# =====================================================================================
def encoder_q_fwd(p, frames):
    f = (frames - IMG_MEAN) / IMG_STD
    x = conv2d(f, p['conv1'], stride=2, padding=3)
    x = batchnorm(x, p['bn1'])
    c1 = jnp.maximum(x, 0.0)
    x = maxpool3x3s2(c1)
    r2 = conv2d(x, p['res2'], 1, 1, relu=True)
    r3 = conv2d(r2, p['res3'], 2, 1, relu=True)
    r4 = conv2d(r3, p['res4'], 2, 1, relu=True)
    r5 = conv2d(r4, p['res5'], 2, 1, relu=True)
    return r5, r4, r3, r2, c1, f


def encoder_m_fwd(p, in_f, in_m):
    f = (in_f - IMG_MEAN) / IMG_STD
    m = in_m[:, None].astype(jnp.float32)
    x = conv2d(f, p['conv1'], stride=2, padding=3) + conv2d(m, p['conv1_m'], stride=2, padding=3)
    x = batchnorm(x, p['bn1'])
    c1 = jnp.maximum(x, 0.0)
    x = maxpool3x3s2(c1)
    r2 = conv2d(x, p['res2'], 1, 1, relu=True)
    r3 = conv2d(r2, p['res3'], 2, 1, relu=True)
    r4 = conv2d(r3, p['res4'], 2, 1, relu=True)
    return r4, r3, r2, c1, f


def keyvalue_fwd(p, x):
    # fused key/val projection: one im2col + one matmul over the same patches, split after.
    w = jnp.concatenate([p['key']['w'], p['val']['w']], axis=0)
    b = jnp.concatenate([p['key']['b'], p['val']['b']], axis=0)
    kv = conv2d(x, {'w': w, 'b': b})
    return kv[:, :KEYDIM], kv[:, KEYDIM:]


def memorize_fwd(p, frames, masks):
    (frames, masks), _ = pad_divide_by([frames, masks], 16, (frames.shape[2], frames.shape[3]))
    r4, *_ = encoder_m_fwd(p['enc'], frames, masks)
    k4, v4 = keyvalue_fwd(p['kv'], r4)
    return k4[:, None].astype(jnp.float32), v4[:, None].astype(jnp.float32)


def query_fwd(p, frame):
    (frame,), _ = pad_divide_by([frame], 16, (frame.shape[2], frame.shape[3]))
    _, r4, _, _, _, _ = encoder_q_fwd(p['enc'], frame)
    k4, v4 = keyvalue_fwd(p['kv'], r4)
    return k4, v4


def mem_att_fwd(m_in, m_out, q_in, q_out):
    B, T, De, H, W = m_in.shape
    Do = m_out.shape[2]
    mi = m_in.reshape(B, De, T * H * W).transpose(0, 2, 1)   # (B, THW, De)
    qi = q_in.reshape(B, De, H * W)                          # (B, De, HW)
    mo = m_out.reshape(B, Do, T * H * W)                     # (B, Do, THW)
    mem = mematt_pallas(mi, qi, mo, 1.0 / math.sqrt(De))     # attention map no longer emitted
    mem = mem.reshape(B, Do, H, W)
    return jnp.concatenate([mem, q_out], axis=1)


def cross_att_fwd(p, vis, words):
    B, Cv, H, W = vis.shape
    _, L, Cl = words.shape
    HW = H * W
    N = L * HW
    d = EMB // HEADS

    vis_att = conv2d(vis, p['convSA'], stride=1, padding=0)            # 1x1: no im2col
    lang = linear(words.reshape(B * L, Cl), p['linearSA']).reshape(B, L, EMB)
    lang_att = lang.transpose(0, 2, 1)                                 # (B, EMB, L)

    vis_ = jnp.broadcast_to(vis_att[:, :, None, :, :], (B, EMB, L, H, W))
    emb_ = jnp.broadcast_to(lang_att[:, :, :, None, None], (B, EMB, L, H, W))
    multi = jnp.concatenate([vis_, emb_], axis=1)                      # (B, 2E, L, H, W)
    multi = multi.transpose(0, 2, 1, 3, 4).reshape(B * L, 2 * EMB, H, W)

    # Fused Query/Key/Value/resValue: one im2col + one (M, 2E*9) @ (2E*9, 4E=128) matmul
    # -> lane-dense (128-wide) output, 1 kernel launch instead of 4.
    w_f = jnp.concatenate([p[n]['w'] for n in ('Query', 'Key', 'Value', 'resValue')], axis=0)
    b_f = jnp.concatenate([p[n]['b'] for n in ('Query', 'Key', 'Value', 'resValue')], axis=0)
    qkvr = conv2d(multi, {'w': w_f, 'b': b_f}, channels_last=True)     # (B*L, H, W, 4E)
    qkvr = qkvr.reshape(B, L, H, W, 4, HEADS, d)

    def to_heads(i):                                                   # -> (B, HEADS, N, d)
        return qkvr[..., i, :, :].transpose(0, 4, 1, 2, 3, 5).reshape(B, HEADS, N, d)

    q_, k_, v_ = to_heads(0), to_heads(1), to_heads(2)
    rv = qkvr[..., 3, :, :].reshape(B, L, H, W, EMB)

    v_att = crossatt_pallas(q_, k_, v_)                                # (B, HEADS, N, d) f32
    v_att = v_att.transpose(0, 2, 1, 3).reshape(B, L, H, W, EMB)
    out = jnp.mean(v_att + rv, axis=1)                                 # mean over L
    return out.transpose(0, 3, 1, 2)                                   # (B, EMB, H, W)


def res_block_fwd(p, x):
    r = conv2d(jnp.maximum(x, 0.0), p['conv1'])
    r = conv2d(jnp.maximum(r, 0.0), p['conv2'])
    return x + r


def refine_fwd(p, f, pm):
    s = res_block_fwd(p['ResFS'], conv2d(f, p['convFS']))
    m = s + upsample_bilinear(pm, 2)
    return res_block_fwd(p['ResMM'], m)


def decoder_fwd(p, multi5, mem4, v5, v4, v3, v2, v1):
    m5 = res_block_fwd(p['res_multi_rb'], conv2d(multi5, p['res_multi_conv']))
    r4 = refine_fwd(p['RF4'], v4 + mem4, m5)
    r3 = refine_fwd(p['RF3'], v3, r4)
    r2 = refine_fwd(p['RF2'], v2, r3)
    # TODO(synk): Self_Attention(mdim) architecture is not provided; a 3x3 prediction conv on r2 is used.
    logit = conv2d(r2, p['self_att'])
    pred = upsample_bilinear(logit, 4)
    return pred


def urvos_forward(params, mem_frames, mem_masks, in_frames, words):
    # torch.no_grad() section (inference feature extraction)
    vis_r5, vis_r4, vis_r3, vis_r2, vis_c1, _ = encoder_q_fwd(params['enc_q'], in_frames)
    k_m, v_m = memorize_fwd(params['memorize'], mem_frames, mem_masks)
    k_q, v_q = query_fwd(params['query'], in_frames)
    mem_r4 = mem_att_fwd(k_m, v_m, k_q, v_q)
    multi_r5 = cross_att_fwd(params['cas'], vis_r5, words)

    logit = decoder_fwd(params['dec'], multi_r5, mem_r4, vis_r5, vis_r4, vis_r3, vis_r2, vis_c1)
    mask = softmax_channel_pallas(logit)
    return mask, logit


# =====================================================================================
# Deterministic parameter init
# =====================================================================================
def init_params(key):
    ks = iter(jax.random.split(key, 200))
    nx = lambda: next(ks)

    def conv_p(cout, cin, k, bias=True):
        fan_in = cin * k * k
        std = math.sqrt(2.0 / fan_in)
        w = std * jax.random.normal(nx(), (cout, cin, k, k), jnp.float32)
        b = jnp.zeros((cout,), jnp.float32) if bias else None
        return {'w': w, 'b': b}

    def lin_p(dout, din):
        std = math.sqrt(2.0 / din)
        return {'w': std * jax.random.normal(nx(), (dout, din), jnp.float32),
                'b': jnp.zeros((dout,), jnp.float32)}

    def bn_p(c):
        return {'gamma': jnp.ones((c,), jnp.float32), 'beta': jnp.zeros((c,), jnp.float32),
                'mean': jnp.zeros((c,), jnp.float32), 'var': jnp.ones((c,), jnp.float32)}

    def rb_p(dim):
        return {'conv1': conv_p(dim, dim, 3), 'conv2': conv_p(dim, dim, 3)}

    def refine_p(inplanes, planes):
        return {'convFS': conv_p(planes, inplanes, 3), 'ResFS': rb_p(planes), 'ResMM': rb_p(planes)}

    def enc_q_p():
        return {'conv1': conv_p(C1, 3, 7, bias=False), 'bn1': bn_p(C1),
                'res2': conv_p(C2, C1, 3), 'res3': conv_p(C3, C2, 3),
                'res4': conv_p(C4, C3, 3), 'res5': conv_p(C5, C4, 3)}

    def enc_m_p():
        return {'conv1': conv_p(C1, 3, 7, bias=False), 'conv1_m': conv_p(C1, 1, 7, bias=False),
                'bn1': bn_p(C1),
                'res2': conv_p(C2, C1, 3), 'res3': conv_p(C3, C2, 3), 'res4': conv_p(C4, C3, 3)}

    def kv_p():
        return {'key': conv_p(KEYDIM, C4, 3), 'val': conv_p(VALDIM, C4, 3)}

    # URVOS.Encoder_M / KV_M_r4 / KV_Q_r4 and Decoder.convFM / Mem_emb are unused in forward.
    return {
        'enc_q': enc_q_p(),
        'query': {'enc': enc_q_p(), 'kv': kv_p()},
        'memorize': {'enc': enc_m_p(), 'kv': kv_p()},
        'cas': {'convSA': conv_p(EMB, C5, 1), 'linearSA': lin_p(EMB, LANGD),
                'Query': conv_p(EMB, 2 * EMB, 3), 'Key': conv_p(EMB, 2 * EMB, 3),
                'Value': conv_p(EMB, 2 * EMB, 3), 'resValue': conv_p(EMB, 2 * EMB, 3)},
        'dec': {'res_multi_conv': conv_p(MDIM, MULTI_DIM, 3), 'res_multi_rb': rb_p(MDIM),
                'RF4': refine_p(C4, MDIM), 'RF3': refine_p(C3, MDIM), 'RF2': refine_p(C2, MDIM),
                'self_att': conv_p(NUM_CLASSES, MDIM, 3)},
    }


# =====================================================================================
if __name__ == "__main__":
    key = jax.random.PRNGKey(0)
    kp, k1, k2, k3, k4 = jax.random.split(key, 5)
    params = init_params(kp)

    B, H, W, L = 2, 64, 64, 8
    mem_frames = jax.random.uniform(k1, (B, 3, H, W), jnp.float32)
    mem_masks = (jax.random.uniform(k2, (B, H, W)) > 0.5).astype(jnp.float32)
    in_frames = jax.random.uniform(k3, (B, 3, H, W), jnp.float32)
    words = jax.random.normal(k4, (B, L, LANGD), jnp.float32)

    mask, logit = jax.jit(urvos_forward)(params, mem_frames, mem_masks, in_frames, words)
    jax.block_until_ready((mask, logit))

    assert mask.shape == (B, NUM_CLASSES, H, W), mask.shape
    assert logit.shape == (B, NUM_CLASSES, H, W), logit.shape
    assert bool(jnp.all(jnp.isfinite(mask))) and bool(jnp.all(jnp.isfinite(logit)))
    # softmax over channels sums to 1
    assert bool(jnp.allclose(mask.sum(axis=1), 1.0, atol=1e-4))
    print("KERNEL_OK")
</pallas_src>

<mosaic_0001>
module attributes {stable_mosaic.version = 11 : i64} {
  func.func @_mm_kernel(%arg0: i32, %arg1: memref<16x48xbf16, #tpu.memory_space<vmem>>, %arg2: memref<48x32xbf16, #tpu.memory_space<vmem>>, %arg3: memref<1x32xf32, #tpu.memory_space<vmem>>, %arg4: memref<16x32xf32, #tpu.memory_space<vmem>>) attributes {dimension_semantics = [#tpu.dimension_semantics<parallel>], iteration_bounds = array<i64: 1>, scalar_prefetch = 0 : i64, scratch_operands = 0 : i64, tpu.core_type = #tpu.core_type<tc>, window_params = [{transform_indices = @transform_0, window_bounds = array<i64: 16, 48>}, {pipeline_mode = #tpu.pipeline_mode<synchronous>, transform_indices = @transform_1, window_bounds = array<i64: 48, 32>}, {pipeline_mode = #tpu.pipeline_mode<synchronous>, transform_indices = @transform_2, window_bounds = array<i64: 1, 32>}, {transform_indices = @transform_3, window_bounds = array<i64: 16, 32>}]} {
    %c0 = arith.constant 0 : index
    %c0_0 = arith.constant 0 : index
    %0 = vector.load %arg1[%c0, %c0_0] : memref<16x48xbf16, #tpu.memory_space<vmem>>, vector<16x48xbf16>
    %c0_1 = arith.constant 0 : index
    %c0_2 = arith.constant 0 : index
    %1 = vector.load %arg2[%c0_1, %c0_2] : memref<48x32xbf16, #tpu.memory_space<vmem>>, vector<48x32xbf16>
    %cst = arith.constant dense<0.000000e+00> : vector<16x32xf32>
    %2 = tpu.matmul %0, %1, %cst {dimension_numbers = #tpu.dot_dimension_numbers<[1], [0], [0], [1], [0, 0, 1, 1], [], []>} : vector<16x48xbf16>, vector<48x32xbf16>, vector<16x32xf32> -> vector<16x32xf32>
    %c0_3 = arith.constant 0 : index
    %c0_4 = arith.constant 0 : index
    %3 = vector.load %arg3[%c0_3, %c0_4] : memref<1x32xf32, #tpu.memory_space<vmem>>, vector<1x32xf32>
    %4 = vector.broadcast %3 : vector<1x32xf32> to vector<16x32xf32>
    %5 = arith.addf %2, %4 : vector<16x32xf32>
    %c0_5 = arith.constant 0 : index
    %c0_6 = arith.constant 0 : index
    %6 = vector.load %arg4[%c0_5, %c0_6] : memref<16x32xf32, #tpu.memory_space<vmem>>, vector<16x32xf32>
    tpu.vector_store %arg4[%c0_5, %c0_6], %5 {strides = array<i32>} : memref<16x32xf32, #tpu.memory_space<vmem>>, vector<16x32xf32>,
    return
  }
  func.func @transform_0(%arg0: i32) -> (i32, i32) {
    %c0_i32 = arith.constant 0 : i32
    %c0_i32_0 = arith.constant 0 : i32
    return %arg0, %c0_i32 : i32, i32
  }
  func.func @transform_1(%arg0: i32) -> (i32, i32) {
    %c0_i32 = arith.constant 0 : i32
    %c0_i32_0 = arith.constant 0 : i32
    %c0_i32_1 = arith.constant 0 : i32
    return %c0_i32, %c0_i32_0 : i32, i32
  }
  func.func @transform_2(%arg0: i32) -> (i32, i32) {
    %c0_i32 = arith.constant 0 : i32
    %c0_i32_0 = arith.constant 0 : i32
    %c0_i32_1 = arith.constant 0 : i32
    return %c0_i32, %c0_i32_0 : i32, i32
  }
  func.func @transform_3(%arg0: i32) -> (i32, i32) {
    %c0_i32 = arith.constant 0 : i32
    %c0_i32_0 = arith.constant 0 : i32
    return %arg0, %c0_i32 : i32, i32
  }
}

module attributes {stable_mosaic.version = 11 : i64} {
  func.func @_mm_kernel(%arg0: i32, %arg1: memref<512x147xbf16, #tpu.memory_space<vmem>>, %arg2: memref<147x4xbf16, #tpu.memory_space<vmem>>, %arg3: memref<1x4xf32, #tpu.memory_space<vmem>>, %arg4: memref<512x4xf32, #tpu.memory_space<vmem>>) attributes {dimension_semantics = [#tpu.dimension_semantics<parallel>], iteration_bounds = array<i64: 4>, scalar_prefetch = 0 : i64, scratch_operands = 0 : i64, tpu.core_type = #tpu.core_type<tc>, window_params = [{transform_indices = @transform_0, window_bounds = array<i64: 512, 147>}, {pipeline_mode = #tpu.pipeline_mode<synchronous>, transform_indices = @transform_1, window_bounds = array<i64: 147, 4>}, {pipeline_mode = #tpu.pipeline_mode<synchronous>, transform_indices = @transform_2, window_bounds = array<i64: 1, 4>}, {transform_indices = @transform_3, window_bounds = array<i64: 512, 4>}]} {
    %c0 = arith.constant 0 : index
    %c0_0 = arith.constant 0 : index
    %0 = vector.load %arg1[%c0, %c0_0] : memref<512x147xbf16, #tpu.memory_space<vmem>>, vector<512x147xbf16>
    %c0_1 = arith.constant 0 : index
    %c0_2 = arith.constant 0 : index
    %1 = vector.load %arg2[%c0_1, %c0_2] : memref<147x4xbf16, #tpu.memory_space<vmem>>, vector<147x4xbf16>
    %cst = arith.constant dense<0.000000e+00> : vector<512x4xf32>
    %2 = tpu.matmul %0, %1, %cst {dimension_numbers = #tpu.dot_dimension_numbers<[1], [0], [0], [1], [0, 0, 1, 1], [], []>} : vector<512x147xbf16>, vector<147x4xbf16>, vector<512x4xf32> -> vector<512x4xf32>
    %c0_3 = arith.constant 0 : index
    %c0_4 = arith.constant 0 : index
    %3 = vector.load %arg3[%c0_3, %c0_4] : memref<1x4xf32, #tpu.memory_space<vmem>>, vector<1x4xf32>
    %4 = vector.broadcast %3 : vector<1x4xf32> to vector<512x4xf32>
    %5 = arith.addf %2, %4 : vector<512x4xf32>
    %c0_5 = arith.constant 0 : index
    %c0_6 = arith.constant 0 : index
    %6 = vector.load %arg4[%c0_5, %c0_6] : memref<512x4xf32, #tpu.memory_space<vmem>>, vector<512x4xf32>
    tpu.vector_store %arg4[%c0_5, %c0_6], %5 {strides = array<i32>} : memref<512x4xf32, #tpu.memory_space<vmem>>, vector<512x4xf32>,
    return
  }
  func.func @transform_0(%arg0: i32) -> (i32, i32) {
    %c0_i32 = arith.constant 0 : i32
    %c0_i32_0 = arith.constant 0 : i32
    return %arg0, %c0_i32 : i32, i32
  }
  func.func @transform_1(%arg0: i32) -> (i32, i32) {
    %c0_i32 = arith.constant 0 : i32
    %c0_i32_0 = arith.constant 0 : i32
    %c0_i32_1 = arith.constant 0 : i32
    return %c0_i32, %c0_i32_0 : i32, i32
  }
  func.func @transform_2(%arg0: i32) -> (i32, i32) {
    %c0_i32 = arith.constant 0 : i32
    %c0_i32_0 = arith.constant 0 : i32
    %c0_i32_1 = arith.constant 0 : i32
    return %c0_i32, %c0_i32_0 : i32, i32
  }
  func.func @transform_3(%arg0: i32) -> (i32, i32) {
    %c0_i32 = arith.constant 0 : i32
    %c0_i32_0 = arith.constant 0 : i32
    return %arg0, %c0_i32 : i32, i32
  }
}

module attributes {stable_mosaic.version = 11 : i64} {
  func.func @_mm_kernel(%arg0: i32, %arg1: memref<512x36xbf16, #tpu.memory_space<vmem>>, %arg2: memref<36x16xbf16, #tpu.memory_space<vmem>>, %arg3: memref<1x16xf32, #tpu.memory_space<vmem>>, %arg4: memref<512x16xf32, #tpu.memory_space<vmem>>) attributes {dimension_semantics = [#tpu.dimension_semantics<parallel>], iteration_bounds = array<i64: 1>, scalar_prefetch = 0 : i64, scratch_operands = 0 : i64, tpu.core_type = #tpu.core_type<tc>, window_params = [{transform_indices = @transform_0, window_bounds = array<i64: 512, 36>}, {pipeline_mode = #tpu.pipeline_mode<synchronous>, transform_indices = @transform_1, window_bounds = array<i64: 36, 16>}, {pipeline_mode = #tpu.pipeline_mode<synchronous>, transform_indices = @transform_2, window_bounds = array<i64: 1, 16>}, {transform_indices = @transform_3, window_bounds = array<i64: 512, 16>}]} {
    %c0 = arith.constant 0 : index
    %c0_0 = arith.constant 0 : index
    %0 = vector.load %arg1[%c0, %c0_0] : memref<512x36xbf16, #tpu.memory_space<vmem>>, vector<512x36xbf16>
    %c0_1 = arith.constant 0 : index
    %c0_2 = arith.constant 0 : index
    %1 = vector.load %arg2[%c0_1, %c0_2] : memref<36x16xbf16, #tpu.memory_space<vmem>>, vector<36x16xbf16>
    %cst = arith.constant dense<0.000000e+00> : vector<512x16xf32>
    %2 = tpu.matmul %0, %1, %cst {dimension_numbers = #tpu.dot_dimension_numbers<[1], [0], [0], [1], [0, 0, 1, 1], [], []>} : vector<512x36xbf16>, vector<36x16xbf16>, vector<512x16xf32> -> vector<512x16xf32>
    %c0_3 = arith.constant 0 : index
    %c0_4 = arith.constant 0 : index
    %3 = vector.load %arg3[%c0_3, %c0_4] : memref<1x16xf32, #tpu.memory_space<vmem>>, vector<1x16xf32>
    %4 = vector.broadcast %3 : vector<1x16xf32> to vector<512x16xf32>
    %5 = arith.addf %2, %4 : vector<512x16xf32>
    %cst_5 = arith.constant 0.000000e+00 : f32
    %6 = vector.broadcast %cst_5 : f32 to vector<512x16xf32>
    %7 = arith.maximumf %5, %6 : vector<512x16xf32>
    %c0_6 = arith.constant 0 : index
    %c0_7 = arith.constant 0 : index
    %8 = vector.load %arg4[%c0_6, %c0_7] : memref<512x16xf32, #tpu.memory_space<vmem>>, vector<512x16xf32>
    tpu.vector_store %arg4[%c0_6, %c0_7], %7 {strides = array<i32>} : memref<512x16xf32, #tpu.memory_space<vmem>>, vector<512x16xf32>,
    return
  }
  func.func @transform_0(%arg0: i32) -> (i32, i32) {
    %c0_i32 = arith.constant 0 : i32
    %c0_i32_0 = arith.constant 0 : i32
    return %arg0, %c0_i32 : i32, i32
  }
  func.func @transform_1(%arg0: i32) -> (i32, i32) {
    %c0_i32 = arith.constant 0 : i32
    %c0_i32_0 = arith.constant 0 : i32
    %c0_i32_1 = arith.constant 0 : i32
    return %c0_i32, %c0_i32_0 : i32, i32
  }
  func.func @transform_2(%arg0: i32) -> (i32, i32) {
    %c0_i32 = arith.constant 0 : i32
    %c0_i32_0 = arith.constant 0 : i32
    %c0_i32_1 = arith.constant 0 : i32
    return %c0_i32, %c0_i32_0 : i32, i32
  }
  func.func @transform_3(%arg0: i32) -> (i32, i32) {
    %c0_i32 = arith.constant 0 : i32
    %c0_i32_0 = arith.constant 0 : i32
    return %arg0, %c0_i32 : i32, i32
  }
}

module attributes {stable_mosaic.version = 11 : i64} {
  func.func @_mm_kernel(%arg0: i32, %arg1: memref<128x144xbf16, #tpu.memory_space<vmem>>, %arg2: memref<144x32xbf16, #tpu.memory_space<vmem>>, %arg3: memref<1x32xf32, #tpu.memory_space<vmem>>, %arg4: memref<128x32xf32, #tpu.memory_space<vmem>>) attributes {dimension_semantics = [#tpu.dimension_semantics<parallel>], iteration_bounds = array<i64: 1>, scalar_prefetch = 0 : i64, scratch_operands = 0 : i64, tpu.core_type = #tpu.core_type<tc>, window_params = [{transform_indices = @transform_0, window_bounds = array<i64: 128, 144>}, {pipeline_mode = #tpu.pipeline_mode<synchronous>, transform_indices = @transform_1, window_bounds = array<i64: 144, 32>}, {pipeline_mode = #tpu.pipeline_mode<synchronous>, transform_indices = @transform_2, window_bounds = array<i64: 1, 32>}, {transform_indices = @transform_3, window_bounds = array<i64: 128, 32>}]} {
    %c0 = arith.constant 0 : index
    %c0_0 = arith.constant 0 : index
    %0 = vector.load %arg1[%c0, %c0_0] : memref<128x144xbf16, #tpu.memory_space<vmem>>, vector<128x144xbf16>
    %c0_1 = arith.constant 0 : index
    %c0_2 = arith.constant 0 : index
    %1 = vector.load %arg2[%c0_1, %c0_2] : memref<144x32xbf16, #tpu.memory_space<vmem>>, vector<144x32xbf16>
    %cst = arith.constant dense<0.000000e+00> : vector<128x32xf32>
    %2 = tpu.matmul %0, %1, %cst {dimension_numbers = #tpu.dot_dimension_numbers<[1], [0], [0], [1], [0, 0, 1, 1], [], []>} : vector<128x144xbf16>, vector<144x32xbf16>, vector<128x32xf32> -> vector<128x32xf32>
    %c0_3 = arith.constant 0 : index
    %c0_4 = arith.constant 0 : index
    %3 = vector.load %arg3[%c0_3, %c0_4] : memref<1x32xf32, #tpu.memory_space<vmem>>, vector<1x32xf32>
    %4 = vector.broadcast %3 : vector<1x32xf32> to vector<128x32xf32>
    %5 = arith.addf %2, %4 : vector<128x32xf32>
    %cst_5 = arith.constant 0.000000e+00 : f32
    %6 = vector.broadcast %cst_5 : f32 to vector<128x32xf32>
    %7 = arith.maximumf %5, %6 : vector<128x32xf32>
    %c0_6 = arith.constant 0 : index
    %c0_7 = arith.constant 0 : index
    %8 = vector.load %arg4[%c0_6, %c0_7] : memref<128x32xf32, #tpu.memory_space<vmem>>, vector<128x32xf32>
    tpu.vector_store %arg4[%c0_6, %c0_7], %7 {strides = array<i32>} : memref<128x32xf32, #tpu.memory_space<vmem>>, vector<128x32xf32>,
    return
  }
  func.func @transform_0(%arg0: i32) -> (i32, i32) {
    %c0_i32 = arith.constant 0 : i32
    %c0_i32_0 = arith.constant 0 : i32
    return %arg0, %c0_i32 : i32, i32
  }
  func.func @transform_1(%arg0: i32) -> (i32, i32) {
    %c0_i32 = arith.constant 0 : i32
    %c0_i32_0 = arith.constant 0 : i32
    %c0_i32_1 = arith.constant 0 : i32
    return %c0_i32, %c0_i32_0 : i32, i32
  }
  func.func @transform_2(%arg0: i32) -> (i32, i32) {
    %c0_i32 = arith.constant 0 : i32
    %c0_i32_0 = arith.constant 0 : i32
    %c0_i32_1 = arith.constant 0 : i32
    return %c0_i32, %c0_i32_0 : i32, i32
  }
  func.func @transform_3(%arg0: i32) -> (i32, i32) {
    %c0_i32 = arith.constant 0 : i32
    %c0_i32_0 = arith.constant 0 : i32
    return %arg0, %c0_i32 : i32, i32
  }
}

module attributes {stable_mosaic.version = 11 : i64} {
  func.func @_mm_kernel(%arg0: i32, %arg1: memref<32x288xbf16, #tpu.memory_space<vmem>>, %arg2: memref<288x64xbf16, #tpu.memory_space<vmem>>, %arg3: memref<1x64xf32, #tpu.memory_space<vmem>>, %arg4: memref<32x64xf32, #tpu.memory_space<vmem>>) attributes {dimension_semantics = [#tpu.dimension_semantics<parallel>], iteration_bounds = array<i64: 1>, scalar_prefetch = 0 : i64, scratch_operands = 0 : i64, tpu.core_type = #tpu.core_type<tc>, window_params = [{transform_indices = @transform_0, window_bounds = array<i64: 32, 288>}, {pipeline_mode = #tpu.pipeline_mode<synchronous>, transform_indices = @transform_1, window_bounds = array<i64: 288, 64>}, {pipeline_mode = #tpu.pipeline_mode<synchronous>, transform_indices = @transform_2, window_bounds = array<i64: 1, 64>}, {transform_indices = @transform_3, window_bounds = array<i64: 32, 64>}]} {
    %c0 = arith.constant 0 : index
    %c0_0 = arith.constant 0 : index
    %0 = vector.load %arg1[%c0, %c0_0] : memref<32x288xbf16, #tpu.memory_space<vmem>>, vector<32x288xbf16>
    %c0_1 = arith.constant 0 : index
    %c0_2 = arith.constant 0 : index
    %1 = vector.load %arg2[%c0_1, %c0_2] : memref<288x64xbf16, #tpu.memory_space<vmem>>, vector<288x64xbf16>
    %cst = arith.constant dense<0.000000e+00> : vector<32x64xf32>
    %2 = tpu.matmul %0, %1, %cst {dimension_numbers = #tpu.dot_dimension_numbers<[1], [0], [0], [1], [0, 0, 1, 1], [], []>} : vector<32x288xbf16>, vector<288x64xbf16>, vector<32x64xf32> -> vector<32x64xf32>
    %c0_3 = arith.constant 0 : index
    %c0_4 = arith.constant 0 : index
    %3 = vector.load %arg3[%c0_3, %c0_4] : memref<1x64xf32, #tpu.memory_space<vmem>>, vector<1x64xf32>
    %4 = vector.broadcast %3 : vector<1x64xf32> to vector<32x64xf32>
    %5 = arith.addf %2, %4 : vector<32x64xf32>
    %cst_5 = arith.constant 0.000000e+00 : f32
    %6 = vector.broadcast %cst_5 : f32 to vector<32x64xf32>
    %7 = arith.maximumf %5, %6 : vector<32x64xf32>
    %c0_6 = arith.constant 0 : index
    %c0_7 = arith.constant 0 : index
    %8 = vector.load %arg4[%c0_6, %c0_7] : memref<32x64xf32, #tpu.memory_space<vmem>>, vector<32x64xf32>
    tpu.vector_store %arg4[%c0_6, %c0_7], %7 {strides = array<i32>} : memref<32x64xf32, #tpu.memory_space<vmem>>, vector<32x64xf32>,
    return
  }
  func.func @transform_0(%arg0: i32) -> (i32, i32) {
    %c0_i32 = arith.constant 0 : i32
    %c0_i32_0 = arith.constant 0 : i32
    return %arg0, %c0_i32 : i32, i32
  }
  func.func @transform_1(%arg0: i32) -> (i32, i32) {
    %c0_i32 = arith.constant 0 : i32
    %c0_i32_0 = arith.constant 0 : i32
    %c0_i32_1 = arith.constant 0 : i32
    return %c0_i32, %c0_i32_0 : i32, i32
  }
  func.func @transform_2(%arg0: i32) -> (i32, i32) {
    %c0_i32 = arith.constant 0 : i32
    %c0_i32_0 = arith.constant 0 : i32
    %c0_i32_1 = arith.constant 0 : i32
    return %c0_i32, %c0_i32_0 : i32, i32
  }
  func.func @transform_3(%arg0: i32) -> (i32, i32) {
    %c0_i32 = arith.constant 0 : i32
    %c0_i32_0 = arith.constant 0 : i32
    return %arg0, %c0_i32 : i32, i32
  }
}

module attributes {stable_mosaic.version = 11 : i64} {
  func.func @_mm_kernel(%arg0: i32, %arg1: memref<8x576xbf16, #tpu.memory_space<vmem>>, %arg2: memref<576x128xbf16, #tpu.memory_space<vmem>>, %arg3: memref<1x128xf32, #tpu.memory_space<vmem>>, %arg4: memref<8x128xf32, #tpu.memory_space<vmem>>) attributes {dimension_semantics = [#tpu.dimension_semantics<parallel>], iteration_bounds = array<i64: 1>, scalar_prefetch = 0 : i64, scratch_operands = 0 : i64, tpu.core_type = #tpu.core_type<tc>, window_params = [{transform_indices = @transform_0, window_bounds = array<i64: 8, 576>}, {pipeline_mode = #tpu.pipeline_mode<synchronous>, transform_indices = @transform_1, window_bounds = array<i64: 576, 128>}, {pipeline_mode = #tpu.pipeline_mode<synchronous>, transform_indices = @transform_2, window_bounds = array<i64: 1, 128>}, {transform_indices = @transform_3, window_bounds = array<i64: 8, 128>}]} {
    %c0 = arith.constant 0 : index
    %c0_0 = arith.constant 0 : index
    %0 = vector.load %arg1[%c0, %c0_0] : memref<8x576xbf16, #tpu.memory_space<vmem>>, vector<8x576xbf16>
    %c0_1 = arith.constant 0 : index
    %c0_2 = arith.constant 0 : index
    %1 = vector.load %arg2[%c0_1, %c0_2] : memref<576x128xbf16, #tpu.memory_space<vmem>>, vector<576x128xbf16>
    %cst = arith.constant dense<0.000000e+00> : vector<8x128xf32>
    %2 = tpu.matmul %0, %1, %cst {dimension_numbers = #tpu.dot_dimension_numbers<[1], [0], [0], [1], [0, 0, 1, 1], [], []>} : vector<8x576xbf16>, vector<576x128xbf16>, vector<8x128xf32> -> vector<8x128xf32>
    %c0_3 = arith.constant 0 : index
    %c0_4 = arith.constant 0 : index
    %3 = vector.load %arg3[%c0_3, %c0_4] : memref<1x128xf32, #tpu.memory_space<vmem>>, vector<1x128xf32>
    %4 = vector.broadcast %3 : vector<1x128xf32> to vector<8x128xf32>
    %5 = arith.addf %2, %4 : vector<8x128xf32>
    %cst_5 = arith.constant 0.000000e+00 : f32
    %6 = vector.broadcast %cst_5 : f32 to vector<8x128xf32>
    %7 = arith.maximumf %5, %6 : vector<8x128xf32>
    %c0_6 = arith.constant 0 : index
    %c0_7 = arith.constant 0 : index
    %8 = vector.load %arg4[%c0_6, %c0_7] : memref<8x128xf32, #tpu.memory_space<vmem>>, vector<8x128xf32>
    tpu.vector_store %arg4[%c0_6, %c0_7], %7 {strides = array<i32>} : memref<8x128xf32, #tpu.memory_space<vmem>>, vector<8x128xf32>,
    return
  }
  func.func @transform_0(%arg0: i32) -> (i32, i32) {
    %c0_i32 = arith.constant 0 : i32
    %c0_i32_0 = arith.constant 0 : i32
    return %arg0, %c0_i32 : i32, i32
  }
  func.func @transform_1(%arg0: i32) -> (i32, i32) {
    %c0_i32 = arith.constant 0 : i32
    %c0_i32_0 = arith.constant 0 : i32
    %c0_i32_1 = arith.constant 0 : i32
    return %c0_i32, %c0_i32_0 : i32, i32
  }
  func.func @transform_2(%arg0: i32) -> (i32, i32) {
    %c0_i32 = arith.constant 0 : i32
    %c0_i32_0 = arith.constant 0 : i32
    %c0_i32_1 = arith.constant 0 : i32
    return %c0_i32, %c0_i32_0 : i32, i32
  }
  func.func @transform_3(%arg0: i32) -> (i32, i32) {
    %c0_i32 = arith.constant 0 : i32
    %c0_i32_0 = arith.constant 0 : i32
    return %arg0, %c0_i32 : i32, i32
  }
}

module attributes {stable_mosaic.version = 11 : i64} {
  func.func @_mm_kernel(%arg0: i32, %arg1: memref<8x128xbf16, #tpu.memory_space<vmem>>, %arg2: memref<128x32xbf16, #tpu.memory_space<vmem>>, %arg3: memref<1x32xf32, #tpu.memory_space<vmem>>, %arg4: memref<8x32xf32, #tpu.memory_space<vmem>>) attributes {dimension_semantics = [#tpu.dimension_semantics<parallel>], iteration_bounds = array<i64: 1>, scalar_prefetch = 0 : i64, scratch_operands = 0 : i64, tpu.core_type = #tpu.core_type<tc>, window_params = [{transform_indices = @transform_0, window_bounds = array<i64: 8, 128>}, {pipeline_mode = #tpu.pipeline_mode<synchronous>, transform_indices = @transform_1, window_bounds = array<i64: 128, 32>}, {pipeline_mode = #tpu.pipeline_mode<synchronous>, transform_indices = @transform_2, window_bounds = array<i64: 1, 32>}, {transform_indices = @transform_3, window_bounds = array<i64: 8, 32>}]} {
    %c0 = arith.constant 0 : index
    %c0_0 = arith.constant 0 : index
    %0 = vector.load %arg1[%c0, %c0_0] : memref<8x128xbf16, #tpu.memory_space<vmem>>, vector<8x128xbf16>
    %c0_1 = arith.constant 0 : index
    %c0_2 = arith.constant 0 : index
    %1 = vector.load %arg2[%c0_1, %c0_2] : memref<128x32xbf16, #tpu.memory_space<vmem>>, vector<128x32xbf16>
    %cst = arith.constant dense<0.000000e+00> : vector<8x32xf32>
    %2 = tpu.matmul %0, %1, %cst {dimension_numbers = #tpu.dot_dimension_numbers<[1], [0], [0], [1], [0, 0, 1, 1], [], []>} : vector<8x128xbf16>, vector<128x32xbf16>, vector<8x32xf32> -> vector<8x32xf32>
    %c0_3 = arith.constant 0 : index
    %c0_4 = arith.constant 0 : index
    %3 = vector.load %arg3[%c0_3, %c0_4] : memref<1x32xf32, #tpu.memory_space<vmem>>, vector<1x32xf32>
    %4 = vector.broadcast %3 : vector<1x32xf32> to vector<8x32xf32>
    %5 = arith.addf %2, %4 : vector<8x32xf32>
    %c0_5 = arith.constant 0 : index
    %c0_6 = arith.constant 0 : index
    %6 = vector.load %arg4[%c0_5, %c0_6] : memref<8x32xf32, #tpu.memory_space<vmem>>, vector<8x32xf32>
    tpu.vector_store %arg4[%c0_5, %c0_6], %5 {strides = array<i32>} : memref<8x32xf32, #tpu.memory_space<vmem>>, vector<8x32xf32>,
    return
  }
  func.func @transform_0(%arg0: i32) -> (i32, i32) {
    %c0_i32 = arith.constant 0 : i32
    %c0_i32_0 = arith.constant 0 : i32
    return %arg0, %c0_i32 : i32, i32
  }
  func.func @transform_1(%arg0: i32) -> (i32, i32) {
    %c0_i32 = arith.constant 0 : i32
    %c0_i32_0 = arith.constant 0 : i32
    %c0_i32_1 = arith.constant 0 : i32
    return %c0_i32, %c0_i32_0 : i32, i32
  }
  func.func @transform_2(%arg0: i32) -> (i32, i32) {
    %c0_i32 = arith.constant 0 : i32
    %c0_i32_0 = arith.constant 0 : i32
    %c0_i32_1 = arith.constant 0 : i32
    return %c0_i32, %c0_i32_0 : i32, i32
  }
  func.func @transform_3(%arg0: i32) -> (i32, i32) {
    %c0_i32 = arith.constant 0 : i32
    %c0_i32_0 = arith.constant 0 : i32
    return %arg0, %c0_i32 : i32, i32
  }
}

module attributes {stable_mosaic.version = 11 : i64} {
  func.func @_mm_kernel(%arg0: i32, %arg1: memref<64x576xbf16, #tpu.memory_space<vmem>>, %arg2: memref<576x128xbf16, #tpu.memory_space<vmem>>, %arg3: memref<1x128xf32, #tpu.memory_space<vmem>>, %arg4: memref<64x128xf32, #tpu.memory_space<vmem>>) attributes {dimension_semantics = [#tpu.dimension_semantics<parallel>], iteration_bounds = array<i64: 1>, scalar_prefetch = 0 : i64, scratch_operands = 0 : i64, tpu.core_type = #tpu.core_type<tc>, window_params = [{transform_indices = @transform_0, window_bounds = array<i64: 64, 576>}, {pipeline_mode = #tpu.pipeline_mode<synchronous>, transform_indices = @transform_1, window_bounds = array<i64: 576, 128>}, {pipeline_mode = #tpu.pipeline_mode<synchronous>, transform_indices = @transform_2, window_bounds = array<i64: 1, 128>}, {transform_indices = @transform_3, window_bounds = array<i64: 64, 128>}]} {
    %c0 = arith.constant 0 : index
    %c0_0 = arith.constant 0 : index
    %0 = vector.load %arg1[%c0, %c0_0] : memref<64x576xbf16, #tpu.memory_space<vmem>>, vector<64x576xbf16>
    %c0_1 = arith.constant 0 : index
    %c0_2 = arith.constant 0 : index
    %1 = vector.load %arg2[%c0_1, %c0_2] : memref<576x128xbf16, #tpu.memory_space<vmem>>, vector<576x128xbf16>
    %cst = arith.constant dense<0.000000e+00> : vector<64x128xf32>
    %2 = tpu.matmul %0, %1, %cst {dimension_numbers = #tpu.dot_dimension_numbers<[1], [0], [0], [1], [0, 0, 1, 1], [], []>} : vector<64x576xbf16>, vector<576x128xbf16>, vector<64x128xf32> -> vector<64x128xf32>
    %c0_3 = arith.constant 0 : index
    %c0_4 = arith.constant 0 : index
    %3 = vector.load %arg3[%c0_3, %c0_4] : memref<1x128xf32, #tpu.memory_space<vmem>>, vector<1x128xf32>
    %4 = vector.broadcast %3 : vector<1x128xf32> to vector<64x128xf32>
    %5 = arith.addf %2, %4 : vector<64x128xf32>
    %c0_5 = arith.constant 0 : index
    %c0_6 = arith.constant 0 : index
    %6 = vector.load %arg4[%c0_5, %c0_6] : memref<64x128xf32, #tpu.memory_space<vmem>>, vector<64x128xf32>
    tpu.vector_store %arg4[%c0_5, %c0_6], %5 {strides = array<i32>} : memref<64x128xf32, #tpu.memory_space<vmem>>, vector<64x128xf32>,
    return
  }
  func.func @transform_0(%arg0: i32) -> (i32, i32) {
    %c0_i32 = arith.constant 0 : i32
    %c0_i32_0 = arith.constant 0 : i32
    return %arg0, %c0_i32 : i32, i32
  }
  func.func @transform_1(%arg0: i32) -> (i32, i32) {
    %c0_i32 = arith.constant 0 : i32
    %c0_i32_0 = arith.constant 0 : i32
    %c0_i32_1 = arith.constant 0 : i32
    return %c0_i32, %c0_i32_0 : i32, i32
  }
  func.func @transform_2(%arg0: i32) -> (i32, i32) {
    %c0_i32 = arith.constant 0 : i32
    %c0_i32_0 = arith.constant 0 : i32
    %c0_i32_1 = arith.constant 0 : i32
    return %c0_i32, %c0_i32_0 : i32, i32
  }
  func.func @transform_3(%arg0: i32) -> (i32, i32) {
    %c0_i32 = arith.constant 0 : i32
    %c0_i32_0 = arith.constant 0 : i32
    return %arg0, %c0_i32 : i32, i32
  }
}

module attributes {stable_mosaic.version = 11 : i64} {
  func.func @kernel(%arg0: i32, %arg1: memref<1x8x32x4xbf16, #tpu.memory_space<vmem>>, %arg2: memref<1x8x32x4xbf16, #tpu.memory_space<vmem>>, %arg3: memref<1x8x32x4xbf16, #tpu.memory_space<vmem>>, %arg4: memref<1x8x32x4xf32, #tpu.memory_space<vmem>>) attributes {dimension_semantics = [#tpu.dimension_semantics<parallel>], iteration_bounds = array<i64: 2>, scalar_prefetch = 0 : i64, scratch_operands = 0 : i64, tpu.core_type = #tpu.core_type<tc>, window_params = [{transform_indices = @transform_0, window_bounds = array<i64: 1, 8, 32, 4>}, {transform_indices = @transform_1, window_bounds = array<i64: 1, 8, 32, 4>}, {transform_indices = @transform_2, window_bounds = array<i64: 1, 8, 32, 4>}, {transform_indices = @transform_3, window_bounds = array<i64: 1, 8, 32, 4>}]} {
    %c0 = arith.constant 0 : index
    %c0_0 = arith.constant 0 : index
    %c0_1 = arith.constant 0 : index
    %c0_2 = arith.constant 0 : index
    %0 = vector.load %arg1[%c0, %c0_0, %c0_1, %c0_2] : memref<1x8x32x4xbf16, #tpu.memory_space<vmem>>, vector<1x8x32x4xbf16>
    %1 = vector.shape_cast %0 : vector<1x8x32x4xbf16> to vector<8x32x4xbf16>
    %c0_3 = arith.constant 0 : index
    %c0_4 = arith.constant 0 : index
    %c0_5 = arith.constant 0 : index
    %c0_6 = arith.constant 0 : index
    %2 = vector.load %arg2[%c0_3, %c0_4, %c0_5, %c0_6] : memref<1x8x32x4xbf16, #tpu.memory_space<vmem>>, vector<1x8x32x4xbf16>
    %3 = vector.shape_cast %2 : vector<1x8x32x4xbf16> to vector<8x32x4xbf16>
    %c0_7 = arith.constant 0 : index
    %c0_8 = arith.constant 0 : index
    %c0_9 = arith.constant 0 : index
    %c0_10 = arith.constant 0 : index
    %4 = vector.load %arg3[%c0_7, %c0_8, %c0_9, %c0_10] : memref<1x8x32x4xbf16, #tpu.memory_space<vmem>>, vector<1x8x32x4xbf16>
    %5 = vector.shape_cast %4 : vector<1x8x32x4xbf16> to vector<8x32x4xbf16>
    "tpu.trace_start"() <{level = 10 : i32, message = "hnd,hmd->hnm"}> : () -> ()
    %cst = arith.constant dense<0.000000e+00> : vector<8x32x32xf32>
    %6 = tpu.matmul %1, %3, %cst {dimension_numbers = #tpu.dot_dimension_numbers<[2], [2], [1], [1], [0, 0, 0, 1, 1, 1], [0], [0]>} : vector<8x32x4xbf16>, vector<8x32x4xbf16>, vector<8x32x32xf32> -> vector<8x32x32xf32>
    "tpu.trace_stop"() : () -> ()
    %cst_11 = arith.constant dense<0xFF800000> : vector<8x32xf32>
    %7 = vector.multi_reduction <maximumf>, %6, %cst_11 [2] : vector<8x32x32xf32> to vector<8x32xf32>
    %8 = vector.shape_cast %7 : vector<8x32xf32> to vector<8x32x1xf32>
    %9 = vector.broadcast %8 : vector<8x32x1xf32> to vector<8x32x32xf32>
    %10 = arith.subf %6, %9 : vector<8x32x32xf32>
    %11 = math.exp %10 : vector<8x32x32xf32>
    %cst_12 = arith.constant dense<0.000000e+00> : vector<8x32xf32>
    %12 = vector.multi_reduction <add>, %11, %cst_12 [2] : vector<8x32x32xf32> to vector<8x32xf32>
    %13 = vector.shape_cast %12 : vector<8x32xf32> to vector<8x32x1xf32>
    %14 = vector.broadcast %13 : vector<8x32x1xf32> to vector<8x32x32xf32>
    %15 = arith.divf %11, %14 : vector<8x32x32xf32>
    %16 = arith.truncf %15 : vector<8x32x32xf32> to vector<8x32x32xbf16>
    "tpu.trace_start"() <{level = 10 : i32, message = "hnm,hmd->hnd"}> : () -> ()
    %cst_13 = arith.constant dense<0.000000e+00> : vector<8x32x4xf32>
    %17 = tpu.matmul %16, %5, %cst_13 {dimension_numbers = #tpu.dot_dimension_numbers<[2], [1], [1], [2], [0, 0, 0, 1, 1, 2], [0], [0]>} : vector<8x32x32xbf16>, vector<8x32x4xbf16>, vector<8x32x4xf32> -> vector<8x32x4xf32>
    "tpu.trace_stop"() : () -> ()
    %c0_14 = arith.constant 0 : index
    %c0_15 = arith.constant 0 : index
    %c0_16 = arith.constant 0 : index
    %c0_17 = arith.constant 0 : index
    %18 = vector.load %arg4[%c0_14, %c0_15, %c0_16, %c0_17] : memref<1x8x32x4xf32, #tpu.memory_space<vmem>>, vector<1x8x32x4xf32>
    %19 = vector.shape_cast %18 : vector<1x8x32x4xf32> to vector<8x32x4xf32>
    %20 = vector.shape_cast %17 : vector<8x32x4xf32> to vector<1x8x32x4xf32>
    tpu.vector_store %arg4[%c0_14, %c0_15, %c0_16, %c0_17], %20 {strides = array<i32>} : memref<1x8x32x4xf32, #tpu.memory_space<vmem>>, vector<1x8x32x4xf32>,
    return
  }
  func.func @transform_0(%arg0: i32) -> (i32, i32, i32, i32) {
    %c0_i32 = arith.constant 0 : i32
    %c0_i32_0 = arith.constant 0 : i32
    %c0_i32_1 = arith.constant 0 : i32
    %c0_i32_2 = arith.constant 0 : i32
    return %arg0, %c0_i32, %c0_i32_0, %c0_i32_1 : i32, i32, i32, i32
  }
  func.func @transform_1(%arg0: i32) -> (i32, i32, i32, i32) {
    %c0_i32 = arith.constant 0 : i32
    %c0_i32_0 = arith.constant 0 : i32
    %c0_i32_1 = arith.constant 0 : i32
    %c0_i32_2 = arith.constant 0 : i32
    return %arg0, %c0_i32, %c0_i32_0, %c0_i32_1 : i32, i32, i32, i32
  }
  func.func @transform_2(%arg0: i32) -> (i32, i32, i32, i32) {
    %c0_i32 = arith.constant 0 : i32
    %c0_i32_0 = arith.constant 0 : i32
    %c0_i32_1 = arith.constant 0 : i32
    %c0_i32_2 = arith.constant 0 : i32
    return %arg0, %c0_i32, %c0_i32_0, %c0_i32_1 : i32, i32, i32, i32
  }
  func.func @transform_3(%arg0: i32) -> (i32, i32, i32, i32) {
    %c0_i32 = arith.constant 0 : i32
    %c0_i32_0 = arith.constant 0 : i32
    %c0_i32_1 = arith.constant 0 : i32
    %c0_i32_2 = arith.constant 0 : i32
    return %arg0, %c0_i32, %c0_i32_0, %c0_i32_1 : i32, i32, i32, i32
  }
}

module attributes {stable_mosaic.version = 11 : i64} {
  func.func @_mm_kernel(%arg0: i32, %arg1: memref<8x288xbf16, #tpu.memory_space<vmem>>, %arg2: memref<288x16xbf16, #tpu.memory_space<vmem>>, %arg3: memref<1x16xf32, #tpu.memory_space<vmem>>, %arg4: memref<8x16xf32, #tpu.memory_space<vmem>>) attributes {dimension_semantics = [#tpu.dimension_semantics<parallel>], iteration_bounds = array<i64: 1>, scalar_prefetch = 0 : i64, scratch_operands = 0 : i64, tpu.core_type = #tpu.core_type<tc>, window_params = [{transform_indices = @transform_0, window_bounds = array<i64: 8, 288>}, {pipeline_mode = #tpu.pipeline_mode<synchronous>, transform_indices = @transform_1, window_bounds = array<i64: 288, 16>}, {pipeline_mode = #tpu.pipeline_mode<synchronous>, transform_indices = @transform_2, window_bounds = array<i64: 1, 16>}, {transform_indices = @transform_3, window_bounds = array<i64: 8, 16>}]} {
    %c0 = arith.constant 0 : index
    %c0_0 = arith.constant 0 : index
    %0 = vector.load %arg1[%c0, %c0_0] : memref<8x288xbf16, #tpu.memory_space<vmem>>, vector<8x288xbf16>
    %c0_1 = arith.constant 0 : index
    %c0_2 = arith.constant 0 : index
    %1 = vector.load %arg2[%c0_1, %c0_2] : memref<288x16xbf16, #tpu.memory_space<vmem>>, vector<288x16xbf16>
    %cst = arith.constant dense<0.000000e+00> : vector<8x16xf32>
    %2 = tpu.matmul %0, %1, %cst {dimension_numbers = #tpu.dot_dimension_numbers<[1], [0], [0], [1], [0, 0, 1, 1], [], []>} : vector<8x288xbf16>, vector<288x16xbf16>, vector<8x16xf32> -> vector<8x16xf32>
    %c0_3 = arith.constant 0 : index
    %c0_4 = arith.constant 0 : index
    %3 = vector.load %arg3[%c0_3, %c0_4] : memref<1x16xf32, #tpu.memory_space<vmem>>, vector<1x16xf32>
    %4 = vector.broadcast %3 : vector<1x16xf32> to vector<8x16xf32>
    %5 = arith.addf %2, %4 : vector<8x16xf32>
    %c0_5 = arith.constant 0 : index
    %c0_6 = arith.constant 0 : index
    %6 = vector.load %arg4[%c0_5, %c0_6] : memref<8x16xf32, #tpu.memory_space<vmem>>, vector<8x16xf32>
    tpu.vector_store %arg4[%c0_5, %c0_6], %5 {strides = array<i32>} : memref<8x16xf32, #tpu.memory_space<vmem>>, vector<8x16xf32>,
    return
  }
  func.func @transform_0(%arg0: i32) -> (i32, i32) {
    %c0_i32 = arith.constant 0 : i32
    %c0_i32_0 = arith.constant 0 : i32
    return %arg0, %c0_i32 : i32, i32
  }
  func.func @transform_1(%arg0: i32) -> (i32, i32) {
    %c0_i32 = arith.constant 0 : i32
    %c0_i32_0 = arith.constant 0 : i32
    %c0_i32_1 = arith.constant 0 : i32
    return %c0_i32, %c0_i32_0 : i32, i32
  }
  func.func @transform_2(%arg0: i32) -> (i32, i32) {
    %c0_i32 = arith.constant 0 : i32
    %c0_i32_0 = arith.constant 0 : i32
    %c0_i32_1 = arith.constant 0 : i32
    return %c0_i32, %c0_i32_0 : i32, i32
  }
  func.func @transform_3(%arg0: i32) -> (i32, i32) {
    %c0_i32 = arith.constant 0 : i32
    %c0_i32_0 = arith.constant 0 : i32
    return %arg0, %c0_i32 : i32, i32
  }
}

module attributes {stable_mosaic.version = 11 : i64} {
  func.func @_mm_kernel(%arg0: i32, %arg1: memref<8x144xbf16, #tpu.memory_space<vmem>>, %arg2: memref<144x16xbf16, #tpu.memory_space<vmem>>, %arg3: memref<1x16xf32, #tpu.memory_space<vmem>>, %arg4: memref<8x16xf32, #tpu.memory_space<vmem>>) attributes {dimension_semantics = [#tpu.dimension_semantics<parallel>], iteration_bounds = array<i64: 1>, scalar_prefetch = 0 : i64, scratch_operands = 0 : i64, tpu.core_type = #tpu.core_type<tc>, window_params = [{transform_indices = @transform_0, window_bounds = array<i64: 8, 144>}, {pipeline_mode = #tpu.pipeline_mode<synchronous>, transform_indices = @transform_1, window_bounds = array<i64: 144, 16>}, {pipeline_mode = #tpu.pipeline_mode<synchronous>, transform_indices = @transform_2, window_bounds = array<i64: 1, 16>}, {transform_indices = @transform_3, window_bounds = array<i64: 8, 16>}]} {
    %c0 = arith.constant 0 : index
    %c0_0 = arith.constant 0 : index
    %0 = vector.load %arg1[%c0, %c0_0] : memref<8x144xbf16, #tpu.memory_space<vmem>>, vector<8x144xbf16>
    %c0_1 = arith.constant 0 : index
    %c0_2 = arith.constant 0 : index
    %1 = vector.load %arg2[%c0_1, %c0_2] : memref<144x16xbf16, #tpu.memory_space<vmem>>, vector<144x16xbf16>
    %cst = arith.constant dense<0.000000e+00> : vector<8x16xf32>
    %2 = tpu.matmul %0, %1, %cst {dimension_numbers = #tpu.dot_dimension_numbers<[1], [0], [0], [1], [0, 0, 1, 1], [], []>} : vector<8x144xbf16>, vector<144x16xbf16>, vector<8x16xf32> -> vector<8x16xf32>
    %c0_3 = arith.constant 0 : index
    %c0_4 = arith.constant 0 : index
    %3 = vector.load %arg3[%c0_3, %c0_4] : memref<1x16xf32, #tpu.memory_space<vmem>>, vector<1x16xf32>
    %4 = vector.broadcast %3 : vector<1x16xf32> to vector<8x16xf32>
    %5 = arith.addf %2, %4 : vector<8x16xf32>
    %c0_5 = arith.constant 0 : index
    %c0_6 = arith.constant 0 : index
    %6 = vector.load %arg4[%c0_5, %c0_6] : memref<8x16xf32, #tpu.memory_space<vmem>>, vector<8x16xf32>
    tpu.vector_store %arg4[%c0_5, %c0_6], %5 {strides = array<i32>} : memref<8x16xf32, #tpu.memory_space<vmem>>, vector<8x16xf32>,
    return
  }
  func.func @transform_0(%arg0: i32) -> (i32, i32) {
    %c0_i32 = arith.constant 0 : i32
    %c0_i32_0 = arith.constant 0 : i32
    return %arg0, %c0_i32 : i32, i32
  }
  func.func @transform_1(%arg0: i32) -> (i32, i32) {
    %c0_i32 = arith.constant 0 : i32
    %c0_i32_0 = arith.constant 0 : i32
    %c0_i32_1 = arith.constant 0 : i32
    return %c0_i32, %c0_i32_0 : i32, i32
  }
  func.func @transform_2(%arg0: i32) -> (i32, i32) {
    %c0_i32 = arith.constant 0 : i32
    %c0_i32_0 = arith.constant 0 : i32
    %c0_i32_1 = arith.constant 0 : i32
    return %c0_i32, %c0_i32_0 : i32, i32
  }
  func.func @transform_3(%arg0: i32) -> (i32, i32) {
    %c0_i32 = arith.constant 0 : i32
    %c0_i32_0 = arith.constant 0 : i32
    return %arg0, %c0_i32 : i32, i32
  }
}

module attributes {stable_mosaic.version = 11 : i64} {
  func.func @_mm_kernel(%arg0: i32, %arg1: memref<32x576xbf16, #tpu.memory_space<vmem>>, %arg2: memref<576x40xbf16, #tpu.memory_space<vmem>>, %arg3: memref<1x40xf32, #tpu.memory_space<vmem>>, %arg4: memref<32x40xf32, #tpu.memory_space<vmem>>) attributes {dimension_semantics = [#tpu.dimension_semantics<parallel>], iteration_bounds = array<i64: 1>, scalar_prefetch = 0 : i64, scratch_operands = 0 : i64, tpu.core_type = #tpu.core_type<tc>, window_params = [{transform_indices = @transform_0, window_bounds = array<i64: 32, 576>}, {pipeline_mode = #tpu.pipeline_mode<synchronous>, transform_indices = @transform_1, window_bounds = array<i64: 576, 40>}, {pipeline_mode = #tpu.pipeline_mode<synchronous>, transform_indices = @transform_2, window_bounds = array<i64: 1, 40>}, {transform_indices = @transform_3, window_bounds = array<i64: 32, 40>}]} {
    %c0 = arith.constant 0 : index
    %c0_0 = arith.constant 0 : index
    %0 = vector.load %arg1[%c0, %c0_0] : memref<32x576xbf16, #tpu.memory_space<vmem>>, vector<32x576xbf16>
    %c0_1 = arith.constant 0 : index
    %c0_2 = arith.constant 0 : index
    %1 = vector.load %arg2[%c0_1, %c0_2] : memref<576x40xbf16, #tpu.memory_space<vmem>>, vector<576x40xbf16>
    %cst = arith.constant dense<0.000000e+00> : vector<32x40xf32>
    %2 = tpu.matmul %0, %1, %cst {dimension_numbers = #tpu.dot_dimension_numbers<[1], [0], [0], [1], [0, 0, 1, 1], [], []>} : vector<32x576xbf16>, vector<576x40xbf16>, vector<32x40xf32> -> vector<32x40xf32>
    %c0_3 = arith.constant 0 : index
    %c0_4 = arith.constant 0 : index
    %3 = vector.load %arg3[%c0_3, %c0_4] : memref<1x40xf32, #tpu.memory_space<vmem>>, vector<1x40xf32>
    %4 = vector.broadcast %3 : vector<1x40xf32> to vector<32x40xf32>
    %5 = arith.addf %2, %4 : vector<32x40xf32>
    %c0_5 = arith.constant 0 : index
    %c0_6 = arith.constant 0 : index
    %6 = vector.load %arg4[%c0_5, %c0_6] : memref<32x40xf32, #tpu.memory_space<vmem>>, vector<32x40xf32>
    tpu.vector_store %arg4[%c0_5, %c0_6], %5 {strides = array<i32>} : memref<32x40xf32, #tpu.memory_space<vmem>>, vector<32x40xf32>,
    return
  }
  func.func @transform_0(%arg0: i32) -> (i32, i32) {
    %c0_i32 = arith.constant 0 : i32
    %c0_i32_0 = arith.constant 0 : i32
    return %arg0, %c0_i32 : i32, i32
  }
  func.func @transform_1(%arg0: i32) -> (i32, i32) {
    %c0_i32 = arith.constant 0 : i32
    %c0_i32_0 = arith.constant 0 : i32
    %c0_i32_1 = arith.constant 0 : i32
    return %c0_i32, %c0_i32_0 : i32, i32
  }
  func.func @transform_2(%arg0: i32) -> (i32, i32) {
    %c0_i32 = arith.constant 0 : i32
    %c0_i32_0 = arith.constant 0 : i32
    %c0_i32_1 = arith.constant 0 : i32
    return %c0_i32, %c0_i32_0 : i32, i32
  }
  func.func @transform_3(%arg0: i32) -> (i32, i32) {
    %c0_i32 = arith.constant 0 : i32
    %c0_i32_0 = arith.constant 0 : i32
    return %arg0, %c0_i32 : i32, i32
  }
}

module attributes {stable_mosaic.version = 11 : i64} {
  func.func @_mm_kernel(%arg0: i32, %arg1: memref<512x49xbf16, #tpu.memory_space<vmem>>, %arg2: memref<49x4xbf16, #tpu.memory_space<vmem>>, %arg3: memref<1x4xf32, #tpu.memory_space<vmem>>, %arg4: memref<512x4xf32, #tpu.memory_space<vmem>>) attributes {dimension_semantics = [#tpu.dimension_semantics<parallel>], iteration_bounds = array<i64: 4>, scalar_prefetch = 0 : i64, scratch_operands = 0 : i64, tpu.core_type = #tpu.core_type<tc>, window_params = [{transform_indices = @transform_0, window_bounds = array<i64: 512, 49>}, {pipeline_mode = #tpu.pipeline_mode<synchronous>, transform_indices = @transform_1, window_bounds = array<i64: 49, 4>}, {pipeline_mode = #tpu.pipeline_mode<synchronous>, transform_indices = @transform_2, window_bounds = array<i64: 1, 4>}, {transform_indices = @transform_3, window_bounds = array<i64: 512, 4>}]} {
    %c0 = arith.constant 0 : index
    %c0_0 = arith.constant 0 : index
    %0 = vector.load %arg1[%c0, %c0_0] : memref<512x49xbf16, #tpu.memory_space<vmem>>, vector<512x49xbf16>
    %c0_1 = arith.constant 0 : index
    %c0_2 = arith.constant 0 : index
    %1 = vector.load %arg2[%c0_1, %c0_2] : memref<49x4xbf16, #tpu.memory_space<vmem>>, vector<49x4xbf16>
    %cst = arith.constant dense<0.000000e+00> : vector<512x4xf32>
    %2 = tpu.matmul %0, %1, %cst {dimension_numbers = #tpu.dot_dimension_numbers<[1], [0], [0], [1], [0, 0, 1, 1], [], []>} : vector<512x49xbf16>, vector<49x4xbf16>, vector<512x4xf32> -> vector<512x4xf32>
    %c0_3 = arith.constant 0 : index
    %c0_4 = arith.constant 0 : index
    %3 = vector.load %arg3[%c0_3, %c0_4] : memref<1x4xf32, #tpu.memory_space<vmem>>, vector<1x4xf32>
    %4 = vector.broadcast %3 : vector<1x4xf32> to vector<512x4xf32>
    %5 = arith.addf %2, %4 : vector<512x4xf32>
    %c0_5 = arith.constant 0 : index
    %c0_6 = arith.constant 0 : index
    %6 = vector.load %arg4[%c0_5, %c0_6] : memref<512x4xf32, #tpu.memory_space<vmem>>, vector<512x4xf32>
    tpu.vector_store %arg4[%c0_5, %c0_6], %5 {strides = array<i32>} : memref<512x4xf32, #tpu.memory_space<vmem>>, vector<512x4xf32>,
    return
  }
  func.func @transform_0(%arg0: i32) -> (i32, i32) {
    %c0_i32 = arith.constant 0 : i32
    %c0_i32_0 = arith.constant 0 : i32
    return %arg0, %c0_i32 : i32, i32
  }
  func.func @transform_1(%arg0: i32) -> (i32, i32) {
    %c0_i32 = arith.constant 0 : i32
    %c0_i32_0 = arith.constant 0 : i32
    %c0_i32_1 = arith.constant 0 : i32
    return %c0_i32, %c0_i32_0 : i32, i32
  }
  func.func @transform_2(%arg0: i32) -> (i32, i32) {
    %c0_i32 = arith.constant 0 : i32
    %c0_i32_0 = arith.constant 0 : i32
    %c0_i32_1 = arith.constant 0 : i32
    return %c0_i32, %c0_i32_0 : i32, i32
  }
  func.func @transform_3(%arg0: i32) -> (i32, i32) {
    %c0_i32 = arith.constant 0 : i32
    %c0_i32_0 = arith.constant 0 : i32
    return %arg0, %c0_i32 : i32, i32
  }
}

module attributes {stable_mosaic.version = 11 : i64} {
  func.func @kernel(%arg0: i32, %arg1: i32, %arg2: memref<1x16x8xbf16, #tpu.memory_space<vmem>>, %arg3: memref<1x8x16xbf16, #tpu.memory_space<vmem>>, %arg4: memref<1x32x16xbf16, #tpu.memory_space<vmem>>, %arg5: memref<1x32x16xf32, #tpu.memory_space<vmem>>) attributes {dimension_semantics = [#tpu.dimension_semantics<parallel>, #tpu.dimension_semantics<parallel>], iteration_bounds = array<i64: 2, 1>, scalar_prefetch = 0 : i64, scratch_operands = 0 : i64, tpu.core_type = #tpu.core_type<tc>, window_params = [{transform_indices = @transform_0, window_bounds = array<i64: 1, 16, 8>}, {transform_indices = @transform_1, window_bounds = array<i64: 1, 8, 16>}, {transform_indices = @transform_2, window_bounds = array<i64: 1, 32, 16>}, {transform_indices = @transform_3, window_bounds = array<i64: 1, 32, 16>}]} {
    %c0 = arith.constant 0 : index
    %c0_0 = arith.constant 0 : index
    %c0_1 = arith.constant 0 : index
    %0 = vector.load %arg2[%c0, %c0_0, %c0_1] : memref<1x16x8xbf16, #tpu.memory_space<vmem>>, vector<1x16x8xbf16>
    %1 = vector.shape_cast %0 : vector<1x16x8xbf16> to vector<16x8xbf16>
    %c0_2 = arith.constant 0 : index
    %c0_3 = arith.constant 0 : index
    %c0_4 = arith.constant 0 : index
    %2 = vector.load %arg3[%c0_2, %c0_3, %c0_4] : memref<1x8x16xbf16, #tpu.memory_space<vmem>>, vector<1x8x16xbf16>
    %3 = vector.shape_cast %2 : vector<1x8x16xbf16> to vector<8x16xbf16>
    %cst = arith.constant dense<0.000000e+00> : vector<16x16xf32>
    %4 = tpu.matmul %1, %3, %cst {dimension_numbers = #tpu.dot_dimension_numbers<[1], [0], [0], [1], [0, 0, 1, 1], [], []>} : vector<16x8xbf16>, vector<8x16xbf16>, vector<16x16xf32> -> vector<16x16xf32>
    %cst_5 = arith.constant 0.353553385 : f32
    %5 = vector.broadcast %cst_5 : f32 to vector<16x16xf32>
    %6 = arith.mulf %4, %5 : vector<16x16xf32>
    %cst_6 = arith.constant dense<0xFF800000> : vector<16xf32>
    %7 = vector.multi_reduction <maximumf>, %6, %cst_6 [0] : vector<16x16xf32> to vector<16xf32>
    %8 = vector.shape_cast %7 : vector<16xf32> to vector<1x16xf32>
    %9 = vector.broadcast %8 : vector<1x16xf32> to vector<16x16xf32>
    %10 = arith.subf %6, %9 : vector<16x16xf32>
    %11 = math.exp %10 : vector<16x16xf32>
    %cst_7 = arith.constant dense<0.000000e+00> : vector<16xf32>
    %12 = vector.multi_reduction <add>, %11, %cst_7 [0] : vector<16x16xf32> to vector<16xf32>
    %13 = vector.shape_cast %12 : vector<16xf32> to vector<1x16xf32>
    %14 = vector.broadcast %13 : vector<1x16xf32> to vector<16x16xf32>
    %15 = arith.divf %11, %14 : vector<16x16xf32>
    %c0_8 = arith.constant 0 : index
    %c0_9 = arith.constant 0 : index
    %c0_10 = arith.constant 0 : index
    %16 = vector.load %arg4[%c0_8, %c0_9, %c0_10] : memref<1x32x16xbf16, #tpu.memory_space<vmem>>, vector<1x32x16xbf16>
    %17 = vector.shape_cast %16 : vector<1x32x16xbf16> to vector<32x16xbf16>
    %18 = arith.truncf %15 : vector<16x16xf32> to vector<16x16xbf16>
    %cst_11 = arith.constant dense<0.000000e+00> : vector<32x16xf32>
    %19 = tpu.matmul %17, %18, %cst_11 {dimension_numbers = #tpu.dot_dimension_numbers<[1], [0], [0], [1], [0, 0, 1, 1], [], []>} : vector<32x16xbf16>, vector<16x16xbf16>, vector<32x16xf32> -> vector<32x16xf32>
    %c0_12 = arith.constant 0 : index
    %c0_13 = arith.constant 0 : index
    %c0_14 = arith.constant 0 : index
    %20 = vector.load %arg5[%c0_12, %c0_13, %c0_14] : memref<1x32x16xf32, #tpu.memory_space<vmem>>, vector<1x32x16xf32>
    %21 = vector.shape_cast %20 : vector<1x32x16xf32> to vector<32x16xf32>
    %22 = vector.shape_cast %19 : vector<32x16xf32> to vector<1x32x16xf32>
    tpu.vector_store %arg5[%c0_12, %c0_13, %c0_14], %22 {strides = array<i32>} : memref<1x32x16xf32, #tpu.memory_space<vmem>>, vector<1x32x16xf32>,
    return
  }
  func.func @transform_0(%arg0: i32, %arg1: i32) -> (i32, i32, i32) {
    %c0_i32 = arith.constant 0 : i32
    %c0_i32_0 = arith.constant 0 : i32
    %c0_i32_1 = arith.constant 0 : i32
    return %arg0, %c0_i32, %c0_i32_0 : i32, i32, i32
  }
  func.func @transform_1(%arg0: i32, %arg1: i32) -> (i32, i32, i32) {
    %c0_i32 = arith.constant 0 : i32
    %c0_i32_0 = arith.constant 0 : i32
    return %arg0, %c0_i32, %arg1 : i32, i32, i32
  }
  func.func @transform_2(%arg0: i32, %arg1: i32) -> (i32, i32, i32) {
    %c0_i32 = arith.constant 0 : i32
    %c0_i32_0 = arith.constant 0 : i32
    %c0_i32_1 = arith.constant 0 : i32
    return %arg0, %c0_i32, %c0_i32_0 : i32, i32, i32
  }
  func.func @transform_3(%arg0: i32, %arg1: i32) -> (i32, i32, i32) {
    %c0_i32 = arith.constant 0 : i32
    %c0_i32_0 = arith.constant 0 : i32
    return %arg0, %c0_i32, %arg1 : i32, i32, i32
  }
}

module attributes {stable_mosaic.version = 11 : i64} {
  func.func @_mm_kernel(%arg0: i32, %arg1: memref<32x576xbf16, #tpu.memory_space<vmem>>, %arg2: memref<576x16xbf16, #tpu.memory_space<vmem>>, %arg3: memref<1x16xf32, #tpu.memory_space<vmem>>, %arg4: memref<32x16xf32, #tpu.memory_space<vmem>>) attributes {dimension_semantics = [#tpu.dimension_semantics<parallel>], iteration_bounds = array<i64: 1>, scalar_prefetch = 0 : i64, scratch_operands = 0 : i64, tpu.core_type = #tpu.core_type<tc>, window_params = [{transform_indices = @transform_0, window_bounds = array<i64: 32, 576>}, {pipeline_mode = #tpu.pipeline_mode<synchronous>, transform_indices = @transform_1, window_bounds = array<i64: 576, 16>}, {pipeline_mode = #tpu.pipeline_mode<synchronous>, transform_indices = @transform_2, window_bounds = array<i64: 1, 16>}, {transform_indices = @transform_3, window_bounds = array<i64: 32, 16>}]} {
    %c0 = arith.constant 0 : index
    %c0_0 = arith.constant 0 : index
    %0 = vector.load %arg1[%c0, %c0_0] : memref<32x576xbf16, #tpu.memory_space<vmem>>, vector<32x576xbf16>
    %c0_1 = arith.constant 0 : index
    %c0_2 = arith.constant 0 : index
    %1 = vector.load %arg2[%c0_1, %c0_2] : memref<576x16xbf16, #tpu.memory_space<vmem>>, vector<576x16xbf16>
    %cst = arith.constant dense<0.000000e+00> : vector<32x16xf32>
    %2 = tpu.matmul %0, %1, %cst {dimension_numbers = #tpu.dot_dimension_numbers<[1], [0], [0], [1], [0, 0, 1, 1], [], []>} : vector<32x576xbf16>, vector<576x16xbf16>, vector<32x16xf32> -> vector<32x16xf32>
    %c0_3 = arith.constant 0 : index
    %c0_4 = arith.constant 0 : index
    %3 = vector.load %arg3[%c0_3, %c0_4] : memref<1x16xf32, #tpu.memory_space<vmem>>, vector<1x16xf32>
    %4 = vector.broadcast %3 : vector<1x16xf32> to vector<32x16xf32>
    %5 = arith.addf %2, %4 : vector<32x16xf32>
    %c0_5 = arith.constant 0 : index
    %c0_6 = arith.constant 0 : index
    %6 = vector.load %arg4[%c0_5, %c0_6] : memref<32x16xf32, #tpu.memory_space<vmem>>, vector<32x16xf32>
    tpu.vector_store %arg4[%c0_5, %c0_6], %5 {strides = array<i32>} : memref<32x16xf32, #tpu.memory_space<vmem>>, vector<32x16xf32>,
    return
  }
  func.func @transform_0(%arg0: i32) -> (i32, i32) {
    %c0_i32 = arith.constant 0 : i32
    %c0_i32_0 = arith.constant 0 : i32
    return %arg0, %c0_i32 : i32, i32
  }
  func.func @transform_1(%arg0: i32) -> (i32, i32) {
    %c0_i32 = arith.constant 0 : i32
    %c0_i32_0 = arith.constant 0 : i32
    %c0_i32_1 = arith.constant 0 : i32
    return %c0_i32, %c0_i32_0 : i32, i32
  }
  func.func @transform_2(%arg0: i32) -> (i32, i32) {
    %c0_i32 = arith.constant 0 : i32
    %c0_i32_0 = arith.constant 0 : i32
    %c0_i32_1 = arith.constant 0 : i32
    return %c0_i32, %c0_i32_0 : i32, i32
  }
  func.func @transform_3(%arg0: i32) -> (i32, i32) {
    %c0_i32 = arith.constant 0 : i32
    %c0_i32_0 = arith.constant 0 : i32
    return %arg0, %c0_i32 : i32, i32
  }
}

module attributes {stable_mosaic.version = 11 : i64} {
  func.func @_mm_kernel(%arg0: i32, %arg1: memref<32x144xbf16, #tpu.memory_space<vmem>>, %arg2: memref<144x16xbf16, #tpu.memory_space<vmem>>, %arg3: memref<1x16xf32, #tpu.memory_space<vmem>>, %arg4: memref<32x16xf32, #tpu.memory_space<vmem>>) attributes {dimension_semantics = [#tpu.dimension_semantics<parallel>], iteration_bounds = array<i64: 1>, scalar_prefetch = 0 : i64, scratch_operands = 0 : i64, tpu.core_type = #tpu.core_type<tc>, window_params = [{transform_indices = @transform_0, window_bounds = array<i64: 32, 144>}, {pipeline_mode = #tpu.pipeline_mode<synchronous>, transform_indices = @transform_1, window_bounds = array<i64: 144, 16>}, {pipeline_mode = #tpu.pipeline_mode<synchronous>, transform_indices = @transform_2, window_bounds = array<i64: 1, 16>}, {transform_indices = @transform_3, window_bounds = array<i64: 32, 16>}]} {
    %c0 = arith.constant 0 : index
    %c0_0 = arith.constant 0 : index
    %0 = vector.load %arg1[%c0, %c0_0] : memref<32x144xbf16, #tpu.memory_space<vmem>>, vector<32x144xbf16>
    %c0_1 = arith.constant 0 : index
    %c0_2 = arith.constant 0 : index
    %1 = vector.load %arg2[%c0_1, %c0_2] : memref<144x16xbf16, #tpu.memory_space<vmem>>, vector<144x16xbf16>
    %cst = arith.constant dense<0.000000e+00> : vector<32x16xf32>
    %2 = tpu.matmul %0, %1, %cst {dimension_numbers = #tpu.dot_dimension_numbers<[1], [0], [0], [1], [0, 0, 1, 1], [], []>} : vector<32x144xbf16>, vector<144x16xbf16>, vector<32x16xf32> -> vector<32x16xf32>
    %c0_3 = arith.constant 0 : index
    %c0_4 = arith.constant 0 : index
    %3 = vector.load %arg3[%c0_3, %c0_4] : memref<1x16xf32, #tpu.memory_space<vmem>>, vector<1x16xf32>
    %4 = vector.broadcast %3 : vector<1x16xf32> to vector<32x16xf32>
    %5 = arith.addf %2, %4 : vector<32x16xf32>
    %c0_5 = arith.constant 0 : index
    %c0_6 = arith.constant 0 : index
    %6 = vector.load %arg4[%c0_5, %c0_6] : memref<32x16xf32, #tpu.memory_space<vmem>>, vector<32x16xf32>
    tpu.vector_store %arg4[%c0_5, %c0_6], %5 {strides = array<i32>} : memref<32x16xf32, #tpu.memory_space<vmem>>, vector<32x16xf32>,
    return
  }
  func.func @transform_0(%arg0: i32) -> (i32, i32) {
    %c0_i32 = arith.constant 0 : i32
    %c0_i32_0 = arith.constant 0 : i32
    return %arg0, %c0_i32 : i32, i32
  }
  func.func @transform_1(%arg0: i32) -> (i32, i32) {
    %c0_i32 = arith.constant 0 : i32
    %c0_i32_0 = arith.constant 0 : i32
    %c0_i32_1 = arith.constant 0 : i32
    return %c0_i32, %c0_i32_0 : i32, i32
  }
  func.func @transform_2(%arg0: i32) -> (i32, i32) {
    %c0_i32 = arith.constant 0 : i32
    %c0_i32_0 = arith.constant 0 : i32
    %c0_i32_1 = arith.constant 0 : i32
    return %c0_i32, %c0_i32_0 : i32, i32
  }
  func.func @transform_3(%arg0: i32) -> (i32, i32) {
    %c0_i32 = arith.constant 0 : i32
    %c0_i32_0 = arith.constant 0 : i32
    return %arg0, %c0_i32 : i32, i32
  }
}

module attributes {stable_mosaic.version = 11 : i64} {
  func.func @_mm_kernel(%arg0: i32, %arg1: memref<128x288xbf16, #tpu.memory_space<vmem>>, %arg2: memref<288x16xbf16, #tpu.memory_space<vmem>>, %arg3: memref<1x16xf32, #tpu.memory_space<vmem>>, %arg4: memref<128x16xf32, #tpu.memory_space<vmem>>) attributes {dimension_semantics = [#tpu.dimension_semantics<parallel>], iteration_bounds = array<i64: 1>, scalar_prefetch = 0 : i64, scratch_operands = 0 : i64, tpu.core_type = #tpu.core_type<tc>, window_params = [{transform_indices = @transform_0, window_bounds = array<i64: 128, 288>}, {pipeline_mode = #tpu.pipeline_mode<synchronous>, transform_indices = @transform_1, window_bounds = array<i64: 288, 16>}, {pipeline_mode = #tpu.pipeline_mode<synchronous>, transform_indices = @transform_2, window_bounds = array<i64: 1, 16>}, {transform_indices = @transform_3, window_bounds = array<i64: 128, 16>}]} {
    %c0 = arith.constant 0 : index
    %c0_0 = arith.constant 0 : index
    %0 = vector.load %arg1[%c0, %c0_0] : memref<128x288xbf16, #tpu.memory_space<vmem>>, vector<128x288xbf16>
    %c0_1 = arith.constant 0 : index
    %c0_2 = arith.constant 0 : index
    %1 = vector.load %arg2[%c0_1, %c0_2] : memref<288x16xbf16, #tpu.memory_space<vmem>>, vector<288x16xbf16>
    %cst = arith.constant dense<0.000000e+00> : vector<128x16xf32>
    %2 = tpu.matmul %0, %1, %cst {dimension_numbers = #tpu.dot_dimension_numbers<[1], [0], [0], [1], [0, 0, 1, 1], [], []>} : vector<128x288xbf16>, vector<288x16xbf16>, vector<128x16xf32> -> vector<128x16xf32>
    %c0_3 = arith.constant 0 : index
    %c0_4 = arith.constant 0 : index
    %3 = vector.load %arg3[%c0_3, %c0_4] : memref<1x16xf32, #tpu.memory_space<vmem>>, vector<1x16xf32>
    %4 = vector.broadcast %3 : vector<1x16xf32> to vector<128x16xf32>
    %5 = arith.addf %2, %4 : vector<128x16xf32>
    %c0_5 = arith.constant 0 : index
    %c0_6 = arith.constant 0 : index
    %6 = vector.load %arg4[%c0_5, %c0_6] : memref<128x16xf32, #tpu.memory_space<vmem>>, vector<128x16xf32>
    tpu.vector_store %arg4[%c0_5, %c0_6], %5 {strides = array<i32>} : memref<128x16xf32, #tpu.memory_space<vmem>>, vector<128x16xf32>,
    return
  }
  func.func @transform_0(%arg0: i32) -> (i32, i32) {
    %c0_i32 = arith.constant 0 : i32
    %c0_i32_0 = arith.constant 0 : i32
    return %arg0, %c0_i32 : i32, i32
  }
  func.func @transform_1(%arg0: i32) -> (i32, i32) {
    %c0_i32 = arith.constant 0 : i32
    %c0_i32_0 = arith.constant 0 : i32
    %c0_i32_1 = arith.constant 0 : i32
    return %c0_i32, %c0_i32_0 : i32, i32
  }
  func.func @transform_2(%arg0: i32) -> (i32, i32) {
    %c0_i32 = arith.constant 0 : i32
    %c0_i32_0 = arith.constant 0 : i32
    %c0_i32_1 = arith.constant 0 : i32
    return %c0_i32, %c0_i32_0 : i32, i32
  }
  func.func @transform_3(%arg0: i32) -> (i32, i32) {
    %c0_i32 = arith.constant 0 : i32
    %c0_i32_0 = arith.constant 0 : i32
    return %arg0, %c0_i32 : i32, i32
  }
}

module attributes {stable_mosaic.version = 11 : i64} {
  func.func @_mm_kernel(%arg0: i32, %arg1: memref<128x144xbf16, #tpu.memory_space<vmem>>, %arg2: memref<144x16xbf16, #tpu.memory_space<vmem>>, %arg3: memref<1x16xf32, #tpu.memory_space<vmem>>, %arg4: memref<128x16xf32, #tpu.memory_space<vmem>>) attributes {dimension_semantics = [#tpu.dimension_semantics<parallel>], iteration_bounds = array<i64: 1>, scalar_prefetch = 0 : i64, scratch_operands = 0 : i64, tpu.core_type = #tpu.core_type<tc>, window_params = [{transform_indices = @transform_0, window_bounds = array<i64: 128, 144>}, {pipeline_mode = #tpu.pipeline_mode<synchronous>, transform_indices = @transform_1, window_bounds = array<i64: 144, 16>}, {pipeline_mode = #tpu.pipeline_mode<synchronous>, transform_indices = @transform_2, window_bounds = array<i64: 1, 16>}, {transform_indices = @transform_3, window_bounds = array<i64: 128, 16>}]} {
    %c0 = arith.constant 0 : index
    %c0_0 = arith.constant 0 : index
    %0 = vector.load %arg1[%c0, %c0_0] : memref<128x144xbf16, #tpu.memory_space<vmem>>, vector<128x144xbf16>
    %c0_1 = arith.constant 0 : index
    %c0_2 = arith.constant 0 : index
    %1 = vector.load %arg2[%c0_1, %c0_2] : memref<144x16xbf16, #tpu.memory_space<vmem>>, vector<144x16xbf16>
    %cst = arith.constant dense<0.000000e+00> : vector<128x16xf32>
    %2 = tpu.matmul %0, %1, %cst {dimension_numbers = #tpu.dot_dimension_numbers<[1], [0], [0], [1], [0, 0, 1, 1], [], []>} : vector<128x144xbf16>, vector<144x16xbf16>, vector<128x16xf32> -> vector<128x16xf32>
    %c0_3 = arith.constant 0 : index
    %c0_4 = arith.constant 0 : index
    %3 = vector.load %arg3[%c0_3, %c0_4] : memref<1x16xf32, #tpu.memory_space<vmem>>, vector<1x16xf32>
    %4 = vector.broadcast %3 : vector<1x16xf32> to vector<128x16xf32>
    %5 = arith.addf %2, %4 : vector<128x16xf32>
    %c0_5 = arith.constant 0 : index
    %c0_6 = arith.constant 0 : index
    %6 = vector.load %arg4[%c0_5, %c0_6] : memref<128x16xf32, #tpu.memory_space<vmem>>, vector<128x16xf32>
    tpu.vector_store %arg4[%c0_5, %c0_6], %5 {strides = array<i32>} : memref<128x16xf32, #tpu.memory_space<vmem>>, vector<128x16xf32>,
    return
  }
  func.func @transform_0(%arg0: i32) -> (i32, i32) {
    %c0_i32 = arith.constant 0 : i32
    %c0_i32_0 = arith.constant 0 : i32
    return %arg0, %c0_i32 : i32, i32
  }
  func.func @transform_1(%arg0: i32) -> (i32, i32) {
    %c0_i32 = arith.constant 0 : i32
    %c0_i32_0 = arith.constant 0 : i32
    %c0_i32_1 = arith.constant 0 : i32
    return %c0_i32, %c0_i32_0 : i32, i32
  }
  func.func @transform_2(%arg0: i32) -> (i32, i32) {
    %c0_i32 = arith.constant 0 : i32
    %c0_i32_0 = arith.constant 0 : i32
    %c0_i32_1 = arith.constant 0 : i32
    return %c0_i32, %c0_i32_0 : i32, i32
  }
  func.func @transform_3(%arg0: i32) -> (i32, i32) {
    %c0_i32 = arith.constant 0 : i32
    %c0_i32_0 = arith.constant 0 : i32
    return %arg0, %c0_i32 : i32, i32
  }
}

module attributes {stable_mosaic.version = 11 : i64} {
  func.func @_mm_kernel(%arg0: i32, %arg1: memref<512x144xbf16, #tpu.memory_space<vmem>>, %arg2: memref<144x16xbf16, #tpu.memory_space<vmem>>, %arg3: memref<1x16xf32, #tpu.memory_space<vmem>>, %arg4: memref<512x16xf32, #tpu.memory_space<vmem>>) attributes {dimension_semantics = [#tpu.dimension_semantics<parallel>], iteration_bounds = array<i64: 1>, scalar_prefetch = 0 : i64, scratch_operands = 0 : i64, tpu.core_type = #tpu.core_type<tc>, window_params = [{transform_indices = @transform_0, window_bounds = array<i64: 512, 144>}, {pipeline_mode = #tpu.pipeline_mode<synchronous>, transform_indices = @transform_1, window_bounds = array<i64: 144, 16>}, {pipeline_mode = #tpu.pipeline_mode<synchronous>, transform_indices = @transform_2, window_bounds = array<i64: 1, 16>}, {transform_indices = @transform_3, window_bounds = array<i64: 512, 16>}]} {
    %c0 = arith.constant 0 : index
    %c0_0 = arith.constant 0 : index
    %0 = vector.load %arg1[%c0, %c0_0] : memref<512x144xbf16, #tpu.memory_space<vmem>>, vector<512x144xbf16>
    %c0_1 = arith.constant 0 : index
    %c0_2 = arith.constant 0 : index
    %1 = vector.load %arg2[%c0_1, %c0_2] : memref<144x16xbf16, #tpu.memory_space<vmem>>, vector<144x16xbf16>
    %cst = arith.constant dense<0.000000e+00> : vector<512x16xf32>
    %2 = tpu.matmul %0, %1, %cst {dimension_numbers = #tpu.dot_dimension_numbers<[1], [0], [0], [1], [0, 0, 1, 1], [], []>} : vector<512x144xbf16>, vector<144x16xbf16>, vector<512x16xf32> -> vector<512x16xf32>
    %c0_3 = arith.constant 0 : index
    %c0_4 = arith.constant 0 : index
    %3 = vector.load %arg3[%c0_3, %c0_4] : memref<1x16xf32, #tpu.memory_space<vmem>>, vector<1x16xf32>
    %4 = vector.broadcast %3 : vector<1x16xf32> to vector<512x16xf32>
    %5 = arith.addf %2, %4 : vector<512x16xf32>
    %c0_5 = arith.constant 0 : index
    %c0_6 = arith.constant 0 : index
    %6 = vector.load %arg4[%c0_5, %c0_6] : memref<512x16xf32, #tpu.memory_space<vmem>>, vector<512x16xf32>
    tpu.vector_store %arg4[%c0_5, %c0_6], %5 {strides = array<i32>} : memref<512x16xf32, #tpu.memory_space<vmem>>, vector<512x16xf32>,
    return
  }
  func.func @transform_0(%arg0: i32) -> (i32, i32) {
    %c0_i32 = arith.constant 0 : i32
    %c0_i32_0 = arith.constant 0 : i32
    return %arg0, %c0_i32 : i32, i32
  }
  func.func @transform_1(%arg0: i32) -> (i32, i32) {
    %c0_i32 = arith.constant 0 : i32
    %c0_i32_0 = arith.constant 0 : i32
    %c0_i32_1 = arith.constant 0 : i32
    return %c0_i32, %c0_i32_0 : i32, i32
  }
  func.func @transform_2(%arg0: i32) -> (i32, i32) {
    %c0_i32 = arith.constant 0 : i32
    %c0_i32_0 = arith.constant 0 : i32
    %c0_i32_1 = arith.constant 0 : i32
    return %c0_i32, %c0_i32_0 : i32, i32
  }
  func.func @transform_3(%arg0: i32) -> (i32, i32) {
    %c0_i32 = arith.constant 0 : i32
    %c0_i32_0 = arith.constant 0 : i32
    return %arg0, %c0_i32 : i32, i32
  }
}

module attributes {stable_mosaic.version = 11 : i64} {
  func.func @_mm_kernel(%arg0: i32, %arg1: memref<512x144xbf16, #tpu.memory_space<vmem>>, %arg2: memref<144x2xbf16, #tpu.memory_space<vmem>>, %arg3: memref<1x2xf32, #tpu.memory_space<vmem>>, %arg4: memref<512x2xf32, #tpu.memory_space<vmem>>) attributes {dimension_semantics = [#tpu.dimension_semantics<parallel>], iteration_bounds = array<i64: 1>, scalar_prefetch = 0 : i64, scratch_operands = 0 : i64, tpu.core_type = #tpu.core_type<tc>, window_params = [{transform_indices = @transform_0, window_bounds = array<i64: 512, 144>}, {pipeline_mode = #tpu.pipeline_mode<synchronous>, transform_indices = @transform_1, window_bounds = array<i64: 144, 2>}, {pipeline_mode = #tpu.pipeline_mode<synchronous>, transform_indices = @transform_2, window_bounds = array<i64: 1, 2>}, {transform_indices = @transform_3, window_bounds = array<i64: 512, 2>}]} {
    %c0 = arith.constant 0 : index
    %c0_0 = arith.constant 0 : index
    %0 = vector.load %arg1[%c0, %c0_0] : memref<512x144xbf16, #tpu.memory_space<vmem>>, vector<512x144xbf16>
    %c0_1 = arith.constant 0 : index
    %c0_2 = arith.constant 0 : index
    %1 = vector.load %arg2[%c0_1, %c0_2] : memref<144x2xbf16, #tpu.memory_space<vmem>>, vector<144x2xbf16>
    %cst = arith.constant dense<0.000000e+00> : vector<512x2xf32>
    %2 = tpu.matmul %0, %1, %cst {dimension_numbers = #tpu.dot_dimension_numbers<[1], [0], [0], [1], [0, 0, 1, 1], [], []>} : vector<512x144xbf16>, vector<144x2xbf16>, vector<512x2xf32> -> vector<512x2xf32>
    %c0_3 = arith.constant 0 : index
    %c0_4 = arith.constant 0 : index
    %3 = vector.load %arg3[%c0_3, %c0_4] : memref<1x2xf32, #tpu.memory_space<vmem>>, vector<1x2xf32>
    %4 = vector.broadcast %3 : vector<1x2xf32> to vector<512x2xf32>
    %5 = arith.addf %2, %4 : vector<512x2xf32>
    %c0_5 = arith.constant 0 : index
    %c0_6 = arith.constant 0 : index
    %6 = vector.load %arg4[%c0_5, %c0_6] : memref<512x2xf32, #tpu.memory_space<vmem>>, vector<512x2xf32>
    tpu.vector_store %arg4[%c0_5, %c0_6], %5 {strides = array<i32>} : memref<512x2xf32, #tpu.memory_space<vmem>>, vector<512x2xf32>,
    return
  }
  func.func @transform_0(%arg0: i32) -> (i32, i32) {
    %c0_i32 = arith.constant 0 : i32
    %c0_i32_0 = arith.constant 0 : i32
    return %arg0, %c0_i32 : i32, i32
  }
  func.func @transform_1(%arg0: i32) -> (i32, i32) {
    %c0_i32 = arith.constant 0 : i32
    %c0_i32_0 = arith.constant 0 : i32
    %c0_i32_1 = arith.constant 0 : i32
    return %c0_i32, %c0_i32_0 : i32, i32
  }
  func.func @transform_2(%arg0: i32) -> (i32, i32) {
    %c0_i32 = arith.constant 0 : i32
    %c0_i32_0 = arith.constant 0 : i32
    %c0_i32_1 = arith.constant 0 : i32
    return %c0_i32, %c0_i32_0 : i32, i32
  }
  func.func @transform_3(%arg0: i32) -> (i32, i32) {
    %c0_i32 = arith.constant 0 : i32
    %c0_i32_0 = arith.constant 0 : i32
    return %arg0, %c0_i32 : i32, i32
  }
}

module attributes {stable_mosaic.version = 11 : i64} {
  func.func @kernel(%arg0: i32, %arg1: memref<1x2x4096xf32, #tpu.memory_space<vmem>>, %arg2: memref<1x2x4096xf32, #tpu.memory_space<vmem>>) attributes {dimension_semantics = [#tpu.dimension_semantics<parallel>], iteration_bounds = array<i64: 2>, scalar_prefetch = 0 : i64, scratch_operands = 0 : i64, tpu.core_type = #tpu.core_type<tc>, window_params = [{transform_indices = @transform_0, window_bounds = array<i64: 1, 2, 4096>}, {transform_indices = @transform_1, window_bounds = array<i64: 1, 2, 4096>}]} {
    %c0 = arith.constant 0 : index
    %c0_0 = arith.constant 0 : index
    %c0_1 = arith.constant 0 : index
    %0 = vector.load %arg1[%c0, %c0_0, %c0_1] : memref<1x2x4096xf32, #tpu.memory_space<vmem>>, vector<1x2x4096xf32>
    %1 = vector.shape_cast %0 : vector<1x2x4096xf32> to vector<2x4096xf32>
    %cst = arith.constant dense<0xFF800000> : vector<4096xf32>
    %2 = vector.multi_reduction <maximumf>, %1, %cst [0] : vector<2x4096xf32> to vector<4096xf32>
    %3 = vector.shape_cast %2 : vector<4096xf32> to vector<1x4096xf32>
    %4 = vector.broadcast %3 : vector<1x4096xf32> to vector<2x4096xf32>
    %5 = arith.subf %1, %4 : vector<2x4096xf32>
    %6 = math.exp %5 : vector<2x4096xf32>
    %cst_2 = arith.constant dense<0.000000e+00> : vector<4096xf32>
    %7 = vector.multi_reduction <add>, %6, %cst_2 [0] : vector<2x4096xf32> to vector<4096xf32>
    %8 = vector.shape_cast %7 : vector<4096xf32> to vector<1x4096xf32>
    %9 = vector.broadcast %8 : vector<1x4096xf32> to vector<2x4096xf32>
    %10 = arith.divf %6, %9 : vector<2x4096xf32>
    %c0_3 = arith.constant 0 : index
    %c0_4 = arith.constant 0 : index
    %c0_5 = arith.constant 0 : index
    %11 = vector.load %arg2[%c0_3, %c0_4, %c0_5] : memref<1x2x4096xf32, #tpu.memory_space<vmem>>, vector<1x2x4096xf32>
    %12 = vector.shape_cast %11 : vector<1x2x4096xf32> to vector<2x4096xf32>
    %13 = vector.shape_cast %10 : vector<2x4096xf32> to vector<1x2x4096xf32>
    tpu.vector_store %arg2[%c0_3, %c0_4, %c0_5], %13 {strides = array<i32>} : memref<1x2x4096xf32, #tpu.memory_space<vmem>>, vector<1x2x4096xf32>,
    return
  }
  func.func @transform_0(%arg0: i32) -> (i32, i32, i32) {
    %c0_i32 = arith.constant 0 : i32
    %c0_i32_0 = arith.constant 0 : i32
    %c0_i32_1 = arith.constant 0 : i32
    return %arg0, %c0_i32, %c0_i32_0 : i32, i32, i32
  }
  func.func @transform_1(%arg0: i32) -> (i32, i32, i32) {
    %c0_i32 = arith.constant 0 : i32
    %c0_i32_0 = arith.constant 0 : i32
    %c0_i32_1 = arith.constant 0 : i32
    return %arg0, %c0_i32, %c0_i32_0 : i32, i32, i32
  }
}

</mosaic_0001>

<bundles_post_ra>
// kernel: urvos_forward.59
= control target key start
LH: loop header
LB: loop body
LE: loop exit
PB: predicated region body
PF: predicated region fallthrough
CT: control target
= control target key end

     0   :  { %8 = vsyncpa [#allocation3], 0  ;;  %s167_s12 = smov [#allocation2]   ;;  %s211_s0 = inlined_call_operand.vmem [shape: bf16[16,48], index: 0, kind: input, shape index: {}]   ;;  %s212_s1 = inlined_call_operand.vmem [shape: bf16[48,32], index: 1, kind: input, shape index: {}]   ;;  %s213_s2 = inlined_call_operand.hbm [shape: f32[1,32], index: 2, kind: input, shape index: {}]   ;;  %s214_s3 = inlined_call_operand.vmem [shape: f32[16,32], index: 3, kind: output, shape index: {}]  }
   0x1   :  { %s19_s13 = sshll.u32 %s167_s12, 4  ;;  %s20_s13 = int_to_ptr.vmem [resolvable:$true] %s19_s13 }
   0x2   :  { %s153_s14 = scalar_lea.vmem %s20_s13, 16  ;;  %s157_s15 = scalar_lea.vmem %s20_s13, 32 }
   0x3   :  { %p154_p0 = scmp.ne.s32.totalorder %s20_s13, %s153_s14  ;;  %p158_p1 = scmp.lt.s32.totalorder %s20_s13, %s20_s13 }
   0x4   :  { %p159_p2 = scmp.lt.s32.totalorder %s157_s15, %s153_s14 }
   0x6   :  { %p160_p3 = por %p159_p2, %p158_p1 }
   0x8   :  { %p161_p4 = pnand %p160_p3, %p154_p0 }
   0xa   :  { %164 = shalt.err (!%p161_p4)
}
   0xb   :  { %22 = dma.hbm_to_vmem [thread:$0]  %s213_s2, 16, %s20_s13, [#allocation3]  }
   0xc   :  { %165 = dma.done.wait [#allocation3], 16  }
   0xd   :  { %166 = vsyncadd [#allocation3], 4294967280  ;;  %v168_v0 = vmov 0.0   ;;  %vm169_vm0 = vmmov 0   ;;  %v141_v1 = vld [vmem:[%s212_s1 + $0x10] sm:$0xff]   ;;  %v142_v2 = vld [vmem:[%s212_s1 + $0x8] sm:$0xff]  }
   0xe   :  { %128 = vmatprep.subr.bf16.mxu0 %v168_v0  ;;  %134 = vmatprep.mubr.msk.bf16.mxu0 %vm169_vm0, %v168_v0  ;;  %v143_v3 = vld [vmem:[%s212_s1] sm:$0xff]   ;;  %vm65_vm1 = vcmask 392192   ;;  %vm110_vm2 = vcmask 261120  }
   0xf   :  { %129 = vmatpush3.bf16.msra.mxu0 %v141_v1  ;;  %v144_v4 = vld [vmem:[%s211_s0] sm:$0xff]  }
  0x10   :  { %130 = vmatprep.subr.bf16.mxu0 %v168_v0  ;;  %v118_v5 = vld [vmem:[#allocation2] ss:$0 sm:$0xff] }
  0x13   :  { %131 = vmatpush3.bf16.msra.mxu0 %v142_v2 }
  0x14   :  { %132 = vmatprep.subr.bf16.mxu0 %v168_v0 }
  0x17   :  { %133 = vmatpush3.bf16.msra.mxu0 %v143_v3 }
  0x1a   :  { %135 = vmatmul.mubr.msk.bf16.vlgmr.msra.gmra.mxu0 %vm65_vm1, %v144_v4 }
  0xda   :  { %v103_v6 = vpop.f32.mrf.mxu0 }
  0xdb   :  { %v104_v7 = vadd.f32 %v118_v5, %v103_v6 }
  0xdc   :  { %v136_v8 = vpop.f32.mrf.mxu0 }
  0xdd   :  { %111 = vst.msk [vmem:[%s214_s3] sm:$0xff] %vm110_vm2, %v104_v7 }
  0xde   :  { %v106_v9 = vpop.f32.mrf.mxu0 }
  0xdf   :  { %v107_v10 = vadd.f32 %v118_v5, %v106_v9 }
  0xe0   :  { %v137_v11 = vpop.f32.mrf.mxu0 }
  0xe1   :  { %112 = vst.msk [vmem:[%s214_s3 + $0x8] sm:$0xff] %vm110_vm2, %v107_v10 }
  0xe2   :  { %117 = vsyncpa [#allocation3], 1 }

// kernel: urvos_forward.41
= control target key start
LH: loop header
LB: loop body
LE: loop exit
PB: predicated region body
PF: predicated region fallthrough
CT: control target
= control target key end

     0   :  { %s1413_s12 = smov 0   ;;  %s1764_s0 = inlined_call_operand.vmem [shape: bf16[2048,147], index: 0, kind: input, shape index: {}]   ;;  %s1765_s1 = inlined_call_operand.vmem [shape: bf16[147,4], index: 1, kind: input, shape index: {}]   ;;  %s1766_s2 = inlined_call_operand.vmem [shape: f32[1,4], index: 2, kind: input, shape index: {}]   ;;  %s1767_s3 = inlined_call_operand.vmem [shape: f32[2048,4], index: 3, kind: output, shape index: {}]  }
   0x1 LB: > { %s1127_s13 = sadd.s32 4294967295, %s1389_s12   ;;  %p1131_p0 = scmp.ge.s32.totalorder %s1389_s12, 1  ;;  %s1389_s12 = sphi %s1413_s12, %s13_s12  }
   0x2   : > { %p139_p1 = scmp.lt.s32.totalorder %s1389_s12, 5 }
   0x4   : > { %p140_p2 = pnand %p1131_p0, %p139_p1 }
   0x5   : > { %s1132_s20 = sshll.u32 (!%p140_p2), %s1127_s13, 6 }
   0x6   : > { %143 = sbr.rel (%p140_p2) target bundleno = 372 (0x174), region = 32  ;;  %p165_p3 = scmp.lt.s32.totalorder (!%p140_p2), %s1132_s20, 255 }
   0xb   : > { %v1277_v0 = vld [vmem:[%s1765_s1 + $0x38] sm:$0xff]   ;;  %v1391_v1 = vmov 0   ;;  %v1278_v2 = vld [vmem:[%s1765_s1 + $0x30] sm:$0xff]   ;;  %v1279_v3 = vld [vmem:[%s1765_s1 + $0x28] sm:$0xff]   ;;  %s1769_s20 = smov (!%p165_p3, %s1132_s20), 255  ;;  %vm613_vm0 = vcmask 154624  }
   0xc   : > { %717 = vmatprep.subr.bf16.mxu0 %v1391_v1  ;;  %1247 = vmatprep.subr.bf16.mxu1 %v1391_v1  ;;  %v1280_v4 = vld [vmem:[%s1765_s1 + $0x20] sm:$0xff]   ;;  %s1246_s23 = sshll.u32 %s1769_s20, 3  ;;  %v1281_v5 = vld [vmem:[%s1765_s1 + $0x18] sm:$0xff]   ;;  %v1282_v8 = vld [vmem:[%s1765_s1 + $0x10] sm:$0xff]   ;;  %vm710_vm1 = vcmask 1040384   ;;  %vm711_vm2 = vcmask 1041408  }
   0xd   : > { %718 = vmatpush1.bf16.msra.mxu0 %v1277_v0  ;;  %1257 = vmatpush1.bf16.msra.mxu1 %v1277_v0  ;;  %s1441_s26 = scalar_lea.vmem %s1764_s0, %s1246_s23  ;;  %v1283_v9 = vld [vmem:[%s1765_s1 + $0x8] sm:$0xff]   ;;  %v1392_v10 = vmov 65535   ;;  %v1284_v12 = vld [vmem:[%s1765_s1] sm:$0xff]   ;;  %s1567_s17 = scalar_lea.vmem %s1767_s3, %s1246_s23  ;;  %vm1006_vm3 = vcmask 31744  }
   0xe   : > { %719 = vmatprep.subr.bf16.mxu0 %v1391_v1  ;;  %1248 = vmatprep.subr.bf16.mxu1 %v1391_v1  ;;  %v1289_v6 = vld [vmem:[%s1441_s26 + $0x4] ss:$8 sps:$4 sm:$0xff]   ;;  %v712_v11 = vsel %vm710_vm1, 4294967295, %v1392_v10  ;;  %v1285_v13 = vld [vmem:[%s1765_s1 + $0x48] ss:$0 sps:$4 sm:$0x33]  }
   0xf   : > { %v1292_v7 = vld [vmem:[%s1441_s26 + $0x104] ss:$8 sps:$4 sm:$0xff]   ;;  %1212 = vmatprep.mubr.msk.bf16.mxu0 %vm613_vm0, %v1289_v6  ;;  %v713_v14 = vsel %vm711_vm2, %v712_v11, 0  ;;  %v1287_v17 = vld [vmem:[%s1441_s26] ss:$8 sps:$4 sm:$0xff]  }
  0x10   : > { %1228 = vmatprep.mubr.msk.bf16.mxu1 %vm613_vm0, %v1292_v7  ;;  %v715_v15 = vand.u32 %v1285_v13, %v713_v14  ;;  %v1286_v16 = vld [vmem:[%s1765_s1 + $0x40] sm:$0xff]   ;;  %v1293_v19 = vld [vmem:[%s1441_s26 + $0x14] ss:$8 sps:$4 sm:$0xff]   ;;  %v1297_v21 = vld [vmem:[%s1441_s26 + $0x10] ss:$8 sps:$4 sm:$0xff]  }
  0x11   : > { %720 = vmatpush1.bf16.msra.mxu0 %v1278_v2  ;;  %1258 = vmatpush1.bf16.msra.mxu1 %v1278_v2  ;;  %v1290_v18 = vld [vmem:[%s1441_s26 + $0x100] ss:$8 sps:$4 sm:$0xff]   ;;  %v1295_v20 = vld [vmem:[%s1441_s26 + $0x114] ss:$8 sps:$4 sm:$0xff]   ;;  %v1298_v22 = vld [vmem:[%s1441_s26 + $0x110] ss:$8 sps:$4 sm:$0xff]  }
  0x12   : > { %721 = vmatprep.subr.bf16.mxu0 %v1391_v1  ;;  %1249 = vmatprep.subr.bf16.mxu1 %v1391_v1  ;;  %v1299_v23 = vld [vmem:[%s1441_s26 + $0x24] ss:$8 sps:$4 sm:$0xff]   ;;  %v1303_v25 = vld [vmem:[%s1441_s26 + $0x20] ss:$8 sps:$4 sm:$0xff]   ;;  %v1305_v27 = vld [vmem:[%s1441_s26 + $0x34] ss:$8 sps:$4 sm:$0xff]  }
  0x13   : > { %v1301_v24 = vld [vmem:[%s1441_s26 + $0x124] ss:$8 sps:$4 sm:$0xff]   ;;  %v1304_v26 = vld [vmem:[%s1441_s26 + $0x120] ss:$8 sps:$4 sm:$0xff]   ;;  %v1307_v28 = vld [vmem:[%s1441_s26 + $0x134] ss:$8 sps:$4 sm:$0xff]  }
  0x14   : > { %v1309_v29 = vld [vmem:[%s1441_s26 + $0x30] ss:$8 sps:$4 sm:$0xff]   ;;  %v1311_v31 = vld [vmem:[%s1441_s26 + $0x44] ss:$8 sps:$4 sm:$0xff]   ;;  %v1315_v33 = vld [vmem:[%s1441_s26 + $0x40] ss:$8 sps:$4 sm:$0xff]  }
  0x15   : > { %722 = vmatpush1.bf16.msra.mxu0 %v1279_v3  ;;  %1259 = vmatpush1.bf16.msra.mxu1 %v1279_v3  ;;  %v1310_v30 = vld [vmem:[%s1441_s26 + $0x130] ss:$8 sps:$4 sm:$0xff]   ;;  %v1313_v32 = vld [vmem:[%s1441_s26 + $0x144] ss:$8 sps:$4 sm:$0xff]   ;;  %v1316_v34 = vld [vmem:[%s1441_s26 + $0x140] ss:$8 sps:$4 sm:$0xff]  }
  0x16   : > { %723 = vmatprep.subr.bf16.mxu0 %v1391_v1  ;;  %1250 = vmatprep.subr.bf16.mxu1 %v1391_v1  ;;  %v1317_v35 = vld [vmem:[%s1441_s26 + $0x54] ss:$8 sps:$4 sm:$0xff]   ;;  %v1321_v37 = vld [vmem:[%s1441_s26 + $0x50] ss:$8 sps:$4 sm:$0xff]   ;;  %v1323_v39 = vld [vmem:[%s1441_s26 + $0x64] ss:$8 sps:$4 sm:$0xff]  }
  0x17   : > { %v1319_v36 = vld [vmem:[%s1441_s26 + $0x154] ss:$8 sps:$4 sm:$0xff]   ;;  %v1322_v38 = vld [vmem:[%s1441_s26 + $0x150] ss:$8 sps:$4 sm:$0xff]   ;;  %v1325_v40 = vld [vmem:[%s1441_s26 + $0x164] ss:$8 sps:$4 sm:$0xff]  }
  0x18   : > { %v1327_v41 = vld [vmem:[%s1441_s26 + $0x60] ss:$8 sps:$4 sm:$0xff]   ;;  %v1329_v43 = vld [vmem:[%s1441_s26 + $0x74] ss:$8 sps:$4 sm:$0xff]   ;;  %v1333_v45 = vld [vmem:[%s1441_s26 + $0x70] ss:$8 sps:$4 sm:$0xff]  }
  0x19   : > { %724 = vmatpush1.bf16.msra.mxu0 %v1280_v4  ;;  %1260 = vmatpush1.bf16.msra.mxu1 %v1280_v4  ;;  %v1328_v42 = vld [vmem:[%s1441_s26 + $0x160] ss:$8 sps:$4 sm:$0xff]   ;;  %v1331_v44 = vld [vmem:[%s1441_s26 + $0x174] ss:$8 sps:$4 sm:$0xff]   ;;  %v1334_v46 = vld [vmem:[%s1441_s26 + $0x170] ss:$8 sps:$4 sm:$0xff]  }
  0x1a   : > { %725 = vmatprep.subr.bf16.mxu0 %v1391_v1  ;;  %1251 = vmatprep.subr.bf16.mxu1 %v1391_v1  ;;  %v1335_v47 = vld [vmem:[%s1441_s26 + $0x84] ss:$8 sps:$4 sm:$0xff]   ;;  %v1339_v49 = vld [vmem:[%s1441_s26 + $0x80] ss:$8 sps:$4 sm:$0xff]   ;;  %v1341_v51 = vld [vmem:[%s1441_s26 + $0x94] ss:$8 sps:$4 sm:$0xff]  }
  0x1b   : > { %v1337_v48 = vld [vmem:[%s1441_s26 + $0x184] ss:$8 sps:$4 sm:$0xff]   ;;  %v1340_v50 = vld [vmem:[%s1441_s26 + $0x180] ss:$8 sps:$4 sm:$0xff]   ;;  %v1343_v52 = vld [vmem:[%s1441_s26 + $0x194] ss:$8 sps:$4 sm:$0xff]  }
  0x1c   : > { %v1345_v53 = vld [vmem:[%s1441_s26 + $0x90] ss:$8 sps:$4 sm:$0xff]   ;;  %v1347_v55 = vld [vmem:[%s1441_s26 + $0xa4] ss:$8 sps:$4 sm:$0xff]   ;;  %v1351_v57 = vld [vmem:[%s1441_s26 + $0xa0] ss:$8 sps:$4 sm:$0xff]  }
  0x1d   : > { %726 = vmatpush1.bf16.msra.mxu0 %v1281_v5  ;;  %1261 = vmatpush1.bf16.msra.mxu1 %v1281_v5  ;;  %v1346_v54 = vld [vmem:[%s1441_s26 + $0x190] ss:$8 sps:$4 sm:$0xff]   ;;  %v1349_v56 = vld [vmem:[%s1441_s26 + $0x1a4] ss:$8 sps:$4 sm:$0xff]   ;;  %v1352_v58 = vld [vmem:[%s1441_s26 + $0x1a0] ss:$8 sps:$4 sm:$0xff]  }
  0x1e   : > { %727 = vmatprep.subr.bf16.mxu0 %v1391_v1  ;;  %1252 = vmatprep.subr.bf16.mxu1 %v1391_v1  ;;  %v1353_v59 = vld [vmem:[%s1441_s26 + $0xb4] ss:$8 sps:$4 sm:$0xff]   ;;  %v1357_v61 = vld [vmem:[%s1441_s26 + $0xb0] ss:$8 sps:$4 sm:$0xff]   ;;  %v1359_v63 = vld [vmem:[%s1441_s26 + $0xc4] ss:$8 sps:$4 sm:$0xff]  }
  0x1f   : > { %v1355_v60 = vld [vmem:[%s1441_s26 + $0x1b4] ss:$8 sps:$4 sm:$0xff]   ;;  %v1358_v62 = vld [vmem:[%s1441_s26 + $0x1b0] ss:$8 sps:$4 sm:$0xff]   ;;  %v1361_v0 = vld [vmem:[%s1441_s26 + $0x1c4] ss:$8 sps:$4 sm:$0xff]  }
  0x20   : > { %v1364_v2 = vld [vmem:[%s1441_s26 + $0x1c0] ss:$8 sps:$4 sm:$0xff]   ;;  %v1365_v3 = vld [vmem:[%s1441_s26 + $0xd4] ss:$8 sps:$4 sm:$0xff]   ;;  %v1369_v5 = vld [vmem:[%s1441_s26 + $0xd0] ss:$8 sps:$4 sm:$0xff]  }
  0x21   : > { %728 = vmatpush1.bf16.msra.mxu0 %v1282_v8  ;;  %1262 = vmatpush1.bf16.msra.mxu1 %v1282_v8  ;;  %v1367_v4 = vld [vmem:[%s1441_s26 + $0x1d4] ss:$8 sps:$4 sm:$0xff]   ;;  %v1370_v6 = vld [vmem:[%s1441_s26 + $0x1d0] ss:$8 sps:$4 sm:$0xff]   ;;  %v1371_v7 = vld [vmem:[%s1441_s26 + $0xe4] ss:$8 sps:$4 sm:$0xff]  }
  0x22   : > { %729 = vmatprep.subr.bf16.mxu0 %v1391_v1  ;;  %1253 = vmatprep.subr.bf16.mxu1 %v1391_v1  ;;  %v1373_v8 = vld [vmem:[%s1441_s26 + $0x1e4] ss:$8 sps:$4 sm:$0xff]   ;;  %v1376_v10 = vld [vmem:[%s1441_s26 + $0x1e0] ss:$8 sps:$4 sm:$0xff]   ;;  %v1377_v11 = vld [vmem:[%s1441_s26 + $0xf4] ss:$8 sps:$4 sm:$0xff]  }
  0x23   : > { %v1381_v13 = vld [vmem:[%s1441_s26 + $0xf0] ss:$8 sps:$4 sm:$0xff]  }
  0x24   : > { %v1382_v14 = vld [vmem:[%s1441_s26 + $0x1f0] ss:$8 sps:$4 sm:$0xff]  }
  0x25   : > { %730 = vmatpush1.bf16.msra.mxu0 %v1283_v9  ;;  %1263 = vmatpush1.bf16.msra.mxu1 %v1283_v9  ;;  %v1375_v9 = vld [vmem:[%s1441_s26 + $0xe0] ss:$8 sps:$4 sm:$0xff]  }
  0x26   : > { %731 = vmatprep.subr.bf16.mxu0 %v1391_v1  ;;  %1254 = vmatprep.subr.bf16.mxu1 %v1391_v1 }
  0x29   : > { %732 = vmatpush1.bf16.msra.mxu0 %v1284_v12  ;;  %1264 = vmatpush1.bf16.msra.mxu1 %v1284_v12  ;;  %v1379_v12 = vld [vmem:[%s1441_s26 + $0x1f4] ss:$8 sps:$4 sm:$0xff]  }
  0x2a   : > { %745 = vmatprep.subr.bf16.mxu0 %v1391_v1  ;;  %1255 = vmatprep.subr.bf16.mxu1 %v1391_v1 }
  0x2d   : > { %746 = vmatpush2.bf16.msra.mxu0 %v715_v15  ;;  %1265 = vmatpush2.bf16.msra.mxu1 %v715_v15  ;;  %v1560_v15 = vld [vmem:[%s1766_s2] ss:$0 sm:$0xff] }
  0x2e   : > { %747 = vmatprep.subr.bf16.mxu0 %v1391_v1  ;;  %1256 = vmatprep.subr.bf16.mxu1 %v1391_v1  ;;  %v1363_v1 = vld [vmem:[%s1441_s26 + $0xc0] ss:$8 sps:$4 sm:$0xff]  }
  0x31   : > { %748 = vmatpush2.bf16.msra.mxu0 %v1286_v16  ;;  %1266 = vmatpush2.bf16.msra.mxu1 %v1286_v16 }
  0x34   : > { %750 = vmatmul.mubr.bf16.vlgmr.msra.gmra.mxu0 %v1287_v17  ;;  %878 = vmatmul.mubr.bf16.vlgmr.msra.gmra.mxu1 %v1290_v18 }
  0x35   : > { %1213 = vmatprep.mubr.msk.bf16.mxu0 %vm613_vm0, %v1293_v19  ;;  %1229 = vmatprep.mubr.msk.bf16.mxu1 %vm613_vm0, %v1295_v20 }
  0x3c   : > { %758 = vmatmul.mubr.bf16.gmra.mxu0 %v1297_v21  ;;  %886 = vmatmul.mubr.bf16.gmra.mxu1 %v1298_v22 }
  0x3d   : > { %1214 = vmatprep.mubr.msk.bf16.mxu0 %vm613_vm0, %v1299_v23  ;;  %1230 = vmatprep.mubr.msk.bf16.mxu1 %vm613_vm0, %v1301_v24 }
  0x44   : > { %766 = vmatmul.mubr.bf16.gmra.mxu0 %v1303_v25  ;;  %894 = vmatmul.mubr.bf16.gmra.mxu1 %v1304_v26 }
  0x45   : > { %1215 = vmatprep.mubr.msk.bf16.mxu0 %vm613_vm0, %v1305_v27  ;;  %1231 = vmatprep.mubr.msk.bf16.mxu1 %vm613_vm0, %v1307_v28 }
  0x4c   : > { %774 = vmatmul.mubr.bf16.gmra.mxu0 %v1309_v29  ;;  %902 = vmatmul.mubr.bf16.gmra.mxu1 %v1310_v30 }
  0x4d   : > { %1216 = vmatprep.mubr.msk.bf16.mxu0 %vm613_vm0, %v1311_v31  ;;  %1232 = vmatprep.mubr.msk.bf16.mxu1 %vm613_vm0, %v1313_v32 }
  0x54   : > { %782 = vmatmul.mubr.bf16.gmra.mxu0 %v1315_v33  ;;  %910 = vmatmul.mubr.bf16.gmra.mxu1 %v1316_v34 }
  0x55   : > { %1217 = vmatprep.mubr.msk.bf16.mxu0 %vm613_vm0, %v1317_v35  ;;  %1233 = vmatprep.mubr.msk.bf16.mxu1 %vm613_vm0, %v1319_v36 }
  0x5c   : > { %790 = vmatmul.mubr.bf16.gmra.mxu0 %v1321_v37  ;;  %918 = vmatmul.mubr.bf16.gmra.mxu1 %v1322_v38 }
  0x5d   : > { %1218 = vmatprep.mubr.msk.bf16.mxu0 %vm613_vm0, %v1323_v39  ;;  %1234 = vmatprep.mubr.msk.bf16.mxu1 %vm613_vm0, %v1325_v40 }
  0x64   : > { %798 = vmatmul.mubr.bf16.gmra.mxu0 %v1327_v41  ;;  %926 = vmatmul.mubr.bf16.gmra.mxu1 %v1328_v42 }
  0x65   : > { %1219 = vmatprep.mubr.msk.bf16.mxu0 %vm613_vm0, %v1329_v43  ;;  %1235 = vmatprep.mubr.msk.bf16.mxu1 %vm613_vm0, %v1331_v44 }
  0x6c   : > { %806 = vmatmul.mubr.bf16.gmra.mxu0 %v1333_v45  ;;  %934 = vmatmul.mubr.bf16.gmra.mxu1 %v1334_v46 }
  0x6d   : > { %1220 = vmatprep.mubr.msk.bf16.mxu0 %vm613_vm0, %v1335_v47  ;;  %1236 = vmatprep.mubr.msk.bf16.mxu1 %vm613_vm0, %v1337_v48 }
  0x74   : > { %814 = vmatmul.mubr.bf16.gmra.mxu0 %v1339_v49  ;;  %942 = vmatmul.mubr.bf16.gmra.mxu1 %v1340_v50 }
  0x75   : > { %1221 = vmatprep.mubr.msk.bf16.mxu0 %vm613_vm0, %v1341_v51  ;;  %1237 = vmatprep.mubr.msk.bf16.mxu1 %vm613_vm0, %v1343_v52 }
  0x7c   : > { %822 = vmatmul.mubr.bf16.gmra.mxu0 %v1345_v53  ;;  %950 = vmatmul.mubr.bf16.gmra.mxu1 %v1346_v54 }
  0x7d   : > { %1222 = vmatprep.mubr.msk.bf16.mxu0 %vm613_vm0, %v1347_v55  ;;  %1238 = vmatprep.mubr.msk.bf16.mxu1 %vm613_vm0, %v1349_v56 }
  0x84   : > { %830 = vmatmul.mubr.bf16.gmra.mxu0 %v1351_v57  ;;  %958 = vmatmul.mubr.bf16.gmra.mxu1 %v1352_v58 }
  0x85   : > { %1223 = vmatprep.mubr.msk.bf16.mxu0 %vm613_vm0, %v1353_v59  ;;  %1239 = vmatprep.mubr.msk.bf16.mxu1 %vm613_vm0, %v1355_v60 }
  0x8c   : > { %838 = vmatmul.mubr.bf16.gmra.mxu0 %v1357_v61  ;;  %966 = vmatmul.mubr.bf16.gmra.mxu1 %v1358_v62 }
  0x8d   : > { %1224 = vmatprep.mubr.msk.bf16.mxu0 %vm613_vm0, %v1359_v63  ;;  %1240 = vmatprep.mubr.msk.bf16.mxu1 %vm613_vm0, %v1361_v0 }
  0x94   : > { %846 = vmatmul.mubr.bf16.gmra.mxu0 %v1363_v1  ;;  %974 = vmatmul.mubr.bf16.gmra.mxu1 %v1364_v2 }
  0x95   : > { %1225 = vmatprep.mubr.msk.bf16.mxu0 %vm613_vm0, %v1365_v3  ;;  %1241 = vmatprep.mubr.msk.bf16.mxu1 %vm613_vm0, %v1367_v4 }
  0x9c   : > { %854 = vmatmul.mubr.bf16.gmra.mxu0 %v1369_v5  ;;  %982 = vmatmul.mubr.bf16.gmra.mxu1 %v1370_v6 }
  0x9d   : > { %1226 = vmatprep.mubr.msk.bf16.mxu0 %vm613_vm0, %v1371_v7  ;;  %1242 = vmatprep.mubr.msk.bf16.mxu1 %vm613_vm0, %v1373_v8 }
  0xa4   : > { %862 = vmatmul.mubr.bf16.gmra.mxu0 %v1375_v9  ;;  %990 = vmatmul.mubr.bf16.gmra.mxu1 %v1376_v10 }
  0xa5   : > { %1227 = vmatprep.mubr.msk.bf16.mxu0 %vm613_vm0, %v1377_v11  ;;  %1243 = vmatprep.mubr.msk.bf16.mxu1 %vm613_vm0, %v1379_v12 }
  0xac   : > { %870 = vmatmul.mubr.bf16.gmra.mxu0 %v1381_v13  ;;  %998 = vmatmul.mubr.bf16.gmra.mxu1 %v1382_v14 }
  0xf4   : > { %v751_v16 = vpop.f32.mrf.mxu0  ;;  %v879_v17 = vpop.f32.mrf.mxu1 }
  0xf5   : > { %v752_v18 = vadd.f32 %v1560_v15, %v751_v16  ;;  %v880_v19 = vadd.f32 %v1560_v15, %v879_v17 }
  0xf6   : > { %v753_v20 = vpop.f32.mrf.mxu0  ;;  %v881_v21 = vpop.f32.mrf.mxu1 }
  0xf7   : > { %1007 = vst.msk [vmem:[%s1567_s17] sm:$0xff] %vm1006_vm3, %v752_v18  ;;  %1039 = vst.msk [vmem:[%s1567_s17 + $0x100] sm:$0xff] %vm1006_vm3, %v880_v19 }
  0xf8   : > { %v754_v22 = vpop.f32.mrf.mxu0  ;;  %v882_v23 = vpop.f32.mrf.mxu1 }
  0xf9   : > { %v755_v24 = vadd.f32 %v1560_v15, %v754_v22  ;;  %v883_v25 = vadd.f32 %v1560_v15, %v882_v23 }
  0xfa   : > { %v756_v26 = vpop.f32.mrf.mxu0  ;;  %v884_v27 = vpop.f32.mrf.mxu1 }
  0xfb   : > { %1008 = vst.msk [vmem:[%s1567_s17 + $0x8] sm:$0xff] %vm1006_vm3, %v755_v24  ;;  %1040 = vst.msk [vmem:[%s1567_s17 + $0x108] sm:$0xff] %vm1006_vm3, %v883_v25 }
  0xfc   : > { %v759_v28 = vpop.f32.mrf.mxu0  ;;  %v887_v29 = vpop.f32.mrf.mxu1 }
  0xfd   : > { %v760_v30 = vadd.f32 %v1560_v15, %v759_v28  ;;  %v888_v31 = vadd.f32 %v1560_v15, %v887_v29 }
  0xfe   : > { %v761_v32 = vpop.f32.mrf.mxu0  ;;  %v889_v33 = vpop.f32.mrf.mxu1 }
  0xff   : > { %1009 = vst.msk [vmem:[%s1567_s17 + $0x10] sm:$0xff] %vm1006_vm3, %v760_v30  ;;  %1041 = vst.msk [vmem:[%s1567_s17 + $0x110] sm:$0xff] %vm1006_vm3, %v888_v31 }
 0x100   : > { %v762_v34 = vpop.f32.mrf.mxu0  ;;  %v890_v35 = vpop.f32.mrf.mxu1 }
 0x101   : > { %v763_v36 = vadd.f32 %v1560_v15, %v762_v34  ;;  %v891_v37 = vadd.f32 %v1560_v15, %v890_v35 }
 0x102   : > { %v764_v38 = vpop.f32.mrf.mxu0  ;;  %v892_v39 = vpop.f32.mrf.mxu1 }
 0x103   : > { %1010 = vst.msk [vmem:[%s1567_s17 + $0x18] sm:$0xff] %vm1006_vm3, %v763_v36  ;;  %1042 = vst.msk [vmem:[%s1567_s17 + $0x118] sm:$0xff] %vm1006_vm3, %v891_v37 }
 0x104   : > { %v767_v40 = vpop.f32.mrf.mxu0  ;;  %v895_v41 = vpop.f32.mrf.mxu1 }
 0x105   : > { %v768_v42 = vadd.f32 %v1560_v15, %v767_v40  ;;  %v896_v43 = vadd.f32 %v1560_v15, %v895_v41 }
 0x106   : > { %v769_v44 = vpop.f32.mrf.mxu0  ;;  %v897_v45 = vpop.f32.mrf.mxu1 }
 0x107   : > { %1011 = vst.msk [vmem:[%s1567_s17 + $0x20] sm:$0xff] %vm1006_vm3, %v768_v42  ;;  %1043 = vst.msk [vmem:[%s1567_s17 + $0x120] sm:$0xff] %vm1006_vm3, %v896_v43 }
 0x108   : > { %v770_v46 = vpop.f32.mrf.mxu0  ;;  %v898_v47 = vpop.f32.mrf.mxu1 }
 0x109   : > { %v771_v48 = vadd.f32 %v1560_v15, %v770_v46  ;;  %v899_v49 = vadd.f32 %v1560_v15, %v898_v47 }
 0x10a   : > { %v772_v50 = vpop.f32.mrf.mxu0  ;;  %v900_v51 = vpop.f32.mrf.mxu1 }
 0x10b   : > { %1012 = vst.msk [vmem:[%s1567_s17 + $0x28] sm:$0xff] %vm1006_vm3, %v771_v48  ;;  %1044 = vst.msk [vmem:[%s1567_s17 + $0x128] sm:$0xff] %vm1006_vm3, %v899_v49 }
 0x10c   : > { %v775_v52 = vpop.f32.mrf.mxu0  ;;  %v903_v53 = vpop.f32.mrf.mxu1 }
 0x10d   : > { %v776_v54 = vadd.f32 %v1560_v15, %v775_v52  ;;  %v904_v55 = vadd.f32 %v1560_v15, %v903_v53 }
 0x10e   : > { %v777_v56 = vpop.f32.mrf.mxu0  ;;  %v905_v57 = vpop.f32.mrf.mxu1 }
 0x10f   : > { %1013 = vst.msk [vmem:[%s1567_s17 + $0x30] sm:$0xff] %vm1006_vm3, %v776_v54  ;;  %1045 = vst.msk [vmem:[%s1567_s17 + $0x130] sm:$0xff] %vm1006_vm3, %v904_v55 }
 0x110   : > { %v778_v58 = vpop.f32.mrf.mxu0  ;;  %v906_v59 = vpop.f32.mrf.mxu1 }
 0x111   : > { %v779_v60 = vadd.f32 %v1560_v15, %v778_v58  ;;  %v907_v61 = vadd.f32 %v1560_v15, %v906_v59 }
 0x112   : > { %v780_v62 = vpop.f32.mrf.mxu0  ;;  %v908_v63 = vpop.f32.mrf.mxu1 }
 0x113   : > { %1014 = vst.msk [vmem:[%s1567_s17 + $0x38] sm:$0xff] %vm1006_vm3, %v779_v60  ;;  %1046 = vst.msk [vmem:[%s1567_s17 + $0x138] sm:$0xff] %vm1006_vm3, %v907_v61 }
 0x114   : > { %v783_v0 = vpop.f32.mrf.mxu0  ;;  %v911_v1 = vpop.f32.mrf.mxu1 }
 0x115   : > { %v784_v2 = vadd.f32 %v1560_v15, %v783_v0  ;;  %v912_v3 = vadd.f32 %v1560_v15, %v911_v1 }
 0x116   : > { %v785_v4 = vpop.f32.mrf.mxu0  ;;  %v913_v5 = vpop.f32.mrf.mxu1 }
 0x117   : > { %1015 = vst.msk [vmem:[%s1567_s17 + $0x40] sm:$0xff] %vm1006_vm3, %v784_v2  ;;  %1047 = vst.msk [vmem:[%s1567_s17 + $0x140] sm:$0xff] %vm1006_vm3, %v912_v3 }
 0x118   : > { %v786_v6 = vpop.f32.mrf.mxu0  ;;  %v914_v7 = vpop.f32.mrf.mxu1 }
 0x119   : > { %v787_v8 = vadd.f32 %v1560_v15, %v786_v6  ;;  %v915_v9 = vadd.f32 %v1560_v15, %v914_v7 }
 0x11a   : > { %v788_v10 = vpop.f32.mrf.mxu0  ;;  %v916_v11 = vpop.f32.mrf.mxu1 }
 0x11b   : > { %1016 = vst.msk [vmem:[%s1567_s17 + $0x48] sm:$0xff] %vm1006_vm3, %v787_v8  ;;  %1048 = vst.msk [vmem:[%s1567_s17 + $0x148] sm:$0xff] %vm1006_vm3, %v915_v9 }
 0x11c   : > { %v791_v12 = vpop.f32.mrf.mxu0  ;;  %v919_v13 = vpop.f32.mrf.mxu1 }
 0x11d   : > { %v792_v14 = vadd.f32 %v1560_v15, %v791_v12  ;;  %v920_v16 = vadd.f32 %v1560_v15, %v919_v13 }
 0x11e   : > { %v793_v17 = vpop.f32.mrf.mxu0  ;;  %v921_v18 = vpop.f32.mrf.mxu1 }
 0x11f   : > { %1017 = vst.msk [vmem:[%s1567_s17 + $0x50] sm:$0xff] %vm1006_vm3, %v792_v14  ;;  %1049 = vst.msk [vmem:[%s1567_s17 + $0x150] sm:$0xff] %vm1006_vm3, %v920_v16 }
 0x120   : > { %v794_v19 = vpop.f32.mrf.mxu0  ;;  %v922_v20 = vpop.f32.mrf.mxu1 }
 0x121   : > { %v795_v21 = vadd.f32 %v1560_v15, %v794_v19  ;;  %v923_v22 = vadd.f32 %v1560_v15, %v922_v20 }
 0x122   : > { %v796_v23 = vpop.f32.mrf.mxu0  ;;  %v924_v24 = vpop.f32.mrf.mxu1 }
 0x123   : > { %1018 = vst.msk [vmem:[%s1567_s17 + $0x58] sm:$0xff] %vm1006_vm3, %v795_v21  ;;  %1050 = vst.msk [vmem:[%s1567_s17 + $0x158] sm:$0xff] %vm1006_vm3, %v923_v22 }
 0x124   : > { %v799_v25 = vpop.f32.mrf.mxu0  ;;  %v927_v26 = vpop.f32.mrf.mxu1 }
 0x125   : > { %v800_v27 = vadd.f32 %v1560_v15, %v799_v25  ;;  %v928_v28 = vadd.f32 %v1560_v15, %v927_v26 }
 0x126   : > { %v801_v29 = vpop.f32.mrf.mxu0  ;;  %v929_v30 = vpop.f32.mrf.mxu1 }
 0x127   : > { %1019 = vst.msk [vmem:[%s1567_s17 + $0x60] sm:$0xff] %vm1006_vm3, %v800_v27  ;;  %1051 = vst.msk [vmem:[%s1567_s17 + $0x160] sm:$0xff] %vm1006_vm3, %v928_v28 }
 0x128   : > { %v802_v31 = vpop.f32.mrf.mxu0  ;;  %v930_v32 = vpop.f32.mrf.mxu1 }
 0x129   : > { %v803_v33 = vadd.f32 %v1560_v15, %v802_v31  ;;  %v931_v34 = vadd.f32 %v1560_v15, %v930_v32 }
 0x12a   : > { %v804_v35 = vpop.f32.mrf.mxu0  ;;  %v932_v36 = vpop.f32.mrf.mxu1 }
 0x12b   : > { %1020 = vst.msk [vmem:[%s1567_s17 + $0x68] sm:$0xff] %vm1006_vm3, %v803_v33  ;;  %1052 = vst.msk [vmem:[%s1567_s17 + $0x168] sm:$0xff] %vm1006_vm3, %v931_v34 }
 0x12c   : > { %v807_v37 = vpop.f32.mrf.mxu0  ;;  %v935_v38 = vpop.f32.mrf.mxu1 }
 0x12d   : > { %v808_v39 = vadd.f32 %v1560_v15, %v807_v37  ;;  %v936_v40 = vadd.f32 %v1560_v15, %v935_v38 }
 0x12e   : > { %v809_v41 = vpop.f32.mrf.mxu0  ;;  %v937_v42 = vpop.f32.mrf.mxu1 }
 0x12f   : > { %1021 = vst.msk [vmem:[%s1567_s17 + $0x70] sm:$0xff] %vm1006_vm3, %v808_v39  ;;  %1053 = vst.msk [vmem:[%s1567_s17 + $0x170] sm:$0xff] %vm1006_vm3, %v936_v40 }
 0x130   : > { %v810_v43 = vpop.f32.mrf.mxu0  ;;  %v938_v44 = vpop.f32.mrf.mxu1 }
 0x131   : > { %v811_v45 = vadd.f32 %v1560_v15, %v810_v43  ;;  %v939_v46 = vadd.f32 %v1560_v15, %v938_v44 }
 0x132   : > { %v812_v47 = vpop.f32.mrf.mxu0  ;;  %v940_v48 = vpop.f32.mrf.mxu1 }
 0x133   : > { %1022 = vst.msk [vmem:[%s1567_s17 + $0x78] sm:$0xff] %vm1006_vm3, %v811_v45  ;;  %1054 = vst.msk [vmem:[%s1567_s17 + $0x178] sm:$0xff] %vm1006_vm3, %v939_v46 }
 0x134   : > { %v815_v49 = vpop.f32.mrf.mxu0  ;;  %v943_v50 = vpop.f32.mrf.mxu1 }
 0x135   : > { %v816_v51 = vadd.f32 %v1560_v15, %v815_v49  ;;  %v944_v52 = vadd.f32 %v1560_v15, %v943_v50 }
 0x136   : > { %v817_v53 = vpop.f32.mrf.mxu0  ;;  %v945_v54 = vpop.f32.mrf.mxu1 }
 0x137   : > { %1023 = vst.msk [vmem:[%s1567_s17 + $0x80] sm:$0xff] %vm1006_vm3, %v816_v51  ;;  %1055 = vst.msk [vmem:[%s1567_s17 + $0x180] sm:$0xff] %vm1006_vm3, %v944_v52 }
 0x138   : > { %v818_v55 = vpop.f32.mrf.mxu0  ;;  %v946_v56 = vpop.f32.mrf.mxu1 }
 0x139   : > { %v819_v57 = vadd.f32 %v1560_v15, %v818_v55  ;;  %v947_v58 = vadd.f32 %v1560_v15, %v946_v56 }
 0x13a   : > { %v820_v59 = vpop.f32.mrf.mxu0  ;;  %v948_v60 = vpop.f32.mrf.mxu1 }
 0x13b   : > { %1024 = vst.msk [vmem:[%s1567_s17 + $0x88] sm:$0xff] %vm1006_vm3, %v819_v57  ;;  %1056 = vst.msk [vmem:[%s1567_s17 + $0x188] sm:$0xff] %vm1006_vm3, %v947_v58 }
 0x13c   : > { %v823_v61 = vpop.f32.mrf.mxu0  ;;  %v951_v62 = vpop.f32.mrf.mxu1 }
 0x13d   : > { %v824_v63 = vadd.f32 %v1560_v15, %v823_v61  ;;  %v952_v0 = vadd.f32 %v1560_v15, %v951_v62 }
 0x13e   : > { %v825_v1 = vpop.f32.mrf.mxu0  ;;  %v953_v2 = vpop.f32.mrf.mxu1 }
 0x13f   : > { %1025 = vst.msk [vmem:[%s1567_s17 + $0x90] sm:$0xff] %vm1006_vm3, %v824_v63  ;;  %1057 = vst.msk [vmem:[%s1567_s17 + $0x190] sm:$0xff] %vm1006_vm3, %v952_v0 }
 0x140   : > { %v826_v3 = vpop.f32.mrf.mxu0  ;;  %v954_v4 = vpop.f32.mrf.mxu1 }
 0x141   : > { %v827_v5 = vadd.f32 %v1560_v15, %v826_v3  ;;  %v955_v6 = vadd.f32 %v1560_v15, %v954_v4 }
 0x142   : > { %v828_v7 = vpop.f32.mrf.mxu0  ;;  %v956_v8 = vpop.f32.mrf.mxu1 }
 0x143   : > { %1026 = vst.msk [vmem:[%s1567_s17 + $0x98] sm:$0xff] %vm1006_vm3, %v827_v5  ;;  %1058 = vst.msk [vmem:[%s1567_s17 + $0x198] sm:$0xff] %vm1006_vm3, %v955_v6 }
 0x144   : > { %v831_v9 = vpop.f32.mrf.mxu0  ;;  %v959_v10 = vpop.f32.mrf.mxu1 }
 0x145   : > { %v832_v11 = vadd.f32 %v1560_v15, %v831_v9  ;;  %v960_v12 = vadd.f32 %v1560_v15, %v959_v10 }
 0x146   : > { %v833_v13 = vpop.f32.mrf.mxu0  ;;  %v961_v14 = vpop.f32.mrf.mxu1 }
 0x147   : > { %1027 = vst.msk [vmem:[%s1567_s17 + $0xa0] sm:$0xff] %vm1006_vm3, %v832_v11  ;;  %1059 = vst.msk [vmem:[%s1567_s17 + $0x1a0] sm:$0xff] %vm1006_vm3, %v960_v12 }
 0x148   : > { %v834_v16 = vpop.f32.mrf.mxu0  ;;  %v962_v17 = vpop.f32.mrf.mxu1 }
 0x149   : > { %v835_v18 = vadd.f32 %v1560_v15, %v834_v16  ;;  %v963_v19 = vadd.f32 %v1560_v15, %v962_v17 }
 0x14a   : > { %v836_v20 = vpop.f32.mrf.mxu0  ;;  %v964_v21 = vpop.f32.mrf.mxu1 }
 0x14b   : > { %1028 = vst.msk [vmem:[%s1567_s17 + $0xa8] sm:$0xff] %vm1006_vm3, %v835_v18  ;;  %1060 = vst.msk [vmem:[%s1567_s17 + $0x1a8] sm:$0xff] %vm1006_vm3, %v963_v19 }
 0x14c   : > { %v839_v22 = vpop.f32.mrf.mxu0  ;;  %v967_v23 = vpop.f32.mrf.mxu1 }
 0x14d   : > { %v840_v24 = vadd.f32 %v1560_v15, %v839_v22  ;;  %v968_v25 = vadd.f32 %v1560_v15, %v967_v23 }
 0x14e   : > { %v841_v26 = vpop.f32.mrf.mxu0  ;;  %v969_v27 = vpop.f32.mrf.mxu1 }
 0x14f   : > { %1029 = vst.msk [vmem:[%s1567_s17 + $0xb0] sm:$0xff] %vm1006_vm3, %v840_v24  ;;  %1061 = vst.msk [vmem:[%s1567_s17 + $0x1b0] sm:$0xff] %vm1006_vm3, %v968_v25 }
 0x150   : > { %v842_v28 = vpop.f32.mrf.mxu0  ;;  %v970_v29 = vpop.f32.mrf.mxu1 }
 0x151   : > { %v843_v30 = vadd.f32 %v1560_v15, %v842_v28  ;;  %v971_v31 = vadd.f32 %v1560_v15, %v970_v29 }
 0x152   : > { %v844_v32 = vpop.f32.mrf.mxu0  ;;  %v972_v33 = vpop.f32.mrf.mxu1 }
 0x153   : > { %1030 = vst.msk [vmem:[%s1567_s17 + $0xb8] sm:$0xff] %vm1006_vm3, %v843_v30  ;;  %1062 = vst.msk [vmem:[%s1567_s17 + $0x1b8] sm:$0xff] %vm1006_vm3, %v971_v31 }
 0x154   : > { %v847_v34 = vpop.f32.mrf.mxu0  ;;  %v975_v35 = vpop.f32.mrf.mxu1 }
 0x155   : > { %v848_v36 = vadd.f32 %v1560_v15, %v847_v34  ;;  %v976_v37 = vadd.f32 %v1560_v15, %v975_v35 }
 0x156   : > { %v849_v38 = vpop.f32.mrf.mxu0  ;;  %v977_v39 = vpop.f32.mrf.mxu1 }
 0x157   : > { %1031 = vst.msk [vmem:[%s1567_s17 + $0xc0] sm:$0xff] %vm1006_vm3, %v848_v36  ;;  %1063 = vst.msk [vmem:[%s1567_s17 + $0x1c0] sm:$0xff] %vm1006_vm3, %v976_v37 }
 0x158   : > { %v850_v40 = vpop.f32.mrf.mxu0  ;;  %v978_v41 = vpop.f32.mrf.mxu1 }
 0x159   : > { %v851_v42 = vadd.f32 %v1560_v15, %v850_v40  ;;  %v979_v43 = vadd.f32 %v1560_v15, %v978_v41 }
 0x15a   : > { %v852_v44 = vpop.f32.mrf.mxu0  ;;  %v980_v45 = vpop.f32.mrf.mxu1 }
 0x15b   : > { %1032 = vst.msk [vmem:[%s1567_s17 + $0xc8] sm:$0xff] %vm1006_vm3, %v851_v42  ;;  %1064 = vst.msk [vmem:[%s1567_s17 + $0x1c8] sm:$0xff] %vm1006_vm3, %v979_v43 }
 0x15c   : > { %v855_v46 = vpop.f32.mrf.mxu0  ;;  %v983_v47 = vpop.f32.mrf.mxu1 }
 0x15d   : > { %v856_v48 = vadd.f32 %v1560_v15, %v855_v46  ;;  %v984_v49 = vadd.f32 %v1560_v15, %v983_v47 }
 0x15e   : > { %v857_v50 = vpop.f32.mrf.mxu0  ;;  %v985_v51 = vpop.f32.mrf.mxu1 }
 0x15f   : > { %1033 = vst.msk [vmem:[%s1567_s17 + $0xd0] sm:$0xff] %vm1006_vm3, %v856_v48  ;;  %1065 = vst.msk [vmem:[%s1567_s17 + $0x1d0] sm:$0xff] %vm1006_vm3, %v984_v49 }
 0x160   : > { %v858_v52 = vpop.f32.mrf.mxu0  ;;  %v986_v53 = vpop.f32.mrf.mxu1 }
 0x161   : > { %v859_v54 = vadd.f32 %v1560_v15, %v858_v52  ;;  %v987_v55 = vadd.f32 %v1560_v15, %v986_v53 }
 0x162   : > { %v860_v56 = vpop.f32.mrf.mxu0  ;;  %v988_v57 = vpop.f32.mrf.mxu1 }
 0x163   : > { %1034 = vst.msk [vmem:[%s1567_s17 + $0xd8] sm:$0xff] %vm1006_vm3, %v859_v54  ;;  %1066 = vst.msk [vmem:[%s1567_s17 + $0x1d8] sm:$0xff] %vm1006_vm3, %v987_v55 }
 0x164   : > { %v863_v58 = vpop.f32.mrf.mxu0  ;;  %v991_v59 = vpop.f32.mrf.mxu1 }
 0x165   : > { %v864_v60 = vadd.f32 %v1560_v15, %v863_v58  ;;  %v992_v61 = vadd.f32 %v1560_v15, %v991_v59 }
 0x166   : > { %v865_v62 = vpop.f32.mrf.mxu0  ;;  %v993_v63 = vpop.f32.mrf.mxu1 }
 0x167   : > { %1035 = vst.msk [vmem:[%s1567_s17 + $0xe0] sm:$0xff] %vm1006_vm3, %v864_v60  ;;  %1067 = vst.msk [vmem:[%s1567_s17 + $0x1e0] sm:$0xff] %vm1006_vm3, %v992_v61 }
 0x168   : > { %v866_v0 = vpop.f32.mrf.mxu0  ;;  %v994_v1 = vpop.f32.mrf.mxu1 }
 0x169   : > { %v867_v2 = vadd.f32 %v1560_v15, %v866_v0  ;;  %v995_v3 = vadd.f32 %v1560_v15, %v994_v1 }
 0x16a   : > { %v868_v4 = vpop.f32.mrf.mxu0  ;;  %v996_v5 = vpop.f32.mrf.mxu1 }
 0x16b   : > { %1036 = vst.msk [vmem:[%s1567_s17 + $0xe8] sm:$0xff] %vm1006_vm3, %v867_v2  ;;  %1068 = vst.msk [vmem:[%s1567_s17 + $0x1e8] sm:$0xff] %vm1006_vm3, %v995_v3 }
 0x16c   : > { %v871_v6 = vpop.f32.mrf.mxu0  ;;  %v999_v7 = vpop.f32.mrf.mxu1 }
 0x16d   : > { %v872_v8 = vadd.f32 %v1560_v15, %v871_v6  ;;  %v1000_v9 = vadd.f32 %v1560_v15, %v999_v7 }
 0x16e   : > { %v873_v10 = vpop.f32.mrf.mxu0  ;;  %v1001_v11 = vpop.f32.mrf.mxu1 }
 0x16f   : > { %1037 = vst.msk [vmem:[%s1567_s17 + $0xf0] sm:$0xff] %vm1006_vm3, %v872_v8  ;;  %1069 = vst.msk [vmem:[%s1567_s17 + $0x1f0] sm:$0xff] %vm1006_vm3, %v1000_v9 }
 0x170   : > { %v874_v12 = vpop.f32.mrf.mxu0  ;;  %v1002_v13 = vpop.f32.mrf.mxu1 }
 0x171   : > { %v875_v14 = vadd.f32 %v1560_v15, %v874_v12  ;;  %v1003_v16 = vadd.f32 %v1560_v15, %v1002_v13 }
 0x172   : > { %v876_v17 = vpop.f32.mrf.mxu0  ;;  %v1004_v18 = vpop.f32.mrf.mxu1 }
 0x173   : > { %1038 = vst.msk [vmem:[%s1567_s17 + $0xf8] sm:$0xff] %vm1006_vm3, %v875_v14  ;;  %1070 = vst.msk [vmem:[%s1567_s17 + $0x1f8] sm:$0xff] %vm1006_vm3, %v1003_v16 }
 0x174 PF: > { %s13_s12 = sadd.s32 1, %s1389_s12  }
 0x175   : > { %p10_p4 = scmp.ge.s32.totalorder %s13_s12, 6  }
 0x177   :  { %12 = sbr.rel (!%p10_p4) target bundleno = 1 (0x1), region = 62 }

// kernel: urvos_forward.42
= control target key start
LH: loop header
LB: loop body
LE: loop exit
PB: predicated region body
PF: predicated region fallthrough
CT: control target
= control target key end

     0   :  { %vm363_vm0 = vcmask 1041408   ;;  %vm266_vm1 = vcmask 293888   ;;  %vm720_vm2 = vcmask 130048   ;;  %s1487_s1 = inlined_call_operand.vmem [shape: bf16[36,16], index: 1, kind: input, shape index: {}]   ;;  %s1488_s0 = inlined_call_operand.vmem [shape: bf16[512,36], index: 0, kind: input, shape index: {}]   ;;  %s1489_s2 = inlined_call_operand.vmem [shape: f32[1,16], index: 2, kind: input, shape index: {}]   ;;  %s1490_s3 = inlined_call_operand.vmem [shape: f32[512,16], index: 3, kind: output, shape index: {}]  }
   0x1   :  { %v970_v0 = vld [vmem:[%s1487_s1 + $0x10] ss:$0 sps:$4 sm:$0x33]   ;;  %v971_v1 = vld [vmem:[%s1487_s1 + $0x8] sm:$0xff]   ;;  %v972_v3 = vld [vmem:[%s1487_s1] sm:$0xff]  }
   0x2   :  { %968 = vmatprep.subr.msk.bf16.mxu0 %vm363_vm0, %v970_v0  ;;  %969 = vmatprep.subr.msk.bf16.mxu1 %vm363_vm0, %v970_v0  ;;  %v365_v2 = vsel %vm363_vm0, %v970_v0, 0  ;;  %v973_v4 = vld [vmem:[%s1488_s0] sm:$0xff]   ;;  %v975_v6 = vld [vmem:[%s1488_s0 + $0x8] sm:$0xff]   ;;  %v977_v8 = vld [vmem:[%s1488_s0 + $0x10] sm:$0xff]  }
   0x3   :  { %893 = vmatpush3.bf16.msra.mxu0 %v365_v2  ;;  %965 = vmatpush3.bf16.msra.mxu1 %v365_v2  ;;  %v974_v5 = vld [vmem:[%s1488_s0 + $0x80] sm:$0xff]   ;;  %v976_v7 = vld [vmem:[%s1488_s0 + $0x88] sm:$0xff]   ;;  %v978_v9 = vld [vmem:[%s1488_s0 + $0x90] sm:$0xff]  }
   0x4   :  { %894 = vmatprep.subr.bf16.mxu0 %v971_v1  ;;  %963 = vmatprep.subr.bf16.mxu1 %v971_v1  ;;  %v979_v10 = vld [vmem:[%s1488_s0 + $0x18] sm:$0xff]   ;;  %v981_v12 = vld [vmem:[%s1488_s0 + $0x20] sm:$0xff]   ;;  %v983_v14 = vld [vmem:[%s1488_s0 + $0x28] sm:$0xff]  }
   0x5   :  { %898 = vmatprep.mubr.msk.bf16.mxu0 %vm266_vm1, %v973_v4  ;;  %930 = vmatprep.mubr.msk.bf16.mxu1 %vm266_vm1, %v974_v5  ;;  %v980_v11 = vld [vmem:[%s1488_s0 + $0x98] sm:$0xff]   ;;  %v982_v13 = vld [vmem:[%s1488_s0 + $0xa0] sm:$0xff]   ;;  %v984_v15 = vld [vmem:[%s1488_s0 + $0xa8] sm:$0xff]  }
   0x6   :  { %v985_v16 = vld [vmem:[%s1488_s0 + $0x30] sm:$0xff]   ;;  %v987_v18 = vld [vmem:[%s1488_s0 + $0x38] sm:$0xff]   ;;  %v989_v20 = vld [vmem:[%s1488_s0 + $0x40] sm:$0xff]  }
   0x7   :  { %895 = vmatpush3.bf16.msra.mxu0 %v971_v1  ;;  %966 = vmatpush3.bf16.msra.mxu1 %v971_v1  ;;  %v986_v17 = vld [vmem:[%s1488_s0 + $0xb0] sm:$0xff]   ;;  %v988_v19 = vld [vmem:[%s1488_s0 + $0xb8] sm:$0xff]   ;;  %v990_v21 = vld [vmem:[%s1488_s0 + $0xc0] sm:$0xff]  }
   0x8   :  { %896 = vmatprep.subr.bf16.mxu0 %v972_v3  ;;  %964 = vmatprep.subr.bf16.mxu1 %v972_v3  ;;  %v991_v22 = vld [vmem:[%s1488_s0 + $0x48] sm:$0xff]   ;;  %v993_v24 = vld [vmem:[%s1488_s0 + $0x50] sm:$0xff]   ;;  %v995_v26 = vld [vmem:[%s1488_s0 + $0x58] sm:$0xff]  }
   0x9   :  { %v992_v23 = vld [vmem:[%s1488_s0 + $0xc8] sm:$0xff]   ;;  %v994_v25 = vld [vmem:[%s1488_s0 + $0xd0] sm:$0xff]   ;;  %v996_v27 = vld [vmem:[%s1488_s0 + $0xd8] sm:$0xff]  }
   0xa   :  { %v997_v28 = vld [vmem:[%s1488_s0 + $0x60] sm:$0xff]   ;;  %v999_v30 = vld [vmem:[%s1488_s0 + $0x68] sm:$0xff]   ;;  %v1001_v32 = vld [vmem:[%s1488_s0 + $0x70] sm:$0xff]  }
   0xb   :  { %897 = vmatpush3.bf16.msra.mxu0 %v972_v3  ;;  %967 = vmatpush3.bf16.msra.mxu1 %v972_v3  ;;  %v998_v29 = vld [vmem:[%s1488_s0 + $0xe0] sm:$0xff]   ;;  %v1000_v31 = vld [vmem:[%s1488_s0 + $0xe8] sm:$0xff]   ;;  %v1002_v33 = vld [vmem:[%s1488_s0 + $0xf0] sm:$0xff]  }
   0xc   :  { %v1003_v34 = vld [vmem:[%s1488_s0 + $0x78] sm:$0xff]   ;;  %v1165_v36 = vld [vmem:[%s1489_s2] ss:$0 sm:$0xff] }
   0xd   :  { %v1004_v35 = vld [vmem:[%s1488_s0 + $0xf8] sm:$0xff]  }
   0xe   :  { %899 = vmatmul.mubr.msk.bf16.vlgmr.msra.gmra.mxu0 %vm266_vm1, %v975_v6  ;;  %931 = vmatmul.mubr.msk.bf16.vlgmr.msra.gmra.mxu1 %vm266_vm1, %v976_v7 }
   0xf   :  { %902 = vmatprep.mubr.msk.bf16.mxu0 %vm266_vm1, %v977_v8  ;;  %934 = vmatprep.mubr.msk.bf16.mxu1 %vm266_vm1, %v978_v9 }
  0x16   :  { %903 = vmatmul.mubr.msk.bf16.gmra.mxu0 %vm266_vm1, %v979_v10  ;;  %935 = vmatmul.mubr.msk.bf16.gmra.mxu1 %vm266_vm1, %v980_v11 }
  0x17   :  { %906 = vmatprep.mubr.msk.bf16.mxu0 %vm266_vm1, %v981_v12  ;;  %938 = vmatprep.mubr.msk.bf16.mxu1 %vm266_vm1, %v982_v13 }
  0x1e   :  { %907 = vmatmul.mubr.msk.bf16.gmra.mxu0 %vm266_vm1, %v983_v14  ;;  %939 = vmatmul.mubr.msk.bf16.gmra.mxu1 %vm266_vm1, %v984_v15 }
  0x1f   :  { %910 = vmatprep.mubr.msk.bf16.mxu0 %vm266_vm1, %v985_v16  ;;  %942 = vmatprep.mubr.msk.bf16.mxu1 %vm266_vm1, %v986_v17 }
  0x26   :  { %911 = vmatmul.mubr.msk.bf16.gmra.mxu0 %vm266_vm1, %v987_v18  ;;  %943 = vmatmul.mubr.msk.bf16.gmra.mxu1 %vm266_vm1, %v988_v19 }
  0x27   :  { %914 = vmatprep.mubr.msk.bf16.mxu0 %vm266_vm1, %v989_v20  ;;  %946 = vmatprep.mubr.msk.bf16.mxu1 %vm266_vm1, %v990_v21 }
  0x2e   :  { %915 = vmatmul.mubr.msk.bf16.gmra.mxu0 %vm266_vm1, %v991_v22  ;;  %947 = vmatmul.mubr.msk.bf16.gmra.mxu1 %vm266_vm1, %v992_v23 }
  0x2f   :  { %918 = vmatprep.mubr.msk.bf16.mxu0 %vm266_vm1, %v993_v24  ;;  %950 = vmatprep.mubr.msk.bf16.mxu1 %vm266_vm1, %v994_v25 }
  0x36   :  { %919 = vmatmul.mubr.msk.bf16.gmra.mxu0 %vm266_vm1, %v995_v26  ;;  %951 = vmatmul.mubr.msk.bf16.gmra.mxu1 %vm266_vm1, %v996_v27 }
  0x37   :  { %922 = vmatprep.mubr.msk.bf16.mxu0 %vm266_vm1, %v997_v28  ;;  %954 = vmatprep.mubr.msk.bf16.mxu1 %vm266_vm1, %v998_v29 }
  0x3e   :  { %923 = vmatmul.mubr.msk.bf16.gmra.mxu0 %vm266_vm1, %v999_v30  ;;  %955 = vmatmul.mubr.msk.bf16.gmra.mxu1 %vm266_vm1, %v1000_v31 }
  0x3f   :  { %926 = vmatprep.mubr.msk.bf16.mxu0 %vm266_vm1, %v1001_v32  ;;  %958 = vmatprep.mubr.msk.bf16.mxu1 %vm266_vm1, %v1002_v33 }
  0x46   :  { %927 = vmatmul.mubr.msk.bf16.gmra.mxu0 %vm266_vm1, %v1003_v34  ;;  %959 = vmatmul.mubr.msk.bf16.gmra.mxu1 %vm266_vm1, %v1004_v35 }
  0xce   :  { %v900_v37 = vpop.f32.mrf.mxu0  ;;  %v932_v38 = vpop.f32.mrf.mxu1 }
  0xcf   :  { %v410_v39 = vadd.f32 %v900_v37, %v1165_v36  ;;  %v538_v40 = vadd.f32 %v932_v38, %v1165_v36 }
  0xd0   :  { %v401_v41 = vpop.f32.mrf.mxu0  ;;  %v529_v42 = vpop.f32.mrf.mxu1 }
  0xd1   :  { %v658_v43 = vmax.f32 %v410_v39, 0.0  ;;  %v690_v44 = vmax.f32 %v538_v40, 0.0  ;;  %v402_v45 = vadd.f32 %v1165_v36, %v401_v41  ;;  %v530_v46 = vadd.f32 %v1165_v36, %v529_v42 }
  0xd2   :  { %v901_v47 = vpop.f32.mrf.mxu0  ;;  %v933_v48 = vpop.f32.mrf.mxu1 }
  0xd3   :  { %723 = vst.msk [vmem:[%s1490_s3 + $0x10] sm:$0xff] %vm720_vm2, %v658_v43  ;;  %755 = vst.msk [vmem:[%s1490_s3 + $0x110] sm:$0xff] %vm720_vm2, %v690_v44  ;;  %v656_v49 = vmax.f32 %v402_v45, 0.0  ;;  %v688_v50 = vmax.f32 %v530_v46, 0.0  ;;  %v413_v51 = vadd.f32 %v901_v47, %v1165_v36  ;;  %v541_v52 = vadd.f32 %v933_v48, %v1165_v36 }
  0xd4   :  { %v404_v53 = vpop.f32.mrf.mxu0  ;;  %v532_v54 = vpop.f32.mrf.mxu1 }
  0xd5   :  { %721 = vst.msk [vmem:[%s1490_s3] sm:$0xff] %vm720_vm2, %v656_v49  ;;  %753 = vst.msk [vmem:[%s1490_s3 + $0x100] sm:$0xff] %vm720_vm2, %v688_v50  ;;  %v659_v55 = vmax.f32 %v413_v51, 0.0  ;;  %v691_v56 = vmax.f32 %v541_v52, 0.0  ;;  %v405_v57 = vadd.f32 %v1165_v36, %v404_v53  ;;  %v533_v58 = vadd.f32 %v1165_v36, %v532_v54 }
  0xd6   :  { %v904_v59 = vpop.f32.mrf.mxu0  ;;  %v936_v60 = vpop.f32.mrf.mxu1 }
  0xd7   :  { %724 = vst.msk [vmem:[%s1490_s3 + $0x18] sm:$0xff] %vm720_vm2, %v659_v55  ;;  %756 = vst.msk [vmem:[%s1490_s3 + $0x118] sm:$0xff] %vm720_vm2, %v691_v56  ;;  %v657_v61 = vmax.f32 %v405_v57, 0.0  ;;  %v689_v62 = vmax.f32 %v533_v58, 0.0  ;;  %v426_v63 = vadd.f32 %v904_v59, %v1165_v36  ;;  %v554_v0 = vadd.f32 %v936_v60, %v1165_v36 }
  0xd8   :  { %v417_v1 = vpop.f32.mrf.mxu0  ;;  %v545_v2 = vpop.f32.mrf.mxu1 }
  0xd9   :  { %722 = vst.msk [vmem:[%s1490_s3 + $0x8] sm:$0xff] %vm720_vm2, %v657_v61  ;;  %754 = vst.msk [vmem:[%s1490_s3 + $0x108] sm:$0xff] %vm720_vm2, %v689_v62  ;;  %v662_v3 = vmax.f32 %v426_v63, 0.0  ;;  %v694_v4 = vmax.f32 %v554_v0, 0.0  ;;  %v418_v5 = vadd.f32 %v1165_v36, %v417_v1  ;;  %v546_v6 = vadd.f32 %v1165_v36, %v545_v2 }
  0xda   :  { %v905_v7 = vpop.f32.mrf.mxu0  ;;  %v937_v8 = vpop.f32.mrf.mxu1 }
  0xdb   :  { %727 = vst.msk [vmem:[%s1490_s3 + $0x30] sm:$0xff] %vm720_vm2, %v662_v3  ;;  %759 = vst.msk [vmem:[%s1490_s3 + $0x130] sm:$0xff] %vm720_vm2, %v694_v4  ;;  %v660_v9 = vmax.f32 %v418_v5, 0.0  ;;  %v692_v10 = vmax.f32 %v546_v6, 0.0  ;;  %v429_v11 = vadd.f32 %v905_v7, %v1165_v36  ;;  %v557_v12 = vadd.f32 %v937_v8, %v1165_v36 }
  0xdc   :  { %v420_v13 = vpop.f32.mrf.mxu0  ;;  %v548_v14 = vpop.f32.mrf.mxu1 }
  0xdd   :  { %725 = vst.msk [vmem:[%s1490_s3 + $0x20] sm:$0xff] %vm720_vm2, %v660_v9  ;;  %757 = vst.msk [vmem:[%s1490_s3 + $0x120] sm:$0xff] %vm720_vm2, %v692_v10  ;;  %v663_v15 = vmax.f32 %v429_v11, 0.0  ;;  %v695_v16 = vmax.f32 %v557_v12, 0.0  ;;  %v421_v17 = vadd.f32 %v1165_v36, %v420_v13  ;;  %v549_v18 = vadd.f32 %v1165_v36, %v548_v14 }
  0xde   :  { %v908_v19 = vpop.f32.mrf.mxu0  ;;  %v940_v20 = vpop.f32.mrf.mxu1 }
  0xdf   :  { %728 = vst.msk [vmem:[%s1490_s3 + $0x38] sm:$0xff] %vm720_vm2, %v663_v15  ;;  %760 = vst.msk [vmem:[%s1490_s3 + $0x138] sm:$0xff] %vm720_vm2, %v695_v16  ;;  %v661_v21 = vmax.f32 %v421_v17, 0.0  ;;  %v693_v22 = vmax.f32 %v549_v18, 0.0  ;;  %v442_v23 = vadd.f32 %v908_v19, %v1165_v36  ;;  %v570_v24 = vadd.f32 %v940_v20, %v1165_v36 }
  0xe0   :  { %v433_v25 = vpop.f32.mrf.mxu0  ;;  %v561_v26 = vpop.f32.mrf.mxu1 }
  0xe1   :  { %726 = vst.msk [vmem:[%s1490_s3 + $0x28] sm:$0xff] %vm720_vm2, %v661_v21  ;;  %758 = vst.msk [vmem:[%s1490_s3 + $0x128] sm:$0xff] %vm720_vm2, %v693_v22  ;;  %v666_v27 = vmax.f32 %v442_v23, 0.0  ;;  %v698_v28 = vmax.f32 %v570_v24, 0.0  ;;  %v434_v29 = vadd.f32 %v1165_v36, %v433_v25  ;;  %v562_v30 = vadd.f32 %v1165_v36, %v561_v26 }
  0xe2   :  { %v909_v31 = vpop.f32.mrf.mxu0  ;;  %v941_v32 = vpop.f32.mrf.mxu1 }
  0xe3   :  { %731 = vst.msk [vmem:[%s1490_s3 + $0x50] sm:$0xff] %vm720_vm2, %v666_v27  ;;  %763 = vst.msk [vmem:[%s1490_s3 + $0x150] sm:$0xff] %vm720_vm2, %v698_v28  ;;  %v664_v33 = vmax.f32 %v434_v29, 0.0  ;;  %v696_v34 = vmax.f32 %v562_v30, 0.0  ;;  %v445_v35 = vadd.f32 %v909_v31, %v1165_v36  ;;  %v573_v37 = vadd.f32 %v941_v32, %v1165_v36 }
  0xe4   :  { %v436_v38 = vpop.f32.mrf.mxu0  ;;  %v564_v39 = vpop.f32.mrf.mxu1 }
  0xe5   :  { %729 = vst.msk [vmem:[%s1490_s3 + $0x40] sm:$0xff] %vm720_vm2, %v664_v33  ;;  %761 = vst.msk [vmem:[%s1490_s3 + $0x140] sm:$0xff] %vm720_vm2, %v696_v34  ;;  %v667_v40 = vmax.f32 %v445_v35, 0.0  ;;  %v699_v41 = vmax.f32 %v573_v37, 0.0  ;;  %v437_v42 = vadd.f32 %v1165_v36, %v436_v38  ;;  %v565_v43 = vadd.f32 %v1165_v36, %v564_v39 }
  0xe6   :  { %v912_v44 = vpop.f32.mrf.mxu0  ;;  %v944_v45 = vpop.f32.mrf.mxu1 }
  0xe7   :  { %732 = vst.msk [vmem:[%s1490_s3 + $0x58] sm:$0xff] %vm720_vm2, %v667_v40  ;;  %764 = vst.msk [vmem:[%s1490_s3 + $0x158] sm:$0xff] %vm720_vm2, %v699_v41  ;;  %v665_v46 = vmax.f32 %v437_v42, 0.0  ;;  %v697_v47 = vmax.f32 %v565_v43, 0.0  ;;  %v458_v48 = vadd.f32 %v912_v44, %v1165_v36  ;;  %v586_v49 = vadd.f32 %v944_v45, %v1165_v36 }
  0xe8   :  { %v449_v50 = vpop.f32.mrf.mxu0  ;;  %v577_v51 = vpop.f32.mrf.mxu1 }
  0xe9   :  { %730 = vst.msk [vmem:[%s1490_s3 + $0x48] sm:$0xff] %vm720_vm2, %v665_v46  ;;  %762 = vst.msk [vmem:[%s1490_s3 + $0x148] sm:$0xff] %vm720_vm2, %v697_v47  ;;  %v670_v52 = vmax.f32 %v458_v48, 0.0  ;;  %v702_v53 = vmax.f32 %v586_v49, 0.0  ;;  %v450_v54 = vadd.f32 %v1165_v36, %v449_v50  ;;  %v578_v55 = vadd.f32 %v1165_v36, %v577_v51 }
  0xea   :  { %v913_v56 = vpop.f32.mrf.mxu0  ;;  %v945_v57 = vpop.f32.mrf.mxu1 }
  0xeb   :  { %735 = vst.msk [vmem:[%s1490_s3 + $0x70] sm:$0xff] %vm720_vm2, %v670_v52  ;;  %767 = vst.msk [vmem:[%s1490_s3 + $0x170] sm:$0xff] %vm720_vm2, %v702_v53  ;;  %v668_v58 = vmax.f32 %v450_v54, 0.0  ;;  %v700_v59 = vmax.f32 %v578_v55, 0.0  ;;  %v461_v60 = vadd.f32 %v913_v56, %v1165_v36  ;;  %v589_v61 = vadd.f32 %v945_v57, %v1165_v36 }
  0xec   :  { %v452_v62 = vpop.f32.mrf.mxu0  ;;  %v580_v63 = vpop.f32.mrf.mxu1 }
  0xed   :  { %733 = vst.msk [vmem:[%s1490_s3 + $0x60] sm:$0xff] %vm720_vm2, %v668_v58  ;;  %765 = vst.msk [vmem:[%s1490_s3 + $0x160] sm:$0xff] %vm720_vm2, %v700_v59  ;;  %v671_v0 = vmax.f32 %v461_v60, 0.0  ;;  %v703_v1 = vmax.f32 %v589_v61, 0.0  ;;  %v453_v2 = vadd.f32 %v1165_v36, %v452_v62  ;;  %v581_v3 = vadd.f32 %v1165_v36, %v580_v63 }
  0xee   :  { %v916_v4 = vpop.f32.mrf.mxu0  ;;  %v948_v5 = vpop.f32.mrf.mxu1 }
  0xef   :  { %736 = vst.msk [vmem:[%s1490_s3 + $0x78] sm:$0xff] %vm720_vm2, %v671_v0  ;;  %768 = vst.msk [vmem:[%s1490_s3 + $0x178] sm:$0xff] %vm720_vm2, %v703_v1  ;;  %v669_v6 = vmax.f32 %v453_v2, 0.0  ;;  %v701_v7 = vmax.f32 %v581_v3, 0.0  ;;  %v474_v8 = vadd.f32 %v916_v4, %v1165_v36  ;;  %v602_v9 = vadd.f32 %v948_v5, %v1165_v36 }
  0xf0   :  { %v465_v10 = vpop.f32.mrf.mxu0  ;;  %v593_v11 = vpop.f32.mrf.mxu1 }
  0xf1   :  { %734 = vst.msk [vmem:[%s1490_s3 + $0x68] sm:$0xff] %vm720_vm2, %v669_v6  ;;  %766 = vst.msk [vmem:[%s1490_s3 + $0x168] sm:$0xff] %vm720_vm2, %v701_v7  ;;  %v674_v12 = vmax.f32 %v474_v8, 0.0  ;;  %v706_v13 = vmax.f32 %v602_v9, 0.0  ;;  %v466_v14 = vadd.f32 %v1165_v36, %v465_v10  ;;  %v594_v15 = vadd.f32 %v1165_v36, %v593_v11 }
  0xf2   :  { %v917_v16 = vpop.f32.mrf.mxu0  ;;  %v949_v17 = vpop.f32.mrf.mxu1 }
  0xf3   :  { %739 = vst.msk [vmem:[%s1490_s3 + $0x90] sm:$0xff] %vm720_vm2, %v674_v12  ;;  %771 = vst.msk [vmem:[%s1490_s3 + $0x190] sm:$0xff] %vm720_vm2, %v706_v13  ;;  %v672_v18 = vmax.f32 %v466_v14, 0.0  ;;  %v704_v19 = vmax.f32 %v594_v15, 0.0  ;;  %v477_v20 = vadd.f32 %v917_v16, %v1165_v36  ;;  %v605_v21 = vadd.f32 %v949_v17, %v1165_v36 }
  0xf4   :  { %v468_v22 = vpop.f32.mrf.mxu0  ;;  %v596_v23 = vpop.f32.mrf.mxu1 }
  0xf5   :  { %737 = vst.msk [vmem:[%s1490_s3 + $0x80] sm:$0xff] %vm720_vm2, %v672_v18  ;;  %769 = vst.msk [vmem:[%s1490_s3 + $0x180] sm:$0xff] %vm720_vm2, %v704_v19  ;;  %v675_v24 = vmax.f32 %v477_v20, 0.0  ;;  %v707_v25 = vmax.f32 %v605_v21, 0.0  ;;  %v469_v26 = vadd.f32 %v1165_v36, %v468_v22  ;;  %v597_v27 = vadd.f32 %v1165_v36, %v596_v23 }
  0xf6   :  { %v920_v28 = vpop.f32.mrf.mxu0  ;;  %v952_v29 = vpop.f32.mrf.mxu1 }
  0xf7   :  { %740 = vst.msk [vmem:[%s1490_s3 + $0x98] sm:$0xff] %vm720_vm2, %v675_v24  ;;  %772 = vst.msk [vmem:[%s1490_s3 + $0x198] sm:$0xff] %vm720_vm2, %v707_v25  ;;  %v673_v30 = vmax.f32 %v469_v26, 0.0  ;;  %v705_v31 = vmax.f32 %v597_v27, 0.0  ;;  %v490_v32 = vadd.f32 %v920_v28, %v1165_v36  ;;  %v618_v33 = vadd.f32 %v952_v29, %v1165_v36 }
  0xf8   :  { %v481_v34 = vpop.f32.mrf.mxu0  ;;  %v609_v35 = vpop.f32.mrf.mxu1 }
  0xf9   :  { %738 = vst.msk [vmem:[%s1490_s3 + $0x88] sm:$0xff] %vm720_vm2, %v673_v30  ;;  %770 = vst.msk [vmem:[%s1490_s3 + $0x188] sm:$0xff] %vm720_vm2, %v705_v31  ;;  %v678_v37 = vmax.f32 %v490_v32, 0.0  ;;  %v710_v38 = vmax.f32 %v618_v33, 0.0  ;;  %v482_v39 = vadd.f32 %v1165_v36, %v481_v34  ;;  %v610_v40 = vadd.f32 %v1165_v36, %v609_v35 }
  0xfa   :  { %v921_v41 = vpop.f32.mrf.mxu0  ;;  %v953_v42 = vpop.f32.mrf.mxu1 }
  0xfb   :  { %743 = vst.msk [vmem:[%s1490_s3 + $0xb0] sm:$0xff] %vm720_vm2, %v678_v37  ;;  %775 = vst.msk [vmem:[%s1490_s3 + $0x1b0] sm:$0xff] %vm720_vm2, %v710_v38  ;;  %v676_v43 = vmax.f32 %v482_v39, 0.0  ;;  %v708_v44 = vmax.f32 %v610_v40, 0.0  ;;  %v493_v45 = vadd.f32 %v921_v41, %v1165_v36  ;;  %v621_v46 = vadd.f32 %v953_v42, %v1165_v36 }
  0xfc   :  { %v484_v47 = vpop.f32.mrf.mxu0  ;;  %v612_v48 = vpop.f32.mrf.mxu1 }
  0xfd   :  { %741 = vst.msk [vmem:[%s1490_s3 + $0xa0] sm:$0xff] %vm720_vm2, %v676_v43  ;;  %773 = vst.msk [vmem:[%s1490_s3 + $0x1a0] sm:$0xff] %vm720_vm2, %v708_v44  ;;  %v679_v49 = vmax.f32 %v493_v45, 0.0  ;;  %v711_v50 = vmax.f32 %v621_v46, 0.0  ;;  %v485_v51 = vadd.f32 %v1165_v36, %v484_v47  ;;  %v613_v52 = vadd.f32 %v1165_v36, %v612_v48 }
  0xfe   :  { %v924_v53 = vpop.f32.mrf.mxu0  ;;  %v956_v54 = vpop.f32.mrf.mxu1 }
  0xff   :  { %744 = vst.msk [vmem:[%s1490_s3 + $0xb8] sm:$0xff] %vm720_vm2, %v679_v49  ;;  %776 = vst.msk [vmem:[%s1490_s3 + $0x1b8] sm:$0xff] %vm720_vm2, %v711_v50  ;;  %v677_v55 = vmax.f32 %v485_v51, 0.0  ;;  %v709_v56 = vmax.f32 %v613_v52, 0.0  ;;  %v506_v57 = vadd.f32 %v924_v53, %v1165_v36  ;;  %v634_v58 = vadd.f32 %v956_v54, %v1165_v36 }
 0x100   :  { %v497_v59 = vpop.f32.mrf.mxu0  ;;  %v625_v60 = vpop.f32.mrf.mxu1 }
 0x101   :  { %742 = vst.msk [vmem:[%s1490_s3 + $0xa8] sm:$0xff] %vm720_vm2, %v677_v55  ;;  %774 = vst.msk [vmem:[%s1490_s3 + $0x1a8] sm:$0xff] %vm720_vm2, %v709_v56  ;;  %v682_v61 = vmax.f32 %v506_v57, 0.0  ;;  %v714_v62 = vmax.f32 %v634_v58, 0.0  ;;  %v498_v63 = vadd.f32 %v1165_v36, %v497_v59  ;;  %v626_v0 = vadd.f32 %v1165_v36, %v625_v60 }
 0x102   :  { %v925_v1 = vpop.f32.mrf.mxu0  ;;  %v957_v2 = vpop.f32.mrf.mxu1 }
 0x103   :  { %747 = vst.msk [vmem:[%s1490_s3 + $0xd0] sm:$0xff] %vm720_vm2, %v682_v61  ;;  %779 = vst.msk [vmem:[%s1490_s3 + $0x1d0] sm:$0xff] %vm720_vm2, %v714_v62  ;;  %v680_v3 = vmax.f32 %v498_v63, 0.0  ;;  %v712_v4 = vmax.f32 %v626_v0, 0.0  ;;  %v509_v5 = vadd.f32 %v925_v1, %v1165_v36  ;;  %v637_v6 = vadd.f32 %v957_v2, %v1165_v36 }
 0x104   :  { %v500_v7 = vpop.f32.mrf.mxu0  ;;  %v628_v8 = vpop.f32.mrf.mxu1 }
 0x105   :  { %745 = vst.msk [vmem:[%s1490_s3 + $0xc0] sm:$0xff] %vm720_vm2, %v680_v3  ;;  %777 = vst.msk [vmem:[%s1490_s3 + $0x1c0] sm:$0xff] %vm720_vm2, %v712_v4  ;;  %v683_v9 = vmax.f32 %v509_v5, 0.0  ;;  %v715_v10 = vmax.f32 %v637_v6, 0.0  ;;  %v501_v11 = vadd.f32 %v1165_v36, %v500_v7  ;;  %v629_v12 = vadd.f32 %v1165_v36, %v628_v8 }
 0x106   :  { %v928_v13 = vpop.f32.mrf.mxu0  ;;  %v960_v14 = vpop.f32.mrf.mxu1 }
 0x107   :  { %748 = vst.msk [vmem:[%s1490_s3 + $0xd8] sm:$0xff] %vm720_vm2, %v683_v9  ;;  %780 = vst.msk [vmem:[%s1490_s3 + $0x1d8] sm:$0xff] %vm720_vm2, %v715_v10  ;;  %v681_v15 = vmax.f32 %v501_v11, 0.0  ;;  %v713_v16 = vmax.f32 %v629_v12, 0.0  ;;  %v522_v17 = vadd.f32 %v928_v13, %v1165_v36  ;;  %v650_v18 = vadd.f32 %v960_v14, %v1165_v36 }
 0x108   :  { %v513_v19 = vpop.f32.mrf.mxu0  ;;  %v641_v20 = vpop.f32.mrf.mxu1 }
 0x109   :  { %746 = vst.msk [vmem:[%s1490_s3 + $0xc8] sm:$0xff] %vm720_vm2, %v681_v15  ;;  %778 = vst.msk [vmem:[%s1490_s3 + $0x1c8] sm:$0xff] %vm720_vm2, %v713_v16  ;;  %v686_v21 = vmax.f32 %v522_v17, 0.0  ;;  %v718_v22 = vmax.f32 %v650_v18, 0.0  ;;  %v514_v23 = vadd.f32 %v1165_v36, %v513_v19  ;;  %v642_v24 = vadd.f32 %v1165_v36, %v641_v20 }
 0x10a   :  { %v929_v25 = vpop.f32.mrf.mxu0  ;;  %v961_v26 = vpop.f32.mrf.mxu1 }
 0x10b   :  { %751 = vst.msk [vmem:[%s1490_s3 + $0xf0] sm:$0xff] %vm720_vm2, %v686_v21  ;;  %783 = vst.msk [vmem:[%s1490_s3 + $0x1f0] sm:$0xff] %vm720_vm2, %v718_v22  ;;  %v684_v27 = vmax.f32 %v514_v23, 0.0  ;;  %v716_v28 = vmax.f32 %v642_v24, 0.0  ;;  %v525_v29 = vadd.f32 %v929_v25, %v1165_v36  ;;  %v653_v30 = vadd.f32 %v961_v26, %v1165_v36 }
 0x10c   :  { %v516_v31 = vpop.f32.mrf.mxu0  ;;  %v644_v32 = vpop.f32.mrf.mxu1 }
 0x10d   :  { %749 = vst.msk [vmem:[%s1490_s3 + $0xe0] sm:$0xff] %vm720_vm2, %v684_v27  ;;  %781 = vst.msk [vmem:[%s1490_s3 + $0x1e0] sm:$0xff] %vm720_vm2, %v716_v28  ;;  %v687_v33 = vmax.f32 %v525_v29, 0.0  ;;  %v719_v34 = vmax.f32 %v653_v30, 0.0  ;;  %v517_v35 = vadd.f32 %v1165_v36, %v516_v31  ;;  %v645_v37 = vadd.f32 %v1165_v36, %v644_v32 }
 0x10f   :  { %752 = vst.msk [vmem:[%s1490_s3 + $0xf8] sm:$0xff] %vm720_vm2, %v687_v33  ;;  %784 = vst.msk [vmem:[%s1490_s3 + $0x1f8] sm:$0xff] %vm720_vm2, %v719_v34  ;;  %v685_v38 = vmax.f32 %v517_v35, 0.0  ;;  %v717_v39 = vmax.f32 %v645_v37, 0.0 }
 0x111   :  { %750 = vst.msk [vmem:[%s1490_s3 + $0xe8] sm:$0xff] %vm720_vm2, %v685_v38  ;;  %782 = vst.msk [vmem:[%s1490_s3 + $0x1e8] sm:$0xff] %vm720_vm2, %v717_v39 }

// kernel: urvos_forward.43
= control target key start
LH: loop header
LB: loop body
LE: loop exit
PB: predicated region body
PF: predicated region fallthrough
CT: control target
= control target key end

     0   :  { %v427_v0 = vmov 0   ;;  %vm182_vm0 = vcmask 130048   ;;  %vm320_vm1 = vcmask 261120   ;;  %s616_s1 = inlined_call_operand.vmem [shape: bf16[144,32], index: 1, kind: input, shape index: {}]   ;;  %s617_s0 = inlined_call_operand.vmem [shape: bf16[128,144], index: 0, kind: input, shape index: {}]   ;;  %s618_s2 = inlined_call_operand.vmem [shape: f32[1,32], index: 2, kind: input, shape index: {}]   ;;  %s619_s3 = inlined_call_operand.vmem [shape: f32[128,32], index: 3, kind: output, shape index: {}]  }
   0x1   :  { %207 = vmatprep.subr.bf16.mxu0 %v427_v0  ;;  %375 = vmatprep.subr.bf16.mxu1 %v427_v0  ;;  %v394_v1 = vld [vmem:[%s616_s1 + $0x38] sm:$0xff]   ;;  %v395_v2 = vld [vmem:[%s616_s1 + $0x30] sm:$0xff]   ;;  %v396_v3 = vld [vmem:[%s616_s1 + $0x28] sm:$0xff]  }
   0x2   :  { %208 = vmatpush1.bf16.msra.mxu0 %v394_v1  ;;  %384 = vmatpush1.bf16.msra.mxu1 %v394_v1  ;;  %v397_v4 = vld [vmem:[%s616_s1 + $0x20] sm:$0xff]   ;;  %v398_v7 = vld [vmem:[%s616_s1 + $0x18] sm:$0xff]   ;;  %v399_v8 = vld [vmem:[%s616_s1 + $0x10] sm:$0xff]  }
   0x3   :  { %209 = vmatprep.subr.bf16.mxu0 %v427_v0  ;;  %376 = vmatprep.subr.bf16.mxu1 %v427_v0  ;;  %v405_v5 = vld [vmem:[%s617_s0 + $0x4] ss:$8 sps:$4 sm:$0xff]   ;;  %v403_v12 = vld [vmem:[%s617_s0] ss:$8 sps:$4 sm:$0xff]   ;;  %v409_v14 = vld [vmem:[%s617_s0 + $0x14] ss:$8 sps:$4 sm:$0xff]  }
   0x4   :  { %v408_v6 = vld [vmem:[%s617_s0 + $0x44] ss:$8 sps:$4 sm:$0xff]   ;;  %367 = vmatprep.mubr.msk.bf16.mxu0 %vm182_vm0, %v405_v5  ;;  %v406_v13 = vld [vmem:[%s617_s0 + $0x40] ss:$8 sps:$4 sm:$0xff]   ;;  %v411_v15 = vld [vmem:[%s617_s0 + $0x54] ss:$8 sps:$4 sm:$0xff]  }
   0x5   :  { %371 = vmatprep.mubr.msk.bf16.mxu1 %vm182_vm0, %v408_v6  ;;  %v400_v9 = vld [vmem:[%s616_s1 + $0x8] sm:$0xff]   ;;  %v401_v10 = vld [vmem:[%s616_s1] sm:$0xff]   ;;  %v413_v16 = vld [vmem:[%s617_s0 + $0x10] ss:$8 sps:$4 sm:$0xff]  }
   0x6   :  { %210 = vmatpush1.bf16.msra.mxu0 %v395_v2  ;;  %385 = vmatpush1.bf16.msra.mxu1 %v395_v2  ;;  %v402_v11 = vld [vmem:[%s616_s1 + $0x40] sm:$0xff]   ;;  %v414_v17 = vld [vmem:[%s617_s0 + $0x50] ss:$8 sps:$4 sm:$0xff]   ;;  %v421_v22 = vld [vmem:[%s617_s0 + $0x34] ss:$8 sps:$4 sm:$0xff]  }
   0x7   :  { %211 = vmatprep.subr.bf16.mxu0 %v427_v0  ;;  %377 = vmatprep.subr.bf16.mxu1 %v427_v0  ;;  %v415_v18 = vld [vmem:[%s617_s0 + $0x24] ss:$8 sps:$4 sm:$0xff]   ;;  %v419_v20 = vld [vmem:[%s617_s0 + $0x20] ss:$8 sps:$4 sm:$0xff]   ;;  %v423_v23 = vld [vmem:[%s617_s0 + $0x74] ss:$8 sps:$4 sm:$0xff]  }
   0x8   :  { %v417_v19 = vld [vmem:[%s617_s0 + $0x64] ss:$8 sps:$4 sm:$0xff]   ;;  %v420_v21 = vld [vmem:[%s617_s0 + $0x60] ss:$8 sps:$4 sm:$0xff]   ;;  %v425_v24 = vld [vmem:[%s617_s0 + $0x30] ss:$8 sps:$4 sm:$0xff]  }
   0x9   :  { %v426_v25 = vld [vmem:[%s617_s0 + $0x70] ss:$8 sps:$4 sm:$0xff]   ;;  %v534_v26 = vld [vmem:[%s618_s2] ss:$0 sm:$0xff] }
   0xa   :  { %212 = vmatpush1.bf16.msra.mxu0 %v396_v3  ;;  %386 = vmatpush1.bf16.msra.mxu1 %v396_v3 }
   0xb   :  { %213 = vmatprep.subr.bf16.mxu0 %v427_v0  ;;  %378 = vmatprep.subr.bf16.mxu1 %v427_v0 }
   0xe   :  { %214 = vmatpush1.bf16.msra.mxu0 %v397_v4  ;;  %387 = vmatpush1.bf16.msra.mxu1 %v397_v4 }
   0xf   :  { %215 = vmatprep.subr.bf16.mxu0 %v427_v0  ;;  %379 = vmatprep.subr.bf16.mxu1 %v427_v0 }
  0x12   :  { %216 = vmatpush1.bf16.msra.mxu0 %v398_v7  ;;  %388 = vmatpush1.bf16.msra.mxu1 %v398_v7 }
  0x13   :  { %217 = vmatprep.subr.bf16.mxu0 %v427_v0  ;;  %380 = vmatprep.subr.bf16.mxu1 %v427_v0 }
  0x16   :  { %218 = vmatpush1.bf16.msra.mxu0 %v399_v8  ;;  %389 = vmatpush1.bf16.msra.mxu1 %v399_v8 }
  0x17   :  { %219 = vmatprep.subr.bf16.mxu0 %v427_v0  ;;  %381 = vmatprep.subr.bf16.mxu1 %v427_v0 }
  0x1a   :  { %220 = vmatpush1.bf16.msra.mxu0 %v400_v9  ;;  %390 = vmatpush1.bf16.msra.mxu1 %v400_v9 }
  0x1b   :  { %221 = vmatprep.subr.bf16.mxu0 %v427_v0  ;;  %382 = vmatprep.subr.bf16.mxu1 %v427_v0 }
  0x1e   :  { %222 = vmatpush1.bf16.msra.mxu0 %v401_v10  ;;  %391 = vmatpush1.bf16.msra.mxu1 %v401_v10 }
  0x1f   :  { %237 = vmatprep.subr.bf16.mxu0 %v427_v0  ;;  %383 = vmatprep.subr.bf16.mxu1 %v427_v0 }
  0x22   :  { %238 = vmatpush2.bf16.msra.mxu0 %v402_v11  ;;  %392 = vmatpush2.bf16.msra.mxu1 %v402_v11 }
  0x25   :  { %240 = vmatmul.mubr.bf16.vlgmr.msra.gmra.mxu0 %v403_v12  ;;  %272 = vmatmul.mubr.bf16.vlgmr.msra.gmra.mxu1 %v406_v13 }
  0x26   :  { %368 = vmatprep.mubr.msk.bf16.mxu0 %vm182_vm0, %v409_v14  ;;  %372 = vmatprep.mubr.msk.bf16.mxu1 %vm182_vm0, %v411_v15 }
  0x2d   :  { %248 = vmatmul.mubr.bf16.gmra.mxu0 %v413_v16  ;;  %280 = vmatmul.mubr.bf16.gmra.mxu1 %v414_v17 }
  0x2e   :  { %369 = vmatprep.mubr.msk.bf16.mxu0 %vm182_vm0, %v415_v18  ;;  %373 = vmatprep.mubr.msk.bf16.mxu1 %vm182_vm0, %v417_v19 }
  0x35   :  { %256 = vmatmul.mubr.bf16.gmra.mxu0 %v419_v20  ;;  %288 = vmatmul.mubr.bf16.gmra.mxu1 %v420_v21 }
  0x36   :  { %370 = vmatprep.mubr.msk.bf16.mxu0 %vm182_vm0, %v421_v22  ;;  %374 = vmatprep.mubr.msk.bf16.mxu1 %vm182_vm0, %v423_v23 }
  0x3d   :  { %264 = vmatmul.mubr.bf16.gmra.mxu0 %v425_v24  ;;  %296 = vmatmul.mubr.bf16.gmra.mxu1 %v426_v25 }
  0xe5   :  { %v241_v27 = vpop.f32.mrf.mxu0  ;;  %v273_v28 = vpop.f32.mrf.mxu1 }
  0xe6   :  { %v242_v29 = vadd.f32 %v534_v26, %v241_v27  ;;  %v274_v30 = vadd.f32 %v534_v26, %v273_v28 }
  0xe7   :  { %v243_v31 = vpop.f32.mrf.mxu0  ;;  %v275_v32 = vpop.f32.mrf.mxu1 }
  0xe8   :  { %v304_v33 = vmax.f32 %v242_v29, 0.0  ;;  %v312_v34 = vmax.f32 %v274_v30, 0.0 }
  0xe9   :  { %v244_v35 = vpop.f32.mrf.mxu0  ;;  %v276_v36 = vpop.f32.mrf.mxu1 }
  0xea   :  { %321 = vst.msk [vmem:[%s619_s3] sm:$0xff] %vm320_vm1, %v304_v33  ;;  %329 = vst.msk [vmem:[%s619_s3 + $0x40] sm:$0xff] %vm320_vm1, %v312_v34  ;;  %v245_v37 = vadd.f32 %v534_v26, %v244_v35  ;;  %v277_v38 = vadd.f32 %v534_v26, %v276_v36 }
  0xeb   :  { %v246_v39 = vpop.f32.mrf.mxu0  ;;  %v278_v40 = vpop.f32.mrf.mxu1 }
  0xec   :  { %v305_v41 = vmax.f32 %v245_v37, 0.0  ;;  %v313_v42 = vmax.f32 %v277_v38, 0.0 }
  0xed   :  { %v249_v43 = vpop.f32.mrf.mxu0  ;;  %v281_v44 = vpop.f32.mrf.mxu1 }
  0xee   :  { %322 = vst.msk [vmem:[%s619_s3 + $0x8] sm:$0xff] %vm320_vm1, %v305_v41  ;;  %330 = vst.msk [vmem:[%s619_s3 + $0x48] sm:$0xff] %vm320_vm1, %v313_v42  ;;  %v250_v45 = vadd.f32 %v534_v26, %v249_v43  ;;  %v282_v46 = vadd.f32 %v534_v26, %v281_v44 }
  0xef   :  { %v251_v47 = vpop.f32.mrf.mxu0  ;;  %v283_v48 = vpop.f32.mrf.mxu1 }
  0xf0   :  { %v306_v49 = vmax.f32 %v250_v45, 0.0  ;;  %v314_v50 = vmax.f32 %v282_v46, 0.0 }
  0xf1   :  { %v252_v51 = vpop.f32.mrf.mxu0  ;;  %v284_v52 = vpop.f32.mrf.mxu1 }
  0xf2   :  { %323 = vst.msk [vmem:[%s619_s3 + $0x10] sm:$0xff] %vm320_vm1, %v306_v49  ;;  %331 = vst.msk [vmem:[%s619_s3 + $0x50] sm:$0xff] %vm320_vm1, %v314_v50  ;;  %v253_v53 = vadd.f32 %v534_v26, %v252_v51  ;;  %v285_v54 = vadd.f32 %v534_v26, %v284_v52 }
  0xf3   :  { %v254_v55 = vpop.f32.mrf.mxu0  ;;  %v286_v56 = vpop.f32.mrf.mxu1 }
  0xf4   :  { %v307_v57 = vmax.f32 %v253_v53, 0.0  ;;  %v315_v58 = vmax.f32 %v285_v54, 0.0 }
  0xf5   :  { %v257_v59 = vpop.f32.mrf.mxu0  ;;  %v289_v60 = vpop.f32.mrf.mxu1 }
  0xf6   :  { %324 = vst.msk [vmem:[%s619_s3 + $0x18] sm:$0xff] %vm320_vm1, %v307_v57  ;;  %332 = vst.msk [vmem:[%s619_s3 + $0x58] sm:$0xff] %vm320_vm1, %v315_v58  ;;  %v258_v61 = vadd.f32 %v534_v26, %v257_v59  ;;  %v290_v62 = vadd.f32 %v534_v26, %v289_v60 }
  0xf7   :  { %v259_v63 = vpop.f32.mrf.mxu0  ;;  %v291_v0 = vpop.f32.mrf.mxu1 }
  0xf8   :  { %v308_v1 = vmax.f32 %v258_v61, 0.0  ;;  %v316_v2 = vmax.f32 %v290_v62, 0.0 }
  0xf9   :  { %v260_v3 = vpop.f32.mrf.mxu0  ;;  %v292_v4 = vpop.f32.mrf.mxu1 }
  0xfa   :  { %325 = vst.msk [vmem:[%s619_s3 + $0x20] sm:$0xff] %vm320_vm1, %v308_v1  ;;  %333 = vst.msk [vmem:[%s619_s3 + $0x60] sm:$0xff] %vm320_vm1, %v316_v2  ;;  %v261_v5 = vadd.f32 %v534_v26, %v260_v3  ;;  %v293_v6 = vadd.f32 %v534_v26, %v292_v4 }
  0xfb   :  { %v262_v7 = vpop.f32.mrf.mxu0  ;;  %v294_v8 = vpop.f32.mrf.mxu1 }
  0xfc   :  { %v309_v9 = vmax.f32 %v261_v5, 0.0  ;;  %v317_v10 = vmax.f32 %v293_v6, 0.0 }
  0xfd   :  { %v265_v11 = vpop.f32.mrf.mxu0  ;;  %v297_v12 = vpop.f32.mrf.mxu1 }
  0xfe   :  { %326 = vst.msk [vmem:[%s619_s3 + $0x28] sm:$0xff] %vm320_vm1, %v309_v9  ;;  %334 = vst.msk [vmem:[%s619_s3 + $0x68] sm:$0xff] %vm320_vm1, %v317_v10  ;;  %v266_v13 = vadd.f32 %v534_v26, %v265_v11  ;;  %v298_v14 = vadd.f32 %v534_v26, %v297_v12 }
  0xff   :  { %v267_v15 = vpop.f32.mrf.mxu0  ;;  %v299_v16 = vpop.f32.mrf.mxu1 }
 0x100   :  { %v310_v17 = vmax.f32 %v266_v13, 0.0  ;;  %v318_v18 = vmax.f32 %v298_v14, 0.0 }
 0x101   :  { %v268_v19 = vpop.f32.mrf.mxu0  ;;  %v300_v20 = vpop.f32.mrf.mxu1 }
 0x102   :  { %327 = vst.msk [vmem:[%s619_s3 + $0x30] sm:$0xff] %vm320_vm1, %v310_v17  ;;  %335 = vst.msk [vmem:[%s619_s3 + $0x70] sm:$0xff] %vm320_vm1, %v318_v18  ;;  %v269_v21 = vadd.f32 %v534_v26, %v268_v19  ;;  %v301_v22 = vadd.f32 %v534_v26, %v300_v20 }
 0x103   :  { %v270_v23 = vpop.f32.mrf.mxu0  ;;  %v302_v24 = vpop.f32.mrf.mxu1 }
 0x104   :  { %v311_v25 = vmax.f32 %v269_v21, 0.0  ;;  %v319_v27 = vmax.f32 %v301_v22, 0.0 }
 0x106   :  { %328 = vst.msk [vmem:[%s619_s3 + $0x38] sm:$0xff] %vm320_vm1, %v311_v25  ;;  %336 = vst.msk [vmem:[%s619_s3 + $0x78] sm:$0xff] %vm320_vm1, %v319_v27 }

// kernel: urvos_forward.44
= control target key start
LH: loop header
LB: loop body
LE: loop exit
PB: predicated region body
PF: predicated region fallthrough
CT: control target
= control target key end

     0   :  { %vm204_vm0 = vcmask 261120   ;;  %vm313_vm1 = vcmask 523264   ;;  %s526_s1 = inlined_call_operand.vmem [shape: bf16[288,64], index: 1, kind: input, shape index: {}]   ;;  %s527_s0 = inlined_call_operand.vmem [shape: bf16[32,288], index: 0, kind: input, shape index: {}]   ;;  %s528_s2 = inlined_call_operand.vmem [shape: f32[1,64], index: 2, kind: input, shape index: {}]   ;;  %s529_s3 = inlined_call_operand.vmem [shape: f32[32,64], index: 3, kind: output, shape index: {}]  }
   0x1   :  { %v389_v0 = vld [vmem:[%s526_s1 + $0x78] sm:$0xff]   ;;  %v391_v2 = vld [vmem:[%s526_s1 + $0x70] sm:$0xff]   ;;  %v393_v4 = vld [vmem:[%s526_s1 + $0x68] sm:$0xff]  }
   0x2   :  { %v390_v1 = vld [vmem:[%s526_s1 + $0x38] sm:$0xff]   ;;  %349 = vmatprep.subr.bf16.mxu0 %v389_v0  ;;  %v392_v3 = vld [vmem:[%s526_s1 + $0x30] sm:$0xff]   ;;  %v394_v5 = vld [vmem:[%s526_s1 + $0x28] sm:$0xff]  }
   0x3   :  { %350 = vmatpush3.bf16.msra.mxu0 %v390_v1  ;;  %v395_v6 = vld [vmem:[%s526_s1 + $0x60] sm:$0xff]   ;;  %v397_v8 = vld [vmem:[%s526_s1 + $0x58] sm:$0xff]   ;;  %v404_v10 = vld [vmem:[%s526_s1 + $0x88] sm:$0xff]  }
   0x4   :  { %351 = vmatprep.subr.bf16.mxu0 %v391_v2  ;;  %v396_v7 = vld [vmem:[%s526_s1 + $0x20] sm:$0xff]   ;;  %v398_v9 = vld [vmem:[%s526_s1 + $0x18] sm:$0xff]   ;;  %v399_v11 = vld [vmem:[%s526_s1 + $0x50] sm:$0xff]   ;;  %381 = vmatprep.subr.bf16.mxu1 %v404_v10 }
   0x5   :  { %v400_v12 = vld [vmem:[%s526_s1 + $0x10] sm:$0xff]   ;;  %v401_v13 = vld [vmem:[%s526_s1 + $0x48] sm:$0xff]   ;;  %382 = vmatpush3.bf16.msra.mxu1 %v404_v10  ;;  %v409_v15 = vld [vmem:[%s526_s1 + $0x80] sm:$0xff]  }
   0x6   :  { %v408_v14 = vld [vmem:[%s527_s0 + $0x4] ss:$12 sps:$4 sm:$0xff]   ;;  %v410_v16 = vld [vmem:[%s527_s0 + $0x8] ss:$12 sps:$4 sm:$0xff]   ;;  %383 = vmatprep.subr.bf16.mxu1 %v409_v15  ;;  %v411_v17 = vld [vmem:[%s527_s0 + $0x20] ss:$12 sps:$4 sm:$0xff]  }
   0x7   :  { %352 = vmatpush3.bf16.msra.mxu0 %v392_v3  ;;  %243 = vmatprep.mubr.bf16.mxu0 %v408_v14  ;;  %v402_v18 = vld [vmem:[%s526_s1 + $0x8] sm:$0xff]   ;;  %v403_v19 = vld [vmem:[%s526_s1 + $0x40] sm:$0xff]  }
   0x8   :  { %353 = vmatprep.subr.bf16.mxu0 %v393_v4  ;;  %385 = vmatprep.mubr.msk.bf16.mxu1 %vm204_vm0, %v410_v16  ;;  %v405_v20 = vld [vmem:[%s526_s1] sm:$0xff]   ;;  %v412_v22 = vld [vmem:[%s527_s0 + $0x1c] ss:$12 sps:$4 sm:$0xff]  }
   0x9   :  { %384 = vmatpush3.bf16.msra.mxu1 %v409_v15  ;;  %v406_v21 = vld [vmem:[%s527_s0] ss:$12 sps:$4 sm:$0xff]   ;;  %v414_v23 = vld [vmem:[%s527_s0 + $0x18] ss:$12 sps:$4 sm:$0xff]  }
   0xa   :  { %v322_v28 = vld [vmem:[%s528_s2] ss:$0 sm:$0xff] }
   0xb   :  { %354 = vmatpush3.bf16.msra.mxu0 %v394_v5 }
   0xc   :  { %355 = vmatprep.subr.bf16.mxu0 %v395_v6  ;;  %386 = vmatmul.mubr.msk.bf16.vlgmr.msra.gmra.mxu1 %vm204_vm0, %v411_v17 }
   0xf   :  { %356 = vmatpush3.bf16.msra.mxu0 %v396_v7 }
  0x10   :  { %357 = vmatprep.subr.bf16.mxu0 %v397_v8 }
  0x13   :  { %358 = vmatpush3.bf16.msra.mxu0 %v398_v9 }
  0x14   :  { %359 = vmatprep.subr.bf16.mxu0 %v399_v11 }
  0x17   :  { %360 = vmatpush3.bf16.msra.mxu0 %v400_v12 }
  0x18   :  { %361 = vmatprep.subr.bf16.mxu0 %v401_v13 }
  0x1b   :  { %362 = vmatpush3.bf16.msra.mxu0 %v402_v18 }
  0x1c   :  { %363 = vmatprep.subr.bf16.mxu0 %v403_v19 }
  0x1f   :  { %364 = vmatpush3.bf16.msra.mxu0 %v405_v20 }
  0x22   :  { %244 = vmatmul.mubr.bf16.vlgmr.msra.gmra.mxu0 %v406_v21 }
  0x23   :  { %251 = vmatprep.mubr.bf16.mxu0 %v412_v22 }
  0x2a   :  { %252 = vmatmul.mubr.bf16.gmra.mxu0 %v414_v23 }
  0xcc   :  { %v387_v24 = vpop.f32.mrf.mxu1 }
  0xce   :  { %v294_v26 = vpop.f32.mrf.mxu1 }
  0xd0   :  { %v388_v31 = vpop.f32.mrf.mxu1 }
  0xd2   :  { %v297_v37 = vpop.f32.mrf.mxu1 }
  0xe2   :  { %v365_v25 = vpop.f32.mrf.mxu0 }
  0xe4   :  { %v366_v27 = vpop.f32.mrf.mxu0 }
  0xe5   :  { %v367_v29 = vadd.f32 %v366_v27, %v365_v25 }
  0xe6   :  { %v368_v30 = vpop.f32.mrf.mxu0 }
  0xe7   :  { %v246_v32 = vadd.f32 %v367_v29, %v322_v28 }
  0xe8   :  { %v369_v33 = vpop.f32.mrf.mxu0 }
  0xe9   :  { %v370_v34 = vadd.f32 %v369_v33, %v368_v30  ;;  %v295_v35 = vadd.f32 %v294_v26, %v246_v32 }
  0xea   :  { %v371_v36 = vpop.f32.mrf.mxu0 }
  0xeb   :  { %v309_v38 = vmax.f32 %v295_v35, 0.0  ;;  %v249_v39 = vadd.f32 %v370_v34, %v322_v28 }
  0xec   :  { %v372_v40 = vpop.f32.mrf.mxu0 }
  0xed   :  { %314 = vst.msk [vmem:[%s529_s3] sm:$0xff] %vm313_vm1, %v309_v38  ;;  %v373_v41 = vadd.f32 %v372_v40, %v371_v36  ;;  %v298_v42 = vadd.f32 %v297_v37, %v249_v39 }
  0xee   :  { %v374_v43 = vpop.f32.mrf.mxu0 }
  0xef   :  { %v254_v44 = vadd.f32 %v373_v41, %v322_v28  ;;  %v310_v45 = vmax.f32 %v298_v42, 0.0 }
  0xf0   :  { %v375_v46 = vpop.f32.mrf.mxu0 }
  0xf1   :  { %v303_v47 = vadd.f32 %v387_v24, %v254_v44  ;;  %315 = vst.msk [vmem:[%s529_s3 + $0x8] sm:$0xff] %vm313_vm1, %v310_v45  ;;  %v376_v48 = vadd.f32 %v375_v46, %v374_v43 }
  0xf3   :  { %v311_v49 = vmax.f32 %v303_v47, 0.0  ;;  %v257_v50 = vadd.f32 %v376_v48, %v322_v28 }
  0xf5   :  { %316 = vst.msk [vmem:[%s529_s3 + $0x10] sm:$0xff] %vm313_vm1, %v311_v49  ;;  %v306_v51 = vadd.f32 %v388_v31, %v257_v50 }
  0xf7   :  { %v312_v52 = vmax.f32 %v306_v51, 0.0 }
  0xf9   :  { %317 = vst.msk [vmem:[%s529_s3 + $0x18] sm:$0xff] %vm313_vm1, %v312_v52 }

// kernel: urvos_forward.45
= control target key start
LH: loop header
LB: loop body
LE: loop exit
PB: predicated region body
PF: predicated region fallthrough
CT: control target
= control target key end

     0   :  { %v607_v35 = vmov 0.0   ;;  %vm608_vm0 = vmmov 0   ;;  %vm330_vm1 = vcmask 523264   ;;  %s752_s1 = inlined_call_operand.vmem [shape: bf16[576,128], index: 1, kind: input, shape index: {}]   ;;  %s753_s0 = inlined_call_operand.vmem [shape: bf16[8,576], index: 0, kind: input, shape index: {}]   ;;  %s754_s2 = inlined_call_operand.vmem [shape: f32[1,128], index: 2, kind: input, shape index: {}]   ;;  %s755_s3 = inlined_call_operand.vmem [shape: f32[8,128], index: 3, kind: output, shape index: {}]  }
   0x1   :  { %v566_v0 = vld [vmem:[%s752_s1 + $0x78] sm:$0xff]   ;;  %v570_v4 = vld [vmem:[%s752_s1 + $0x70] sm:$0xff]   ;;  %v574_v8 = vld [vmem:[%s752_s1 + $0x68] sm:$0xff]  }
   0x2   :  { %v567_v1 = vld [vmem:[%s752_s1 + $0x38] sm:$0xff]   ;;  %503 = vmatprep.subr.bf16.mxu0 %v566_v0  ;;  %v571_v5 = vld [vmem:[%s752_s1 + $0x30] sm:$0xff]   ;;  %v575_v9 = vld [vmem:[%s752_s1 + $0x28] sm:$0xff]  }
   0x3   :  { %v568_v2 = vld [vmem:[%s752_s1 + $0xf8] sm:$0xff]   ;;  %504 = vmatpush3.bf16.msra.mxu0 %v567_v1  ;;  %v572_v6 = vld [vmem:[%s752_s1 + $0xf0] sm:$0xff]   ;;  %v576_v10 = vld [vmem:[%s752_s1 + $0xe8] sm:$0xff]  }
   0x4   :  { %v569_v3 = vld [vmem:[%s752_s1 + $0xb8] sm:$0xff]   ;;  %525 = vmatprep.subr.bf16.mxu1 %v568_v2  ;;  %505 = vmatprep.subr.bf16.mxu0 %v570_v4  ;;  %v573_v7 = vld [vmem:[%s752_s1 + $0xb0] sm:$0xff]   ;;  %v577_v11 = vld [vmem:[%s752_s1 + $0xa8] sm:$0xff]  }
   0x5   :  { %526 = vmatpush3.bf16.msra.mxu1 %v569_v3  ;;  %v578_v12 = vld [vmem:[%s752_s1 + $0x60] sm:$0xff]   ;;  %v582_v16 = vld [vmem:[%s752_s1 + $0x58] sm:$0xff]   ;;  %v586_v20 = vld [vmem:[%s752_s1 + $0x50] sm:$0xff]  }
   0x6   :  { %527 = vmatprep.subr.bf16.mxu1 %v572_v6  ;;  %v579_v13 = vld [vmem:[%s752_s1 + $0x20] sm:$0xff]   ;;  %v583_v17 = vld [vmem:[%s752_s1 + $0x18] sm:$0xff]   ;;  %v587_v21 = vld [vmem:[%s752_s1 + $0x10] sm:$0xff]  }
   0x7   :  { %506 = vmatpush3.bf16.msra.mxu0 %v571_v5  ;;  %v580_v14 = vld [vmem:[%s752_s1 + $0xe0] sm:$0xff]   ;;  %v584_v18 = vld [vmem:[%s752_s1 + $0xd8] sm:$0xff]   ;;  %v588_v22 = vld [vmem:[%s752_s1 + $0xd0] sm:$0xff]  }
   0x8   :  { %507 = vmatprep.subr.bf16.mxu0 %v574_v8  ;;  %v581_v15 = vld [vmem:[%s752_s1 + $0xa0] sm:$0xff]   ;;  %v585_v19 = vld [vmem:[%s752_s1 + $0x98] sm:$0xff]   ;;  %v589_v23 = vld [vmem:[%s752_s1 + $0x90] sm:$0xff]  }
   0x9   :  { %528 = vmatpush3.bf16.msra.mxu1 %v573_v7  ;;  %v590_v24 = vld [vmem:[%s752_s1 + $0x48] sm:$0xff]   ;;  %v594_v28 = vld [vmem:[%s752_s1 + $0x40] sm:$0xff]   ;;  %v603_v39 = vld [vmem:[%s752_s1 + $0x118] sm:$0xff]  }
   0xa   :  { %529 = vmatprep.subr.bf16.mxu1 %v576_v10  ;;  %v591_v25 = vld [vmem:[%s752_s1 + $0x8] sm:$0xff]   ;;  %v595_v29 = vld [vmem:[%s752_s1] sm:$0xff]   ;;  %v604_v40 = vld [vmem:[%s752_s1 + $0x110] sm:$0xff]  }
   0xb   :  { %508 = vmatpush3.bf16.msra.mxu0 %v575_v9  ;;  %v592_v26 = vld [vmem:[%s752_s1 + $0xc8] sm:$0xff]   ;;  %v596_v30 = vld [vmem:[%s752_s1 + $0xc0] sm:$0xff]   ;;  %v599_v43 = vld [vmem:[%s753_s0 + $0x10] ss:$0 sps:$4 sm:$0xff]  }
   0xc   :  { %509 = vmatprep.subr.bf16.mxu0 %v578_v12  ;;  %v593_v27 = vld [vmem:[%s752_s1 + $0x88] sm:$0xff]   ;;  %v15_v31 = vld [vmem:[%s753_s0] sm:$0xff] }
   0xd   :  { %530 = vmatpush3.bf16.msra.mxu1 %v577_v11  ;;  %v461_v32 = vcombine.low %v15_v31, %v15_v31  ;;  %v462_v33 = vcombine.high %v15_v31, %v15_v31  ;;  %v600_v34 = vld [vmem:[%s752_s1 + $0x80] sm:$0xff]   ;;  %v16_v36 = vld [vmem:[%s753_s0 + $0x8] sm:$0xff] }
   0xe   :  { %531 = vmatprep.subr.bf16.mxu1 %v580_v14  ;;  %v463_v37 = vcombine.low %v16_v36, %v16_v36  ;;  %v464_v38 = vcombine.high %v16_v36, %v16_v36  ;;  %v605_v41 = vld [vmem:[%s752_s1 + $0x108] sm:$0xff]   ;;  %v606_v42 = vld [vmem:[%s752_s1 + $0x100] sm:$0xff]  }
   0xf   :  { %510 = vmatpush3.bf16.msra.mxu0 %v579_v13  ;;  %366 = vmatprep.mubr.bf16.mxu0 %v462_v33  ;;  %v460_v52 = vld [vmem:[%s754_s2] ss:$0 sm:$0xff] }
  0x10   :  { %511 = vmatprep.subr.bf16.mxu0 %v582_v16  ;;  %406 = vmatprep.mubr.bf16.mxu1 %v464_v38 }
  0x11   :  { %532 = vmatpush3.bf16.msra.mxu1 %v581_v15 }
  0x12   :  { %533 = vmatprep.subr.bf16.mxu1 %v584_v18 }
  0x13   :  { %512 = vmatpush3.bf16.msra.mxu0 %v583_v17 }
  0x14   :  { %513 = vmatprep.subr.bf16.mxu0 %v586_v20 }
  0x15   :  { %534 = vmatpush3.bf16.msra.mxu1 %v585_v19 }
  0x16   :  { %535 = vmatprep.subr.bf16.mxu1 %v588_v22 }
  0x17   :  { %514 = vmatpush3.bf16.msra.mxu0 %v587_v21 }
  0x18   :  { %515 = vmatprep.subr.bf16.mxu0 %v590_v24 }
  0x19   :  { %536 = vmatpush3.bf16.msra.mxu1 %v589_v23 }
  0x1a   :  { %537 = vmatprep.subr.bf16.mxu1 %v592_v26 }
  0x1b   :  { %516 = vmatpush3.bf16.msra.mxu0 %v591_v25 }
  0x1c   :  { %517 = vmatprep.subr.bf16.mxu0 %v594_v28 }
  0x1d   :  { %538 = vmatpush3.bf16.msra.mxu1 %v593_v27 }
  0x1e   :  { %539 = vmatprep.subr.bf16.mxu1 %v596_v30 }
  0x1f   :  { %518 = vmatpush3.bf16.msra.mxu0 %v595_v29 }
  0x20   :  { %552 = vmatprep.subr.bf16.mxu0 %v607_v35 }
  0x21   :  { %540 = vmatpush3.bf16.msra.mxu1 %v600_v34 }
  0x22   :  { %367 = vmatmul.mubr.bf16.vlgmr.msra.gmra.mxu0 %v461_v32 }
  0x23   :  { %553 = vmatpush3.bf16.msra.mxu0 %v603_v39  ;;  %560 = vmatprep.mubr.msk.bf16.mxu0 %vm608_vm0, %v607_v35 }
  0x24   :  { %407 = vmatmul.mubr.bf16.vlgmr.msra.gmra.mxu1 %v463_v37  ;;  %554 = vmatprep.subr.bf16.mxu0 %v607_v35 }
  0x27   :  { %555 = vmatpush3.bf16.msra.mxu0 %v604_v40 }
  0x28   :  { %556 = vmatprep.subr.bf16.mxu0 %v607_v35 }
  0x2b   :  { %557 = vmatpush3.bf16.msra.mxu0 %v605_v41 }
  0x2c   :  { %558 = vmatprep.subr.bf16.mxu0 %v607_v35 }
  0x2f   :  { %559 = vmatpush3.bf16.msra.mxu0 %v606_v42 }
  0x32   :  { %561 = vmatmul.mubr.msk.bf16.vlgmr.msra.gmra.mxu0 %vm330_vm1, %v599_v43 }
  0xe2   :  { %v519_v44 = vpop.f32.mrf.mxu0 }
  0xe4   :  { %v520_v45 = vpop.f32.mrf.mxu0  ;;  %v541_v46 = vpop.f32.mrf.mxu1 }
  0xe5   :  { %v521_v51 = vadd.f32 %v520_v45, %v519_v44 }
  0xe6   :  { %v522_v47 = vpop.f32.mrf.mxu0  ;;  %v542_v48 = vpop.f32.mrf.mxu1 }
  0xe7   :  { %v369_v54 = vadd.f32 %v521_v51, %v460_v52  ;;  %v543_v55 = vadd.f32 %v542_v48, %v541_v46 }
  0xe8   :  { %v523_v49 = vpop.f32.mrf.mxu0  ;;  %v544_v50 = vpop.f32.mrf.mxu1 }
  0xe9   :  { %v409_v56 = vadd.f32 %v543_v55, %v369_v54 }
  0xea   :  { %v545_v53 = vpop.f32.mrf.mxu1 }
  0xf2   :  { %v448_v57 = vpop.f32.mrf.mxu0 }
  0xf3   :  { %v449_v58 = vadd.f32 %v448_v57, %v409_v56 }
  0xf4   :  { %v562_v59 = vpop.f32.mrf.mxu0 }
  0xf5   :  { %v454_v60 = vmax.f32 %v449_v58, 0.0 }
  0xf6   :  { %v451_v61 = vpop.f32.mrf.mxu0 }
  0xf7   :  { %455 = vst [vmem:[%s755_s3] sm:$0xff] %v454_v60 }
  0xf8   :  { %v563_v62 = vpop.f32.mrf.mxu0 }

// kernel: urvos_forward.58
= control target key start
LH: loop header
LB: loop body
LE: loop exit
PB: predicated region body
PF: predicated region fallthrough
CT: control target
= control target key end

     0   :  { %v181_v0 = vmov 0.0   ;;  %vm182_vm0 = vmmov 0   ;;  %vm127_vm1 = vcmask 261120   ;;  %s236_s1 = inlined_call_operand.vmem [shape: bf16[128,32], index: 1, kind: input, shape index: {}]   ;;  %s237_s0 = inlined_call_operand.vmem [shape: bf16[8,128], index: 0, kind: input, shape index: {}]   ;;  %s238_s2 = inlined_call_operand.vmem [shape: f32[1,32], index: 2, kind: input, shape index: {}]   ;;  %s239_s3 = inlined_call_operand.vmem [shape: f32[8,32], index: 3, kind: output, shape index: {}]  }
   0x1   :  { %151 = vmatprep.subr.bf16.mxu0 %v181_v0  ;;  %v173_v1 = vld [vmem:[%s236_s1 + $0x38] sm:$0xff]   ;;  %167 = vmatprep.mubr.msk.bf16.mxu0 %vm182_vm0, %v181_v0  ;;  %v174_v2 = vld [vmem:[%s236_s1 + $0x30] sm:$0xff]   ;;  %v175_v3 = vld [vmem:[%s236_s1 + $0x28] sm:$0xff]  }
   0x2   :  { %152 = vmatpush3.bf16.msra.mxu0 %v173_v1  ;;  %v176_v4 = vld [vmem:[%s236_s1 + $0x20] sm:$0xff]   ;;  %v177_v5 = vld [vmem:[%s236_s1 + $0x18] sm:$0xff]   ;;  %v178_v6 = vld [vmem:[%s236_s1 + $0x10] sm:$0xff]  }
   0x3   :  { %153 = vmatprep.subr.bf16.mxu0 %v181_v0  ;;  %v179_v7 = vld [vmem:[%s236_s1 + $0x8] sm:$0xff]   ;;  %v180_v8 = vld [vmem:[%s236_s1] sm:$0xff]  }
   0x4   :  { %v15_v9 = vld [vmem:[%s237_s0] sm:$0xf] }
   0x5   :  { %v133_v10 = vld [vmem:[%s238_s2] ss:$0 sm:$0xff] }
   0x6   :  { %154 = vmatpush3.bf16.msra.mxu0 %v174_v2 }
   0x7   :  { %155 = vmatprep.subr.bf16.mxu0 %v181_v0 }
   0xa   :  { %156 = vmatpush3.bf16.msra.mxu0 %v175_v3 }
   0xb   :  { %157 = vmatprep.subr.bf16.mxu0 %v181_v0 }
   0xe   :  { %158 = vmatpush3.bf16.msra.mxu0 %v176_v4 }
   0xf   :  { %159 = vmatprep.subr.bf16.mxu0 %v181_v0 }
  0x12   :  { %160 = vmatpush3.bf16.msra.mxu0 %v177_v5 }
  0x13   :  { %161 = vmatprep.subr.bf16.mxu0 %v181_v0 }
  0x16   :  { %162 = vmatpush3.bf16.msra.mxu0 %v178_v6 }
  0x17   :  { %163 = vmatprep.subr.bf16.mxu0 %v181_v0 }
  0x1a   :  { %164 = vmatpush3.bf16.msra.mxu0 %v179_v7 }
  0x1b   :  { %165 = vmatprep.subr.bf16.mxu0 %v181_v0 }
  0x1e   :  { %166 = vmatpush3.bf16.msra.mxu0 %v180_v8 }
  0x21   :  { %168 = vmatmul.mubr.bf16.vlgmr.msra.gmra.mxu0 %v15_v9 }
  0xe1   :  { %v121_v11 = vpop.f32.mrf.mxu0 }
  0xe2   :  { %v122_v12 = vadd.f32 %v133_v10, %v121_v11 }
  0xe3   :  { %v169_v13 = vpop.f32.mrf.mxu0 }
  0xe4   :  { %128 = vst.msk [vmem:[%s239_s3] sm:$0xff] %vm127_vm1, %v122_v12 }
  0xe5   :  { %v124_v14 = vpop.f32.mrf.mxu0 }
  0xe7   :  { %v170_v15 = vpop.f32.mrf.mxu0 }

// kernel: urvos_forward.60
= control target key start
LH: loop header
LB: loop body
LE: loop exit
PB: predicated region body
PF: predicated region fallthrough
CT: control target
= control target key end

     0   :  { %vm434_vm0 = vcmask 523264   ;;  %s1106_s1 = inlined_call_operand.vmem [shape: bf16[576,128], index: 1, kind: input, shape index: {}]   ;;  %s1107_s0 = inlined_call_operand.vmem [shape: bf16[64,576], index: 0, kind: input, shape index: {}]   ;;  %s1108_s2 = inlined_call_operand.vmem [shape: f32[1,128], index: 2, kind: input, shape index: {}]   ;;  %s1109_s3 = inlined_call_operand.vmem [shape: f32[64,128], index: 3, kind: output, shape index: {}]  }
   0x1   :  { %v827_v0 = vld [vmem:[%s1106_s1 + $0x78] sm:$0xff]   ;;  %v831_v4 = vld [vmem:[%s1106_s1 + $0x70] sm:$0xff]   ;;  %v835_v8 = vld [vmem:[%s1106_s1 + $0x68] sm:$0xff]  }
   0x2   :  { %v828_v1 = vld [vmem:[%s1106_s1 + $0xf8] sm:$0xff]   ;;  %715 = vmatprep.subr.bf16.mxu0 %v827_v0  ;;  %v832_v5 = vld [vmem:[%s1106_s1 + $0xf0] sm:$0xff]   ;;  %v836_v9 = vld [vmem:[%s1106_s1 + $0xe8] sm:$0xff]  }
   0x3   :  { %v829_v2 = vld [vmem:[%s1106_s1 + $0x38] sm:$0xff]   ;;  %755 = vmatprep.subr.bf16.mxu1 %v828_v1  ;;  %v833_v6 = vld [vmem:[%s1106_s1 + $0x30] sm:$0xff]   ;;  %v837_v10 = vld [vmem:[%s1106_s1 + $0x28] sm:$0xff]  }
   0x4   :  { %v830_v3 = vld [vmem:[%s1106_s1 + $0xb8] sm:$0xff]   ;;  %716 = vmatpush3.bf16.msra.mxu0 %v829_v2  ;;  %v834_v7 = vld [vmem:[%s1106_s1 + $0xb0] sm:$0xff]   ;;  %v838_v11 = vld [vmem:[%s1106_s1 + $0xa8] sm:$0xff]  }
   0x5   :  { %756 = vmatpush3.bf16.msra.mxu1 %v830_v3  ;;  %717 = vmatprep.subr.bf16.mxu0 %v831_v4  ;;  %v839_v12 = vld [vmem:[%s1106_s1 + $0x60] sm:$0xff]   ;;  %v843_v16 = vld [vmem:[%s1106_s1 + $0x58] sm:$0xff]   ;;  %v847_v20 = vld [vmem:[%s1106_s1 + $0x50] sm:$0xff]  }
   0x6   :  { %757 = vmatprep.subr.bf16.mxu1 %v832_v5  ;;  %v840_v13 = vld [vmem:[%s1106_s1 + $0xe0] sm:$0xff]   ;;  %v844_v17 = vld [vmem:[%s1106_s1 + $0xd8] sm:$0xff]   ;;  %v848_v21 = vld [vmem:[%s1106_s1 + $0xd0] sm:$0xff]  }
   0x7   :  { %v841_v14 = vld [vmem:[%s1106_s1 + $0x20] sm:$0xff]   ;;  %v845_v18 = vld [vmem:[%s1106_s1 + $0x18] sm:$0xff]   ;;  %v849_v22 = vld [vmem:[%s1106_s1 + $0x10] sm:$0xff]  }
   0x8   :  { %718 = vmatpush3.bf16.msra.mxu0 %v833_v6  ;;  %v842_v15 = vld [vmem:[%s1106_s1 + $0xa0] sm:$0xff]   ;;  %v846_v19 = vld [vmem:[%s1106_s1 + $0x98] sm:$0xff]   ;;  %v850_v23 = vld [vmem:[%s1106_s1 + $0x90] sm:$0xff]  }
   0x9   :  { %758 = vmatpush3.bf16.msra.mxu1 %v834_v7  ;;  %719 = vmatprep.subr.bf16.mxu0 %v835_v8  ;;  %v851_v24 = vld [vmem:[%s1106_s1 + $0x48] sm:$0xff]   ;;  %v855_v28 = vld [vmem:[%s1106_s1 + $0x40] sm:$0xff]   ;;  %v865_v36 = vld [vmem:[%s1106_s1 + $0x118] sm:$0xff]  }
   0xa   :  { %759 = vmatprep.subr.bf16.mxu1 %v836_v9  ;;  %v852_v25 = vld [vmem:[%s1106_s1 + $0xc8] sm:$0xff]   ;;  %v856_v29 = vld [vmem:[%s1106_s1 + $0xc0] sm:$0xff]   ;;  %v872_v39 = vld [vmem:[%s1106_s1 + $0x110] sm:$0xff]  }
   0xb   :  { %v853_v26 = vld [vmem:[%s1106_s1 + $0x8] sm:$0xff]   ;;  %v857_v30 = vld [vmem:[%s1106_s1] sm:$0xff]   ;;  %v875_v43 = vld [vmem:[%s1107_s0 + $0x5c] ss:$20 sps:$4 sm:$0xff]  }
   0xc   :  { %720 = vmatpush3.bf16.msra.mxu0 %v837_v10  ;;  %v854_v27 = vld [vmem:[%s1106_s1 + $0x88] sm:$0xff]   ;;  %v858_v31 = vld [vmem:[%s1106_s1 + $0x80] sm:$0xff]   ;;  %v880_v48 = vld [vmem:[%s1107_s0 + $0x7c] ss:$20 sps:$4 sm:$0xff]  }
   0xd   :  { %760 = vmatpush3.bf16.msra.mxu1 %v838_v11  ;;  %721 = vmatprep.subr.bf16.mxu0 %v839_v12  ;;  %v859_v32 = vld [vmem:[%s1107_s0] ss:$20 sps:$4 sm:$0xff]   ;;  %v861_v33 = vld [vmem:[%s1107_s0 + $0x4] ss:$20 sps:$4 sm:$0xff]   ;;  %v862_v34 = vld [vmem:[%s1107_s0 + $0x8] ss:$20 sps:$4 sm:$0xff]  }
   0xe   :  { %761 = vmatprep.subr.bf16.mxu1 %v840_v13  ;;  %v864_v35 = vld [vmem:[%s1107_s0 + $0xc] ss:$20 sps:$4 sm:$0xff]   ;;  %479 = vmatprep.mubr.bf16.mxu0 %v861_v33  ;;  %v868_v38 = vld [vmem:[%s1107_s0 + $0x34] ss:$20 sps:$4 sm:$0xff]   ;;  %v871_v41 = vld [vmem:[%s1107_s0 + $0x30] ss:$20 sps:$4 sm:$0xff]  }
   0xf   :  { %544 = vmatprep.mubr.bf16.mxu1 %v864_v35  ;;  %v866_v37 = vld [vmem:[%s1107_s0 + $0x2c] ss:$20 sps:$4 sm:$0xff]   ;;  %v870_v40 = vld [vmem:[%s1107_s0 + $0x28] ss:$20 sps:$4 sm:$0xff]   ;;  %v877_v46 = vld [vmem:[%s1107_s0 + $0x50] ss:$20 sps:$4 sm:$0xff]  }
  0x10   :  { %722 = vmatpush3.bf16.msra.mxu0 %v841_v14  ;;  %v873_v42 = vld [vmem:[%s1107_s0 + $0x54] ss:$20 sps:$4 sm:$0xff]   ;;  %v886_v45 = vld [vmem:[%s1106_s1 + $0x100] sm:$0xff]   ;;  %v878_v47 = vld [vmem:[%s1107_s0 + $0x58] ss:$20 sps:$4 sm:$0xff]  }
  0x11   :  { %762 = vmatpush3.bf16.msra.mxu1 %v842_v15  ;;  %723 = vmatprep.subr.bf16.mxu0 %v843_v16  ;;  %v879_v44 = vld [vmem:[%s1106_s1 + $0x108] sm:$0xff]   ;;  %v882_v49 = vld [vmem:[%s1107_s0 + $0x84] ss:$20 sps:$4 sm:$0xff]   ;;  %v885_v51 = vld [vmem:[%s1107_s0 + $0x80] ss:$20 sps:$4 sm:$0xff]  }
  0x12   :  { %763 = vmatprep.subr.bf16.mxu1 %v844_v17  ;;  %v884_v50 = vld [vmem:[%s1107_s0 + $0x78] ss:$20 sps:$4 sm:$0xff]   ;;  %v887_v52 = vld [vmem:[%s1107_s0 + $0x10] ss:$20 sps:$4 sm:$0xff]   ;;  %v888_v53 = vld [vmem:[%s1107_s0 + $0x60] ss:$20 sps:$4 sm:$0xff]  }
  0x13   :  { %v889_v54 = vld [vmem:[%s1107_s0 + $0x38] ss:$20 sps:$4 sm:$0xff]   ;;  %v890_v55 = vld [vmem:[%s1107_s0 + $0x88] ss:$20 sps:$4 sm:$0xff]  }
  0x14   :  { %724 = vmatpush3.bf16.msra.mxu0 %v845_v18 }
  0x15   :  { %764 = vmatpush3.bf16.msra.mxu1 %v846_v19  ;;  %725 = vmatprep.subr.bf16.mxu0 %v847_v20  ;;  %v654_v19 = vld [vmem:[%s1108_s2] ss:$0 sm:$0xff] }
  0x16   :  { %765 = vmatprep.subr.bf16.mxu1 %v848_v21 }
  0x18   :  { %726 = vmatpush3.bf16.msra.mxu0 %v849_v22 }
  0x19   :  { %766 = vmatpush3.bf16.msra.mxu1 %v850_v23  ;;  %727 = vmatprep.subr.bf16.mxu0 %v851_v24 }
  0x1a   :  { %767 = vmatprep.subr.bf16.mxu1 %v852_v25 }
  0x1c   :  { %728 = vmatpush3.bf16.msra.mxu0 %v853_v26 }
  0x1d   :  { %768 = vmatpush3.bf16.msra.mxu1 %v854_v27  ;;  %729 = vmatprep.subr.bf16.mxu0 %v855_v28 }
  0x1e   :  { %769 = vmatprep.subr.bf16.mxu1 %v856_v29 }
  0x20   :  { %730 = vmatpush3.bf16.msra.mxu0 %v857_v30 }
  0x21   :  { %770 = vmatpush3.bf16.msra.mxu1 %v858_v31  ;;  %803 = vmatprep.subr.bf16.mxu0 %v865_v36 }
  0x22   :  { %819 = vmatprep.subr.bf16.mxu1 %v865_v36 }
  0x23   :  { %480 = vmatmul.mubr.bf16.vlgmr.msra.gmra.mxu0 %v859_v32 }
  0x24   :  { %545 = vmatmul.mubr.bf16.vlgmr.msra.gmra.mxu1 %v862_v34  ;;  %804 = vmatpush3.bf16.msra.mxu0 %v865_v36 }
  0x25   :  { %823 = vmatpush3.bf16.msra.mxu1 %v865_v36  ;;  %487 = vmatprep.mubr.bf16.mxu0 %v866_v37 }
  0x26   :  { %552 = vmatprep.mubr.bf16.mxu1 %v868_v38  ;;  %805 = vmatprep.subr.bf16.mxu0 %v872_v39 }
  0x27   :  { %820 = vmatprep.subr.bf16.mxu1 %v872_v39 }
  0x28   :  { %806 = vmatpush3.bf16.msra.mxu0 %v872_v39 }
  0x29   :  { %824 = vmatpush3.bf16.msra.mxu1 %v872_v39  ;;  %807 = vmatprep.subr.bf16.mxu0 %v879_v44 }
  0x2a   :  { %821 = vmatprep.subr.bf16.mxu1 %v879_v44 }
  0x2b   :  { %488 = vmatmul.mubr.bf16.gmra.mxu0 %v870_v40 }
  0x2c   :  { %553 = vmatmul.mubr.bf16.gmra.mxu1 %v871_v41  ;;  %495 = vmatprep.mubr.bf16.mxu0 %v873_v42 }
  0x2d   :  { %560 = vmatprep.mubr.bf16.mxu1 %v875_v43  ;;  %808 = vmatpush3.bf16.msra.mxu0 %v879_v44 }
  0x2e   :  { %825 = vmatpush3.bf16.msra.mxu1 %v879_v44  ;;  %809 = vmatprep.subr.bf16.mxu0 %v886_v45 }
  0x2f   :  { %822 = vmatprep.subr.bf16.mxu1 %v886_v45 }
  0x31   :  { %810 = vmatpush3.bf16.msra.mxu0 %v886_v45 }
  0x32   :  { %826 = vmatpush3.bf16.msra.mxu1 %v886_v45 }
  0x33   :  { %496 = vmatmul.mubr.bf16.gmra.mxu0 %v877_v46 }
  0x34   :  { %561 = vmatmul.mubr.bf16.gmra.mxu1 %v878_v47  ;;  %503 = vmatprep.mubr.bf16.mxu0 %v880_v48 }
  0x35   :  { %568 = vmatprep.mubr.bf16.mxu1 %v882_v49 }
  0x3b   :  { %504 = vmatmul.mubr.bf16.gmra.mxu0 %v884_v50 }
  0x3c   :  { %569 = vmatmul.mubr.bf16.gmra.mxu1 %v885_v51  ;;  %811 = vmatprep.mubr.msk.bf16.mxu0 %vm434_vm0, %v887_v52 }
  0x3d   :  { %815 = vmatprep.mubr.msk.bf16.mxu1 %vm434_vm0, %v888_v53 }
  0x43   :  { %812 = vmatmul.mubr.msk.bf16.vlgmr.msra.gmra.mxu0 %vm434_vm0, %v889_v54 }
  0x44   :  { %816 = vmatmul.mubr.msk.bf16.vlgmr.msra.gmra.mxu1 %vm434_vm0, %v890_v55 }
  0xe3   :  { %v731_v56 = vpop.f32.mrf.mxu0 }
  0xe4   :  { %v771_v57 = vpop.f32.mrf.mxu1 }
  0xe5   :  { %v732_v58 = vpop.f32.mrf.mxu0 }
  0xe6   :  { %v772_v59 = vpop.f32.mrf.mxu1  ;;  %v733_v17 = vadd.f32 %v732_v58, %v731_v56 }
  0xe7   :  { %v734_v60 = vpop.f32.mrf.mxu0  ;;  %v773_v34 = vadd.f32 %v772_v59, %v771_v57 }
  0xe8   :  { %v774_v61 = vpop.f32.mrf.mxu1  ;;  %v482_v27 = vadd.f32 %v733_v17, %v654_v19 }
  0xe9   :  { %v735_v62 = vpop.f32.mrf.mxu0 }
  0xea   :  { %v775_v63 = vpop.f32.mrf.mxu1  ;;  %v736_v28 = vadd.f32 %v735_v62, %v734_v60  ;;  %v547_v46 = vadd.f32 %v773_v34, %v482_v27 }
  0xeb   :  { %v737_v0 = vpop.f32.mrf.mxu0  ;;  %v776_v56 = vadd.f32 %v775_v63, %v774_v61 }
  0xec   :  { %v777_v1 = vpop.f32.mrf.mxu1  ;;  %v485_v43 = vadd.f32 %v736_v28, %v654_v19 }
  0xed   :  { %v738_v2 = vpop.f32.mrf.mxu0 }
  0xee   :  { %v778_v3 = vpop.f32.mrf.mxu1  ;;  %v739_v15 = vadd.f32 %v738_v2, %v737_v0  ;;  %v550_v2 = vadd.f32 %v776_v56, %v485_v43 }
  0xef   :  { %v740_v4 = vpop.f32.mrf.mxu0  ;;  %v779_v30 = vadd.f32 %v778_v3, %v777_v1 }
  0xf0   :  { %v780_v5 = vpop.f32.mrf.mxu1  ;;  %v490_v23 = vadd.f32 %v739_v15, %v654_v19 }
  0xf1   :  { %v741_v6 = vpop.f32.mrf.mxu0 }
  0xf2   :  { %v781_v7 = vpop.f32.mrf.mxu1  ;;  %v742_v24 = vadd.f32 %v741_v6, %v740_v4  ;;  %v555_v41 = vadd.f32 %v779_v30, %v490_v23 }
  0xf3   :  { %v743_v8 = vpop.f32.mrf.mxu0  ;;  %v782_v47 = vadd.f32 %v781_v7, %v780_v5 }
  0xf4   :  { %v783_v9 = vpop.f32.mrf.mxu1  ;;  %v493_v38 = vadd.f32 %v742_v24, %v654_v19 }
  0xf5   :  { %v744_v10 = vpop.f32.mrf.mxu0 }
  0xf6   :  { %v784_v11 = vpop.f32.mrf.mxu1  ;;  %v745_v21 = vadd.f32 %v744_v10, %v743_v8  ;;  %v558_v59 = vadd.f32 %v782_v47, %v493_v38 }
  0xf7   :  { %v746_v12 = vpop.f32.mrf.mxu0  ;;  %v785_v44 = vadd.f32 %v784_v11, %v783_v9 }
  0xf8   :  { %v786_v13 = vpop.f32.mrf.mxu1  ;;  %v498_v35 = vadd.f32 %v745_v21, %v654_v19 }
  0xf9   :  { %v747_v14 = vpop.f32.mrf.mxu0 }
  0xfa   :  { %v787_v16 = vpop.f32.mrf.mxu1  ;;  %v748_v36 = vadd.f32 %v747_v14, %v746_v12  ;;  %v563_v55 = vadd.f32 %v785_v44, %v498_v35 }
  0xfb   :  { %v749_v18 = vpop.f32.mrf.mxu0  ;;  %v788_v62 = vadd.f32 %v787_v16, %v786_v13 }
  0xfc   :  { %v789_v20 = vpop.f32.mrf.mxu1  ;;  %v501_v52 = vadd.f32 %v748_v36, %v654_v19 }
  0xfd   :  { %v750_v22 = vpop.f32.mrf.mxu0 }
  0xfe   :  { %v751_v25 = vadd.f32 %v750_v22, %v749_v18  ;;  %v790_v26 = vpop.f32.mrf.mxu1  ;;  %v566_v5 = vadd.f32 %v788_v62, %v501_v52 }
  0xff   :  { %v752_v29 = vpop.f32.mrf.mxu0  ;;  %v791_v32 = vadd.f32 %v790_v26, %v789_v20 }
 0x100   :  { %v506_v31 = vadd.f32 %v751_v25, %v654_v19  ;;  %v792_v33 = vpop.f32.mrf.mxu1 }
 0x101   :  { %v753_v37 = vpop.f32.mrf.mxu0 }
 0x102   :  { %v754_v39 = vadd.f32 %v753_v37, %v752_v29  ;;  %v793_v40 = vpop.f32.mrf.mxu1  ;;  %v571_v42 = vadd.f32 %v791_v32, %v506_v31 }
 0x103   :  { %v813_v45 = vpop.f32.mrf.mxu0  ;;  %v794_v49 = vadd.f32 %v793_v40, %v792_v33 }
 0x104   :  { %v509_v48 = vadd.f32 %v754_v39, %v654_v19  ;;  %v620_v50 = vadd.f32 %v813_v45, %v555_v41  ;;  %v817_v51 = vpop.f32.mrf.mxu1 }
 0x105   :  { %v636_v53 = vadd.f32 %v817_v51, %v571_v42  ;;  %v611_v54 = vpop.f32.mrf.mxu0 }
 0x106   :  { %644 = vst [vmem:[%s1109_s3 + $0x10] sm:$0xff] %v620_v50  ;;  %v612_v57 = vadd.f32 %v611_v54, %v547_v46  ;;  %v627_v58 = vpop.f32.mrf.mxu1  ;;  %v574_v60 = vadd.f32 %v794_v49, %v509_v48 }
 0x107   :  { %648 = vst [vmem:[%s1109_s3 + $0x30] sm:$0xff] %v636_v53  ;;  %v628_v0 = vadd.f32 %v627_v58, %v563_v55  ;;  %v814_v1 = vpop.f32.mrf.mxu0 }
 0x108   :  { %642 = vst [vmem:[%s1109_s3] sm:$0xff] %v612_v57  ;;  %v623_v61 = vadd.f32 %v814_v1, %v558_v59  ;;  %v818_v63 = vpop.f32.mrf.mxu1 }
 0x109   :  { %646 = vst [vmem:[%s1109_s3 + $0x20] sm:$0xff] %v628_v0  ;;  %v639_v3 = vadd.f32 %v818_v63, %v574_v60  ;;  %v614_v4 = vpop.f32.mrf.mxu0 }
 0x10a   :  { %645 = vst [vmem:[%s1109_s3 + $0x18] sm:$0xff] %v623_v61  ;;  %v615_v6 = vadd.f32 %v614_v4, %v550_v2  ;;  %v630_v7 = vpop.f32.mrf.mxu1 }
 0x10b   :  { %649 = vst [vmem:[%s1109_s3 + $0x38] sm:$0xff] %v639_v3  ;;  %v631_v8 = vadd.f32 %v630_v7, %v566_v5 }
 0x10c   :  { %643 = vst [vmem:[%s1109_s3 + $0x8] sm:$0xff] %v615_v6 }
 0x10d   :  { %647 = vst [vmem:[%s1109_s3 + $0x28] sm:$0xff] %v631_v8 }

// kernel: urvos_forward.61
= control target key start
LH: loop header
LB: loop body
LE: loop exit
PB: predicated region body
PF: predicated region fallthrough
CT: control target
= control target key end

     0   :  { %s2492_s12 = smov 0   ;;  %s3036_s0 = inlined_call_operand.vmem [shape: bf16[2,8,32,4], index: 0, kind: input, shape index: {}]   ;;  %s3037_s1 = inlined_call_operand.vmem [shape: bf16[2,8,32,4], index: 1, kind: input, shape index: {}]   ;;  %s3038_s2 = inlined_call_operand.vmem [shape: bf16[2,8,32,4], index: 2, kind: input, shape index: {}]   ;;  %s3039_s3 = inlined_call_operand.vmem [shape: f32[2,8,32,4], index: 3, kind: output, shape index: {}]  }
   0x1 LB: > { %s1973_s13 = sadd.s32 4294967295, %s2470_s12   ;;  %p1977_p0 = scmp.ge.s32.totalorder %s2470_s12, 1  ;;  %s2470_s12 = sphi %s2492_s12, %s13_s12  }
   0x2   : > { %p157_p1 = scmp.lt.s32.totalorder %s2470_s12, 3 }
   0x4   : > { %p158_p2 = pnand %p1977_p0, %p157_p1 }
   0x5   : > { %p191_p3 = scmp.lt.s32.totalorder (!%p158_p2), %s1973_s13, 1 }
   0x6   : > { %161 = sbr.rel (%p158_p2) target bundleno = 805 (0x325), region = 32 }
   0xb   : > { %s3041_s13 = smov (!%p191_p3, %s1973_s13), 1  ;;  %vm328_vm0 = vcmask 31744   ;;  %vm957_vm1 = vcmask 261120  }
   0xc   : > { %s2503_s14 = sshll.u32 %s3041_s13, 7  ;;  %s2071_s24 = sshll.u32 %s3041_s13, 8 }
   0xd   : > { %s2509_s17 = scalar_lea.vmem %s3037_s1, %s2503_s14  ;;  %s2517_s20 = scalar_lea.vmem %s3036_s0, %s2503_s14 }
   0xe   : > { %v2288_v0 = vld [vmem:[%s2509_s17 + $0x8] sm:$0xff]   ;;  %v2289_v1 = vld [vmem:[%s2509_s17 + $0x18] sm:$0xff]   ;;  %v2290_v3 = vld [vmem:[%s2509_s17] sm:$0xff]   ;;  %s2822_s23 = scalar_lea.vmem %s3038_s2, %s2503_s14  ;;  %s2967_s27 = scalar_lea.vmem %s3039_s3, %s2071_s24 }
   0xf   : > { %2264 = vmatprep.subr.msk.bf16.mxu0 %vm328_vm0, %v2288_v0  ;;  %v339_v2 = vsel %vm328_vm0, %v2288_v0, 0  ;;  %2266 = vmatprep.subr.msk.bf16.mxu1 %vm328_vm0, %v2289_v1  ;;  %v420_v4 = vsel %vm328_vm0, %v2289_v1, 0  ;;  %v2291_v5 = vld [vmem:[%s2509_s17 + $0x10] sm:$0xff]   ;;  %v2292_v6 = vld [vmem:[%s2517_s20] sm:$0xff]   ;;  %v336_v8 = vsel %vm328_vm0, %v2290_v3, 0  ;;  %v2296_v9 = vld [vmem:[%s2509_s17 + $0x28] sm:$0xff]  }
  0x10   : > { %2137 = vmatpush3.bf16.xpose.msra.mxu0 %v339_v2  ;;  %2145 = vmatpush3.bf16.xpose.msra.mxu1 %v420_v4  ;;  %v2293_v7 = vld [vmem:[%s2517_s20 + $0x10] sm:$0xff]   ;;  %v417_v10 = vsel %vm328_vm0, %v2291_v5, 0  ;;  %v2297_v11 = vld [vmem:[%s2509_s17 + $0x38] sm:$0xff]   ;;  %v2294_v12 = vld [vmem:[%s2517_s20 + $0x8] sm:$0xff]   ;;  %v501_v15 = vsel %vm328_vm0, %v2296_v9, 0 }
  0x11   : > { %2265 = vmatprep.subr.msk.bf16.mxu0 %vm328_vm0, %v2290_v3  ;;  %2267 = vmatprep.subr.msk.bf16.mxu1 %vm328_vm0, %v2291_v5  ;;  %v2295_v13 = vld [vmem:[%s2517_s20 + $0x18] sm:$0xff]   ;;  %v2298_v14 = vld [vmem:[%s2509_s17 + $0x20] sm:$0xff]   ;;  %v2299_v16 = vld [vmem:[%s2509_s17 + $0x30] sm:$0xff]   ;;  %v582_v17 = vsel %vm328_vm0, %v2297_v11, 0 }
  0x12   : > { %2140 = vmatprep.mubr.msk.bf16.mxu0 %vm328_vm0, %v2292_v6  ;;  %2148 = vmatprep.mubr.msk.bf16.mxu1 %vm328_vm0, %v2293_v7  ;;  %v2300_v18 = vld [vmem:[%s2517_s20 + $0x20] sm:$0xff]   ;;  %v2301_v19 = vld [vmem:[%s2517_s20 + $0x30] sm:$0xff]   ;;  %v498_v20 = vsel %vm328_vm0, %v2298_v14, 0  ;;  %v2304_v21 = vld [vmem:[%s2509_s17 + $0x48] sm:$0xff]   ;;  %v579_v22 = vsel %vm328_vm0, %v2299_v16, 0 }
  0x13   : > { %v2305_v23 = vld [vmem:[%s2509_s17 + $0x58] sm:$0xff]   ;;  %v2302_v24 = vld [vmem:[%s2517_s20 + $0x28] sm:$0xff]   ;;  %v663_v26 = vsel %vm328_vm0, %v2304_v21, 0  ;;  %v2306_v27 = vld [vmem:[%s2509_s17 + $0x40] sm:$0xff]  }
  0x14   : > { %v2303_v25 = vld [vmem:[%s2517_s20 + $0x38] sm:$0xff]   ;;  %v744_v28 = vsel %vm328_vm0, %v2305_v23, 0  ;;  %v2307_v29 = vld [vmem:[%s2509_s17 + $0x50] sm:$0xff]   ;;  %v2308_v30 = vld [vmem:[%s2517_s20 + $0x40] sm:$0xff]   ;;  %v660_v32 = vsel %vm328_vm0, %v2306_v27, 0 }
  0x15   : > { %v2309_v31 = vld [vmem:[%s2517_s20 + $0x50] sm:$0xff]   ;;  %v2312_v33 = vld [vmem:[%s2509_s17 + $0x68] sm:$0xff]   ;;  %v741_v34 = vsel %vm328_vm0, %v2307_v29, 0  ;;  %v2313_v35 = vld [vmem:[%s2509_s17 + $0x78] sm:$0xff]  }
  0x16   : > { %v2310_v36 = vld [vmem:[%s2517_s20 + $0x48] sm:$0xff]   ;;  %v2311_v37 = vld [vmem:[%s2517_s20 + $0x58] sm:$0xff]   ;;  %v825_v38 = vsel %vm328_vm0, %v2312_v33, 0  ;;  %v2314_v39 = vld [vmem:[%s2509_s17 + $0x60] sm:$0xff]   ;;  %v906_v40 = vsel %vm328_vm0, %v2313_v35, 0 }
  0x17   : > { %v2315_v41 = vld [vmem:[%s2509_s17 + $0x70] sm:$0xff]   ;;  %v2316_v42 = vld [vmem:[%s2517_s20 + $0x60] sm:$0xff]   ;;  %v822_v44 = vsel %vm328_vm0, %v2314_v39, 0  ;;  %v2317_v46 = vld [vmem:[%s2517_s20 + $0x68] sm:$0xff]  }
  0x18   : > { %2139 = vmatpush3.bf16.xpose.msra.mxu0 %v336_v8  ;;  %2147 = vmatpush3.bf16.xpose.msra.mxu1 %v417_v10  ;;  %v2318_v43 = vld [vmem:[%s2517_s20 + $0x70] sm:$0xff]   ;;  %v903_v45 = vsel %vm328_vm0, %v2315_v41, 0  ;;  %v2319_v47 = vld [vmem:[%s2517_s20 + $0x78] sm:$0xff]  }
  0x19   : > { %2268 = vmatprep.subr.msk.bf16.mxu0 %vm328_vm0, %v2296_v9  ;;  %2270 = vmatprep.subr.msk.bf16.mxu1 %vm328_vm0, %v2297_v11 }
  0x1f   : > { %2141 = vmatmul.mubr.msk.bf16.vlgmr.msra.gmra.mxu0 %vm328_vm0, %v2294_v12  ;;  %2149 = vmatmul.mubr.msk.bf16.vlgmr.msra.gmra.mxu1 %vm328_vm0, %v2295_v13 }
  0x20   : > { %2153 = vmatpush3.bf16.xpose.msra.mxu0 %v501_v15  ;;  %2161 = vmatpush3.bf16.xpose.msra.mxu1 %v582_v17 }
  0x21   : > { %2269 = vmatprep.subr.msk.bf16.mxu0 %vm328_vm0, %v2298_v14  ;;  %2271 = vmatprep.subr.msk.bf16.mxu1 %vm328_vm0, %v2299_v16 }
  0x22   : > { %2156 = vmatprep.mubr.msk.bf16.mxu0 %vm328_vm0, %v2300_v18  ;;  %2164 = vmatprep.mubr.msk.bf16.mxu1 %vm328_vm0, %v2301_v19 }
  0x28   : > { %2155 = vmatpush3.bf16.xpose.msra.mxu0 %v498_v20  ;;  %2163 = vmatpush3.bf16.xpose.msra.mxu1 %v579_v22 }
  0x29   : > { %2272 = vmatprep.subr.msk.bf16.mxu0 %vm328_vm0, %v2304_v21  ;;  %2274 = vmatprep.subr.msk.bf16.mxu1 %vm328_vm0, %v2305_v23 }
  0x2f   : > { %2157 = vmatmul.mubr.msk.bf16.vlgmr.msra.gmra.mxu0 %vm328_vm0, %v2302_v24  ;;  %2165 = vmatmul.mubr.msk.bf16.vlgmr.msra.gmra.mxu1 %vm328_vm0, %v2303_v25 }
  0x30   : > { %2169 = vmatpush3.bf16.xpose.msra.mxu0 %v663_v26  ;;  %2177 = vmatpush3.bf16.xpose.msra.mxu1 %v744_v28 }
  0x31   : > { %2273 = vmatprep.subr.msk.bf16.mxu0 %vm328_vm0, %v2306_v27  ;;  %2275 = vmatprep.subr.msk.bf16.mxu1 %vm328_vm0, %v2307_v29 }
  0x32   : > { %2172 = vmatprep.mubr.msk.bf16.mxu0 %vm328_vm0, %v2308_v30  ;;  %2180 = vmatprep.mubr.msk.bf16.mxu1 %vm328_vm0, %v2309_v31 }
  0x38   : > { %2171 = vmatpush3.bf16.xpose.msra.mxu0 %v660_v32  ;;  %2179 = vmatpush3.bf16.xpose.msra.mxu1 %v741_v34 }
  0x39   : > { %2276 = vmatprep.subr.msk.bf16.mxu0 %vm328_vm0, %v2312_v33  ;;  %2278 = vmatprep.subr.msk.bf16.mxu1 %vm328_vm0, %v2313_v35 }
  0x3f   : > { %2173 = vmatmul.mubr.msk.bf16.vlgmr.msra.gmra.mxu0 %vm328_vm0, %v2310_v36  ;;  %2181 = vmatmul.mubr.msk.bf16.vlgmr.msra.gmra.mxu1 %vm328_vm0, %v2311_v37 }
  0x40   : > { %2185 = vmatpush3.bf16.xpose.msra.mxu0 %v825_v38  ;;  %2193 = vmatpush3.bf16.xpose.msra.mxu1 %v906_v40 }
  0x41   : > { %2277 = vmatprep.subr.msk.bf16.mxu0 %vm328_vm0, %v2314_v39  ;;  %2279 = vmatprep.subr.msk.bf16.mxu1 %vm328_vm0, %v2315_v41 }
  0x42   : > { %2188 = vmatprep.mubr.msk.bf16.mxu0 %vm328_vm0, %v2316_v42  ;;  %2196 = vmatprep.mubr.msk.bf16.mxu1 %vm328_vm0, %v2318_v43 }
  0x48   : > { %2187 = vmatpush3.bf16.xpose.msra.mxu0 %v822_v44  ;;  %2195 = vmatpush3.bf16.xpose.msra.mxu1 %v903_v45 }
  0x4f   : > { %2189 = vmatmul.mubr.msk.bf16.vlgmr.msra.gmra.mxu0 %vm328_vm0, %v2317_v46  ;;  %2197 = vmatmul.mubr.msk.bf16.vlgmr.msra.gmra.mxu1 %vm328_vm0, %v2319_v47 }
  0xdf   : > { %v2597_v48 = vpop.f32.mrf.mxu0  ;;  %v2599_v49 = vpop.f32.mrf.mxu1 }
  0xe0   : > { %v964_v50 = vsel %vm957_vm1, %v2597_v48, -inf  ;;  %v976_v55 = vsel %vm957_vm1, %v2599_v49, -inf }
  0xe1   : > { %965 = vmax.xlane.f32.xlu0 %v964_v50  ;;  %v2603_v51 = vpop.f32.mrf.mxu0  ;;  %v2605_v52 = vpop.f32.mrf.mxu1 }
  0xe2   : > { %v970_v53 = vsel %vm957_vm1, %v2605_v52, -inf  ;;  %v958_v58 = vsel %vm957_vm1, %v2603_v51, -inf }
  0xe3   : > { %971 = vmax.xlane.f32.xlu1 %v970_v53  ;;  %v2609_v54 = vpop.f32.mrf.mxu0  ;;  %v2615_v57 = vpop.f32.mrf.mxu1 }
  0xe4   : > { %v967_v56 = vsel %vm957_vm1, %v2609_v54, -inf  ;;  %v979_v60 = vsel %vm957_vm1, %v2615_v57, -inf }
  0xe5   : > { %977 = vmax.xlane.f32.xlu0 %v976_v55  ;;  %v2619_v59 = vpop.f32.mrf.mxu0  ;;  %v2623_v61 = vpop.f32.mrf.mxu1 }
  0xe6   : > { %v961_v62 = vsel %vm957_vm1, %v2619_v59, -inf  ;;  %v973_v63 = vsel %vm957_vm1, %v2623_v61, -inf }
  0xe7   : > { %968 = vmax.xlane.f32.xlu1 %v967_v56 }
  0xe9   : > { %959 = vmax.xlane.f32.xlu0 %v958_v58 }
  0xeb   : > { %980 = vmax.xlane.f32.xlu1 %v979_v60 }
  0xed   : > { %962 = vmax.xlane.f32.xlu0 %v961_v62 }
  0xef   : > { %v2629_v0 = vpop.f32.mrf.mxu0  ;;  %v2631_v1 = vpop.f32.mrf.mxu1  ;;  %974 = vmax.xlane.f32.xlu1 %v973_v63 }
  0xf0   : > { %v988_v2 = vsel %vm957_vm1, %v2629_v0, -inf  ;;  %v1000_v4 = vsel %vm957_vm1, %v2631_v1, -inf }
  0xf1   : > { %989 = vmax.xlane.f32.xlu0 %v988_v2  ;;  %v2635_v3 = vpop.f32.mrf.mxu0  ;;  %v2639_v5 = vpop.f32.mrf.mxu1 }
  0xf2   : > { %v982_v9 = vsel %vm957_vm1, %v2635_v3, -inf  ;;  %v994_v12 = vsel %vm957_vm1, %v2639_v5, -inf }
  0xf3   : > { %v2641_v6 = vpop.f32.mrf.mxu0  ;;  %v2645_v8 = vpop.f32.mrf.mxu1 }
  0xf4   : > { %v991_v7 = vsel %vm957_vm1, %v2641_v6, -inf  ;;  %v1003_v10 = vsel %vm957_vm1, %v2645_v8, -inf }
  0xf5   : > { %1001 = vmax.xlane.f32.xlu0 %v1000_v4  ;;  %992 = vmax.xlane.f32.xlu1 %v991_v7  ;;  %v2651_v11 = vpop.f32.mrf.mxu0  ;;  %v2657_v14 = vpop.f32.mrf.mxu1 }
  0xf6   : > { %v985_v13 = vsel %vm957_vm1, %v2651_v11, -inf  ;;  %v997_v17 = vsel %vm957_vm1, %v2657_v14, -inf }
  0xf9   : > { %983 = vmax.xlane.f32.xlu0 %v982_v9  ;;  %1004 = vmax.xlane.f32.xlu1 %v1003_v10 }
  0xfd   : > { %995 = vmax.xlane.f32.xlu0 %v994_v12  ;;  %986 = vmax.xlane.f32.xlu1 %v985_v13 }
  0xff   : > { %v2659_v15 = vpop.f32.mrf.mxu0  ;;  %v2661_v16 = vpop.f32.mrf.mxu1 }
 0x100   : > { %v1012_v18 = vsel %vm957_vm1, %v2659_v15, -inf  ;;  %v1024_v20 = vsel %vm957_vm1, %v2661_v16, -inf }
 0x101   : > { %998 = vmax.xlane.f32.xlu1 %v997_v17  ;;  %1013 = vmax.xlane.f32.xlu0 %v1012_v18  ;;  %v2667_v19 = vpop.f32.mrf.mxu0  ;;  %v2671_v21 = vpop.f32.mrf.mxu1 }
 0x102   : > { %v1006_v25 = vsel %vm957_vm1, %v2667_v19, -inf  ;;  %v1018_v28 = vsel %vm957_vm1, %v2671_v21, -inf }
 0x103   : > { %v2673_v22 = vpop.f32.mrf.mxu0  ;;  %v2677_v24 = vpop.f32.mrf.mxu1 }
 0x104   : > { %v1015_v23 = vsel %vm957_vm1, %v2673_v22, -inf  ;;  %v1027_v26 = vsel %vm957_vm1, %v2677_v24, -inf }
 0x105   : > { %1025 = vmax.xlane.f32.xlu0 %v1024_v20  ;;  %1016 = vmax.xlane.f32.xlu1 %v1015_v23  ;;  %v2683_v27 = vpop.f32.mrf.mxu0  ;;  %v2689_v30 = vpop.f32.mrf.mxu1 }
 0x106   : > { %v1009_v29 = vsel %vm957_vm1, %v2683_v27, -inf  ;;  %v1021_v33 = vsel %vm957_vm1, %v2689_v30, -inf }
 0x109   : > { %1007 = vmax.xlane.f32.xlu0 %v1006_v25  ;;  %1028 = vmax.xlane.f32.xlu1 %v1027_v26 }
 0x10d   : > { %1019 = vmax.xlane.f32.xlu0 %v1018_v28  ;;  %1010 = vmax.xlane.f32.xlu1 %v1009_v29 }
 0x10f   : > { %v2691_v31 = vpop.f32.mrf.mxu0  ;;  %v2693_v32 = vpop.f32.mrf.mxu1 }
 0x110   : > { %v1036_v34 = vsel %vm957_vm1, %v2691_v31, -inf  ;;  %v1048_v45 = vsel %vm957_vm1, %v2693_v32, -inf }
 0x111   : > { %1022 = vmax.xlane.f32.xlu1 %v1021_v33  ;;  %1037 = vmax.xlane.f32.xlu0 %v1036_v34  ;;  %v2699_v35 = vpop.f32.mrf.mxu0  ;;  %v2701_v36 = vpop.f32.mrf.mxu1 }
 0x112   : > { %v1030_v38 = vsel %vm957_vm1, %v2699_v35, -inf  ;;  %v1042_v42 = vsel %vm957_vm1, %v2701_v36, -inf }
 0x113   : > { %v2703_v37 = vpop.f32.mrf.mxu0  ;;  %v2709_v40 = vpop.f32.mrf.mxu1 }
 0x114   : > { %v1039_v39 = vsel %vm957_vm1, %v2703_v37, -inf  ;;  %v1051_v47 = vsel %vm957_vm1, %v2709_v40, -inf }
 0x115   : > { %1031 = vmax.xlane.f32.xlu0 %v1030_v38  ;;  %1040 = vmax.xlane.f32.xlu1 %v1039_v39  ;;  %v2711_v41 = vpop.f32.mrf.mxu0  ;;  %v2717_v44 = vpop.f32.mrf.mxu1 }
 0x116   : > { %v1033_v43 = vsel %vm957_vm1, %v2711_v41, -inf  ;;  %v1045_v46 = vsel %vm957_vm1, %v2717_v44, -inf }
 0x119   : > { %1043 = vmax.xlane.f32.xlu0 %v1042_v42  ;;  %1034 = vmax.xlane.f32.xlu1 %v1033_v43 }
 0x11d   : > { %1049 = vmax.xlane.f32.xlu0 %v1048_v45  ;;  %1046 = vmax.xlane.f32.xlu1 %v1045_v46 }
 0x121   : > { %1052 = vmax.xlane.f32.xlu1 %v1051_v47 }
 0x16a   : > { %v966_v50 = vpop.xlane.xlu0 %965 }
 0x16b   : > { %v1056_v53 = vsub.f32 %v2597_v48, %v966_v50 }
 0x16c   : > { %v972_v56 = vpop.xlane.xlu1 %971 }
 0x16d   : > { %v1090_v55 = vmul.f32 1.442695, %v1056_v53  ;;  %v1058_v62 = vsub.f32 %v2605_v52, %v972_v56 }
 0x16e   : > { %v978_v58 = vpop.xlane.xlu0 %977 }
 0x16f   : > { %2336 = vpow2.f32 %v1090_v55  ;;  %v1060_v60 = vsub.f32 %v2599_v49, %v978_v58  ;;  %v1094_v12 = vmul.f32 1.442695, %v1058_v62 }
 0x170   : > { %v969_v2 = vpop.xlane.xlu1 %968 }
 0x171   : > { %v1098_v63 = vmul.f32 1.442695, %v1060_v60  ;;  %v1057_v4 = vsub.f32 %v2609_v54, %v969_v2 }
 0x172   : > { %v960_v7 = vpop.xlane.xlu0 %959 }
 0x173   : > { %2338 = vpow2.f32 %v1098_v63  ;;  %v1054_v9 = vsub.f32 %v2603_v51, %v960_v7  ;;  %v1092_v10 = vmul.f32 1.442695, %v1057_v4 }
 0x174   : > { %v981_v48 = vpop.xlane.xlu1 %980 }
 0x175   : > { %v1086_v13 = vmul.f32 1.442695, %v1054_v9  ;;  %2340 = vpow2.f32 %v1092_v10  ;;  %v1061_v17 = vsub.f32 %v2615_v57, %v981_v48 }
 0x176   : > { %v963_v18 = vpop.xlane.xlu0 %962 }
 0x177   : > { %2342 = vpow2.f32 %v1086_v13  ;;  %v1055_v49 = vsub.f32 %v2619_v59, %v963_v18  ;;  %v1100_v52 = vmul.f32 1.442695, %v1061_v17 }
 0x178   : > { %2344 = vpow2.f32 %v1094_v12  ;;  %v975_v23 = vpop.xlane.xlu1 %974 }
 0x179   : > { %v1088_v20 = vmul.f32 1.442695, %v1055_v49  ;;  %2346 = vpow2.f32 %v1100_v52  ;;  %v1059_v54 = vsub.f32 %v2623_v61, %v975_v23 }
 0x17a   : > { %v990_v25 = vpop.xlane.xlu0 %989 }
 0x17b   : > { %v1064_v51 = vsub.f32 %v2629_v0, %v990_v25  ;;  %2348 = vpow2.f32 %v1088_v20  ;;  %v1096_v28 = vmul.f32 1.442695, %v1059_v54 }
 0x17c   : > { %v2734_v26 = vpop.eup %2336 }
 0x17d   : > { %v1106_v29 = vmul.f32 1.442695, %v1064_v51  ;;  %v1156_v57 = vsel %vm957_vm1, %v2734_v26, 0.0 }
 0x17e   : > { %v1002_v33 = vpop.xlane.xlu0 %1001  ;;  %v993_v59 = vpop.xlane.xlu1 %992  ;;  %1157 = vadd.xlane.f32.xlu0 %v1156_v57 }
 0x17f   : > { %2350 = vpow2.f32 %v1106_v29  ;;  %v1068_v34 = vsub.f32 %v2631_v1, %v1002_v33  ;;  %v1065_v38 = vsub.f32 %v2641_v6, %v993_v59 }
 0x180   : > { %v2740_v61 = vpop.eup %2338  ;;  %2352 = vpow2.f32 %v1096_v28 }
 0x181   : > { %v1114_v0 = vmul.f32 1.442695, %v1068_v34  ;;  %v1108_v39 = vmul.f32 1.442695, %v1065_v38  ;;  %v1168_v42 = vsel %vm957_vm1, %v2740_v61, 0.0 }
 0x182   : > { %v984_v43 = vpop.xlane.xlu0 %983  ;;  %v1005_v45 = vpop.xlane.xlu1 %1004  ;;  %1169 = vadd.xlane.f32.xlu0 %v1168_v42 }
 0x183   : > { %v2744_v46 = vpop.eup %2340  ;;  %2354 = vpow2.f32 %v1114_v0  ;;  %v1062_v47 = vsub.f32 %v2635_v3, %v984_v43  ;;  %v1069_v1 = vsub.f32 %v2645_v8, %v1005_v45 }
 0x184   : > { %v2748_v50 = vpop.eup %2342  ;;  %2356 = vpow2.f32 %v1108_v39  ;;  %v1159_v6 = vsel %vm957_vm1, %v2744_v46, 0.0 }
 0x185   : > { %v1102_v53 = vmul.f32 1.442695, %v1062_v47  ;;  %v1116_v55 = vmul.f32 1.442695, %v1069_v1  ;;  %1160 = vadd.xlane.f32.xlu1 %v1159_v6  ;;  %v1150_v56 = vsel %vm957_vm1, %v2748_v50, 0.0  ;;  %v2754_v58 = vpop.eup %2344 }
 0x186   : > { %v996_v60 = vpop.xlane.xlu0 %995  ;;  %v987_v62 = vpop.xlane.xlu1 %986  ;;  %1151 = vadd.xlane.f32.xlu0 %v1150_v56  ;;  %v1162_v10 = vsel %vm957_vm1, %v2754_v58, 0.0 }
 0x187   : > { %v2756_v3 = vpop.eup %2346  ;;  %2358 = vpow2.f32 %v1102_v53  ;;  %v1066_v8 = vsub.f32 %v2639_v5, %v996_v60  ;;  %v1063_v63 = vsub.f32 %v2651_v11, %v987_v62 }
 0x188   : > { %2360 = vpow2.f32 %v1116_v55  ;;  %v1171_v2 = vsel %vm957_vm1, %v2756_v3, 0.0  ;;  %v2762_v4 = vpop.eup %2348 }
 0x189   : > { %v1110_v7 = vmul.f32 1.442695, %v1066_v8  ;;  %v1104_v9 = vmul.f32 1.442695, %v1063_v63  ;;  %1172 = vadd.xlane.f32.xlu1 %v1171_v2  ;;  %v1153_v17 = vsel %vm957_vm1, %v2762_v4, 0.0 }
 0x18a   : > { %v999_v12 = vpop.xlane.xlu1 %998  ;;  %v1014_v13 = vpop.xlane.xlu0 %1013  ;;  %1163 = vadd.xlane.f32.xlu0 %v1162_v10 }
 0x18b   : > { %2362 = vpow2.f32 %v1110_v7  ;;  %v1067_v5 = vsub.f32 %v2657_v14, %v999_v12  ;;  %v1072_v11 = vsub.f32 %v2659_v15, %v1014_v13 }
 0x18c   : > { %v2768_v48 = vpop.eup %2350  ;;  %2364 = vpow2.f32 %v1104_v9 }
 0x18d   : > { %v2772_v18 = vpop.eup %2352  ;;  %v1112_v49 = vmul.f32 1.442695, %v1067_v5  ;;  %v1122_v52 = vmul.f32 1.442695, %v1072_v11  ;;  %1154 = vadd.xlane.f32.xlu1 %v1153_v17  ;;  %v1180_v20 = vsel %vm957_vm1, %v2768_v48, 0.0 }
 0x18e   : > { %v1026_v23 = vpop.xlane.xlu0 %1025  ;;  %v1017_v54 = vpop.xlane.xlu1 %1016  ;;  %1181 = vadd.xlane.f32.xlu0 %v1180_v20  ;;  %v1165_v51 = vsel %vm957_vm1, %v2772_v18, 0.0 }
 0x18f   : > { %2366 = vpow2.f32 %v1112_v49  ;;  %v1076_v14 = vsub.f32 %v2661_v16, %v1026_v23  ;;  %v1073_v15 = vsub.f32 %v2673_v22, %v1017_v54 }
 0x190   : > { %v2778_v25 = vpop.eup %2354  ;;  %2368 = vpow2.f32 %v1122_v52  ;;  %v2320_v52 = vld [vmem:[%s2822_s23 + $0x8] sm:$0xff]  }
 0x191   : > { %v2782_v28 = vpop.eup %2356  ;;  %v1130_v29 = vmul.f32 1.442695, %v1076_v14  ;;  %v1124_v57 = vmul.f32 1.442695, %v1073_v15  ;;  %1166 = vadd.xlane.f32.xlu1 %v1165_v51  ;;  %v1192_v33 = vsel %vm957_vm1, %v2778_v25, 0.0  ;;  %2200 = vmatprep.subr.bf16.mxu0 %v2320_v52 }
 0x192   : > { %v1008_v59 = vpop.xlane.xlu0 %1007  ;;  %v1029_v34 = vpop.xlane.xlu1 %1028  ;;  %1193 = vadd.xlane.f32.xlu0 %v1192_v33  ;;  %v1183_v0 = vsel %vm957_vm1, %v2782_v28, 0.0  ;;  %2201 = vmatpush3.bf16.msra.mxu0 %v2320_v52  ;;  %v2321_v33 = vld [vmem:[%s2822_s23] sm:$0xff]  }
 0x193   : > { %2370 = vpow2.f32 %v1130_v29  ;;  %v1070_v16 = vsub.f32 %v2667_v19, %v1008_v59  ;;  %v1077_v22 = vsub.f32 %v2677_v24, %v1029_v34  ;;  %v2322_v59 = vld [vmem:[%s2822_s23 + $0x18] sm:$0xff]   ;;  %2202 = vmatprep.subr.bf16.mxu0 %v2321_v33 }
 0x194   : > { %v2788_v38 = vpop.eup %2358  ;;  %2372 = vpow2.f32 %v1124_v57  ;;  %2208 = vmatprep.subr.bf16.mxu1 %v2322_v59 }
 0x195   : > { %v2792_v39 = vpop.eup %2360  ;;  %v1118_v42 = vmul.f32 1.442695, %v1070_v16  ;;  %v1132_v43 = vmul.f32 1.442695, %v1077_v22  ;;  %1184 = vadd.xlane.f32.xlu1 %v1183_v0  ;;  %v1174_v45 = vsel %vm957_vm1, %v2788_v38, 0.0  ;;  %2209 = vmatpush3.bf16.msra.mxu1 %v2322_v59 }
 0x196   : > { %v1020_v47 = vpop.xlane.xlu0 %1019  ;;  %v1011_v1 = vpop.xlane.xlu1 %1010  ;;  %1175 = vadd.xlane.f32.xlu0 %v1174_v45  ;;  %v1195_v53 = vsel %vm957_vm1, %v2792_v39, 0.0  ;;  %2203 = vmatpush3.bf16.msra.mxu0 %v2321_v33 }
 0x197   : > { %2374 = vpow2.f32 %v1118_v42  ;;  %v1074_v19 = vsub.f32 %v2671_v21, %v1020_v47  ;;  %v1071_v24 = vsub.f32 %v2683_v27, %v1011_v1  ;;  %v2323_v1 = vld [vmem:[%s2822_s23 + $0x10] sm:$0xff]  }
 0x198   : > { %v2798_v6 = vpop.eup %2362  ;;  %2376 = vpow2.f32 %v1132_v43  ;;  %2210 = vmatprep.subr.bf16.mxu1 %v2323_v1 }
 0x199   : > { %v2802_v55 = vpop.eup %2364  ;;  %v1126_v56 = vmul.f32 1.442695, %v1074_v19  ;;  %v1120_v60 = vmul.f32 1.442695, %v1071_v24  ;;  %1196 = vadd.xlane.f32.xlu1 %v1195_v53  ;;  %v1186_v62 = vsel %vm957_vm1, %v2798_v6, 0.0  ;;  %2211 = vmatpush3.bf16.msra.mxu1 %v2323_v1 }
 0x19a   : > { %v1023_v8 = vpop.xlane.xlu1 %1022  ;;  %v1038_v63 = vpop.xlane.xlu0 %1037  ;;  %1187 = vadd.xlane.f32.xlu0 %v1186_v62  ;;  %v1177_v7 = vsel %vm957_vm1, %v2802_v55, 0.0 }
 0x19b   : > { %2378 = vpow2.f32 %v1126_v56  ;;  %v1075_v21 = vsub.f32 %v2689_v30, %v1023_v8  ;;  %v1080_v27 = vsub.f32 %v2691_v31, %v1038_v63 }
 0x19c   : > { %v2808_v2 = vpop.eup %2366  ;;  %2380 = vpow2.f32 %v1120_v60 }
 0x19d   : > { %v2812_v9 = vpop.eup %2368  ;;  %v1128_v10 = vmul.f32 1.442695, %v1075_v21  ;;  %v1138_v12 = vmul.f32 1.442695, %v1080_v27  ;;  %1178 = vadd.xlane.f32.xlu1 %v1177_v7  ;;  %v1189_v49 = vsel %vm957_vm1, %v2808_v2, 0.0 }
 0x19e   : > { %v1204_v13 = vsel %vm957_vm1, %v2812_v9, 0.0  ;;  %v1032_v5 = vpop.xlane.xlu0 %1031  ;;  %v1041_v11 = vpop.xlane.xlu1 %1040 }
 0x19f   : > { %2382 = vpow2.f32 %v1128_v10  ;;  %1205 = vadd.xlane.f32.xlu0 %v1204_v13  ;;  %v1078_v30 = vsub.f32 %v2699_v35, %v1032_v5  ;;  %v1081_v31 = vsub.f32 %v2703_v37, %v1041_v11  ;;  %v2882_v11 = vld [vmem:[%s2822_s23 + $0x38] sm:$0xff]  }
 0x1a0   : > { %v2824_v17 = vpop.eup %2370  ;;  %2384 = vpow2.f32 %v1138_v12  ;;  %2224 = vmatprep.subr.bf16.mxu1 %v2882_v11 }
 0x1a1   : > { %v2829_v20 = vpop.eup %2372  ;;  %v1134_v23 = vmul.f32 1.442695, %v1078_v30  ;;  %v1140_v35 = vmul.f32 1.442695, %v1081_v31  ;;  %1190 = vadd.xlane.f32.xlu1 %v1189_v49  ;;  %v1216_v37 = vsel %vm957_vm1, %v2824_v17, 0.0 }
 0x1a2   : > { %v1044_v54 = vpop.xlane.xlu0 %1043  ;;  %v1035_v14 = vpop.xlane.xlu1 %1034  ;;  %v1207_v57 = vsel %vm957_vm1, %v2829_v20, 0.0 }
 0x1a3   : > { %2386 = vpow2.f32 %v1134_v23  ;;  %1217 = vadd.xlane.f32.xlu0 %v1216_v37  ;;  %v1082_v15 = vsub.f32 %v2701_v36, %v1044_v54  ;;  %v1079_v51 = vsub.f32 %v2711_v41, %v1035_v14 }
 0x1a4   : > { %v2835_v29 = vpop.eup %2374  ;;  %2388 = vpow2.f32 %v1140_v35 }
 0x1a5   : > { %v2841_v34 = vpop.eup %2376  ;;  %v1142_v16 = vmul.f32 1.442695, %v1082_v15  ;;  %v1136_v22 = vmul.f32 1.442695, %v1079_v51  ;;  %1208 = vadd.xlane.f32.xlu1 %v1207_v57  ;;  %v1198_v36 = vsel %vm957_vm1, %v2835_v29, 0.0 }
 0x1a6   : > { %v1050_v0 = vpop.xlane.xlu0 %1049  ;;  %v1047_v41 = vpop.xlane.xlu1 %1046  ;;  %v1219_v47 = vsel %vm957_vm1, %v2841_v34, 0.0 }
 0x1a7   : > { %2390 = vpow2.f32 %v1142_v16  ;;  %1199 = vadd.xlane.f32.xlu0 %v1198_v36  ;;  %v1084_v42 = vsub.f32 %v2693_v32, %v1050_v0  ;;  %v1083_v43 = vsub.f32 %v2717_v44, %v1047_v41 }
 0x1a8   : > { %v2847_v45 = vpop.eup %2378  ;;  %2392 = vpow2.f32 %v1136_v22 }
 0x1a9   : > { %v2852_v19 = vpop.eup %2380  ;;  %v1146_v24 = vmul.f32 1.442695, %v1084_v42  ;;  %v1144_v53 = vmul.f32 1.442695, %v1083_v43  ;;  %1220 = vadd.xlane.f32.xlu1 %v1219_v47  ;;  %v1210_v56 = vsel %vm957_vm1, %v2847_v45, 0.0 }
 0x1aa   : > { %v1053_v32 = vpop.xlane.xlu1 %1052  ;;  %v1201_v44 = vsel %vm957_vm1, %v2852_v19, 0.0 }
 0x1ab   : > { %2394 = vpow2.f32 %v1146_v24  ;;  %1211 = vadd.xlane.f32.xlu0 %v1210_v56  ;;  %v1085_v60 = vsub.f32 %v2709_v40, %v1053_v32  ;;  %v2870_v40 = vld [vmem:[%s2822_s23 + $0x28] sm:$0xff]  }
 0x1ac   : > { %v2859_v62 = vpop.eup %2382  ;;  %2396 = vpow2.f32 %v1144_v53  ;;  %2216 = vmatprep.subr.bf16.mxu0 %v2870_v40 }
 0x1ad   : > { %v2861_v8 = vpop.eup %2384  ;;  %v1148_v63 = vmul.f32 1.442695, %v1085_v60  ;;  %1202 = vadd.xlane.f32.xlu1 %v1201_v44  ;;  %v1213_v7 = vsel %vm957_vm1, %v2859_v62, 0.0 }
 0x1ae   : > { %v1228_v21 = vsel %vm957_vm1, %v2861_v8, 0.0 }
 0x1af   : > { %1229 = vadd.xlane.f32.xlu0 %v1228_v21  ;;  %2398 = vpow2.f32 %v1148_v63 }
 0x1b0   : > { %v2865_v27 = vpop.eup %2386 }
 0x1b1   : > { %v2872_v10 = vpop.eup %2388  ;;  %1214 = vadd.xlane.f32.xlu1 %v1213_v7  ;;  %v1222_v12 = vsel %vm957_vm1, %v2865_v27, 0.0 }
 0x1b2   : > { %v1231_v5 = vsel %vm957_vm1, %v2872_v10, 0.0 }
 0x1b3   : > { %1223 = vadd.xlane.f32.xlu0 %v1222_v12 }
 0x1b4   : > { %v2877_v13 = vpop.eup %2390 }
 0x1b5   : > { %v2884_v30 = vpop.eup %2392  ;;  %1232 = vadd.xlane.f32.xlu1 %v1231_v5  ;;  %v1234_v31 = vsel %vm957_vm1, %v2877_v13, 0.0 }
 0x1b6   : > { %v1225_v52 = vsel %vm957_vm1, %v2884_v30, 0.0 }
 0x1b7   : > { %1235 = vadd.xlane.f32.xlu0 %v1234_v31 }
 0x1b8   : > { %v2889_v49 = vpop.eup %2394 }
 0x1b9   : > { %v2893_v23 = vpop.eup %2396  ;;  %1226 = vadd.xlane.f32.xlu1 %v1225_v52  ;;  %v1240_v35 = vsel %vm957_vm1, %v2889_v49, 0.0 }
 0x1ba   : > { %v1237_v37 = vsel %vm957_vm1, %v2893_v23, 0.0 }
 0x1bb   : > { %1241 = vadd.xlane.f32.xlu0 %v1240_v35 }
 0x1bc   : > { %v2899_v54 = vpop.eup %2398 }
 0x1bd   : > { %1238 = vadd.xlane.f32.xlu1 %v1237_v37  ;;  %v1243_v14 = vsel %vm957_vm1, %v2899_v54, 0.0 }
 0x1c1   : > { %1244 = vadd.xlane.f32.xlu1 %v1243_v14 }
 0x207   : > { %v1158_v15 = vpop.xlane.xlu0 %1157 }
 0x20b   : > { %v1170_v51 = vpop.xlane.xlu0 %1169 }
 0x20e   : > { %v1161_v57 = vpop.xlane.xlu1 %1160 }
 0x20f   : > { %v1152_v33 = vpop.xlane.xlu0 %1151  ;;  %2400 = vrcp.f32 %v1161_v57 }
 0x210   : > { %2402 = vrcp.f32 %v1152_v33 }
 0x211   : > { %2404 = vrcp.f32 %v1158_v15  ;;  %v2325_v15 = vld [vmem:[%s2822_s23 + $0x20] sm:$0xff]  }
 0x212   : > { %v1173_v59 = vpop.xlane.xlu1 %1172 }
 0x213   : > { %v1164_v16 = vpop.xlane.xlu0 %1163 }
 0x216   : > { %v1155_v22 = vpop.xlane.xlu1 %1154 }
 0x217   : > { %2406 = vrcp.f32 %v1155_v22  ;;  %v1182_v36 = vpop.xlane.xlu0 %1181 }
 0x218   : > { %2408 = vrcp.f32 %v1173_v59  ;;  %v2327_v59 = vld [vmem:[%s2822_s23 + $0x30] sm:$0xff]  }
 0x219   : > { %2410 = vrcp.f32 %v1164_v16  ;;  %v2328_v16 = vld [vmem:[%s2822_s23 + $0x48] sm:$0xff]  }
 0x21a   : > { %2412 = vrcp.f32 %v1170_v51  ;;  %v1167_v0 = vpop.xlane.xlu1 %1166 }
 0x21b   : > { %2414 = vrcp.f32 %v1167_v0  ;;  %v1194_v41 = vpop.xlane.xlu0 %1193 }
 0x21c   : > { %v2401_v47 = vpop.eup %2400 }
 0x21d   : > { %v2403_v1 = vpop.eup %2402  ;;  %v1253_v44 = vmul.f32 %v2401_v47, %v2744_v46 }
 0x21e   : > { %v1185_v42 = vpop.xlane.xlu1 %1184  ;;  %v2405_v53 = vpop.eup %2404  ;;  %v1247_v63 = vmul.f32 %v2403_v1, %v2748_v50 }
 0x21f   : > { %v1176_v43 = vpop.xlane.xlu0 %1175  ;;  %2416 = vrcp.f32 %v1185_v42  ;;  %v1251_v5 = vmul.f32 %v2405_v53, %v2734_v26 }
 0x220   : > { %2418 = vrcp.f32 %v1176_v43 }
 0x221   : > { %2420 = vrcp.f32 %v1182_v36  ;;  %v1311_v14 = vpack.c.bf16 %v1253_v44, %v1251_v5 }
 0x222   : > { %v1197_v24 = vpop.xlane.xlu1 %1196 }
 0x223   : > { %v1188_v56 = vpop.xlane.xlu0 %1187 }
 0x224   : > { %v2407_v32 = vpop.eup %2406 }
 0x225   : > { %v2409_v60 = vpop.eup %2408  ;;  %v1249_v21 = vmul.f32 %v2407_v32, %v2762_v4 }
 0x226   : > { %v2411_v7 = vpop.eup %2410  ;;  %v1179_v12 = vpop.xlane.xlu1 %1178  ;;  %v1261_v46 = vmul.f32 %v2409_v60, %v2756_v3 }
 0x227   : > { %v2413_v31 = vpop.eup %2412  ;;  %2422 = vrcp.f32 %v1179_v12  ;;  %v1310_v52 = vpack.c.bf16 %v1249_v21, %v1247_v63  ;;  %v1255_v50 = vmul.f32 %v2411_v7, %v2754_v58  ;;  %v2329_v7 = vld [vmem:[%s2822_s23 + $0x40] sm:$0xff]  }
 0x228   : > { %v2415_v35 = vpop.eup %2414  ;;  %2424 = vrcp.f32 %v1197_v24  ;;  %v1206_v37 = vpop.xlane.xlu0 %1205  ;;  %v1259_v51 = vmul.f32 %v2413_v31, %v2740_v61  ;;  %v2330_v61 = vld [vmem:[%s2822_s23 + $0x58] sm:$0xff]  }
 0x229   : > { %2426 = vrcp.f32 %v1188_v56  ;;  %2204 = vmatprep.mubr.msk.bf16.mxu0 %vm957_vm1, %v1310_v52  ;;  %v1257_v4 = vmul.f32 %v2415_v35, %v2772_v18  ;;  %v2331_v52 = vld [vmem:[%s2822_s23 + $0x50] sm:$0xff]   ;;  %v2332_v35 = vld [vmem:[%s2822_s23 + $0x68] sm:$0xff]  }
 0x22a   : > { %2428 = vrcp.f32 %v1194_v41  ;;  %2205 = vmatmul.mubr.msk.bf16.vlgmr.msra.gmra.mxu0 %vm957_vm1, %v1311_v14  ;;  %v1191_v26 = vpop.xlane.xlu1 %1190  ;;  %v1313_v33 = vpack.c.bf16 %v1261_v46, %v1259_v51 }
 0x22b   : > { %2430 = vrcp.f32 %v1191_v26  ;;  %v1312_v57 = vpack.c.bf16 %v1257_v4, %v1255_v50  ;;  %2217 = vmatpush3.bf16.msra.mxu0 %v2870_v40 }
 0x22c   : > { %v1218_v3 = vpop.xlane.xlu0 %1217  ;;  %2218 = vmatprep.subr.bf16.mxu0 %v2325_v15  ;;  %v2417_v22 = vpop.eup %2416 }
 0x22d   : > { %2212 = vmatprep.mubr.msk.bf16.mxu1 %vm957_vm1, %v1312_v57  ;;  %v2419_v36 = vpop.eup %2418  ;;  %v1269_v43 = vmul.f32 %v2417_v22, %v2782_v28 }
 0x22e   : > { %2213 = vmatmul.mubr.msk.bf16.vlgmr.msra.gmra.mxu1 %vm957_vm1, %v1313_v33  ;;  %v1209_v58 = vpop.xlane.xlu1 %1208  ;;  %v2421_v0 = vpop.eup %2420 }
 0x22f   : > { %2219 = vmatpush3.bf16.msra.mxu0 %v2325_v15  ;;  %2225 = vmatpush3.bf16.msra.mxu1 %v2882_v11  ;;  %2432 = vrcp.f32 %v1209_v58  ;;  %v1263_v11 = vmul.f32 %v2419_v36, %v2788_v38  ;;  %v1267_v56 = vmul.f32 %v2421_v0, %v2768_v48  ;;  %v2333_v36 = vld [vmem:[%s2822_s23 + $0x60] sm:$0xff]  }
 0x230   : > { %v1200_v18 = vpop.xlane.xlu0 %1199  ;;  %2226 = vmatprep.subr.bf16.mxu1 %v2327_v59  ;;  %2232 = vmatprep.subr.bf16.mxu0 %v2328_v16 }
 0x231   : > { %2434 = vrcp.f32 %v1200_v18  ;;  %v1315_v28 = vpack.c.bf16 %v1269_v43, %v1267_v56 }
 0x232   : > { %v1221_v40 = vpop.xlane.xlu1 %1220  ;;  %2436 = vrcp.f32 %v1206_v37 }
 0x233   : > { %2227 = vmatpush3.bf16.msra.mxu1 %v2327_v59 }
 0x234   : > { %v2423_v41 = vpop.eup %2422  ;;  %v1212_v42 = vpop.xlane.xlu0 %1211  ;;  %2240 = vmatprep.subr.bf16.mxu1 %v2330_v61 }
 0x235   : > { %v2425_v47 = vpop.eup %2424  ;;  %v1265_v1 = vmul.f32 %v2423_v41, %v2802_v55 }
 0x236   : > { %v2427_v24 = vpop.eup %2426  ;;  %v1203_v53 = vpop.xlane.xlu1 %1202  ;;  %v1277_v21 = vmul.f32 %v2425_v47, %v2792_v39 }
 0x237   : > { %v2429_v32 = vpop.eup %2428  ;;  %2438 = vrcp.f32 %v1203_v53  ;;  %v1314_v44 = vpack.c.bf16 %v1265_v1, %v1263_v11  ;;  %v1271_v38 = vmul.f32 %v2427_v24, %v2798_v6 }
 0x238   : > { %v2431_v60 = vpop.eup %2430  ;;  %2440 = vrcp.f32 %v1221_v40  ;;  %v1230_v63 = vpop.xlane.xlu0 %1229  ;;  %v1275_v12 = vmul.f32 %v2429_v32, %v2778_v25  ;;  %v2334_v25 = vld [vmem:[%s2822_s23 + $0x78] sm:$0xff]  }
 0x239   : > { %2442 = vrcp.f32 %v1212_v42  ;;  %2220 = vmatprep.mubr.msk.bf16.mxu0 %vm957_vm1, %v1314_v44  ;;  %v1273_v55 = vmul.f32 %v2431_v60, %v2808_v2  ;;  %v2335_v42 = vld [vmem:[%s2822_s23 + $0x70] sm:$0xff]  }
 0x23a   : > { %2444 = vrcp.f32 %v1218_v3  ;;  %2221 = vmatmul.mubr.msk.bf16.vlgmr.msra.gmra.mxu0 %vm957_vm1, %v1315_v28  ;;  %v1215_v48 = vpop.xlane.xlu1 %1214  ;;  %v1317_v31 = vpack.c.bf16 %v1277_v21, %v1275_v12 }
 0x23b   : > { %2446 = vrcp.f32 %v1215_v48  ;;  %v1316_v5 = vpack.c.bf16 %v1273_v55, %v1271_v38  ;;  %2233 = vmatpush3.bf16.msra.mxu0 %v2328_v16 }
 0x23c   : > { %v1224_v39 = vpop.xlane.xlu0 %1223  ;;  %2234 = vmatprep.subr.bf16.mxu0 %v2329_v7  ;;  %v2433_v37 = vpop.eup %2432 }
 0x23d   : > { %2228 = vmatprep.mubr.msk.bf16.mxu1 %vm957_vm1, %v1316_v5  ;;  %v1285_v4 = vmul.f32 %v2433_v37, %v2829_v20 }
 0x23e   : > { %2229 = vmatmul.mubr.msk.bf16.vlgmr.msra.gmra.mxu1 %vm957_vm1, %v1317_v31  ;;  %v1233_v6 = vpop.xlane.xlu1 %1232  ;;  %v2435_v14 = vpop.eup %2434 }
 0x23f   : > { %2235 = vmatpush3.bf16.msra.mxu0 %v2329_v7  ;;  %2241 = vmatpush3.bf16.msra.mxu1 %v2330_v61  ;;  %2448 = vrcp.f32 %v1233_v6  ;;  %v2437_v15 = vpop.eup %2436  ;;  %v1279_v51 = vmul.f32 %v2435_v14, %v2835_v29 }
 0x240   : > { %v1236_v2 = vpop.xlane.xlu0 %1235  ;;  %2242 = vmatprep.subr.bf16.mxu1 %v2331_v52  ;;  %2248 = vmatprep.subr.bf16.mxu0 %v2332_v35  ;;  %2450 = vrcp.f32 %v1224_v39  ;;  %v1283_v16 = vmul.f32 %v2437_v15, %v2812_v9 }
 0x241   : > { %2452 = vrcp.f32 %v1230_v63 }
 0x242   : > { %v1227_v46 = vpop.xlane.xlu1 %1226  ;;  %v1319_v22 = vpack.c.bf16 %v1285_v4, %v1283_v16 }
 0x243   : > { %2454 = vrcp.f32 %v1227_v46  ;;  %2243 = vmatpush3.bf16.msra.mxu1 %v2331_v52 }
 0x244   : > { %v2439_v50 = vpop.eup %2438  ;;  %2256 = vmatprep.subr.bf16.mxu1 %v2334_v25  ;;  %2456 = vrcp.f32 %v1236_v2  ;;  %v1242_v33 = vpop.xlane.xlu0 %1241 }
 0x245   : > { %v2441_v26 = vpop.eup %2440  ;;  %v1281_v57 = vmul.f32 %v2439_v50, %v2852_v19 }
 0x246   : > { %v2443_v3 = vpop.eup %2442  ;;  %v1239_v59 = vpop.xlane.xlu1 %1238  ;;  %v1293_v20 = vmul.f32 %v2441_v26, %v2841_v34 }
 0x247   : > { %v2445_v58 = vpop.eup %2444  ;;  %2458 = vrcp.f32 %v1239_v59  ;;  %v1318_v18 = vpack.c.bf16 %v1281_v57, %v1279_v51  ;;  %v1287_v29 = vmul.f32 %v2443_v3, %v2847_v45 }
 0x248   : > { %v2447_v61 = vpop.eup %2446  ;;  %2460 = vrcp.f32 %v1242_v33  ;;  %v1291_v9 = vmul.f32 %v2445_v58, %v2824_v17 }
 0x249   : > { %2236 = vmatprep.mubr.msk.bf16.mxu0 %vm957_vm1, %v1318_v18  ;;  %v1289_v19 = vmul.f32 %v2447_v61, %v2859_v62 }
 0x24a   : > { %2237 = vmatmul.mubr.msk.bf16.vlgmr.msra.gmra.mxu0 %vm957_vm1, %v1319_v22  ;;  %v1245_v40 = vpop.xlane.xlu1 %1244  ;;  %v1321_v41 = vpack.c.bf16 %v1293_v20, %v1291_v9 }
 0x24b   : > { %2462 = vrcp.f32 %v1245_v40  ;;  %v1320_v0 = vpack.c.bf16 %v1289_v19, %v1287_v29  ;;  %2249 = vmatpush3.bf16.msra.mxu0 %v2332_v35 }
 0x24c   : > { %2250 = vmatprep.subr.bf16.mxu0 %v2333_v36  ;;  %v2449_v34 = vpop.eup %2448 }
 0x24d   : > { %2244 = vmatprep.mubr.msk.bf16.mxu1 %vm957_vm1, %v1320_v0  ;;  %v2451_v43 = vpop.eup %2450  ;;  %v1301_v47 = vmul.f32 %v2449_v34, %v2872_v10 }
 0x24e   : > { %2245 = vmatmul.mubr.msk.bf16.vlgmr.msra.gmra.mxu1 %vm957_vm1, %v1321_v41  ;;  %v2453_v45 = vpop.eup %2452  ;;  %v1295_v17 = vmul.f32 %v2451_v43, %v2865_v27 }
 0x24f   : > { %2251 = vmatpush3.bf16.msra.mxu0 %v2333_v36  ;;  %2257 = vmatpush3.bf16.msra.mxu1 %v2334_v25  ;;  %v1299_v24 = vmul.f32 %v2453_v45, %v2861_v8 }
 0x250   : > { %v2455_v62 = vpop.eup %2454  ;;  %2258 = vmatprep.subr.bf16.mxu1 %v2335_v42 }
 0x251   : > { %v1297_v11 = vmul.f32 %v2455_v62, %v2884_v30  ;;  %v2457_v1 = vpop.eup %2456  ;;  %v1323_v32 = vpack.c.bf16 %v1301_v47, %v1299_v24 }
 0x252   : > { %v1303_v44 = vmul.f32 %v2457_v1, %v2877_v13 }
 0x253   : > { %v1322_v53 = vpack.c.bf16 %v1297_v11, %v1295_v17  ;;  %2259 = vmatpush3.bf16.msra.mxu1 %v2335_v42 }
 0x254   : > { %v2459_v56 = vpop.eup %2458 }
 0x255   : > { %2252 = vmatprep.mubr.msk.bf16.mxu0 %vm957_vm1, %v1322_v53  ;;  %v1305_v60 = vmul.f32 %v2459_v56, %v2893_v23  ;;  %v2461_v10 = vpop.eup %2460 }
 0x256   : > { %2253 = vmatmul.mubr.msk.bf16.vlgmr.msra.gmra.mxu0 %vm957_vm1, %v1323_v32  ;;  %v1307_v30 = vmul.f32 %v2461_v10, %v2889_v49 }
 0x257   : > { %v1324_v27 = vpack.c.bf16 %v1305_v60, %v1303_v44 }
 0x258   : > { %v2463_v63 = vpop.eup %2462 }
 0x259   : > { %v1309_v8 = vmul.f32 %v2463_v63, %v2899_v54  ;;  %2260 = vmatprep.mubr.msk.bf16.mxu1 %vm957_vm1, %v1324_v27 }
 0x25b   : > { %v1325_v28 = vpack.c.bf16 %v1309_v8, %v1307_v30 }
 0x25d   : > { %2261 = vmatmul.mubr.msk.bf16.vlgmr.msra.gmra.mxu1 %vm957_vm1, %v1325_v28 }
 0x2ea   : > { %v2206_v13 = vpop.f32.mrf.mxu0 }
 0x2eb   : > { %1864 = vst.msk [vmem:[%s2967_s27 + $0x10] sm:$0xff] %vm328_vm0, %v2206_v13 }
 0x2ec   : > { %v1378_v49 = vpop.f32.mrf.mxu0 }
 0x2ed   : > { %1862 = vst.msk [vmem:[%s2967_s27] sm:$0xff] %vm328_vm0, %v1378_v49 }
 0x2ee   : > { %v2207_v23 = vpop.f32.mrf.mxu0  ;;  %v2214_v54 = vpop.f32.mrf.mxu1 }
 0x2ef   : > { %1865 = vst.msk [vmem:[%s2967_s27 + $0x18] sm:$0xff] %vm328_vm0, %v2207_v23  ;;  %1868 = vst.msk [vmem:[%s2967_s27 + $0x30] sm:$0xff] %vm328_vm0, %v2214_v54 }
 0x2f0   : > { %v1381_v21 = vpop.f32.mrf.mxu0  ;;  %v1445_v7 = vpop.f32.mrf.mxu1 }
 0x2f1   : > { %1863 = vst.msk [vmem:[%s2967_s27 + $0x8] sm:$0xff] %vm328_vm0, %v1381_v21  ;;  %1866 = vst.msk [vmem:[%s2967_s27 + $0x20] sm:$0xff] %vm328_vm0, %v1445_v7 }
 0x2f2   : > { %v2215_v38 = vpop.f32.mrf.mxu1 }
 0x2f3   : > { %1869 = vst.msk [vmem:[%s2967_s27 + $0x38] sm:$0xff] %vm328_vm0, %v2215_v38 }
 0x2f4   : > { %v1448_v55 = vpop.f32.mrf.mxu1 }
 0x2f5   : > { %1867 = vst.msk [vmem:[%s2967_s27 + $0x28] sm:$0xff] %vm328_vm0, %v1448_v55 }
 0x2fa   : > { %v2222_v48 = vpop.f32.mrf.mxu0 }
 0x2fb   : > { %1872 = vst.msk [vmem:[%s2967_s27 + $0x50] sm:$0xff] %vm328_vm0, %v2222_v48 }
 0x2fc   : > { %v1512_v12 = vpop.f32.mrf.mxu0 }
 0x2fd   : > { %1870 = vst.msk [vmem:[%s2967_s27 + $0x40] sm:$0xff] %vm328_vm0, %v1512_v12 }
 0x2fe   : > { %v2223_v5 = vpop.f32.mrf.mxu0  ;;  %v2230_v39 = vpop.f32.mrf.mxu1 }
 0x2ff   : > { %1873 = vst.msk [vmem:[%s2967_s27 + $0x58] sm:$0xff] %vm328_vm0, %v2223_v5  ;;  %1876 = vst.msk [vmem:[%s2967_s27 + $0x70] sm:$0xff] %vm328_vm0, %v2230_v39 }
 0x300   : > { %v1515_v31 = vpop.f32.mrf.mxu0  ;;  %v1579_v52 = vpop.f32.mrf.mxu1 }
 0x301   : > { %1871 = vst.msk [vmem:[%s2967_s27 + $0x48] sm:$0xff] %vm328_vm0, %v1515_v31  ;;  %1874 = vst.msk [vmem:[%s2967_s27 + $0x60] sm:$0xff] %vm328_vm0, %v1579_v52 }
 0x302   : > { %v2231_v35 = vpop.f32.mrf.mxu1 }
 0x303   : > { %1877 = vst.msk [vmem:[%s2967_s27 + $0x78] sm:$0xff] %vm328_vm0, %v2231_v35 }
 0x304   : > { %v1582_v6 = vpop.f32.mrf.mxu1 }
 0x305   : > { %1875 = vst.msk [vmem:[%s2967_s27 + $0x68] sm:$0xff] %vm328_vm0, %v1582_v6 }
 0x30a   : > { %v2238_v2 = vpop.f32.mrf.mxu0 }
 0x30b   : > { %1880 = vst.msk [vmem:[%s2967_s27 + $0x90] sm:$0xff] %vm328_vm0, %v2238_v2 }
 0x30c   : > { %v1646_v25 = vpop.f32.mrf.mxu0 }
 0x30d   : > { %1878 = vst.msk [vmem:[%s2967_s27 + $0x80] sm:$0xff] %vm328_vm0, %v1646_v25 }
 0x30e   : > { %v2239_v37 = vpop.f32.mrf.mxu0  ;;  %v2246_v14 = vpop.f32.mrf.mxu1 }
 0x30f   : > { %1881 = vst.msk [vmem:[%s2967_s27 + $0x98] sm:$0xff] %vm328_vm0, %v2239_v37  ;;  %1884 = vst.msk [vmem:[%s2967_s27 + $0xb0] sm:$0xff] %vm328_vm0, %v2246_v14 }
 0x310   : > { %v1649_v46 = vpop.f32.mrf.mxu0  ;;  %v1713_v15 = vpop.f32.mrf.mxu1 }
 0x311   : > { %1879 = vst.msk [vmem:[%s2967_s27 + $0x88] sm:$0xff] %vm328_vm0, %v1649_v46  ;;  %1882 = vst.msk [vmem:[%s2967_s27 + $0xa0] sm:$0xff] %vm328_vm0, %v1713_v15 }
 0x312   : > { %v2247_v50 = vpop.f32.mrf.mxu1 }
 0x313   : > { %1885 = vst.msk [vmem:[%s2967_s27 + $0xb8] sm:$0xff] %vm328_vm0, %v2247_v50 }
 0x314   : > { %v1716_v4 = vpop.f32.mrf.mxu1 }
 0x315   : > { %1883 = vst.msk [vmem:[%s2967_s27 + $0xa8] sm:$0xff] %vm328_vm0, %v1716_v4 }
 0x316   : > { %v2254_v26 = vpop.f32.mrf.mxu0 }
 0x317   : > { %1888 = vst.msk [vmem:[%s2967_s27 + $0xd0] sm:$0xff] %vm328_vm0, %v2254_v26 }
 0x318   : > { %v1780_v51 = vpop.f32.mrf.mxu0 }
 0x319   : > { %1886 = vst.msk [vmem:[%s2967_s27 + $0xc0] sm:$0xff] %vm328_vm0, %v1780_v51 }
 0x31a   : > { %v2255_v57 = vpop.f32.mrf.mxu0 }
 0x31b   : > { %1889 = vst.msk [vmem:[%s2967_s27 + $0xd8] sm:$0xff] %vm328_vm0, %v2255_v57 }
 0x31c   : > { %v1783_v3 = vpop.f32.mrf.mxu0 }
 0x31d   : > { %1887 = vst.msk [vmem:[%s2967_s27 + $0xc8] sm:$0xff] %vm328_vm0, %v1783_v3  ;;  %v2262_v33 = vpop.f32.mrf.mxu1 }
 0x31e   : > { %1892 = vst.msk [vmem:[%s2967_s27 + $0xf0] sm:$0xff] %vm328_vm0, %v2262_v33 }
 0x31f   : > { %v1847_v59 = vpop.f32.mrf.mxu1 }
 0x320   : > { %1890 = vst.msk [vmem:[%s2967_s27 + $0xe0] sm:$0xff] %vm328_vm0, %v1847_v59 }
 0x321   : > { %v2263_v16 = vpop.f32.mrf.mxu1 }
 0x322   : > { %1893 = vst.msk [vmem:[%s2967_s27 + $0xf8] sm:$0xff] %vm328_vm0, %v2263_v16 }
 0x323   : > { %v1850_v58 = vpop.f32.mrf.mxu1 }
 0x324   : > { %1891 = vst.msk [vmem:[%s2967_s27 + $0xe8] sm:$0xff] %vm328_vm0, %v1850_v58 }
 0x325 PF: > { %s13_s12 = sadd.s32 1, %s2470_s12  }
 0x326   : > { %p10_p4 = scmp.ge.s32.totalorder %s13_s12, 4  }
 0x328   :  { %12 = sbr.rel (!%p10_p4) target bundleno = 1 (0x1), region = 68 }

// kernel: urvos_forward.62
= control target key start
LH: loop header
LB: loop body
LE: loop exit
PB: predicated region body
PF: predicated region fallthrough
CT: control target
= control target key end

     0   :  { %v347_v1 = vmov 0.0   ;;  %vm348_vm0 = vmmov 0   ;;  %vm178_vm1 = vcmask 261120   ;;  %vm262_vm2 = vcmask 130048   ;;  %s435_s1 = inlined_call_operand.vmem [shape: bf16[288,16], index: 1, kind: input, shape index: {}]   ;;  %s436_s0 = inlined_call_operand.vmem [shape: bf16[8,288], index: 0, kind: input, shape index: {}]   ;;  %s437_s2 = inlined_call_operand.vmem [shape: f32[1,16], index: 2, kind: input, shape index: {}]   ;;  %s438_s3 = inlined_call_operand.vmem [shape: f32[8,16], index: 3, kind: output, shape index: {}]  }
   0x1   :  { %v326_v0 = vld [vmem:[%s435_s1 + $0x78] sm:$0xff]   ;;  %316 = vmatprep.subr.bf16.mxu1 %v347_v1  ;;  %320 = vmatprep.mubr.msk.bf16.mxu1 %vm348_vm0, %v347_v1  ;;  %v328_v3 = vld [vmem:[%s435_s1 + $0x70] sm:$0xff]   ;;  %v330_v5 = vld [vmem:[%s435_s1 + $0x68] sm:$0xff]  }
   0x2   :  { %v327_v2 = vld [vmem:[%s435_s1 + $0x38] sm:$0xff]   ;;  %291 = vmatprep.subr.bf16.mxu0 %v326_v0  ;;  %v329_v4 = vld [vmem:[%s435_s1 + $0x30] sm:$0xff]   ;;  %v331_v6 = vld [vmem:[%s435_s1 + $0x28] sm:$0xff]  }
   0x3   :  { %292 = vmatpush3.bf16.msra.mxu0 %v327_v2  ;;  %v332_v7 = vld [vmem:[%s435_s1 + $0x60] sm:$0xff]   ;;  %v334_v9 = vld [vmem:[%s435_s1 + $0x58] sm:$0xff]   ;;  %v338_v10 = vld [vmem:[%s435_s1 + $0x88] sm:$0xff]  }
   0x4   :  { %293 = vmatprep.subr.bf16.mxu0 %v328_v3  ;;  %v333_v8 = vld [vmem:[%s435_s1 + $0x20] sm:$0xff]   ;;  %v335_v11 = vld [vmem:[%s435_s1 + $0x18] sm:$0xff]   ;;  %317 = vmatpush3.bf16.msra.mxu1 %v338_v10  ;;  %v336_v13 = vld [vmem:[%s435_s1 + $0x50] sm:$0xff]  }
   0x5   :  { %318 = vmatprep.subr.bf16.mxu1 %v347_v1  ;;  %v341_v12 = vld [vmem:[%s435_s1 + $0x80] sm:$0xff]   ;;  %v344_v14 = vld [vmem:[%s436_s0 + $0x8] ss:$0 sps:$4 sm:$0xff]   ;;  %v337_v16 = vld [vmem:[%s435_s1 + $0x10] sm:$0xff]  }
   0x6   :  { %v15_v15 = vld [vmem:[%s436_s0] sm:$0xff]  ;;  %v339_v18 = vld [vmem:[%s435_s1 + $0x48] sm:$0xff]  }
   0x7   :  { %294 = vmatpush3.bf16.msra.mxu0 %v329_v4  ;;  %v270_v17 = vcombine.high %v15_v15, %v15_v15  ;;  %v340_v19 = vld [vmem:[%s435_s1 + $0x8] sm:$0xff]   ;;  %v342_v20 = vld [vmem:[%s435_s1 + $0x40] sm:$0xff]   ;;  %v269_v22 = vcombine.low %v15_v15, %v15_v15 }
   0x8   :  { %295 = vmatprep.subr.bf16.mxu0 %v330_v5  ;;  %319 = vmatpush3.bf16.msra.mxu1 %v341_v12  ;;  %v343_v21 = vld [vmem:[%s435_s1] sm:$0xff]  }
   0x9   :  { %214 = vmatprep.mubr.bf16.mxu0 %v270_v17  ;;  %v268_v28 = vld [vmem:[%s437_s2] ss:$0 sm:$0xff] }
   0xb   :  { %296 = vmatpush3.bf16.msra.mxu0 %v331_v6  ;;  %321 = vmatmul.mubr.msk.bf16.vlgmr.msra.gmra.mxu1 %vm178_vm1, %v344_v14 }
   0xc   :  { %297 = vmatprep.subr.bf16.mxu0 %v332_v7 }
   0xf   :  { %298 = vmatpush3.bf16.msra.mxu0 %v333_v8 }
  0x10   :  { %299 = vmatprep.subr.bf16.mxu0 %v334_v9 }
  0x13   :  { %300 = vmatpush3.bf16.msra.mxu0 %v335_v11 }
  0x14   :  { %301 = vmatprep.subr.bf16.mxu0 %v336_v13 }
  0x17   :  { %302 = vmatpush3.bf16.msra.mxu0 %v337_v16 }
  0x18   :  { %303 = vmatprep.subr.bf16.mxu0 %v339_v18 }
  0x1b   :  { %304 = vmatpush3.bf16.msra.mxu0 %v340_v19 }
  0x1c   :  { %305 = vmatprep.subr.bf16.mxu0 %v342_v20 }
  0x1f   :  { %306 = vmatpush3.bf16.msra.mxu0 %v343_v21 }
  0x22   :  { %215 = vmatmul.mubr.bf16.vlgmr.msra.gmra.mxu0 %v269_v22 }
  0xcb   :  { %v256_v23 = vpop.f32.mrf.mxu1 }
  0xcd   :  { %v322_v24 = vpop.f32.mrf.mxu1 }
  0xcf   :  { %v259_v25 = vpop.f32.mrf.mxu1 }
  0xd1   :  { %v323_v26 = vpop.f32.mrf.mxu1 }
  0xe2   :  { %v307_v27 = vpop.f32.mrf.mxu0 }
  0xe4   :  { %v308_v29 = vpop.f32.mrf.mxu0 }
  0xe5   :  { %v309_v30 = vadd.f32 %v308_v29, %v307_v27 }
  0xe6   :  { %v310_v31 = vpop.f32.mrf.mxu0 }
  0xe7   :  { %v217_v32 = vadd.f32 %v309_v30, %v268_v28 }
  0xe8   :  { %v311_v33 = vpop.f32.mrf.mxu0 }
  0xe9   :  { %v257_v34 = vadd.f32 %v256_v23, %v217_v32 }
  0xeb   :  { %263 = vst.msk [vmem:[%s438_s3] sm:$0xff] %vm262_vm2, %v257_v34 }

// kernel: urvos_forward.63
= control target key start
LH: loop header
LB: loop body
LE: loop exit
PB: predicated region body
PF: predicated region fallthrough
CT: control target
= control target key end

     0   :  { %v175_v0 = vmov 0   ;;  %vm101_vm0 = vcmask 130048   ;;  %s234_s1 = inlined_call_operand.vmem [shape: bf16[144,16], index: 1, kind: input, shape index: {}]   ;;  %s235_s0 = inlined_call_operand.vmem [shape: bf16[8,144], index: 0, kind: input, shape index: {}]   ;;  %s236_s2 = inlined_call_operand.vmem [shape: f32[1,16], index: 2, kind: input, shape index: {}]   ;;  %s237_s3 = inlined_call_operand.vmem [shape: f32[8,16], index: 3, kind: output, shape index: {}]  }
   0x1   :  { %105 = vmatprep.subr.bf16.mxu0 %v175_v0  ;;  %v164_v1 = vld [vmem:[%s234_s1 + $0x38] sm:$0xff]   ;;  %v165_v2 = vld [vmem:[%s234_s1 + $0x30] sm:$0xff]   ;;  %v166_v3 = vld [vmem:[%s234_s1 + $0x28] sm:$0xff]  }
   0x2   :  { %106 = vmatpush1.bf16.msra.mxu0 %v164_v1  ;;  %v15_v4 = vld [vmem:[%s235_s0] sm:$0xff]  ;;  %v168_v7 = vld [vmem:[%s234_s1 + $0x18] sm:$0xff]   ;;  %v169_v8 = vld [vmem:[%s234_s1 + $0x10] sm:$0xff]  }
   0x3   :  { %107 = vmatprep.subr.bf16.mxu0 %v175_v0  ;;  %v167_v5 = vld [vmem:[%s234_s1 + $0x20] sm:$0xff]   ;;  %v152_v6 = vcombine.high %v15_v4, %v15_v4  ;;  %v170_v9 = vld [vmem:[%s234_s1 + $0x8] sm:$0xff]   ;;  %v151_v12 = vcombine.low %v15_v4, %v15_v4 }
   0x4   :  { %v171_v10 = vld [vmem:[%s234_s1] sm:$0xff]  }
   0x5   :  { %162 = vmatprep.mubr.msk.bf16.mxu0 %vm101_vm0, %v152_v6  ;;  %v172_v11 = vld [vmem:[%s234_s1 + $0x40] sm:$0xff]  }
   0x6   :  { %108 = vmatpush1.bf16.msra.mxu0 %v165_v2  ;;  %v150_v13 = vld [vmem:[%s236_s2] ss:$0 sm:$0xff] }
   0x7   :  { %109 = vmatprep.subr.bf16.mxu0 %v175_v0 }
   0xa   :  { %110 = vmatpush1.bf16.msra.mxu0 %v166_v3 }
   0xb   :  { %111 = vmatprep.subr.bf16.mxu0 %v175_v0 }
   0xe   :  { %112 = vmatpush1.bf16.msra.mxu0 %v167_v5 }
   0xf   :  { %113 = vmatprep.subr.bf16.mxu0 %v175_v0 }
  0x12   :  { %114 = vmatpush1.bf16.msra.mxu0 %v168_v7 }
  0x13   :  { %115 = vmatprep.subr.bf16.mxu0 %v175_v0 }
  0x16   :  { %116 = vmatpush1.bf16.msra.mxu0 %v169_v8 }
  0x17   :  { %117 = vmatprep.subr.bf16.mxu0 %v175_v0 }
  0x1a   :  { %118 = vmatpush1.bf16.msra.mxu0 %v170_v9 }
  0x1b   :  { %119 = vmatprep.subr.bf16.mxu0 %v175_v0 }
  0x1e   :  { %120 = vmatpush1.bf16.msra.mxu0 %v171_v10 }
  0x1f   :  { %135 = vmatprep.subr.bf16.mxu0 %v175_v0 }
  0x22   :  { %136 = vmatpush2.bf16.msra.mxu0 %v172_v11 }
  0x25   :  { %138 = vmatmul.mubr.bf16.vlgmr.msra.gmra.mxu0 %v151_v12 }
  0xe5   :  { %v139_v14 = vpop.f32.mrf.mxu0 }
  0xe6   :  { %v140_v15 = vadd.f32 %v150_v13, %v139_v14 }
  0xe7   :  { %v141_v16 = vpop.f32.mrf.mxu0 }
  0xe8   :  { %145 = vst.msk [vmem:[%s237_s3] sm:$0xff] %vm101_vm0, %v140_v15 }
  0xe9   :  { %v142_v17 = vpop.f32.mrf.mxu0 }
  0xeb   :  { %v143_v18 = vpop.f32.mrf.mxu0 }

// kernel: urvos_forward.56
= control target key start
LH: loop header
LB: loop body
LE: loop exit
PB: predicated region body
PF: predicated region fallthrough
CT: control target
= control target key end

     0   :  { %vm372_vm0 = vcmask 523264   ;;  %vm526_vm1 = vcmask 326656   ;;  %s885_s1 = inlined_call_operand.vmem [shape: bf16[576,40], index: 1, kind: input, shape index: {}]   ;;  %s886_s0 = inlined_call_operand.vmem [shape: bf16[32,576], index: 0, kind: input, shape index: {}]   ;;  %s887_s2 = inlined_call_operand.vmem [shape: f32[1,40], index: 2, kind: input, shape index: {}]   ;;  %s888_s3 = inlined_call_operand.vmem [shape: f32[32,40], index: 3, kind: output, shape index: {}]  }
   0x1   :  { %v658_v0 = vld [vmem:[%s885_s1 + $0x78] sm:$0xff]   ;;  %v662_v4 = vld [vmem:[%s885_s1 + $0x70] sm:$0xff]   ;;  %v666_v8 = vld [vmem:[%s885_s1 + $0x68] sm:$0xff]  }
   0x2   :  { %v659_v1 = vld [vmem:[%s885_s1 + $0xf8] sm:$0xff]   ;;  %584 = vmatprep.subr.bf16.mxu0 %v658_v0  ;;  %v663_v5 = vld [vmem:[%s885_s1 + $0xf0] sm:$0xff]   ;;  %v667_v9 = vld [vmem:[%s885_s1 + $0xe8] sm:$0xff]  }
   0x3   :  { %v660_v2 = vld [vmem:[%s885_s1 + $0x38] sm:$0xff]   ;;  %612 = vmatprep.subr.bf16.mxu1 %v659_v1  ;;  %v664_v6 = vld [vmem:[%s885_s1 + $0x30] sm:$0xff]   ;;  %v668_v10 = vld [vmem:[%s885_s1 + $0x28] sm:$0xff]  }
   0x4   :  { %v661_v3 = vld [vmem:[%s885_s1 + $0xb8] sm:$0xff]   ;;  %585 = vmatpush3.bf16.msra.mxu0 %v660_v2  ;;  %v665_v7 = vld [vmem:[%s885_s1 + $0xb0] sm:$0xff]   ;;  %v669_v11 = vld [vmem:[%s885_s1 + $0xa8] sm:$0xff]  }
   0x5   :  { %613 = vmatpush3.bf16.msra.mxu1 %v661_v3  ;;  %586 = vmatprep.subr.bf16.mxu0 %v662_v4  ;;  %v670_v12 = vld [vmem:[%s885_s1 + $0x60] sm:$0xff]   ;;  %v674_v16 = vld [vmem:[%s885_s1 + $0x58] sm:$0xff]   ;;  %v678_v20 = vld [vmem:[%s885_s1 + $0x50] sm:$0xff]  }
   0x6   :  { %614 = vmatprep.subr.bf16.mxu1 %v663_v5  ;;  %v671_v13 = vld [vmem:[%s885_s1 + $0xe0] sm:$0xff]   ;;  %v675_v17 = vld [vmem:[%s885_s1 + $0xd8] sm:$0xff]   ;;  %v679_v21 = vld [vmem:[%s885_s1 + $0xd0] sm:$0xff]  }
   0x7   :  { %v672_v14 = vld [vmem:[%s885_s1 + $0x20] sm:$0xff]   ;;  %v676_v18 = vld [vmem:[%s885_s1 + $0x18] sm:$0xff]   ;;  %v680_v22 = vld [vmem:[%s885_s1 + $0x10] sm:$0xff]  }
   0x8   :  { %587 = vmatpush3.bf16.msra.mxu0 %v664_v6  ;;  %v673_v15 = vld [vmem:[%s885_s1 + $0xa0] sm:$0xff]   ;;  %v677_v19 = vld [vmem:[%s885_s1 + $0x98] sm:$0xff]   ;;  %v681_v23 = vld [vmem:[%s885_s1 + $0x90] sm:$0xff]  }
   0x9   :  { %615 = vmatpush3.bf16.msra.mxu1 %v665_v7  ;;  %588 = vmatprep.subr.bf16.mxu0 %v666_v8  ;;  %v682_v24 = vld [vmem:[%s885_s1 + $0x48] sm:$0xff]   ;;  %v686_v28 = vld [vmem:[%s885_s1 + $0x40] sm:$0xff]   ;;  %v696_v36 = vld [vmem:[%s885_s1 + $0x118] sm:$0xff]  }
   0xa   :  { %616 = vmatprep.subr.bf16.mxu1 %v667_v9  ;;  %v683_v25 = vld [vmem:[%s885_s1 + $0xc8] sm:$0xff]   ;;  %v687_v29 = vld [vmem:[%s885_s1 + $0xc0] sm:$0xff]   ;;  %v697_v37 = vld [vmem:[%s885_s1 + $0x110] sm:$0xff]  }
   0xb   :  { %v684_v26 = vld [vmem:[%s885_s1 + $0x8] sm:$0xff]   ;;  %v688_v30 = vld [vmem:[%s885_s1] sm:$0xff]  }
   0xc   :  { %589 = vmatpush3.bf16.msra.mxu0 %v668_v10  ;;  %v685_v27 = vld [vmem:[%s885_s1 + $0x88] sm:$0xff]   ;;  %v689_v31 = vld [vmem:[%s885_s1 + $0x80] sm:$0xff]  }
   0xd   :  { %617 = vmatpush3.bf16.msra.mxu1 %v669_v11  ;;  %590 = vmatprep.subr.bf16.mxu0 %v670_v12  ;;  %v690_v32 = vld [vmem:[%s886_s0] ss:$20 sps:$4 sm:$0xff]   ;;  %v692_v33 = vld [vmem:[%s886_s0 + $0x4] ss:$20 sps:$4 sm:$0xff]   ;;  %v693_v34 = vld [vmem:[%s886_s0 + $0x8] ss:$20 sps:$4 sm:$0xff]  }
   0xe   :  { %618 = vmatprep.subr.bf16.mxu1 %v671_v13  ;;  %v695_v35 = vld [vmem:[%s886_s0 + $0xc] ss:$20 sps:$4 sm:$0xff]   ;;  %411 = vmatprep.mubr.bf16.mxu0 %v692_v33  ;;  %v700_v39 = vld [vmem:[%s886_s0 + $0x34] ss:$20 sps:$4 sm:$0xff]   ;;  %v703_v42 = vld [vmem:[%s886_s0 + $0x30] ss:$20 sps:$4 sm:$0xff]  }
   0xf   :  { %460 = vmatprep.mubr.bf16.mxu1 %v695_v35  ;;  %v698_v38 = vld [vmem:[%s886_s0 + $0x2c] ss:$20 sps:$4 sm:$0xff]   ;;  %v702_v40 = vld [vmem:[%s886_s0 + $0x28] ss:$20 sps:$4 sm:$0xff]   ;;  %v706_v43 = vld [vmem:[%s886_s0 + $0x10] ss:$20 sps:$4 sm:$0xff]  }
  0x10   :  { %591 = vmatpush3.bf16.msra.mxu0 %v672_v14  ;;  %v704_v41 = vld [vmem:[%s885_s1 + $0x108] sm:$0xff]   ;;  %v705_v44 = vld [vmem:[%s885_s1 + $0x100] sm:$0xff]  }
  0x11   :  { %619 = vmatpush3.bf16.msra.mxu1 %v673_v15  ;;  %592 = vmatprep.subr.bf16.mxu0 %v674_v16  ;;  %v707_v45 = vld [vmem:[%s886_s0 + $0x38] ss:$20 sps:$4 sm:$0xff]   ;;  %v535_v58 = vld [vmem:[%s887_s2] ss:$0 sm:$0xff] }
  0x12   :  { %620 = vmatprep.subr.bf16.mxu1 %v675_v17 }
  0x14   :  { %593 = vmatpush3.bf16.msra.mxu0 %v676_v18 }
  0x15   :  { %621 = vmatpush3.bf16.msra.mxu1 %v677_v19  ;;  %594 = vmatprep.subr.bf16.mxu0 %v678_v20 }
  0x16   :  { %622 = vmatprep.subr.bf16.mxu1 %v679_v21 }
  0x18   :  { %595 = vmatpush3.bf16.msra.mxu0 %v680_v22 }
  0x19   :  { %623 = vmatpush3.bf16.msra.mxu1 %v681_v23  ;;  %596 = vmatprep.subr.bf16.mxu0 %v682_v24 }
  0x1a   :  { %624 = vmatprep.subr.bf16.mxu1 %v683_v25 }
  0x1c   :  { %597 = vmatpush3.bf16.msra.mxu0 %v684_v26 }
  0x1d   :  { %625 = vmatpush3.bf16.msra.mxu1 %v685_v27  ;;  %598 = vmatprep.subr.bf16.mxu0 %v686_v28 }
  0x1e   :  { %626 = vmatprep.subr.bf16.mxu1 %v687_v29 }
  0x20   :  { %599 = vmatpush3.bf16.msra.mxu0 %v688_v30 }
  0x21   :  { %627 = vmatpush3.bf16.msra.mxu1 %v689_v31  ;;  %646 = vmatprep.subr.bf16.mxu0 %v696_v36 }
  0x23   :  { %412 = vmatmul.mubr.bf16.vlgmr.msra.gmra.mxu0 %v690_v32 }
  0x24   :  { %461 = vmatmul.mubr.bf16.vlgmr.msra.gmra.mxu1 %v693_v34  ;;  %647 = vmatpush3.bf16.msra.mxu0 %v696_v36 }
  0x25   :  { %648 = vmatprep.subr.bf16.mxu0 %v697_v37  ;;  %419 = vmatprep.mubr.bf16.mxu0 %v698_v38 }
  0x26   :  { %468 = vmatprep.mubr.bf16.mxu1 %v700_v39 }
  0x28   :  { %649 = vmatpush3.bf16.msra.mxu0 %v697_v37 }
  0x29   :  { %650 = vmatprep.subr.bf16.mxu0 %v704_v41 }
  0x2b   :  { %420 = vmatmul.mubr.bf16.gmra.mxu0 %v702_v40 }
  0x2c   :  { %469 = vmatmul.mubr.bf16.gmra.mxu1 %v703_v42  ;;  %654 = vmatprep.mubr.msk.bf16.mxu0 %vm372_vm0, %v706_v43 }
  0x2d   :  { %651 = vmatpush3.bf16.msra.mxu0 %v704_v41 }
  0x2e   :  { %652 = vmatprep.subr.bf16.mxu0 %v705_v44 }
  0x31   :  { %653 = vmatpush3.bf16.msra.mxu0 %v705_v44 }
  0x34   :  { %655 = vmatmul.mubr.msk.bf16.vlgmr.msra.gmra.mxu0 %vm372_vm0, %v707_v45 }
  0xe3   :  { %v600_v46 = vpop.f32.mrf.mxu0 }
  0xe4   :  { %v628_v47 = vpop.f32.mrf.mxu1 }
  0xe5   :  { %v601_v48 = vpop.f32.mrf.mxu0 }
  0xe6   :  { %v629_v49 = vpop.f32.mrf.mxu1  ;;  %v602_v56 = vadd.f32 %v601_v48, %v600_v46 }
  0xe7   :  { %v603_v50 = vpop.f32.mrf.mxu0  ;;  %v630_v2 = vadd.f32 %v629_v49, %v628_v47 }
  0xe8   :  { %v631_v51 = vpop.f32.mrf.mxu1  ;;  %v414_v1 = vadd.f32 %v602_v56, %v535_v58 }
  0xe9   :  { %v604_v52 = vpop.f32.mrf.mxu0 }
  0xea   :  { %v632_v53 = vpop.f32.mrf.mxu1  ;;  %v605_v3 = vadd.f32 %v604_v52, %v603_v50  ;;  %v463_v13 = vadd.f32 %v630_v2, %v414_v1 }
  0xeb   :  { %v606_v54 = vpop.f32.mrf.mxu0  ;;  %v633_v16 = vadd.f32 %v632_v53, %v631_v51 }
  0xec   :  { %v634_v55 = vpop.f32.mrf.mxu1  ;;  %v417_v11 = vadd.f32 %v605_v3, %v535_v58 }
  0xed   :  { %v607_v57 = vpop.f32.mrf.mxu0 }
  0xee   :  { %v608_v59 = vadd.f32 %v607_v57, %v606_v54  ;;  %v635_v60 = vpop.f32.mrf.mxu1  ;;  %v466_v20 = vadd.f32 %v633_v16, %v417_v11 }
  0xef   :  { %v636_v61 = vadd.f32 %v635_v60, %v634_v55  ;;  %v609_v62 = vpop.f32.mrf.mxu0 }
  0xf0   :  { %v422_v63 = vadd.f32 %v608_v59, %v535_v58  ;;  %v637_v0 = vpop.f32.mrf.mxu1 }
  0xf1   :  { %v610_v4 = vpop.f32.mrf.mxu0 }
  0xf2   :  { %v611_v5 = vadd.f32 %v610_v4, %v609_v62  ;;  %v638_v6 = vpop.f32.mrf.mxu1  ;;  %v471_v7 = vadd.f32 %v636_v61, %v422_v63 }
  0xf3   :  { %v639_v9 = vadd.f32 %v638_v6, %v637_v0 }
  0xf4   :  { %v425_v8 = vadd.f32 %v611_v5, %v535_v58  ;;  %v656_v10 = vpop.f32.mrf.mxu0 }
  0xf5   :  { %v520_v12 = vadd.f32 %v656_v10, %v471_v7 }
  0xf6   :  { %v511_v14 = vpop.f32.mrf.mxu0  ;;  %v474_v15 = vadd.f32 %v639_v9, %v425_v8 }
  0xf7   :  { %529 = vst.msk [vmem:[%s888_s3 + $0x10] sm:$0xff] %vm526_vm1, %v520_v12  ;;  %v512_v17 = vadd.f32 %v511_v14, %v463_v13 }
  0xf8   :  { %v657_v18 = vpop.f32.mrf.mxu0 }
  0xf9   :  { %527 = vst.msk [vmem:[%s888_s3] sm:$0xff] %vm526_vm1, %v512_v17  ;;  %v523_v19 = vadd.f32 %v657_v18, %v474_v15 }
  0xfa   :  { %v514_v21 = vpop.f32.mrf.mxu0 }
  0xfb   :  { %530 = vst.msk [vmem:[%s888_s3 + $0x18] sm:$0xff] %vm526_vm1, %v523_v19  ;;  %v515_v22 = vadd.f32 %v514_v21, %v466_v20 }
  0xfd   :  { %528 = vst.msk [vmem:[%s888_s3 + $0x8] sm:$0xff] %vm526_vm1, %v515_v22 }

// kernel: urvos_forward.47
= control target key start
LH: loop header
LB: loop body
LE: loop exit
PB: predicated region body
PF: predicated region fallthrough
CT: control target
= control target key end

     0   :  { %s1217_s12 = smov 0   ;;  %s1515_s0 = inlined_call_operand.vmem [shape: bf16[2048,49], index: 0, kind: input, shape index: {}]   ;;  %s1516_s1 = inlined_call_operand.vmem [shape: bf16[49,4], index: 1, kind: input, shape index: {}]   ;;  %s1517_s2 = inlined_call_operand.vmem [shape: f32[1,4], index: 2, kind: input, shape index: {}]   ;;  %s1518_s3 = inlined_call_operand.vmem [shape: f32[2048,4], index: 3, kind: output, shape index: {}]  }
   0x1 LB: > { %s947_s13 = sadd.s32 4294967295, %s1194_s12   ;;  %p951_p0 = scmp.ge.s32.totalorder %s1194_s12, 1  ;;  %s1194_s12 = sphi %s1217_s12, %s13_s12  }
   0x2   : > { %p138_p1 = scmp.lt.s32.totalorder %s1194_s12, 5 }
   0x4   : > { %p139_p2 = pnand %p951_p0, %p138_p1 }
   0x5   : > { %s952_s18 = sshll.u32 (!%p139_p2), %s947_s13, 6 }
   0x6   : > { %142 = sbr.rel (%p139_p2) target bundleno = 289 (0x121), region = 32  ;;  %p163_p3 = scmp.lt.s32.totalorder (!%p139_p2), %s952_s18, 255 }
   0xb   : > { %v1152_v0 = vld [vmem:[%s1516_s1 + $0x18] ss:$0 sps:$4 sm:$0x11]   ;;  %vm531_vm0 = vcmask 1040384   ;;  %v1196_v1 = vmov 0   ;;  %v1153_v4 = vld [vmem:[%s1516_s1 + $0x10] sm:$0xff]  }
   0xc   : > { %v533_v2 = vsel %vm531_vm0, 65535, %v1196_v1  ;;  %s1520_s18 = smov (!%p163_p3, %s952_s18), 255  ;;  %v1154_v5 = vld [vmem:[%s1516_s1 + $0x8] sm:$0xff]   ;;  %v1155_v6 = vld [vmem:[%s1516_s1] sm:$0xff]   ;;  %vm434_vm1 = vcmask 400384   ;;  %vm826_vm2 = vcmask 31744  }
   0xd   : > { %v535_v3 = vand.u32 %v1152_v0, %v533_v2  ;;  %s953_s21 = sshll.u32 %s1520_s18, 2  ;;  %s955_s27 = sshll.u32 %s1520_s18, 3  ;;  %v1313_v39 = vld [vmem:[%s1517_s2] ss:$0 sm:$0xff] }
   0xe   : > { %s1243_s26 = scalar_lea.vmem %s1515_s0, %s953_s21  ;;  %s1318_s5 = scalar_lea.vmem %s1518_s3, %s955_s27 }
   0xf   : > { %1063 = vmatprep.subr.bf16.mxu0 %v535_v3  ;;  %1135 = vmatprep.subr.bf16.mxu1 %v535_v3  ;;  %v1156_v7 = vld [vmem:[%s1243_s26] sm:$0xff]   ;;  %v1158_v9 = vld [vmem:[%s1243_s26 + $0x8] sm:$0xff]   ;;  %v1160_v11 = vld [vmem:[%s1243_s26 + $0x10] sm:$0xff]  }
  0x10   : > { %1064 = vmatpush3.bf16.msra.mxu0 %v535_v3  ;;  %1139 = vmatpush3.bf16.msra.mxu1 %v535_v3  ;;  %v1157_v8 = vld [vmem:[%s1243_s26 + $0x80] sm:$0xff]   ;;  %v1159_v10 = vld [vmem:[%s1243_s26 + $0x88] sm:$0xff]   ;;  %v1161_v12 = vld [vmem:[%s1243_s26 + $0x90] sm:$0xff]  }
  0x11   : > { %1065 = vmatprep.subr.bf16.mxu0 %v1153_v4  ;;  %1136 = vmatprep.subr.bf16.mxu1 %v1153_v4  ;;  %v1162_v13 = vld [vmem:[%s1243_s26 + $0x18] sm:$0xff]   ;;  %v1164_v15 = vld [vmem:[%s1243_s26 + $0x20] sm:$0xff]   ;;  %v1166_v17 = vld [vmem:[%s1243_s26 + $0x28] sm:$0xff]  }
  0x12   : > { %1071 = vmatprep.mubr.msk.bf16.mxu0 %vm434_vm1, %v1156_v7  ;;  %1103 = vmatprep.mubr.msk.bf16.mxu1 %vm434_vm1, %v1157_v8  ;;  %v1163_v14 = vld [vmem:[%s1243_s26 + $0x98] sm:$0xff]   ;;  %v1165_v16 = vld [vmem:[%s1243_s26 + $0xa0] sm:$0xff]   ;;  %v1167_v18 = vld [vmem:[%s1243_s26 + $0xa8] sm:$0xff]  }
  0x13   : > { %v1168_v19 = vld [vmem:[%s1243_s26 + $0x30] sm:$0xff]   ;;  %v1170_v21 = vld [vmem:[%s1243_s26 + $0x38] sm:$0xff]   ;;  %v1172_v23 = vld [vmem:[%s1243_s26 + $0x40] sm:$0xff]  }
  0x14   : > { %1066 = vmatpush3.bf16.msra.mxu0 %v1153_v4  ;;  %1140 = vmatpush3.bf16.msra.mxu1 %v1153_v4  ;;  %v1169_v20 = vld [vmem:[%s1243_s26 + $0xb0] sm:$0xff]   ;;  %v1171_v22 = vld [vmem:[%s1243_s26 + $0xb8] sm:$0xff]   ;;  %v1173_v24 = vld [vmem:[%s1243_s26 + $0xc0] sm:$0xff]  }
  0x15   : > { %1067 = vmatprep.subr.bf16.mxu0 %v1154_v5  ;;  %1137 = vmatprep.subr.bf16.mxu1 %v1154_v5  ;;  %v1174_v25 = vld [vmem:[%s1243_s26 + $0x48] sm:$0xff]   ;;  %v1176_v27 = vld [vmem:[%s1243_s26 + $0x50] sm:$0xff]   ;;  %v1178_v29 = vld [vmem:[%s1243_s26 + $0x58] sm:$0xff]  }
  0x16   : > { %v1175_v26 = vld [vmem:[%s1243_s26 + $0xc8] sm:$0xff]   ;;  %v1177_v28 = vld [vmem:[%s1243_s26 + $0xd0] sm:$0xff]   ;;  %v1179_v30 = vld [vmem:[%s1243_s26 + $0xd8] sm:$0xff]  }
  0x17   : > { %v1180_v31 = vld [vmem:[%s1243_s26 + $0x60] sm:$0xff]   ;;  %v1182_v33 = vld [vmem:[%s1243_s26 + $0x68] sm:$0xff]   ;;  %v1184_v35 = vld [vmem:[%s1243_s26 + $0x70] sm:$0xff]  }
  0x18   : > { %1068 = vmatpush3.bf16.msra.mxu0 %v1154_v5  ;;  %1141 = vmatpush3.bf16.msra.mxu1 %v1154_v5  ;;  %v1181_v32 = vld [vmem:[%s1243_s26 + $0xe0] sm:$0xff]   ;;  %v1183_v34 = vld [vmem:[%s1243_s26 + $0xe8] sm:$0xff]   ;;  %v1185_v36 = vld [vmem:[%s1243_s26 + $0xf0] sm:$0xff]  }
  0x19   : > { %1069 = vmatprep.subr.bf16.mxu0 %v1155_v6  ;;  %1138 = vmatprep.subr.bf16.mxu1 %v1155_v6  ;;  %v1186_v37 = vld [vmem:[%s1243_s26 + $0x78] sm:$0xff]  }
  0x1a   : > { %v1187_v38 = vld [vmem:[%s1243_s26 + $0xf8] sm:$0xff]  }
  0x1c   : > { %1070 = vmatpush3.bf16.msra.mxu0 %v1155_v6  ;;  %1142 = vmatpush3.bf16.msra.mxu1 %v1155_v6 }
  0x1f   : > { %1072 = vmatmul.mubr.msk.bf16.vlgmr.msra.gmra.mxu0 %vm434_vm1, %v1158_v9  ;;  %1104 = vmatmul.mubr.msk.bf16.vlgmr.msra.gmra.mxu1 %vm434_vm1, %v1159_v10 }
  0x20   : > { %1075 = vmatprep.mubr.msk.bf16.mxu0 %vm434_vm1, %v1160_v11  ;;  %1107 = vmatprep.mubr.msk.bf16.mxu1 %vm434_vm1, %v1161_v12 }
  0x27   : > { %1076 = vmatmul.mubr.msk.bf16.gmra.mxu0 %vm434_vm1, %v1162_v13  ;;  %1108 = vmatmul.mubr.msk.bf16.gmra.mxu1 %vm434_vm1, %v1163_v14 }
  0x28   : > { %1079 = vmatprep.mubr.msk.bf16.mxu0 %vm434_vm1, %v1164_v15  ;;  %1111 = vmatprep.mubr.msk.bf16.mxu1 %vm434_vm1, %v1165_v16 }
  0x2f   : > { %1080 = vmatmul.mubr.msk.bf16.gmra.mxu0 %vm434_vm1, %v1166_v17  ;;  %1112 = vmatmul.mubr.msk.bf16.gmra.mxu1 %vm434_vm1, %v1167_v18 }
  0x30   : > { %1083 = vmatprep.mubr.msk.bf16.mxu0 %vm434_vm1, %v1168_v19  ;;  %1115 = vmatprep.mubr.msk.bf16.mxu1 %vm434_vm1, %v1169_v20 }
  0x37   : > { %1084 = vmatmul.mubr.msk.bf16.gmra.mxu0 %vm434_vm1, %v1170_v21  ;;  %1116 = vmatmul.mubr.msk.bf16.gmra.mxu1 %vm434_vm1, %v1171_v22 }
  0x38   : > { %1087 = vmatprep.mubr.msk.bf16.mxu0 %vm434_vm1, %v1172_v23  ;;  %1119 = vmatprep.mubr.msk.bf16.mxu1 %vm434_vm1, %v1173_v24 }
  0x3f   : > { %1088 = vmatmul.mubr.msk.bf16.gmra.mxu0 %vm434_vm1, %v1174_v25  ;;  %1120 = vmatmul.mubr.msk.bf16.gmra.mxu1 %vm434_vm1, %v1175_v26 }
  0x40   : > { %1091 = vmatprep.mubr.msk.bf16.mxu0 %vm434_vm1, %v1176_v27  ;;  %1123 = vmatprep.mubr.msk.bf16.mxu1 %vm434_vm1, %v1177_v28 }
  0x47   : > { %1092 = vmatmul.mubr.msk.bf16.gmra.mxu0 %vm434_vm1, %v1178_v29  ;;  %1124 = vmatmul.mubr.msk.bf16.gmra.mxu1 %vm434_vm1, %v1179_v30 }
  0x48   : > { %1095 = vmatprep.mubr.msk.bf16.mxu0 %vm434_vm1, %v1180_v31  ;;  %1127 = vmatprep.mubr.msk.bf16.mxu1 %vm434_vm1, %v1181_v32 }
  0x4f   : > { %1096 = vmatmul.mubr.msk.bf16.gmra.mxu0 %vm434_vm1, %v1182_v33  ;;  %1128 = vmatmul.mubr.msk.bf16.gmra.mxu1 %vm434_vm1, %v1183_v34 }
  0x50   : > { %1099 = vmatprep.mubr.msk.bf16.mxu0 %vm434_vm1, %v1184_v35  ;;  %1131 = vmatprep.mubr.msk.bf16.mxu1 %vm434_vm1, %v1185_v36 }
  0x57   : > { %1100 = vmatmul.mubr.msk.bf16.gmra.mxu0 %vm434_vm1, %v1186_v37  ;;  %1132 = vmatmul.mubr.msk.bf16.gmra.mxu1 %vm434_vm1, %v1187_v38 }
  0xdf   : > { %v1073_v40 = vpop.f32.mrf.mxu0  ;;  %v1105_v41 = vpop.f32.mrf.mxu1 }
  0xe0   : > { %v580_v42 = vadd.f32 %v1073_v40, %v1313_v39  ;;  %v708_v43 = vadd.f32 %v1105_v41, %v1313_v39 }
  0xe1   : > { %v571_v44 = vpop.f32.mrf.mxu0  ;;  %v699_v45 = vpop.f32.mrf.mxu1 }
  0xe2   : > { %829 = vst.msk [vmem:[%s1318_s5 + $0x10] sm:$0xff] %vm826_vm2, %v580_v42  ;;  %861 = vst.msk [vmem:[%s1318_s5 + $0x110] sm:$0xff] %vm826_vm2, %v708_v43  ;;  %v572_v46 = vadd.f32 %v1313_v39, %v571_v44  ;;  %v700_v47 = vadd.f32 %v1313_v39, %v699_v45 }
  0xe3   : > { %v1074_v48 = vpop.f32.mrf.mxu0  ;;  %v1106_v49 = vpop.f32.mrf.mxu1 }
  0xe4   : > { %827 = vst.msk [vmem:[%s1318_s5] sm:$0xff] %vm826_vm2, %v572_v46  ;;  %859 = vst.msk [vmem:[%s1318_s5 + $0x100] sm:$0xff] %vm826_vm2, %v700_v47  ;;  %v583_v50 = vadd.f32 %v1074_v48, %v1313_v39  ;;  %v711_v51 = vadd.f32 %v1106_v49, %v1313_v39 }
  0xe5   : > { %v574_v52 = vpop.f32.mrf.mxu0  ;;  %v702_v53 = vpop.f32.mrf.mxu1 }
  0xe6   : > { %830 = vst.msk [vmem:[%s1318_s5 + $0x18] sm:$0xff] %vm826_vm2, %v583_v50  ;;  %862 = vst.msk [vmem:[%s1318_s5 + $0x118] sm:$0xff] %vm826_vm2, %v711_v51  ;;  %v575_v54 = vadd.f32 %v1313_v39, %v574_v52  ;;  %v703_v55 = vadd.f32 %v1313_v39, %v702_v53 }
  0xe7   : > { %v1077_v56 = vpop.f32.mrf.mxu0  ;;  %v1109_v57 = vpop.f32.mrf.mxu1 }
  0xe8   : > { %828 = vst.msk [vmem:[%s1318_s5 + $0x8] sm:$0xff] %vm826_vm2, %v575_v54  ;;  %860 = vst.msk [vmem:[%s1318_s5 + $0x108] sm:$0xff] %vm826_vm2, %v703_v55  ;;  %v596_v58 = vadd.f32 %v1077_v56, %v1313_v39  ;;  %v724_v59 = vadd.f32 %v1109_v57, %v1313_v39 }
  0xe9   : > { %v587_v60 = vpop.f32.mrf.mxu0  ;;  %v715_v61 = vpop.f32.mrf.mxu1 }
  0xea   : > { %833 = vst.msk [vmem:[%s1318_s5 + $0x30] sm:$0xff] %vm826_vm2, %v596_v58  ;;  %865 = vst.msk [vmem:[%s1318_s5 + $0x130] sm:$0xff] %vm826_vm2, %v724_v59  ;;  %v588_v62 = vadd.f32 %v1313_v39, %v587_v60  ;;  %v716_v63 = vadd.f32 %v1313_v39, %v715_v61 }
  0xeb   : > { %v1078_v0 = vpop.f32.mrf.mxu0  ;;  %v1110_v1 = vpop.f32.mrf.mxu1 }
  0xec   : > { %831 = vst.msk [vmem:[%s1318_s5 + $0x20] sm:$0xff] %vm826_vm2, %v588_v62  ;;  %863 = vst.msk [vmem:[%s1318_s5 + $0x120] sm:$0xff] %vm826_vm2, %v716_v63  ;;  %v599_v2 = vadd.f32 %v1078_v0, %v1313_v39  ;;  %v727_v3 = vadd.f32 %v1110_v1, %v1313_v39 }
  0xed   : > { %v590_v4 = vpop.f32.mrf.mxu0  ;;  %v718_v5 = vpop.f32.mrf.mxu1 }
  0xee   : > { %834 = vst.msk [vmem:[%s1318_s5 + $0x38] sm:$0xff] %vm826_vm2, %v599_v2  ;;  %866 = vst.msk [vmem:[%s1318_s5 + $0x138] sm:$0xff] %vm826_vm2, %v727_v3  ;;  %v591_v6 = vadd.f32 %v1313_v39, %v590_v4  ;;  %v719_v7 = vadd.f32 %v1313_v39, %v718_v5 }
  0xef   : > { %v1081_v8 = vpop.f32.mrf.mxu0  ;;  %v1113_v9 = vpop.f32.mrf.mxu1 }
  0xf0   : > { %832 = vst.msk [vmem:[%s1318_s5 + $0x28] sm:$0xff] %vm826_vm2, %v591_v6  ;;  %864 = vst.msk [vmem:[%s1318_s5 + $0x128] sm:$0xff] %vm826_vm2, %v719_v7  ;;  %v612_v10 = vadd.f32 %v1081_v8, %v1313_v39  ;;  %v740_v11 = vadd.f32 %v1113_v9, %v1313_v39 }
  0xf1   : > { %v603_v12 = vpop.f32.mrf.mxu0  ;;  %v731_v13 = vpop.f32.mrf.mxu1 }
  0xf2   : > { %837 = vst.msk [vmem:[%s1318_s5 + $0x50] sm:$0xff] %vm826_vm2, %v612_v10  ;;  %869 = vst.msk [vmem:[%s1318_s5 + $0x150] sm:$0xff] %vm826_vm2, %v740_v11  ;;  %v604_v14 = vadd.f32 %v1313_v39, %v603_v12  ;;  %v732_v15 = vadd.f32 %v1313_v39, %v731_v13 }
  0xf3   : > { %v1082_v16 = vpop.f32.mrf.mxu0  ;;  %v1114_v17 = vpop.f32.mrf.mxu1 }
  0xf4   : > { %835 = vst.msk [vmem:[%s1318_s5 + $0x40] sm:$0xff] %vm826_vm2, %v604_v14  ;;  %867 = vst.msk [vmem:[%s1318_s5 + $0x140] sm:$0xff] %vm826_vm2, %v732_v15  ;;  %v615_v18 = vadd.f32 %v1082_v16, %v1313_v39  ;;  %v743_v19 = vadd.f32 %v1114_v17, %v1313_v39 }
  0xf5   : > { %v606_v20 = vpop.f32.mrf.mxu0  ;;  %v734_v21 = vpop.f32.mrf.mxu1 }
  0xf6   : > { %838 = vst.msk [vmem:[%s1318_s5 + $0x58] sm:$0xff] %vm826_vm2, %v615_v18  ;;  %870 = vst.msk [vmem:[%s1318_s5 + $0x158] sm:$0xff] %vm826_vm2, %v743_v19  ;;  %v607_v22 = vadd.f32 %v1313_v39, %v606_v20  ;;  %v735_v23 = vadd.f32 %v1313_v39, %v734_v21 }
  0xf7   : > { %v1085_v24 = vpop.f32.mrf.mxu0  ;;  %v1117_v25 = vpop.f32.mrf.mxu1 }
  0xf8   : > { %836 = vst.msk [vmem:[%s1318_s5 + $0x48] sm:$0xff] %vm826_vm2, %v607_v22  ;;  %868 = vst.msk [vmem:[%s1318_s5 + $0x148] sm:$0xff] %vm826_vm2, %v735_v23  ;;  %v628_v26 = vadd.f32 %v1085_v24, %v1313_v39  ;;  %v756_v27 = vadd.f32 %v1117_v25, %v1313_v39 }
  0xf9   : > { %v619_v28 = vpop.f32.mrf.mxu0  ;;  %v747_v29 = vpop.f32.mrf.mxu1 }
  0xfa   : > { %841 = vst.msk [vmem:[%s1318_s5 + $0x70] sm:$0xff] %vm826_vm2, %v628_v26  ;;  %873 = vst.msk [vmem:[%s1318_s5 + $0x170] sm:$0xff] %vm826_vm2, %v756_v27  ;;  %v620_v30 = vadd.f32 %v1313_v39, %v619_v28  ;;  %v748_v31 = vadd.f32 %v1313_v39, %v747_v29 }
  0xfb   : > { %v1086_v32 = vpop.f32.mrf.mxu0  ;;  %v1118_v33 = vpop.f32.mrf.mxu1 }
  0xfc   : > { %839 = vst.msk [vmem:[%s1318_s5 + $0x60] sm:$0xff] %vm826_vm2, %v620_v30  ;;  %871 = vst.msk [vmem:[%s1318_s5 + $0x160] sm:$0xff] %vm826_vm2, %v748_v31  ;;  %v631_v34 = vadd.f32 %v1086_v32, %v1313_v39  ;;  %v759_v35 = vadd.f32 %v1118_v33, %v1313_v39 }
  0xfd   : > { %v622_v36 = vpop.f32.mrf.mxu0  ;;  %v750_v37 = vpop.f32.mrf.mxu1 }
  0xfe   : > { %842 = vst.msk [vmem:[%s1318_s5 + $0x78] sm:$0xff] %vm826_vm2, %v631_v34  ;;  %874 = vst.msk [vmem:[%s1318_s5 + $0x178] sm:$0xff] %vm826_vm2, %v759_v35  ;;  %v623_v38 = vadd.f32 %v1313_v39, %v622_v36  ;;  %v751_v40 = vadd.f32 %v1313_v39, %v750_v37 }
  0xff   : > { %v1089_v41 = vpop.f32.mrf.mxu0  ;;  %v1121_v42 = vpop.f32.mrf.mxu1 }
 0x100   : > { %840 = vst.msk [vmem:[%s1318_s5 + $0x68] sm:$0xff] %vm826_vm2, %v623_v38  ;;  %872 = vst.msk [vmem:[%s1318_s5 + $0x168] sm:$0xff] %vm826_vm2, %v751_v40  ;;  %v644_v43 = vadd.f32 %v1089_v41, %v1313_v39  ;;  %v772_v44 = vadd.f32 %v1121_v42, %v1313_v39 }
 0x101   : > { %v635_v45 = vpop.f32.mrf.mxu0  ;;  %v763_v46 = vpop.f32.mrf.mxu1 }
 0x102   : > { %845 = vst.msk [vmem:[%s1318_s5 + $0x90] sm:$0xff] %vm826_vm2, %v644_v43  ;;  %877 = vst.msk [vmem:[%s1318_s5 + $0x190] sm:$0xff] %vm826_vm2, %v772_v44  ;;  %v636_v47 = vadd.f32 %v1313_v39, %v635_v45  ;;  %v764_v48 = vadd.f32 %v1313_v39, %v763_v46 }
 0x103   : > { %v1090_v49 = vpop.f32.mrf.mxu0  ;;  %v1122_v50 = vpop.f32.mrf.mxu1 }
 0x104   : > { %843 = vst.msk [vmem:[%s1318_s5 + $0x80] sm:$0xff] %vm826_vm2, %v636_v47  ;;  %875 = vst.msk [vmem:[%s1318_s5 + $0x180] sm:$0xff] %vm826_vm2, %v764_v48  ;;  %v647_v51 = vadd.f32 %v1090_v49, %v1313_v39  ;;  %v775_v52 = vadd.f32 %v1122_v50, %v1313_v39 }
 0x105   : > { %v638_v53 = vpop.f32.mrf.mxu0  ;;  %v766_v54 = vpop.f32.mrf.mxu1 }
 0x106   : > { %846 = vst.msk [vmem:[%s1318_s5 + $0x98] sm:$0xff] %vm826_vm2, %v647_v51  ;;  %878 = vst.msk [vmem:[%s1318_s5 + $0x198] sm:$0xff] %vm826_vm2, %v775_v52  ;;  %v639_v55 = vadd.f32 %v1313_v39, %v638_v53  ;;  %v767_v56 = vadd.f32 %v1313_v39, %v766_v54 }
 0x107   : > { %v1093_v57 = vpop.f32.mrf.mxu0  ;;  %v1125_v58 = vpop.f32.mrf.mxu1 }
 0x108   : > { %844 = vst.msk [vmem:[%s1318_s5 + $0x88] sm:$0xff] %vm826_vm2, %v639_v55  ;;  %876 = vst.msk [vmem:[%s1318_s5 + $0x188] sm:$0xff] %vm826_vm2, %v767_v56  ;;  %v660_v59 = vadd.f32 %v1093_v57, %v1313_v39  ;;  %v788_v60 = vadd.f32 %v1125_v58, %v1313_v39 }
 0x109   : > { %v651_v61 = vpop.f32.mrf.mxu0  ;;  %v779_v62 = vpop.f32.mrf.mxu1 }
 0x10a   : > { %849 = vst.msk [vmem:[%s1318_s5 + $0xb0] sm:$0xff] %vm826_vm2, %v660_v59  ;;  %881 = vst.msk [vmem:[%s1318_s5 + $0x1b0] sm:$0xff] %vm826_vm2, %v788_v60  ;;  %v652_v63 = vadd.f32 %v1313_v39, %v651_v61  ;;  %v780_v0 = vadd.f32 %v1313_v39, %v779_v62 }
 0x10b   : > { %v1094_v1 = vpop.f32.mrf.mxu0  ;;  %v1126_v2 = vpop.f32.mrf.mxu1 }
 0x10c   : > { %847 = vst.msk [vmem:[%s1318_s5 + $0xa0] sm:$0xff] %vm826_vm2, %v652_v63  ;;  %879 = vst.msk [vmem:[%s1318_s5 + $0x1a0] sm:$0xff] %vm826_vm2, %v780_v0  ;;  %v663_v3 = vadd.f32 %v1094_v1, %v1313_v39  ;;  %v791_v4 = vadd.f32 %v1126_v2, %v1313_v39 }
 0x10d   : > { %v654_v5 = vpop.f32.mrf.mxu0  ;;  %v782_v6 = vpop.f32.mrf.mxu1 }
 0x10e   : > { %850 = vst.msk [vmem:[%s1318_s5 + $0xb8] sm:$0xff] %vm826_vm2, %v663_v3  ;;  %882 = vst.msk [vmem:[%s1318_s5 + $0x1b8] sm:$0xff] %vm826_vm2, %v791_v4  ;;  %v655_v7 = vadd.f32 %v1313_v39, %v654_v5  ;;  %v783_v8 = vadd.f32 %v1313_v39, %v782_v6 }
 0x10f   : > { %v1097_v9 = vpop.f32.mrf.mxu0  ;;  %v1129_v10 = vpop.f32.mrf.mxu1 }
 0x110   : > { %848 = vst.msk [vmem:[%s1318_s5 + $0xa8] sm:$0xff] %vm826_vm2, %v655_v7  ;;  %880 = vst.msk [vmem:[%s1318_s5 + $0x1a8] sm:$0xff] %vm826_vm2, %v783_v8  ;;  %v676_v11 = vadd.f32 %v1097_v9, %v1313_v39  ;;  %v804_v12 = vadd.f32 %v1129_v10, %v1313_v39 }
 0x111   : > { %v667_v13 = vpop.f32.mrf.mxu0  ;;  %v795_v14 = vpop.f32.mrf.mxu1 }
 0x112   : > { %853 = vst.msk [vmem:[%s1318_s5 + $0xd0] sm:$0xff] %vm826_vm2, %v676_v11  ;;  %885 = vst.msk [vmem:[%s1318_s5 + $0x1d0] sm:$0xff] %vm826_vm2, %v804_v12  ;;  %v668_v15 = vadd.f32 %v1313_v39, %v667_v13  ;;  %v796_v16 = vadd.f32 %v1313_v39, %v795_v14 }
 0x113   : > { %v1098_v17 = vpop.f32.mrf.mxu0  ;;  %v1130_v18 = vpop.f32.mrf.mxu1 }
 0x114   : > { %851 = vst.msk [vmem:[%s1318_s5 + $0xc0] sm:$0xff] %vm826_vm2, %v668_v15  ;;  %883 = vst.msk [vmem:[%s1318_s5 + $0x1c0] sm:$0xff] %vm826_vm2, %v796_v16  ;;  %v679_v19 = vadd.f32 %v1098_v17, %v1313_v39  ;;  %v807_v20 = vadd.f32 %v1130_v18, %v1313_v39 }
 0x115   : > { %v670_v21 = vpop.f32.mrf.mxu0  ;;  %v798_v22 = vpop.f32.mrf.mxu1 }
 0x116   : > { %854 = vst.msk [vmem:[%s1318_s5 + $0xd8] sm:$0xff] %vm826_vm2, %v679_v19  ;;  %886 = vst.msk [vmem:[%s1318_s5 + $0x1d8] sm:$0xff] %vm826_vm2, %v807_v20  ;;  %v671_v23 = vadd.f32 %v1313_v39, %v670_v21  ;;  %v799_v24 = vadd.f32 %v1313_v39, %v798_v22 }
 0x117   : > { %v1101_v25 = vpop.f32.mrf.mxu0  ;;  %v1133_v26 = vpop.f32.mrf.mxu1 }
 0x118   : > { %852 = vst.msk [vmem:[%s1318_s5 + $0xc8] sm:$0xff] %vm826_vm2, %v671_v23  ;;  %884 = vst.msk [vmem:[%s1318_s5 + $0x1c8] sm:$0xff] %vm826_vm2, %v799_v24  ;;  %v692_v27 = vadd.f32 %v1101_v25, %v1313_v39  ;;  %v820_v28 = vadd.f32 %v1133_v26, %v1313_v39 }
 0x119   : > { %v683_v29 = vpop.f32.mrf.mxu0  ;;  %v811_v30 = vpop.f32.mrf.mxu1 }
 0x11a   : > { %857 = vst.msk [vmem:[%s1318_s5 + $0xf0] sm:$0xff] %vm826_vm2, %v692_v27  ;;  %889 = vst.msk [vmem:[%s1318_s5 + $0x1f0] sm:$0xff] %vm826_vm2, %v820_v28  ;;  %v684_v31 = vadd.f32 %v1313_v39, %v683_v29  ;;  %v812_v32 = vadd.f32 %v1313_v39, %v811_v30 }
 0x11b   : > { %v1102_v33 = vpop.f32.mrf.mxu0  ;;  %v1134_v34 = vpop.f32.mrf.mxu1 }
 0x11c   : > { %855 = vst.msk [vmem:[%s1318_s5 + $0xe0] sm:$0xff] %vm826_vm2, %v684_v31  ;;  %887 = vst.msk [vmem:[%s1318_s5 + $0x1e0] sm:$0xff] %vm826_vm2, %v812_v32  ;;  %v695_v35 = vadd.f32 %v1102_v33, %v1313_v39  ;;  %v823_v36 = vadd.f32 %v1134_v34, %v1313_v39 }
 0x11d   : > { %v686_v37 = vpop.f32.mrf.mxu0  ;;  %v814_v38 = vpop.f32.mrf.mxu1 }
 0x11e   : > { %858 = vst.msk [vmem:[%s1318_s5 + $0xf8] sm:$0xff] %vm826_vm2, %v695_v35  ;;  %890 = vst.msk [vmem:[%s1318_s5 + $0x1f8] sm:$0xff] %vm826_vm2, %v823_v36  ;;  %v687_v40 = vadd.f32 %v1313_v39, %v686_v37  ;;  %v815_v41 = vadd.f32 %v1313_v39, %v814_v38 }
 0x120   : > { %856 = vst.msk [vmem:[%s1318_s5 + $0xe8] sm:$0xff] %vm826_vm2, %v687_v40  ;;  %888 = vst.msk [vmem:[%s1318_s5 + $0x1e8] sm:$0xff] %vm826_vm2, %v815_v41 }
 0x121 PF: > { %s13_s12 = sadd.s32 1, %s1194_s12  }
 0x122   : > { %p10_p4 = scmp.ge.s32.totalorder %s13_s12, 6  }
 0x124   :  { %12 = sbr.rel (!%p10_p4) target bundleno = 1 (0x1), region = 62 }

// kernel: urvos_forward.57
= control target key start
LH: loop header
LB: loop body
LE: loop exit
PB: predicated region body
PF: predicated region fallthrough
CT: control target
= control target key end

     0   :  { %s626_s12 = smov 0   ;;  %s628_s13 = smov 0   ;;  %s685_s0 = inlined_call_operand.vmem [shape: bf16[2,16,8], index: 0, kind: input, shape index: {}]   ;;  %s686_s1 = inlined_call_operand.vmem [shape: bf16[2,8,16], index: 1, kind: input, shape index: {}]   ;;  %s687_s2 = inlined_call_operand.vmem [shape: bf16[2,32,16], index: 2, kind: input, shape index: {}]   ;;  %s688_s3 = inlined_call_operand.vmem [shape: f32[2,32,16], index: 3, kind: output, shape index: {}]  }
   0x1   :  { %s630_s14 = smov 0  }
   0x2 LB: > { %s25_s15 = sadd.s32 1, %s598_s13  ;;  %p509_p0 = scmp.ge.s32.totalorder %s602_s14, 1  ;;  %s602_s14 = sphi %s630_s14, %s13_s14   ;;  %s598_s13 = sphi %s628_s13, %s690_s13   ;;  %s594_s12 = sphi %s626_s12, %s689_s12  }
   0x3   : > { %p27_p1 = scmp.ge.s32.totalorder %s25_s15, 2  ;;  %p175_p2 = scmp.lt.s32.totalorder %s602_s14, 3 }
   0x5   : > { %s692_s15 = smov (%p27_p1, %s25_s15), 0  ;;  %p176_p3 = pnand %p509_p0, %p175_p2 }
   0x6   : > { %p214_p4 = scmp.lt.s32.totalorder (!%p176_p3), %s594_s12, 1 }
   0x7   : > { %179 = sbr.rel (%p176_p3) target bundleno = 490 (0x1ea), region = 32 }
   0xc   : > { %v604_v0 = vmov 0.0   ;;  %vm605_vm0 = vmmov 0   ;;  %s694_s12 = smov (!%p214_p4, %s594_s12), 1  ;;  %vm252_vm1 = vcmask 1043456   ;;  %vm248_vm2 = vcmask 64512  }
   0xd   : > { %533 = vmatprep.subr.bf16.mxu0 %v604_v0  ;;  %535 = vmatprep.mubr.msk.bf16.mxu0 %vm605_vm0, %v604_v0  ;;  %s512_s16 = sshll.u32 %s694_s12, 2  ;;  %s525_s17 = sshll.u32 %s694_s12, 3  ;;  %vm299_vm3 = vcmask 130048  }
   0xe   : > { %s225_s20 = scalar_lea.vmem %s686_s1, %s512_s16  ;;  %s218_s23 = scalar_lea.vmem %s685_s0, %s525_s17 }
   0xf   : > { %v242_v1 = vld [vmem:[%s225_s20] sm:$0xf]  ;;  %s526_s24 = sshll.u32 %s694_s12, 4  ;;  %s527_s28 = sshll.u32 %s694_s12, 5 }
  0x10   : > { %v254_v2 = vsel %vm252_vm1, %v242_v1, 0  ;;  %v571_v3 = vld [vmem:[%s218_s23] sm:$0xff]   ;;  %s658_s27 = scalar_lea.vmem %s687_s2, %s526_s24  ;;  %s238_s4 = scalar_lea.vmem %s688_s3, %s527_s28 }
  0x11   : > { %534 = vmatpush3.bf16.msra.mxu0 %v254_v2  ;;  %v572_v4 = vld [vmem:[%s658_s27] sm:$0xff]   ;;  %v573_v39 = vld [vmem:[%s658_s27 + $0x8] sm:$0xff]  }
  0x12   : > { %541 = vmatprep.mubr.msk.bf16.mxu1 %vm299_vm3, %v572_v4 }
  0x14   : > { %536 = vmatmul.mubr.msk.bf16.vlgmr.msra.gmra.mxu0 %vm248_vm2, %v571_v3 }
  0xd4   : > { %v290_v5 = vpop.f32.mrf.mxu0 }
  0xd5   : > { %v297_v7 = vmul.f32 0.35355338, %v290_v5 }
  0xd6   : > { %v537_v6 = vpop.f32.mrf.mxu0 }
  0xd7   : > { %v300_v11 = vsel %vm299_vm3, %v297_v7, -inf }
  0xd8   : > { %v293_v8 = vpop.f32.mrf.mxu0 }
  0xd9   : > { %v298_v9 = vmul.f32 0.35355338, %v293_v8 }
  0xda   : > { %v538_v10 = vpop.f32.mrf.mxu0 }
  0xdb   : > { %v301_v12 = vsel %vm299_vm3, %v298_v9, -inf }
  0xdc   : > { %v302_v13 = vmax.f32 %v300_v11, %v301_v12 }
  0xde   : > { %v303_v14 = vrot.slane %v302_v13, 4 }
  0xe0   : > { %v304_v15 = vmax.f32 %v302_v13, %v303_v14 }
  0xe2   : > { %v305_v16 = vrot.slane %v304_v15, 2 }
  0xe4   : > { %v306_v17 = vmax.f32 %v304_v15, %v305_v16 }
  0xe6   : > { %v307_v18 = vrot.slane %v306_v17, 1 }
  0xe8   : > { %v308_v19 = vmax.f32 %v306_v17, %v307_v18 }
  0xea   : > { %v309_v20 = vsub.f32 %v297_v7, %v308_v19  ;;  %v310_v21 = vsub.f32 %v298_v9, %v308_v19 }
  0xec   : > { %v311_v22 = vmul.f32 1.442695, %v309_v20  ;;  %v313_v23 = vmul.f32 1.442695, %v310_v21 }
  0xee   : > { %574 = vpow2.f32 %v311_v22 }
  0xef   : > { %576 = vpow2.f32 %v313_v23 }
  0xfb   : > { %v575_v24 = vpop.eup %574 }
  0xfc   : > { %v577_v25 = vpop.eup %576  ;;  %v315_v26 = vsel %vm299_vm3, %v575_v24, 0.0 }
  0xfd   : > { %v316_v27 = vsel %vm299_vm3, %v577_v25, 0.0 }
  0xfe   : > { %v317_v28 = vadd.f32 %v316_v27, %v315_v26 }
 0x100   : > { %v318_v29 = vrot.slane %v317_v28, 4 }
 0x102   : > { %v319_v30 = vadd.f32 %v318_v29, %v317_v28 }
 0x104   : > { %v320_v31 = vrot.slane %v319_v30, 2 }
 0x106   : > { %v321_v32 = vadd.f32 %v320_v31, %v319_v30 }
 0x108   : > { %v322_v33 = vrot.slane %v321_v32, 1 }
 0x10a   : > { %v323_v34 = vadd.f32 %v322_v33, %v321_v32 }
 0x10c   : > { %578 = vrcp.f32 %v323_v34 }
 0x119   : > { %v579_v35 = vpop.eup %578 }
 0x11a   : > { %v325_v36 = vmul.f32 %v579_v35, %v575_v24  ;;  %v326_v37 = vmul.f32 %v579_v35, %v577_v25 }
 0x11c   : > { %v331_v38 = vpack.c.bf16 %v326_v37, %v325_v36 }
 0x11e   : > { %539 = vmatprep.subr.bf16.mxu1 %v331_v38 }
 0x11f   : > { %540 = vmatpush3.bf16.msra.mxu1 %v331_v38 }
 0x122   : > { %542 = vmatmul.mubr.msk.bf16.vlgmr.msra.gmra.mxu1 %vm299_vm3, %v573_v39 }
 0x1e2   : > { %v543_v40 = vpop.f32.mrf.mxu1 }
 0x1e3   : > { %399 = vst.msk [vmem:[%s238_s4 + $0x10] sm:$0xff] %vm299_vm3, %v543_v40 }
 0x1e4   : > { %v382_v41 = vpop.f32.mrf.mxu1 }
 0x1e5   : > { %397 = vst.msk [vmem:[%s238_s4] sm:$0xff] %vm299_vm3, %v382_v41 }
 0x1e6   : > { %v544_v42 = vpop.f32.mrf.mxu1 }
 0x1e7   : > { %400 = vst.msk [vmem:[%s238_s4 + $0x18] sm:$0xff] %vm299_vm3, %v544_v42 }
 0x1e8   : > { %v385_v43 = vpop.f32.mrf.mxu1 }
 0x1e9   : > { %398 = vst.msk [vmem:[%s238_s4 + $0x8] sm:$0xff] %vm299_vm3, %v385_v43 }
 0x1ea PF: > { %s13_s14 = sadd.s32 1, %s602_s14   ;;  %s689_s12 = smov %s598_s13 }
 0x1eb   : > { %p10_p5 = scmp.ge.s32.totalorder %s13_s14, 4   ;;  %s690_s13 = smov %s692_s15 }
 0x1ed   :  { %12 = sbr.rel (!%p10_p5) target bundleno = 2 (0x2), region = 68 }

// kernel: urvos_forward.65
= control target key start
LH: loop header
LB: loop body
LE: loop exit
PB: predicated region body
PF: predicated region fallthrough
CT: control target
= control target key end

     0   :  { %vm372_vm0 = vcmask 523264   ;;  %vm526_vm1 = vcmask 130048   ;;  %s885_s1 = inlined_call_operand.vmem [shape: bf16[576,16], index: 1, kind: input, shape index: {}]   ;;  %s886_s0 = inlined_call_operand.vmem [shape: bf16[32,576], index: 0, kind: input, shape index: {}]   ;;  %s887_s2 = inlined_call_operand.vmem [shape: f32[1,16], index: 2, kind: input, shape index: {}]   ;;  %s888_s3 = inlined_call_operand.vmem [shape: f32[32,16], index: 3, kind: output, shape index: {}]  }
   0x1   :  { %v658_v0 = vld [vmem:[%s885_s1 + $0x78] sm:$0xff]   ;;  %v662_v4 = vld [vmem:[%s885_s1 + $0x70] sm:$0xff]   ;;  %v666_v8 = vld [vmem:[%s885_s1 + $0x68] sm:$0xff]  }
   0x2   :  { %v659_v1 = vld [vmem:[%s885_s1 + $0xf8] sm:$0xff]   ;;  %584 = vmatprep.subr.bf16.mxu0 %v658_v0  ;;  %v663_v5 = vld [vmem:[%s885_s1 + $0xf0] sm:$0xff]   ;;  %v667_v9 = vld [vmem:[%s885_s1 + $0xe8] sm:$0xff]  }
   0x3   :  { %v660_v2 = vld [vmem:[%s885_s1 + $0x38] sm:$0xff]   ;;  %612 = vmatprep.subr.bf16.mxu1 %v659_v1  ;;  %v664_v6 = vld [vmem:[%s885_s1 + $0x30] sm:$0xff]   ;;  %v668_v10 = vld [vmem:[%s885_s1 + $0x28] sm:$0xff]  }
   0x4   :  { %v661_v3 = vld [vmem:[%s885_s1 + $0xb8] sm:$0xff]   ;;  %585 = vmatpush3.bf16.msra.mxu0 %v660_v2  ;;  %v665_v7 = vld [vmem:[%s885_s1 + $0xb0] sm:$0xff]   ;;  %v669_v11 = vld [vmem:[%s885_s1 + $0xa8] sm:$0xff]  }
   0x5   :  { %613 = vmatpush3.bf16.msra.mxu1 %v661_v3  ;;  %586 = vmatprep.subr.bf16.mxu0 %v662_v4  ;;  %v670_v12 = vld [vmem:[%s885_s1 + $0x60] sm:$0xff]   ;;  %v674_v16 = vld [vmem:[%s885_s1 + $0x58] sm:$0xff]   ;;  %v678_v20 = vld [vmem:[%s885_s1 + $0x50] sm:$0xff]  }
   0x6   :  { %614 = vmatprep.subr.bf16.mxu1 %v663_v5  ;;  %v671_v13 = vld [vmem:[%s885_s1 + $0xe0] sm:$0xff]   ;;  %v675_v17 = vld [vmem:[%s885_s1 + $0xd8] sm:$0xff]   ;;  %v679_v21 = vld [vmem:[%s885_s1 + $0xd0] sm:$0xff]  }
   0x7   :  { %v672_v14 = vld [vmem:[%s885_s1 + $0x20] sm:$0xff]   ;;  %v676_v18 = vld [vmem:[%s885_s1 + $0x18] sm:$0xff]   ;;  %v680_v22 = vld [vmem:[%s885_s1 + $0x10] sm:$0xff]  }
   0x8   :  { %587 = vmatpush3.bf16.msra.mxu0 %v664_v6  ;;  %v673_v15 = vld [vmem:[%s885_s1 + $0xa0] sm:$0xff]   ;;  %v677_v19 = vld [vmem:[%s885_s1 + $0x98] sm:$0xff]   ;;  %v681_v23 = vld [vmem:[%s885_s1 + $0x90] sm:$0xff]  }
   0x9   :  { %615 = vmatpush3.bf16.msra.mxu1 %v665_v7  ;;  %588 = vmatprep.subr.bf16.mxu0 %v666_v8  ;;  %v682_v24 = vld [vmem:[%s885_s1 + $0x48] sm:$0xff]   ;;  %v686_v28 = vld [vmem:[%s885_s1 + $0x40] sm:$0xff]   ;;  %v696_v36 = vld [vmem:[%s885_s1 + $0x118] sm:$0xff]  }
   0xa   :  { %616 = vmatprep.subr.bf16.mxu1 %v667_v9  ;;  %v683_v25 = vld [vmem:[%s885_s1 + $0xc8] sm:$0xff]   ;;  %v687_v29 = vld [vmem:[%s885_s1 + $0xc0] sm:$0xff]   ;;  %v697_v37 = vld [vmem:[%s885_s1 + $0x110] sm:$0xff]  }
   0xb   :  { %v684_v26 = vld [vmem:[%s885_s1 + $0x8] sm:$0xff]   ;;  %v688_v30 = vld [vmem:[%s885_s1] sm:$0xff]  }
   0xc   :  { %589 = vmatpush3.bf16.msra.mxu0 %v668_v10  ;;  %v685_v27 = vld [vmem:[%s885_s1 + $0x88] sm:$0xff]   ;;  %v689_v31 = vld [vmem:[%s885_s1 + $0x80] sm:$0xff]  }
   0xd   :  { %617 = vmatpush3.bf16.msra.mxu1 %v669_v11  ;;  %590 = vmatprep.subr.bf16.mxu0 %v670_v12  ;;  %v690_v32 = vld [vmem:[%s886_s0] ss:$20 sps:$4 sm:$0xff]   ;;  %v692_v33 = vld [vmem:[%s886_s0 + $0x4] ss:$20 sps:$4 sm:$0xff]   ;;  %v693_v34 = vld [vmem:[%s886_s0 + $0x8] ss:$20 sps:$4 sm:$0xff]  }
   0xe   :  { %618 = vmatprep.subr.bf16.mxu1 %v671_v13  ;;  %v695_v35 = vld [vmem:[%s886_s0 + $0xc] ss:$20 sps:$4 sm:$0xff]   ;;  %411 = vmatprep.mubr.bf16.mxu0 %v692_v33  ;;  %v700_v39 = vld [vmem:[%s886_s0 + $0x34] ss:$20 sps:$4 sm:$0xff]   ;;  %v703_v42 = vld [vmem:[%s886_s0 + $0x30] ss:$20 sps:$4 sm:$0xff]  }
   0xf   :  { %460 = vmatprep.mubr.bf16.mxu1 %v695_v35  ;;  %v698_v38 = vld [vmem:[%s886_s0 + $0x2c] ss:$20 sps:$4 sm:$0xff]   ;;  %v702_v40 = vld [vmem:[%s886_s0 + $0x28] ss:$20 sps:$4 sm:$0xff]   ;;  %v706_v43 = vld [vmem:[%s886_s0 + $0x10] ss:$20 sps:$4 sm:$0xff]  }
  0x10   :  { %591 = vmatpush3.bf16.msra.mxu0 %v672_v14  ;;  %v704_v41 = vld [vmem:[%s885_s1 + $0x108] sm:$0xff]   ;;  %v705_v44 = vld [vmem:[%s885_s1 + $0x100] sm:$0xff]  }
  0x11   :  { %619 = vmatpush3.bf16.msra.mxu1 %v673_v15  ;;  %592 = vmatprep.subr.bf16.mxu0 %v674_v16  ;;  %v707_v45 = vld [vmem:[%s886_s0 + $0x38] ss:$20 sps:$4 sm:$0xff]   ;;  %v535_v58 = vld [vmem:[%s887_s2] ss:$0 sm:$0xff] }
  0x12   :  { %620 = vmatprep.subr.bf16.mxu1 %v675_v17 }
  0x14   :  { %593 = vmatpush3.bf16.msra.mxu0 %v676_v18 }
  0x15   :  { %621 = vmatpush3.bf16.msra.mxu1 %v677_v19  ;;  %594 = vmatprep.subr.bf16.mxu0 %v678_v20 }
  0x16   :  { %622 = vmatprep.subr.bf16.mxu1 %v679_v21 }
  0x18   :  { %595 = vmatpush3.bf16.msra.mxu0 %v680_v22 }
  0x19   :  { %623 = vmatpush3.bf16.msra.mxu1 %v681_v23  ;;  %596 = vmatprep.subr.bf16.mxu0 %v682_v24 }
  0x1a   :  { %624 = vmatprep.subr.bf16.mxu1 %v683_v25 }
  0x1c   :  { %597 = vmatpush3.bf16.msra.mxu0 %v684_v26 }
  0x1d   :  { %625 = vmatpush3.bf16.msra.mxu1 %v685_v27  ;;  %598 = vmatprep.subr.bf16.mxu0 %v686_v28 }
  0x1e   :  { %626 = vmatprep.subr.bf16.mxu1 %v687_v29 }
  0x20   :  { %599 = vmatpush3.bf16.msra.mxu0 %v688_v30 }
  0x21   :  { %627 = vmatpush3.bf16.msra.mxu1 %v689_v31  ;;  %646 = vmatprep.subr.bf16.mxu0 %v696_v36 }
  0x23   :  { %412 = vmatmul.mubr.bf16.vlgmr.msra.gmra.mxu0 %v690_v32 }
  0x24   :  { %461 = vmatmul.mubr.bf16.vlgmr.msra.gmra.mxu1 %v693_v34  ;;  %647 = vmatpush3.bf16.msra.mxu0 %v696_v36 }
  0x25   :  { %648 = vmatprep.subr.bf16.mxu0 %v697_v37  ;;  %419 = vmatprep.mubr.bf16.mxu0 %v698_v38 }
  0x26   :  { %468 = vmatprep.mubr.bf16.mxu1 %v700_v39 }
  0x28   :  { %649 = vmatpush3.bf16.msra.mxu0 %v697_v37 }
  0x29   :  { %650 = vmatprep.subr.bf16.mxu0 %v704_v41 }
  0x2b   :  { %420 = vmatmul.mubr.bf16.gmra.mxu0 %v702_v40 }
  0x2c   :  { %469 = vmatmul.mubr.bf16.gmra.mxu1 %v703_v42  ;;  %654 = vmatprep.mubr.msk.bf16.mxu0 %vm372_vm0, %v706_v43 }
  0x2d   :  { %651 = vmatpush3.bf16.msra.mxu0 %v704_v41 }
  0x2e   :  { %652 = vmatprep.subr.bf16.mxu0 %v705_v44 }
  0x31   :  { %653 = vmatpush3.bf16.msra.mxu0 %v705_v44 }
  0x34   :  { %655 = vmatmul.mubr.msk.bf16.vlgmr.msra.gmra.mxu0 %vm372_vm0, %v707_v45 }
  0xe3   :  { %v600_v46 = vpop.f32.mrf.mxu0 }
  0xe4   :  { %v628_v47 = vpop.f32.mrf.mxu1 }
  0xe5   :  { %v601_v48 = vpop.f32.mrf.mxu0 }
  0xe6   :  { %v629_v49 = vpop.f32.mrf.mxu1  ;;  %v602_v56 = vadd.f32 %v601_v48, %v600_v46 }
  0xe7   :  { %v603_v50 = vpop.f32.mrf.mxu0  ;;  %v630_v2 = vadd.f32 %v629_v49, %v628_v47 }
  0xe8   :  { %v631_v51 = vpop.f32.mrf.mxu1  ;;  %v414_v1 = vadd.f32 %v602_v56, %v535_v58 }
  0xe9   :  { %v604_v52 = vpop.f32.mrf.mxu0 }
  0xea   :  { %v632_v53 = vpop.f32.mrf.mxu1  ;;  %v605_v3 = vadd.f32 %v604_v52, %v603_v50  ;;  %v463_v13 = vadd.f32 %v630_v2, %v414_v1 }
  0xeb   :  { %v606_v54 = vpop.f32.mrf.mxu0  ;;  %v633_v16 = vadd.f32 %v632_v53, %v631_v51 }
  0xec   :  { %v634_v55 = vpop.f32.mrf.mxu1  ;;  %v417_v11 = vadd.f32 %v605_v3, %v535_v58 }
  0xed   :  { %v607_v57 = vpop.f32.mrf.mxu0 }
  0xee   :  { %v608_v59 = vadd.f32 %v607_v57, %v606_v54  ;;  %v635_v60 = vpop.f32.mrf.mxu1  ;;  %v466_v20 = vadd.f32 %v633_v16, %v417_v11 }
  0xef   :  { %v636_v61 = vadd.f32 %v635_v60, %v634_v55  ;;  %v609_v62 = vpop.f32.mrf.mxu0 }
  0xf0   :  { %v422_v63 = vadd.f32 %v608_v59, %v535_v58  ;;  %v637_v0 = vpop.f32.mrf.mxu1 }
  0xf1   :  { %v610_v4 = vpop.f32.mrf.mxu0 }
  0xf2   :  { %v611_v5 = vadd.f32 %v610_v4, %v609_v62  ;;  %v638_v6 = vpop.f32.mrf.mxu1  ;;  %v471_v7 = vadd.f32 %v636_v61, %v422_v63 }
  0xf3   :  { %v639_v9 = vadd.f32 %v638_v6, %v637_v0 }
  0xf4   :  { %v425_v8 = vadd.f32 %v611_v5, %v535_v58  ;;  %v656_v10 = vpop.f32.mrf.mxu0 }
  0xf5   :  { %v520_v12 = vadd.f32 %v656_v10, %v471_v7 }
  0xf6   :  { %v511_v14 = vpop.f32.mrf.mxu0  ;;  %v474_v15 = vadd.f32 %v639_v9, %v425_v8 }
  0xf7   :  { %529 = vst.msk [vmem:[%s888_s3 + $0x10] sm:$0xff] %vm526_vm1, %v520_v12  ;;  %v512_v17 = vadd.f32 %v511_v14, %v463_v13 }
  0xf8   :  { %v657_v18 = vpop.f32.mrf.mxu0 }
  0xf9   :  { %527 = vst.msk [vmem:[%s888_s3] sm:$0xff] %vm526_vm1, %v512_v17  ;;  %v523_v19 = vadd.f32 %v657_v18, %v474_v15 }
  0xfa   :  { %v514_v21 = vpop.f32.mrf.mxu0 }
  0xfb   :  { %530 = vst.msk [vmem:[%s888_s3 + $0x18] sm:$0xff] %vm526_vm1, %v523_v19  ;;  %v515_v22 = vadd.f32 %v514_v21, %v466_v20 }
  0xfd   :  { %528 = vst.msk [vmem:[%s888_s3 + $0x8] sm:$0xff] %vm526_vm1, %v515_v22 }

// kernel: urvos_forward.66
= control target key start
LH: loop header
LB: loop body
LE: loop exit
PB: predicated region body
PF: predicated region fallthrough
CT: control target
= control target key end

     0   :  { %v230_v0 = vmov 0   ;;  %vm116_vm0 = vcmask 130048   ;;  %s311_s1 = inlined_call_operand.vmem [shape: bf16[144,16], index: 1, kind: input, shape index: {}]   ;;  %s312_s0 = inlined_call_operand.vmem [shape: bf16[32,144], index: 0, kind: input, shape index: {}]   ;;  %s313_s2 = inlined_call_operand.vmem [shape: f32[1,16], index: 2, kind: input, shape index: {}]   ;;  %s314_s3 = inlined_call_operand.vmem [shape: f32[32,16], index: 3, kind: output, shape index: {}]  }
   0x1   :  { %123 = vmatprep.subr.bf16.mxu0 %v230_v0  ;;  %196 = vmatprep.subr.bf16.mxu1 %v230_v0  ;;  %v215_v1 = vld [vmem:[%s311_s1 + $0x38] sm:$0xff]   ;;  %v216_v2 = vld [vmem:[%s311_s1 + $0x30] sm:$0xff]   ;;  %v217_v3 = vld [vmem:[%s311_s1 + $0x28] sm:$0xff]  }
   0x2   :  { %124 = vmatpush1.bf16.msra.mxu0 %v215_v1  ;;  %205 = vmatpush1.bf16.msra.mxu1 %v215_v1  ;;  %v218_v4 = vld [vmem:[%s311_s1 + $0x20] sm:$0xff]   ;;  %v229_v6 = vld [vmem:[%s312_s0 + $0x14] ss:$8 sps:$4 sm:$0xff]   ;;  %v221_v9 = vld [vmem:[%s311_s1 + $0x8] sm:$0xff]  }
   0x3   :  { %125 = vmatprep.subr.bf16.mxu0 %v230_v0  ;;  %197 = vmatprep.subr.bf16.mxu1 %v230_v0  ;;  %v226_v5 = vld [vmem:[%s312_s0 + $0x4] ss:$8 sps:$4 sm:$0xff]   ;;  %v219_v7 = vld [vmem:[%s311_s1 + $0x18] sm:$0xff]   ;;  %v220_v8 = vld [vmem:[%s311_s1 + $0x10] sm:$0xff]  }
   0x4   :  { %194 = vmatprep.mubr.msk.bf16.mxu0 %vm116_vm0, %v226_v5  ;;  %195 = vmatprep.mubr.msk.bf16.mxu1 %vm116_vm0, %v229_v6  ;;  %v222_v10 = vld [vmem:[%s311_s1] sm:$0xff]   ;;  %v227_v13 = vld [vmem:[%s312_s0 + $0x10] ss:$8 sps:$4 sm:$0xff]  }
   0x5   :  { %v223_v11 = vld [vmem:[%s311_s1 + $0x40] sm:$0xff]  }
   0x6   :  { %126 = vmatpush1.bf16.msra.mxu0 %v216_v2  ;;  %206 = vmatpush1.bf16.msra.mxu1 %v216_v2  ;;  %v224_v12 = vld [vmem:[%s312_s0] ss:$8 sps:$4 sm:$0xff]  }
   0x7   :  { %127 = vmatprep.subr.bf16.mxu0 %v230_v0  ;;  %198 = vmatprep.subr.bf16.mxu1 %v230_v0  ;;  %v180_v14 = vld [vmem:[%s313_s2] ss:$0 sm:$0xff] }
   0xa   :  { %128 = vmatpush1.bf16.msra.mxu0 %v217_v3  ;;  %207 = vmatpush1.bf16.msra.mxu1 %v217_v3 }
   0xb   :  { %129 = vmatprep.subr.bf16.mxu0 %v230_v0  ;;  %199 = vmatprep.subr.bf16.mxu1 %v230_v0 }
   0xe   :  { %130 = vmatpush1.bf16.msra.mxu0 %v218_v4  ;;  %208 = vmatpush1.bf16.msra.mxu1 %v218_v4 }
   0xf   :  { %131 = vmatprep.subr.bf16.mxu0 %v230_v0  ;;  %200 = vmatprep.subr.bf16.mxu1 %v230_v0 }
  0x12   :  { %132 = vmatpush1.bf16.msra.mxu0 %v219_v7  ;;  %209 = vmatpush1.bf16.msra.mxu1 %v219_v7 }
  0x13   :  { %133 = vmatprep.subr.bf16.mxu0 %v230_v0  ;;  %201 = vmatprep.subr.bf16.mxu1 %v230_v0 }
  0x16   :  { %134 = vmatpush1.bf16.msra.mxu0 %v220_v8  ;;  %210 = vmatpush1.bf16.msra.mxu1 %v220_v8 }
  0x17   :  { %135 = vmatprep.subr.bf16.mxu0 %v230_v0  ;;  %202 = vmatprep.subr.bf16.mxu1 %v230_v0 }
  0x1a   :  { %136 = vmatpush1.bf16.msra.mxu0 %v221_v9  ;;  %211 = vmatpush1.bf16.msra.mxu1 %v221_v9 }
  0x1b   :  { %137 = vmatprep.subr.bf16.mxu0 %v230_v0  ;;  %203 = vmatprep.subr.bf16.mxu1 %v230_v0 }
  0x1e   :  { %138 = vmatpush1.bf16.msra.mxu0 %v222_v10  ;;  %212 = vmatpush1.bf16.msra.mxu1 %v222_v10 }
  0x1f   :  { %153 = vmatprep.subr.bf16.mxu0 %v230_v0  ;;  %204 = vmatprep.subr.bf16.mxu1 %v230_v0 }
  0x22   :  { %154 = vmatpush2.bf16.msra.mxu0 %v223_v11  ;;  %213 = vmatpush2.bf16.msra.mxu1 %v223_v11 }
  0x25   :  { %156 = vmatmul.mubr.bf16.vlgmr.msra.gmra.mxu0 %v224_v12  ;;  %164 = vmatmul.mubr.bf16.vlgmr.msra.gmra.mxu1 %v227_v13 }
  0xe5   :  { %v157_v15 = vpop.f32.mrf.mxu0  ;;  %v165_v16 = vpop.f32.mrf.mxu1 }
  0xe6   :  { %v158_v17 = vadd.f32 %v180_v14, %v157_v15  ;;  %v166_v18 = vadd.f32 %v180_v14, %v165_v16 }
  0xe7   :  { %v159_v19 = vpop.f32.mrf.mxu0  ;;  %v167_v20 = vpop.f32.mrf.mxu1 }
  0xe8   :  { %172 = vst.msk [vmem:[%s314_s3] sm:$0xff] %vm116_vm0, %v158_v17  ;;  %174 = vst.msk [vmem:[%s314_s3 + $0x10] sm:$0xff] %vm116_vm0, %v166_v18 }
  0xe9   :  { %v160_v21 = vpop.f32.mrf.mxu0  ;;  %v168_v22 = vpop.f32.mrf.mxu1 }
  0xea   :  { %v161_v23 = vadd.f32 %v180_v14, %v160_v21  ;;  %v169_v24 = vadd.f32 %v180_v14, %v168_v22 }
  0xeb   :  { %v162_v25 = vpop.f32.mrf.mxu0  ;;  %v170_v26 = vpop.f32.mrf.mxu1 }
  0xec   :  { %173 = vst.msk [vmem:[%s314_s3 + $0x8] sm:$0xff] %vm116_vm0, %v161_v23  ;;  %175 = vst.msk [vmem:[%s314_s3 + $0x18] sm:$0xff] %vm116_vm0, %v169_v24 }

// kernel: urvos_forward.70
= control target key start
LH: loop header
LB: loop body
LE: loop exit
PB: predicated region body
PF: predicated region fallthrough
CT: control target
= control target key end

     0   :  { %vm318_vm0 = vcmask 261120   ;;  %vm537_vm1 = vcmask 130048   ;;  %s1023_s1 = inlined_call_operand.vmem [shape: bf16[288,16], index: 1, kind: input, shape index: {}]   ;;  %s1024_s0 = inlined_call_operand.vmem [shape: bf16[128,288], index: 0, kind: input, shape index: {}]   ;;  %s1025_s2 = inlined_call_operand.vmem [shape: f32[1,16], index: 2, kind: input, shape index: {}]   ;;  %s1026_s3 = inlined_call_operand.vmem [shape: f32[128,16], index: 3, kind: output, shape index: {}]  }
   0x1   :  { %v719_v0 = vld [vmem:[%s1023_s1 + $0x78] sm:$0xff]   ;;  %v721_v2 = vld [vmem:[%s1023_s1 + $0x70] sm:$0xff]   ;;  %v723_v4 = vld [vmem:[%s1023_s1 + $0x68] sm:$0xff]  }
   0x2   :  { %v720_v1 = vld [vmem:[%s1023_s1 + $0x38] sm:$0xff]   ;;  %609 = vmatprep.subr.bf16.mxu0 %v719_v0  ;;  %703 = vmatprep.subr.bf16.mxu1 %v719_v0  ;;  %v722_v3 = vld [vmem:[%s1023_s1 + $0x30] sm:$0xff]   ;;  %v724_v5 = vld [vmem:[%s1023_s1 + $0x28] sm:$0xff]  }
   0x3   :  { %610 = vmatpush3.bf16.msra.mxu0 %v720_v1  ;;  %711 = vmatpush3.bf16.msra.mxu1 %v720_v1  ;;  %v725_v6 = vld [vmem:[%s1023_s1 + $0x60] sm:$0xff]   ;;  %v727_v8 = vld [vmem:[%s1023_s1 + $0x58] sm:$0xff]   ;;  %v729_v10 = vld [vmem:[%s1023_s1 + $0x50] sm:$0xff]  }
   0x4   :  { %611 = vmatprep.subr.bf16.mxu0 %v721_v2  ;;  %704 = vmatprep.subr.bf16.mxu1 %v721_v2  ;;  %v726_v7 = vld [vmem:[%s1023_s1 + $0x20] sm:$0xff]   ;;  %v728_v9 = vld [vmem:[%s1023_s1 + $0x18] sm:$0xff]   ;;  %v730_v13 = vld [vmem:[%s1023_s1 + $0x10] sm:$0xff]  }
   0x5   :  { %v737_v11 = vld [vmem:[%s1024_s0 + $0x4] ss:$12 sps:$4 sm:$0xff]   ;;  %v740_v12 = vld [vmem:[%s1024_s0 + $0x94] ss:$12 sps:$4 sm:$0xff]   ;;  %v731_v14 = vld [vmem:[%s1023_s1 + $0x48] sm:$0xff]  }
   0x6   :  { %375 = vmatprep.mubr.bf16.mxu0 %v737_v11  ;;  %423 = vmatprep.mubr.bf16.mxu1 %v740_v12  ;;  %v732_v15 = vld [vmem:[%s1023_s1 + $0x8] sm:$0xff]   ;;  %v733_v16 = vld [vmem:[%s1023_s1 + $0x40] sm:$0xff]   ;;  %v738_v20 = vld [vmem:[%s1024_s0 + $0x90] ss:$12 sps:$4 sm:$0xff]  }
   0x7   :  { %612 = vmatpush3.bf16.msra.mxu0 %v722_v3  ;;  %712 = vmatpush3.bf16.msra.mxu1 %v722_v3  ;;  %v734_v17 = vld [vmem:[%s1023_s1] sm:$0xff]   ;;  %v741_v19 = vld [vmem:[%s1023_s1 + $0x88] sm:$0xff]   ;;  %v752_v28 = vld [vmem:[%s1024_s0 + $0x30] ss:$12 sps:$4 sm:$0xff]  }
   0x8   :  { %613 = vmatprep.subr.bf16.mxu0 %v723_v4  ;;  %705 = vmatprep.subr.bf16.mxu1 %v723_v4  ;;  %v735_v18 = vld [vmem:[%s1024_s0] ss:$12 sps:$4 sm:$0xff]   ;;  %v742_v21 = vld [vmem:[%s1024_s0 + $0x1c] ss:$12 sps:$4 sm:$0xff]   ;;  %v746_v24 = vld [vmem:[%s1024_s0 + $0x18] ss:$12 sps:$4 sm:$0xff]  }
   0x9   :  { %v744_v22 = vld [vmem:[%s1024_s0 + $0xac] ss:$12 sps:$4 sm:$0xff]   ;;  %v748_v23 = vld [vmem:[%s1023_s1 + $0x80] sm:$0xff]   ;;  %v747_v25 = vld [vmem:[%s1024_s0 + $0xa8] ss:$12 sps:$4 sm:$0xff]  }
   0xa   :  { %v749_v26 = vld [vmem:[%s1024_s0 + $0x34] ss:$12 sps:$4 sm:$0xff]   ;;  %v754_v30 = vld [vmem:[%s1024_s0 + $0x4c] ss:$12 sps:$4 sm:$0xff]   ;;  %v758_v33 = vld [vmem:[%s1024_s0 + $0x50] ss:$12 sps:$4 sm:$0xff]  }
   0xb   :  { %614 = vmatpush3.bf16.msra.mxu0 %v724_v5  ;;  %713 = vmatpush3.bf16.msra.mxu1 %v724_v5  ;;  %v751_v27 = vld [vmem:[%s1024_s0 + $0x8] ss:$12 sps:$4 sm:$0xff]   ;;  %v753_v29 = vld [vmem:[%s1024_s0 + $0x20] ss:$12 sps:$4 sm:$0xff]   ;;  %v756_v31 = vld [vmem:[%s1024_s0 + $0x38] ss:$12 sps:$4 sm:$0xff]  }
   0xc   :  { %615 = vmatprep.subr.bf16.mxu0 %v725_v6  ;;  %706 = vmatprep.subr.bf16.mxu1 %v725_v6  ;;  %v757_v32 = vld [vmem:[%s1024_s0 + $0x48] ss:$12 sps:$4 sm:$0xff]   ;;  %v759_v34 = vld [vmem:[%s1024_s0 + $0x64] ss:$12 sps:$4 sm:$0xff]   ;;  %v762_v36 = vld [vmem:[%s1024_s0 + $0x60] ss:$12 sps:$4 sm:$0xff]  }
   0xd   :  { %v761_v35 = vld [vmem:[%s1024_s0 + $0x68] ss:$12 sps:$4 sm:$0xff]   ;;  %v763_v37 = vld [vmem:[%s1024_s0 + $0x80] ss:$12 sps:$4 sm:$0xff]   ;;  %v766_v39 = vld [vmem:[%s1024_s0 + $0x98] ss:$12 sps:$4 sm:$0xff]  }
   0xe   :  { %v764_v38 = vld [vmem:[%s1024_s0 + $0x7c] ss:$12 sps:$4 sm:$0xff]   ;;  %v767_v40 = vld [vmem:[%s1024_s0 + $0x78] ss:$12 sps:$4 sm:$0xff]   ;;  %v936_v60 = vld [vmem:[%s1025_s2] ss:$0 sm:$0xff] }
   0xf   :  { %616 = vmatpush3.bf16.msra.mxu0 %v726_v7  ;;  %714 = vmatpush3.bf16.msra.mxu1 %v726_v7  ;;  %v768_v41 = vld [vmem:[%s1024_s0 + $0xb0] ss:$12 sps:$4 sm:$0xff]  }
  0x10   :  { %617 = vmatprep.subr.bf16.mxu0 %v727_v8  ;;  %707 = vmatprep.subr.bf16.mxu1 %v727_v8 }
  0x13   :  { %618 = vmatpush3.bf16.msra.mxu0 %v728_v9  ;;  %715 = vmatpush3.bf16.msra.mxu1 %v728_v9 }
  0x14   :  { %619 = vmatprep.subr.bf16.mxu0 %v729_v10  ;;  %708 = vmatprep.subr.bf16.mxu1 %v729_v10 }
  0x17   :  { %620 = vmatpush3.bf16.msra.mxu0 %v730_v13  ;;  %716 = vmatpush3.bf16.msra.mxu1 %v730_v13 }
  0x18   :  { %621 = vmatprep.subr.bf16.mxu0 %v731_v14  ;;  %709 = vmatprep.subr.bf16.mxu1 %v731_v14 }
  0x1b   :  { %622 = vmatpush3.bf16.msra.mxu0 %v732_v15  ;;  %717 = vmatpush3.bf16.msra.mxu1 %v732_v15 }
  0x1c   :  { %623 = vmatprep.subr.bf16.mxu0 %v733_v16  ;;  %710 = vmatprep.subr.bf16.mxu1 %v733_v16 }
  0x1f   :  { %624 = vmatpush3.bf16.msra.mxu0 %v734_v17  ;;  %718 = vmatpush3.bf16.msra.mxu1 %v734_v17 }
  0x20   :  { %683 = vmatprep.subr.bf16.mxu1 %v741_v19 }
  0x22   :  { %376 = vmatmul.mubr.bf16.vlgmr.msra.gmra.mxu0 %v735_v18  ;;  %424 = vmatmul.mubr.bf16.vlgmr.msra.gmra.mxu1 %v738_v20 }
  0x23   :  { %684 = vmatpush3.bf16.msra.mxu1 %v741_v19  ;;  %383 = vmatprep.mubr.bf16.mxu0 %v742_v21 }
  0x24   :  { %431 = vmatprep.mubr.bf16.mxu1 %v744_v22  ;;  %685 = vmatprep.subr.bf16.mxu1 %v748_v23 }
  0x27   :  { %686 = vmatpush3.bf16.msra.mxu1 %v748_v23 }
  0x2a   :  { %384 = vmatmul.mubr.bf16.gmra.mxu0 %v746_v24  ;;  %432 = vmatmul.mubr.bf16.gmra.mxu1 %v747_v25 }
  0x2b   :  { %391 = vmatprep.mubr.bf16.mxu0 %v749_v26  ;;  %687 = vmatprep.mubr.msk.bf16.mxu1 %vm318_vm0, %v751_v27 }
  0x32   :  { %392 = vmatmul.mubr.bf16.gmra.mxu0 %v752_v28  ;;  %688 = vmatmul.mubr.msk.bf16.vlgmr.msra.gmra.mxu1 %vm318_vm0, %v753_v29 }
  0x33   :  { %399 = vmatprep.mubr.bf16.mxu0 %v754_v30  ;;  %691 = vmatprep.mubr.msk.bf16.mxu1 %vm318_vm0, %v756_v31 }
  0x3a   :  { %400 = vmatmul.mubr.bf16.gmra.mxu0 %v757_v32  ;;  %692 = vmatmul.mubr.msk.bf16.gmra.mxu1 %vm318_vm0, %v758_v33 }
  0x3b   :  { %407 = vmatprep.mubr.bf16.mxu0 %v759_v34  ;;  %695 = vmatprep.mubr.msk.bf16.mxu1 %vm318_vm0, %v761_v35 }
  0x42   :  { %408 = vmatmul.mubr.bf16.gmra.mxu0 %v762_v36  ;;  %696 = vmatmul.mubr.msk.bf16.gmra.mxu1 %vm318_vm0, %v763_v37 }
  0x43   :  { %415 = vmatprep.mubr.bf16.mxu0 %v764_v38  ;;  %699 = vmatprep.mubr.msk.bf16.mxu1 %vm318_vm0, %v766_v39 }
  0x4a   :  { %416 = vmatmul.mubr.bf16.gmra.mxu0 %v767_v40  ;;  %700 = vmatmul.mubr.msk.bf16.gmra.mxu1 %vm318_vm0, %v768_v41 }
  0xe2   :  { %v625_v42 = vpop.f32.mrf.mxu0  ;;  %v923_v43 = vpop.f32.mrf.mxu1 }
  0xe4   :  { %v626_v44 = vpop.f32.mrf.mxu0  ;;  %v925_v45 = vpop.f32.mrf.mxu1 }
  0xe5   :  { %v627_v57 = vadd.f32 %v626_v44, %v625_v42  ;;  %v663_v44 = vadd.f32 %v925_v45, %v923_v43 }
  0xe6   :  { %v628_v46 = vpop.f32.mrf.mxu0  ;;  %v927_v47 = vpop.f32.mrf.mxu1 }
  0xe7   :  { %v378_v3 = vadd.f32 %v627_v57, %v936_v60 }
  0xe8   :  { %v629_v48 = vpop.f32.mrf.mxu0  ;;  %v929_v49 = vpop.f32.mrf.mxu1 }
  0xe9   :  { %v630_v1 = vadd.f32 %v629_v48, %v628_v46  ;;  %v666_v43 = vadd.f32 %v929_v49, %v927_v47 }
  0xea   :  { %v631_v50 = vpop.f32.mrf.mxu0  ;;  %v667_v51 = vpop.f32.mrf.mxu1 }
  0xeb   :  { %v381_v12 = vadd.f32 %v630_v1, %v936_v60 }
  0xec   :  { %v632_v52 = vpop.f32.mrf.mxu0  ;;  %v668_v53 = vpop.f32.mrf.mxu1 }
  0xed   :  { %v633_v54 = vadd.f32 %v632_v52, %v631_v50  ;;  %v669_v38 = vadd.f32 %v668_v53, %v667_v51 }
  0xee   :  { %v634_v55 = vpop.f32.mrf.mxu0  ;;  %v931_v56 = vpop.f32.mrf.mxu1 }
  0xef   :  { %v386_v62 = vadd.f32 %v633_v54, %v936_v60  ;;  %v434_v53 = vadd.f32 %v669_v38, %v936_v60 }
  0xf0   :  { %v635_v58 = vpop.f32.mrf.mxu0  ;;  %v671_v59 = vpop.f32.mrf.mxu1 }
  0xf1   :  { %v636_v61 = vadd.f32 %v635_v58, %v634_v55  ;;  %v672_v52 = vadd.f32 %v671_v59, %v931_v56 }
  0xf2   :  { %v637_v63 = vpop.f32.mrf.mxu0  ;;  %v689_v0 = vpop.f32.mrf.mxu1 }
  0xf3   :  { %v483_v2 = vadd.f32 %v689_v0, %v386_v62  ;;  %v389_v7 = vadd.f32 %v636_v61, %v936_v60  ;;  %v426_v61 = vadd.f32 %v663_v44, %v936_v60  ;;  %v437_v49 = vadd.f32 %v672_v52, %v936_v60 }
  0xf4   :  { %v638_v4 = vpop.f32.mrf.mxu0  ;;  %v474_v5 = vpop.f32.mrf.mxu1 }
  0xf5   :  { %540 = vst.msk [vmem:[%s1026_s3 + $0x10] sm:$0xff] %vm537_vm1, %v483_v2  ;;  %v475_v6 = vadd.f32 %v474_v5, %v378_v3  ;;  %v639_v10 = vadd.f32 %v638_v4, %v637_v63  ;;  %v429_v4 = vadd.f32 %v666_v43, %v936_v60 }
  0xf6   :  { %v640_v8 = vpop.f32.mrf.mxu0  ;;  %v690_v9 = vpop.f32.mrf.mxu1 }
  0xf7   :  { %538 = vst.msk [vmem:[%s1026_s3] sm:$0xff] %vm537_vm1, %v475_v6  ;;  %v486_v11 = vadd.f32 %v690_v9, %v389_v7  ;;  %v394_v19 = vadd.f32 %v639_v10, %v936_v60 }
  0xf8   :  { %v641_v13 = vpop.f32.mrf.mxu0  ;;  %v477_v14 = vpop.f32.mrf.mxu1 }
  0xf9   :  { %541 = vst.msk [vmem:[%s1026_s3 + $0x18] sm:$0xff] %vm537_vm1, %v486_v11  ;;  %v478_v15 = vadd.f32 %v477_v14, %v381_v12  ;;  %v642_v18 = vadd.f32 %v641_v13, %v640_v8 }
  0xfa   :  { %v643_v16 = vpop.f32.mrf.mxu0  ;;  %v693_v17 = vpop.f32.mrf.mxu1 }
  0xfb   :  { %539 = vst.msk [vmem:[%s1026_s3 + $0x8] sm:$0xff] %vm537_vm1, %v478_v15  ;;  %v397_v27 = vadd.f32 %v642_v18, %v936_v60 }
  0xfc   :  { %v644_v20 = vpop.f32.mrf.mxu0  ;;  %v490_v21 = vpop.f32.mrf.mxu1 }
  0xfd   :  { %v645_v22 = vadd.f32 %v644_v20, %v643_v16  ;;  %v491_v23 = vadd.f32 %v490_v21, %v394_v19 }
  0xfe   :  { %v646_v24 = vpop.f32.mrf.mxu0  ;;  %v694_v25 = vpop.f32.mrf.mxu1 }
  0xff   :  { %v402_v26 = vadd.f32 %v645_v22, %v936_v60  ;;  %542 = vst.msk [vmem:[%s1026_s3 + $0x20] sm:$0xff] %vm537_vm1, %v491_v23 }
 0x100   :  { %v647_v28 = vpop.f32.mrf.mxu0  ;;  %v493_v29 = vpop.f32.mrf.mxu1 }
 0x101   :  { %v499_v30 = vadd.f32 %v693_v17, %v402_v26  ;;  %v648_v31 = vadd.f32 %v647_v28, %v646_v24  ;;  %v494_v32 = vadd.f32 %v493_v29, %v397_v27 }
 0x102   :  { %v649_v33 = vpop.f32.mrf.mxu0  ;;  %v697_v34 = vpop.f32.mrf.mxu1 }
 0x103   :  { %544 = vst.msk [vmem:[%s1026_s3 + $0x30] sm:$0xff] %vm537_vm1, %v499_v30  ;;  %v405_v35 = vadd.f32 %v648_v31, %v936_v60  ;;  %543 = vst.msk [vmem:[%s1026_s3 + $0x28] sm:$0xff] %vm537_vm1, %v494_v32 }
 0x104   :  { %v650_v36 = vpop.f32.mrf.mxu0  ;;  %v506_v37 = vpop.f32.mrf.mxu1 }
 0x105   :  { %v502_v39 = vadd.f32 %v694_v25, %v405_v35  ;;  %v651_v40 = vadd.f32 %v650_v36, %v649_v33 }
 0x106   :  { %v652_v41 = vpop.f32.mrf.mxu0  ;;  %v698_v42 = vpop.f32.mrf.mxu1 }
 0x107   :  { %545 = vst.msk [vmem:[%s1026_s3 + $0x38] sm:$0xff] %vm537_vm1, %v502_v39  ;;  %v410_v46 = vadd.f32 %v651_v40, %v936_v60 }
 0x108   :  { %v653_v48 = vpop.f32.mrf.mxu0  ;;  %v509_v50 = vpop.f32.mrf.mxu1 }
 0x109   :  { %v507_v54 = vadd.f32 %v506_v37, %v410_v46  ;;  %v654_v51 = vadd.f32 %v653_v48, %v652_v41 }
 0x10a   :  { %v655_v55 = vpop.f32.mrf.mxu0  ;;  %v701_v57 = vpop.f32.mrf.mxu1 }
 0x10b   :  { %546 = vst.msk [vmem:[%s1026_s3 + $0x40] sm:$0xff] %vm537_vm1, %v507_v54  ;;  %v413_v45 = vadd.f32 %v654_v51, %v936_v60  ;;  %v531_v58 = vadd.f32 %v701_v57, %v434_v53 }
 0x10c   :  { %v656_v56 = vpop.f32.mrf.mxu0  ;;  %v522_v59 = vpop.f32.mrf.mxu1 }
 0x10d   :  { %v510_v62 = vadd.f32 %v509_v50, %v413_v45  ;;  %552 = vst.msk [vmem:[%s1026_s3 + $0x70] sm:$0xff] %vm537_vm1, %v531_v58  ;;  %v657_v63 = vadd.f32 %v656_v56, %v655_v55  ;;  %v523_v47 = vadd.f32 %v522_v59, %v426_v61 }
 0x10e   :  { %v658_v0 = vpop.f32.mrf.mxu0  ;;  %v702_v1 = vpop.f32.mrf.mxu1 }
 0x10f   :  { %547 = vst.msk [vmem:[%s1026_s3 + $0x48] sm:$0xff] %vm537_vm1, %v510_v62  ;;  %v418_v2 = vadd.f32 %v657_v63, %v936_v60  ;;  %550 = vst.msk [vmem:[%s1026_s3 + $0x60] sm:$0xff] %vm537_vm1, %v523_v47  ;;  %v534_v3 = vadd.f32 %v702_v1, %v437_v49 }
 0x110   :  { %v659_v5 = vpop.f32.mrf.mxu0  ;;  %v525_v6 = vpop.f32.mrf.mxu1 }
 0x111   :  { %v515_v7 = vadd.f32 %v697_v34, %v418_v2  ;;  %553 = vst.msk [vmem:[%s1026_s3 + $0x78] sm:$0xff] %vm537_vm1, %v534_v3  ;;  %v660_v8 = vadd.f32 %v659_v5, %v658_v0  ;;  %v526_v9 = vadd.f32 %v525_v6, %v429_v4 }
 0x113   :  { %548 = vst.msk [vmem:[%s1026_s3 + $0x50] sm:$0xff] %vm537_vm1, %v515_v7  ;;  %v421_v10 = vadd.f32 %v660_v8, %v936_v60  ;;  %551 = vst.msk [vmem:[%s1026_s3 + $0x68] sm:$0xff] %vm537_vm1, %v526_v9 }
 0x115   :  { %v518_v11 = vadd.f32 %v698_v42, %v421_v10 }
 0x117   :  { %549 = vst.msk [vmem:[%s1026_s3 + $0x58] sm:$0xff] %vm537_vm1, %v518_v11 }

// kernel: urvos_forward.71
= control target key start
LH: loop header
LB: loop body
LE: loop exit
PB: predicated region body
PF: predicated region fallthrough
CT: control target
= control target key end

     0   :  { %v410_v0 = vmov 0   ;;  %vm182_vm0 = vcmask 130048   ;;  %s581_s1 = inlined_call_operand.vmem [shape: bf16[144,16], index: 1, kind: input, shape index: {}]   ;;  %s582_s0 = inlined_call_operand.vmem [shape: bf16[128,144], index: 0, kind: input, shape index: {}]   ;;  %s583_s2 = inlined_call_operand.vmem [shape: f32[1,16], index: 2, kind: input, shape index: {}]   ;;  %s584_s3 = inlined_call_operand.vmem [shape: f32[128,16], index: 3, kind: output, shape index: {}]  }
   0x1   :  { %207 = vmatprep.subr.bf16.mxu0 %v410_v0  ;;  %358 = vmatprep.subr.bf16.mxu1 %v410_v0  ;;  %v377_v1 = vld [vmem:[%s581_s1 + $0x38] sm:$0xff]   ;;  %v378_v2 = vld [vmem:[%s581_s1 + $0x30] sm:$0xff]   ;;  %v379_v3 = vld [vmem:[%s581_s1 + $0x28] sm:$0xff]  }
   0x2   :  { %208 = vmatpush1.bf16.msra.mxu0 %v377_v1  ;;  %367 = vmatpush1.bf16.msra.mxu1 %v377_v1  ;;  %v380_v4 = vld [vmem:[%s581_s1 + $0x20] sm:$0xff]   ;;  %v381_v7 = vld [vmem:[%s581_s1 + $0x18] sm:$0xff]   ;;  %v382_v8 = vld [vmem:[%s581_s1 + $0x10] sm:$0xff]  }
   0x3   :  { %209 = vmatprep.subr.bf16.mxu0 %v410_v0  ;;  %359 = vmatprep.subr.bf16.mxu1 %v410_v0  ;;  %v388_v5 = vld [vmem:[%s582_s0 + $0x4] ss:$8 sps:$4 sm:$0xff]   ;;  %v386_v12 = vld [vmem:[%s582_s0] ss:$8 sps:$4 sm:$0xff]   ;;  %v392_v14 = vld [vmem:[%s582_s0 + $0x14] ss:$8 sps:$4 sm:$0xff]  }
   0x4   :  { %v391_v6 = vld [vmem:[%s582_s0 + $0x44] ss:$8 sps:$4 sm:$0xff]   ;;  %350 = vmatprep.mubr.msk.bf16.mxu0 %vm182_vm0, %v388_v5  ;;  %v389_v13 = vld [vmem:[%s582_s0 + $0x40] ss:$8 sps:$4 sm:$0xff]   ;;  %v394_v15 = vld [vmem:[%s582_s0 + $0x54] ss:$8 sps:$4 sm:$0xff]  }
   0x5   :  { %354 = vmatprep.mubr.msk.bf16.mxu1 %vm182_vm0, %v391_v6  ;;  %v383_v9 = vld [vmem:[%s581_s1 + $0x8] sm:$0xff]   ;;  %v384_v10 = vld [vmem:[%s581_s1] sm:$0xff]   ;;  %v396_v16 = vld [vmem:[%s582_s0 + $0x10] ss:$8 sps:$4 sm:$0xff]  }
   0x6   :  { %210 = vmatpush1.bf16.msra.mxu0 %v378_v2  ;;  %368 = vmatpush1.bf16.msra.mxu1 %v378_v2  ;;  %v385_v11 = vld [vmem:[%s581_s1 + $0x40] sm:$0xff]   ;;  %v397_v17 = vld [vmem:[%s582_s0 + $0x50] ss:$8 sps:$4 sm:$0xff]   ;;  %v404_v22 = vld [vmem:[%s582_s0 + $0x34] ss:$8 sps:$4 sm:$0xff]  }
   0x7   :  { %211 = vmatprep.subr.bf16.mxu0 %v410_v0  ;;  %360 = vmatprep.subr.bf16.mxu1 %v410_v0  ;;  %v398_v18 = vld [vmem:[%s582_s0 + $0x24] ss:$8 sps:$4 sm:$0xff]   ;;  %v402_v20 = vld [vmem:[%s582_s0 + $0x20] ss:$8 sps:$4 sm:$0xff]   ;;  %v406_v23 = vld [vmem:[%s582_s0 + $0x74] ss:$8 sps:$4 sm:$0xff]  }
   0x8   :  { %v400_v19 = vld [vmem:[%s582_s0 + $0x64] ss:$8 sps:$4 sm:$0xff]   ;;  %v403_v21 = vld [vmem:[%s582_s0 + $0x60] ss:$8 sps:$4 sm:$0xff]   ;;  %v408_v24 = vld [vmem:[%s582_s0 + $0x30] ss:$8 sps:$4 sm:$0xff]  }
   0x9   :  { %v409_v25 = vld [vmem:[%s582_s0 + $0x70] ss:$8 sps:$4 sm:$0xff]   ;;  %v324_v26 = vld [vmem:[%s583_s2] ss:$0 sm:$0xff] }
   0xa   :  { %212 = vmatpush1.bf16.msra.mxu0 %v379_v3  ;;  %369 = vmatpush1.bf16.msra.mxu1 %v379_v3 }
   0xb   :  { %213 = vmatprep.subr.bf16.mxu0 %v410_v0  ;;  %361 = vmatprep.subr.bf16.mxu1 %v410_v0 }
   0xe   :  { %214 = vmatpush1.bf16.msra.mxu0 %v380_v4  ;;  %370 = vmatpush1.bf16.msra.mxu1 %v380_v4 }
   0xf   :  { %215 = vmatprep.subr.bf16.mxu0 %v410_v0  ;;  %362 = vmatprep.subr.bf16.mxu1 %v410_v0 }
  0x12   :  { %216 = vmatpush1.bf16.msra.mxu0 %v381_v7  ;;  %371 = vmatpush1.bf16.msra.mxu1 %v381_v7 }
  0x13   :  { %217 = vmatprep.subr.bf16.mxu0 %v410_v0  ;;  %363 = vmatprep.subr.bf16.mxu1 %v410_v0 }
  0x16   :  { %218 = vmatpush1.bf16.msra.mxu0 %v382_v8  ;;  %372 = vmatpush1.bf16.msra.mxu1 %v382_v8 }
  0x17   :  { %219 = vmatprep.subr.bf16.mxu0 %v410_v0  ;;  %364 = vmatprep.subr.bf16.mxu1 %v410_v0 }
  0x1a   :  { %220 = vmatpush1.bf16.msra.mxu0 %v383_v9  ;;  %373 = vmatpush1.bf16.msra.mxu1 %v383_v9 }
  0x1b   :  { %221 = vmatprep.subr.bf16.mxu0 %v410_v0  ;;  %365 = vmatprep.subr.bf16.mxu1 %v410_v0 }
  0x1e   :  { %222 = vmatpush1.bf16.msra.mxu0 %v384_v10  ;;  %374 = vmatpush1.bf16.msra.mxu1 %v384_v10 }
  0x1f   :  { %237 = vmatprep.subr.bf16.mxu0 %v410_v0  ;;  %366 = vmatprep.subr.bf16.mxu1 %v410_v0 }
  0x22   :  { %238 = vmatpush2.bf16.msra.mxu0 %v385_v11  ;;  %375 = vmatpush2.bf16.msra.mxu1 %v385_v11 }
  0x25   :  { %240 = vmatmul.mubr.bf16.vlgmr.msra.gmra.mxu0 %v386_v12  ;;  %272 = vmatmul.mubr.bf16.vlgmr.msra.gmra.mxu1 %v389_v13 }
  0x26   :  { %351 = vmatprep.mubr.msk.bf16.mxu0 %vm182_vm0, %v392_v14  ;;  %355 = vmatprep.mubr.msk.bf16.mxu1 %vm182_vm0, %v394_v15 }
  0x2d   :  { %248 = vmatmul.mubr.bf16.gmra.mxu0 %v396_v16  ;;  %280 = vmatmul.mubr.bf16.gmra.mxu1 %v397_v17 }
  0x2e   :  { %352 = vmatprep.mubr.msk.bf16.mxu0 %vm182_vm0, %v398_v18  ;;  %356 = vmatprep.mubr.msk.bf16.mxu1 %vm182_vm0, %v400_v19 }
  0x35   :  { %256 = vmatmul.mubr.bf16.gmra.mxu0 %v402_v20  ;;  %288 = vmatmul.mubr.bf16.gmra.mxu1 %v403_v21 }
  0x36   :  { %353 = vmatprep.mubr.msk.bf16.mxu0 %vm182_vm0, %v404_v22  ;;  %357 = vmatprep.mubr.msk.bf16.mxu1 %vm182_vm0, %v406_v23 }
  0x3d   :  { %264 = vmatmul.mubr.bf16.gmra.mxu0 %v408_v24  ;;  %296 = vmatmul.mubr.bf16.gmra.mxu1 %v409_v25 }
  0xe5   :  { %v241_v27 = vpop.f32.mrf.mxu0  ;;  %v273_v28 = vpop.f32.mrf.mxu1 }
  0xe6   :  { %v242_v29 = vadd.f32 %v324_v26, %v241_v27  ;;  %v274_v30 = vadd.f32 %v324_v26, %v273_v28 }
  0xe7   :  { %v243_v31 = vpop.f32.mrf.mxu0  ;;  %v275_v32 = vpop.f32.mrf.mxu1 }
  0xe8   :  { %304 = vst.msk [vmem:[%s584_s3] sm:$0xff] %vm182_vm0, %v242_v29  ;;  %312 = vst.msk [vmem:[%s584_s3 + $0x40] sm:$0xff] %vm182_vm0, %v274_v30 }
  0xe9   :  { %v244_v33 = vpop.f32.mrf.mxu0  ;;  %v276_v34 = vpop.f32.mrf.mxu1 }
  0xea   :  { %v245_v35 = vadd.f32 %v324_v26, %v244_v33  ;;  %v277_v36 = vadd.f32 %v324_v26, %v276_v34 }
  0xeb   :  { %v246_v37 = vpop.f32.mrf.mxu0  ;;  %v278_v38 = vpop.f32.mrf.mxu1 }
  0xec   :  { %305 = vst.msk [vmem:[%s584_s3 + $0x8] sm:$0xff] %vm182_vm0, %v245_v35  ;;  %313 = vst.msk [vmem:[%s584_s3 + $0x48] sm:$0xff] %vm182_vm0, %v277_v36 }
  0xed   :  { %v249_v39 = vpop.f32.mrf.mxu0  ;;  %v281_v40 = vpop.f32.mrf.mxu1 }
  0xee   :  { %v250_v41 = vadd.f32 %v324_v26, %v249_v39  ;;  %v282_v42 = vadd.f32 %v324_v26, %v281_v40 }
  0xef   :  { %v251_v43 = vpop.f32.mrf.mxu0  ;;  %v283_v44 = vpop.f32.mrf.mxu1 }
  0xf0   :  { %306 = vst.msk [vmem:[%s584_s3 + $0x10] sm:$0xff] %vm182_vm0, %v250_v41  ;;  %314 = vst.msk [vmem:[%s584_s3 + $0x50] sm:$0xff] %vm182_vm0, %v282_v42 }
  0xf1   :  { %v252_v45 = vpop.f32.mrf.mxu0  ;;  %v284_v46 = vpop.f32.mrf.mxu1 }
  0xf2   :  { %v253_v47 = vadd.f32 %v324_v26, %v252_v45  ;;  %v285_v48 = vadd.f32 %v324_v26, %v284_v46 }
  0xf3   :  { %v254_v49 = vpop.f32.mrf.mxu0  ;;  %v286_v50 = vpop.f32.mrf.mxu1 }
  0xf4   :  { %307 = vst.msk [vmem:[%s584_s3 + $0x18] sm:$0xff] %vm182_vm0, %v253_v47  ;;  %315 = vst.msk [vmem:[%s584_s3 + $0x58] sm:$0xff] %vm182_vm0, %v285_v48 }
  0xf5   :  { %v257_v51 = vpop.f32.mrf.mxu0  ;;  %v289_v52 = vpop.f32.mrf.mxu1 }
  0xf6   :  { %v258_v53 = vadd.f32 %v324_v26, %v257_v51  ;;  %v290_v54 = vadd.f32 %v324_v26, %v289_v52 }
  0xf7   :  { %v259_v55 = vpop.f32.mrf.mxu0  ;;  %v291_v56 = vpop.f32.mrf.mxu1 }
  0xf8   :  { %308 = vst.msk [vmem:[%s584_s3 + $0x20] sm:$0xff] %vm182_vm0, %v258_v53  ;;  %316 = vst.msk [vmem:[%s584_s3 + $0x60] sm:$0xff] %vm182_vm0, %v290_v54 }
  0xf9   :  { %v260_v57 = vpop.f32.mrf.mxu0  ;;  %v292_v58 = vpop.f32.mrf.mxu1 }
  0xfa   :  { %v261_v59 = vadd.f32 %v324_v26, %v260_v57  ;;  %v293_v60 = vadd.f32 %v324_v26, %v292_v58 }
  0xfb   :  { %v262_v61 = vpop.f32.mrf.mxu0  ;;  %v294_v62 = vpop.f32.mrf.mxu1 }
  0xfc   :  { %309 = vst.msk [vmem:[%s584_s3 + $0x28] sm:$0xff] %vm182_vm0, %v261_v59  ;;  %317 = vst.msk [vmem:[%s584_s3 + $0x68] sm:$0xff] %vm182_vm0, %v293_v60 }
  0xfd   :  { %v265_v63 = vpop.f32.mrf.mxu0  ;;  %v297_v0 = vpop.f32.mrf.mxu1 }
  0xfe   :  { %v266_v1 = vadd.f32 %v324_v26, %v265_v63  ;;  %v298_v2 = vadd.f32 %v324_v26, %v297_v0 }
  0xff   :  { %v267_v3 = vpop.f32.mrf.mxu0  ;;  %v299_v4 = vpop.f32.mrf.mxu1 }
 0x100   :  { %310 = vst.msk [vmem:[%s584_s3 + $0x30] sm:$0xff] %vm182_vm0, %v266_v1  ;;  %318 = vst.msk [vmem:[%s584_s3 + $0x70] sm:$0xff] %vm182_vm0, %v298_v2 }
 0x101   :  { %v268_v5 = vpop.f32.mrf.mxu0  ;;  %v300_v6 = vpop.f32.mrf.mxu1 }
 0x102   :  { %v269_v7 = vadd.f32 %v324_v26, %v268_v5  ;;  %v301_v8 = vadd.f32 %v324_v26, %v300_v6 }
 0x103   :  { %v270_v9 = vpop.f32.mrf.mxu0  ;;  %v302_v10 = vpop.f32.mrf.mxu1 }
 0x104   :  { %311 = vst.msk [vmem:[%s584_s3 + $0x38] sm:$0xff] %vm182_vm0, %v269_v7  ;;  %319 = vst.msk [vmem:[%s584_s3 + $0x78] sm:$0xff] %vm182_vm0, %v301_v8 }

// kernel: urvos_forward.75
= control target key start
LH: loop header
LB: loop body
LE: loop exit
PB: predicated region body
PF: predicated region fallthrough
CT: control target
= control target key end

     0   :  { %v1130_v0 = vmov 0   ;;  %vm446_vm0 = vcmask 130048   ;;  %s1727_s1 = inlined_call_operand.vmem [shape: bf16[144,16], index: 1, kind: input, shape index: {}]   ;;  %s1728_s0 = inlined_call_operand.vmem [shape: bf16[512,144], index: 0, kind: input, shape index: {}]   ;;  %s1729_s2 = inlined_call_operand.vmem [shape: f32[1,16], index: 2, kind: input, shape index: {}]   ;;  %s1730_s3 = inlined_call_operand.vmem [shape: f32[512,16], index: 3, kind: output, shape index: {}]  }
   0x1   :  { %543 = vmatprep.subr.bf16.mxu0 %v1130_v0  ;;  %1006 = vmatprep.subr.bf16.mxu1 %v1130_v0  ;;  %v1025_v1 = vld [vmem:[%s1727_s1 + $0x38] sm:$0xff]   ;;  %v1026_v2 = vld [vmem:[%s1727_s1 + $0x30] sm:$0xff]   ;;  %v1027_v3 = vld [vmem:[%s1727_s1 + $0x28] sm:$0xff]  }
   0x2   :  { %544 = vmatpush1.bf16.msra.mxu0 %v1025_v1  ;;  %1015 = vmatpush1.bf16.msra.mxu1 %v1025_v1  ;;  %v1028_v4 = vld [vmem:[%s1727_s1 + $0x20] sm:$0xff]   ;;  %v1029_v7 = vld [vmem:[%s1727_s1 + $0x18] sm:$0xff]   ;;  %v1030_v8 = vld [vmem:[%s1727_s1 + $0x10] sm:$0xff]  }
   0x3   :  { %545 = vmatprep.subr.bf16.mxu0 %v1130_v0  ;;  %1007 = vmatprep.subr.bf16.mxu1 %v1130_v0  ;;  %v1036_v5 = vld [vmem:[%s1728_s0 + $0x4] ss:$8 sps:$4 sm:$0xff]   ;;  %v1034_v12 = vld [vmem:[%s1728_s0] ss:$8 sps:$4 sm:$0xff]   ;;  %v1040_v14 = vld [vmem:[%s1728_s0 + $0x14] ss:$8 sps:$4 sm:$0xff]  }
   0x4   :  { %v1039_v6 = vld [vmem:[%s1728_s0 + $0x104] ss:$8 sps:$4 sm:$0xff]   ;;  %974 = vmatprep.mubr.msk.bf16.mxu0 %vm446_vm0, %v1036_v5  ;;  %v1037_v13 = vld [vmem:[%s1728_s0 + $0x100] ss:$8 sps:$4 sm:$0xff]   ;;  %v1042_v15 = vld [vmem:[%s1728_s0 + $0x114] ss:$8 sps:$4 sm:$0xff]  }
   0x5   :  { %990 = vmatprep.mubr.msk.bf16.mxu1 %vm446_vm0, %v1039_v6  ;;  %v1031_v9 = vld [vmem:[%s1727_s1 + $0x8] sm:$0xff]   ;;  %v1032_v10 = vld [vmem:[%s1727_s1] sm:$0xff]   ;;  %v1044_v16 = vld [vmem:[%s1728_s0 + $0x10] ss:$8 sps:$4 sm:$0xff]  }
   0x6   :  { %546 = vmatpush1.bf16.msra.mxu0 %v1026_v2  ;;  %1016 = vmatpush1.bf16.msra.mxu1 %v1026_v2  ;;  %v1033_v11 = vld [vmem:[%s1727_s1 + $0x40] sm:$0xff]   ;;  %v1045_v17 = vld [vmem:[%s1728_s0 + $0x110] ss:$8 sps:$4 sm:$0xff]   ;;  %v1052_v22 = vld [vmem:[%s1728_s0 + $0x34] ss:$8 sps:$4 sm:$0xff]  }
   0x7   :  { %547 = vmatprep.subr.bf16.mxu0 %v1130_v0  ;;  %1008 = vmatprep.subr.bf16.mxu1 %v1130_v0  ;;  %v1046_v18 = vld [vmem:[%s1728_s0 + $0x24] ss:$8 sps:$4 sm:$0xff]   ;;  %v1050_v20 = vld [vmem:[%s1728_s0 + $0x20] ss:$8 sps:$4 sm:$0xff]   ;;  %v1054_v23 = vld [vmem:[%s1728_s0 + $0x134] ss:$8 sps:$4 sm:$0xff]  }
   0x8   :  { %v1048_v19 = vld [vmem:[%s1728_s0 + $0x124] ss:$8 sps:$4 sm:$0xff]   ;;  %v1051_v21 = vld [vmem:[%s1728_s0 + $0x120] ss:$8 sps:$4 sm:$0xff]   ;;  %v1056_v24 = vld [vmem:[%s1728_s0 + $0x30] ss:$8 sps:$4 sm:$0xff]  }
   0x9   :  { %v1057_v25 = vld [vmem:[%s1728_s0 + $0x130] ss:$8 sps:$4 sm:$0xff]   ;;  %v1058_v26 = vld [vmem:[%s1728_s0 + $0x44] ss:$8 sps:$4 sm:$0xff]   ;;  %v1062_v28 = vld [vmem:[%s1728_s0 + $0x40] ss:$8 sps:$4 sm:$0xff]  }
   0xa   :  { %548 = vmatpush1.bf16.msra.mxu0 %v1027_v3  ;;  %1017 = vmatpush1.bf16.msra.mxu1 %v1027_v3  ;;  %v1060_v27 = vld [vmem:[%s1728_s0 + $0x144] ss:$8 sps:$4 sm:$0xff]   ;;  %v1063_v29 = vld [vmem:[%s1728_s0 + $0x140] ss:$8 sps:$4 sm:$0xff]   ;;  %v1064_v30 = vld [vmem:[%s1728_s0 + $0x54] ss:$8 sps:$4 sm:$0xff]  }
   0xb   :  { %549 = vmatprep.subr.bf16.mxu0 %v1130_v0  ;;  %1009 = vmatprep.subr.bf16.mxu1 %v1130_v0  ;;  %v1066_v31 = vld [vmem:[%s1728_s0 + $0x154] ss:$8 sps:$4 sm:$0xff]   ;;  %v1068_v32 = vld [vmem:[%s1728_s0 + $0x50] ss:$8 sps:$4 sm:$0xff]   ;;  %v1070_v34 = vld [vmem:[%s1728_s0 + $0x64] ss:$8 sps:$4 sm:$0xff]  }
   0xc   :  { %v1069_v33 = vld [vmem:[%s1728_s0 + $0x150] ss:$8 sps:$4 sm:$0xff]   ;;  %v1072_v35 = vld [vmem:[%s1728_s0 + $0x164] ss:$8 sps:$4 sm:$0xff]   ;;  %v1074_v36 = vld [vmem:[%s1728_s0 + $0x60] ss:$8 sps:$4 sm:$0xff]  }
   0xd   :  { %v1075_v37 = vld [vmem:[%s1728_s0 + $0x160] ss:$8 sps:$4 sm:$0xff]   ;;  %v1076_v38 = vld [vmem:[%s1728_s0 + $0x74] ss:$8 sps:$4 sm:$0xff]   ;;  %v1080_v40 = vld [vmem:[%s1728_s0 + $0x70] ss:$8 sps:$4 sm:$0xff]  }
   0xe   :  { %550 = vmatpush1.bf16.msra.mxu0 %v1028_v4  ;;  %1018 = vmatpush1.bf16.msra.mxu1 %v1028_v4  ;;  %v1078_v39 = vld [vmem:[%s1728_s0 + $0x174] ss:$8 sps:$4 sm:$0xff]   ;;  %v1081_v41 = vld [vmem:[%s1728_s0 + $0x170] ss:$8 sps:$4 sm:$0xff]   ;;  %v1082_v42 = vld [vmem:[%s1728_s0 + $0x84] ss:$8 sps:$4 sm:$0xff]  }
   0xf   :  { %551 = vmatprep.subr.bf16.mxu0 %v1130_v0  ;;  %1010 = vmatprep.subr.bf16.mxu1 %v1130_v0  ;;  %v1084_v43 = vld [vmem:[%s1728_s0 + $0x184] ss:$8 sps:$4 sm:$0xff]   ;;  %v1086_v44 = vld [vmem:[%s1728_s0 + $0x80] ss:$8 sps:$4 sm:$0xff]   ;;  %v1088_v46 = vld [vmem:[%s1728_s0 + $0x94] ss:$8 sps:$4 sm:$0xff]  }
  0x10   :  { %v1087_v45 = vld [vmem:[%s1728_s0 + $0x180] ss:$8 sps:$4 sm:$0xff]   ;;  %v1090_v47 = vld [vmem:[%s1728_s0 + $0x194] ss:$8 sps:$4 sm:$0xff]   ;;  %v1092_v48 = vld [vmem:[%s1728_s0 + $0x90] ss:$8 sps:$4 sm:$0xff]  }
  0x11   :  { %v1093_v49 = vld [vmem:[%s1728_s0 + $0x190] ss:$8 sps:$4 sm:$0xff]   ;;  %v1094_v50 = vld [vmem:[%s1728_s0 + $0xa4] ss:$8 sps:$4 sm:$0xff]   ;;  %v1098_v52 = vld [vmem:[%s1728_s0 + $0xa0] ss:$8 sps:$4 sm:$0xff]  }
  0x12   :  { %552 = vmatpush1.bf16.msra.mxu0 %v1029_v7  ;;  %1019 = vmatpush1.bf16.msra.mxu1 %v1029_v7  ;;  %v1096_v51 = vld [vmem:[%s1728_s0 + $0x1a4] ss:$8 sps:$4 sm:$0xff]   ;;  %v1099_v53 = vld [vmem:[%s1728_s0 + $0x1a0] ss:$8 sps:$4 sm:$0xff]   ;;  %v1100_v54 = vld [vmem:[%s1728_s0 + $0xb4] ss:$8 sps:$4 sm:$0xff]  }
  0x13   :  { %553 = vmatprep.subr.bf16.mxu0 %v1130_v0  ;;  %1011 = vmatprep.subr.bf16.mxu1 %v1130_v0  ;;  %v1102_v55 = vld [vmem:[%s1728_s0 + $0x1b4] ss:$8 sps:$4 sm:$0xff]   ;;  %v1104_v56 = vld [vmem:[%s1728_s0 + $0xb0] ss:$8 sps:$4 sm:$0xff]   ;;  %v1106_v58 = vld [vmem:[%s1728_s0 + $0xc4] ss:$8 sps:$4 sm:$0xff]  }
  0x14   :  { %v1105_v57 = vld [vmem:[%s1728_s0 + $0x1b0] ss:$8 sps:$4 sm:$0xff]   ;;  %v1108_v59 = vld [vmem:[%s1728_s0 + $0x1c4] ss:$8 sps:$4 sm:$0xff]   ;;  %v1110_v60 = vld [vmem:[%s1728_s0 + $0xc0] ss:$8 sps:$4 sm:$0xff]  }
  0x15   :  { %v1111_v61 = vld [vmem:[%s1728_s0 + $0x1c0] ss:$8 sps:$4 sm:$0xff]   ;;  %v1112_v62 = vld [vmem:[%s1728_s0 + $0xd4] ss:$8 sps:$4 sm:$0xff]   ;;  %v1117_v1 = vld [vmem:[%s1728_s0 + $0x1d0] ss:$8 sps:$4 sm:$0xff]  }
  0x16   :  { %554 = vmatpush1.bf16.msra.mxu0 %v1030_v8  ;;  %1020 = vmatpush1.bf16.msra.mxu1 %v1030_v8  ;;  %v1114_v63 = vld [vmem:[%s1728_s0 + $0x1d4] ss:$8 sps:$4 sm:$0xff]   ;;  %v1118_v2 = vld [vmem:[%s1728_s0 + $0xe4] ss:$8 sps:$4 sm:$0xff]   ;;  %v1122_v4 = vld [vmem:[%s1728_s0 + $0xe0] ss:$8 sps:$4 sm:$0xff]  }
  0x17   :  { %555 = vmatprep.subr.bf16.mxu0 %v1130_v0  ;;  %1012 = vmatprep.subr.bf16.mxu1 %v1130_v0  ;;  %v1120_v3 = vld [vmem:[%s1728_s0 + $0x1e4] ss:$8 sps:$4 sm:$0xff]   ;;  %v1123_v5 = vld [vmem:[%s1728_s0 + $0x1e0] ss:$8 sps:$4 sm:$0xff]   ;;  %v1124_v6 = vld [vmem:[%s1728_s0 + $0xf4] ss:$8 sps:$4 sm:$0xff]  }
  0x18   :  { %v1126_v7 = vld [vmem:[%s1728_s0 + $0x1f4] ss:$8 sps:$4 sm:$0xff]   ;;  %v1128_v8 = vld [vmem:[%s1728_s0 + $0xf0] ss:$8 sps:$4 sm:$0xff]  }
  0x1a   :  { %556 = vmatpush1.bf16.msra.mxu0 %v1031_v9  ;;  %1021 = vmatpush1.bf16.msra.mxu1 %v1031_v9  ;;  %v1129_v9 = vld [vmem:[%s1728_s0 + $0x1f0] ss:$8 sps:$4 sm:$0xff]  }
  0x1b   :  { %557 = vmatprep.subr.bf16.mxu0 %v1130_v0  ;;  %1013 = vmatprep.subr.bf16.mxu1 %v1130_v0 }
  0x1e   :  { %558 = vmatpush1.bf16.msra.mxu0 %v1032_v10  ;;  %1022 = vmatpush1.bf16.msra.mxu1 %v1032_v10  ;;  %v1405_v10 = vld [vmem:[%s1729_s2] ss:$0 sm:$0xff] }
  0x1f   :  { %573 = vmatprep.subr.bf16.mxu0 %v1130_v0  ;;  %1014 = vmatprep.subr.bf16.mxu1 %v1130_v0  ;;  %v1116_v0 = vld [vmem:[%s1728_s0 + $0xd0] ss:$8 sps:$4 sm:$0xff]  }
  0x22   :  { %574 = vmatpush2.bf16.msra.mxu0 %v1033_v11  ;;  %1023 = vmatpush2.bf16.msra.mxu1 %v1033_v11 }
  0x25   :  { %576 = vmatmul.mubr.bf16.vlgmr.msra.gmra.mxu0 %v1034_v12  ;;  %704 = vmatmul.mubr.bf16.vlgmr.msra.gmra.mxu1 %v1037_v13 }
  0x26   :  { %975 = vmatprep.mubr.msk.bf16.mxu0 %vm446_vm0, %v1040_v14  ;;  %991 = vmatprep.mubr.msk.bf16.mxu1 %vm446_vm0, %v1042_v15 }
  0x2d   :  { %584 = vmatmul.mubr.bf16.gmra.mxu0 %v1044_v16  ;;  %712 = vmatmul.mubr.bf16.gmra.mxu1 %v1045_v17 }
  0x2e   :  { %976 = vmatprep.mubr.msk.bf16.mxu0 %vm446_vm0, %v1046_v18  ;;  %992 = vmatprep.mubr.msk.bf16.mxu1 %vm446_vm0, %v1048_v19 }
  0x35   :  { %592 = vmatmul.mubr.bf16.gmra.mxu0 %v1050_v20  ;;  %720 = vmatmul.mubr.bf16.gmra.mxu1 %v1051_v21 }
  0x36   :  { %977 = vmatprep.mubr.msk.bf16.mxu0 %vm446_vm0, %v1052_v22  ;;  %993 = vmatprep.mubr.msk.bf16.mxu1 %vm446_vm0, %v1054_v23 }
  0x3d   :  { %600 = vmatmul.mubr.bf16.gmra.mxu0 %v1056_v24  ;;  %728 = vmatmul.mubr.bf16.gmra.mxu1 %v1057_v25 }
  0x3e   :  { %978 = vmatprep.mubr.msk.bf16.mxu0 %vm446_vm0, %v1058_v26  ;;  %994 = vmatprep.mubr.msk.bf16.mxu1 %vm446_vm0, %v1060_v27 }
  0x45   :  { %608 = vmatmul.mubr.bf16.gmra.mxu0 %v1062_v28  ;;  %736 = vmatmul.mubr.bf16.gmra.mxu1 %v1063_v29 }
  0x46   :  { %979 = vmatprep.mubr.msk.bf16.mxu0 %vm446_vm0, %v1064_v30  ;;  %995 = vmatprep.mubr.msk.bf16.mxu1 %vm446_vm0, %v1066_v31 }
  0x4d   :  { %616 = vmatmul.mubr.bf16.gmra.mxu0 %v1068_v32  ;;  %744 = vmatmul.mubr.bf16.gmra.mxu1 %v1069_v33 }
  0x4e   :  { %980 = vmatprep.mubr.msk.bf16.mxu0 %vm446_vm0, %v1070_v34  ;;  %996 = vmatprep.mubr.msk.bf16.mxu1 %vm446_vm0, %v1072_v35 }
  0x55   :  { %624 = vmatmul.mubr.bf16.gmra.mxu0 %v1074_v36  ;;  %752 = vmatmul.mubr.bf16.gmra.mxu1 %v1075_v37 }
  0x56   :  { %981 = vmatprep.mubr.msk.bf16.mxu0 %vm446_vm0, %v1076_v38  ;;  %997 = vmatprep.mubr.msk.bf16.mxu1 %vm446_vm0, %v1078_v39 }
  0x5d   :  { %632 = vmatmul.mubr.bf16.gmra.mxu0 %v1080_v40  ;;  %760 = vmatmul.mubr.bf16.gmra.mxu1 %v1081_v41 }
  0x5e   :  { %982 = vmatprep.mubr.msk.bf16.mxu0 %vm446_vm0, %v1082_v42  ;;  %998 = vmatprep.mubr.msk.bf16.mxu1 %vm446_vm0, %v1084_v43 }
  0x65   :  { %640 = vmatmul.mubr.bf16.gmra.mxu0 %v1086_v44  ;;  %768 = vmatmul.mubr.bf16.gmra.mxu1 %v1087_v45 }
  0x66   :  { %983 = vmatprep.mubr.msk.bf16.mxu0 %vm446_vm0, %v1088_v46  ;;  %999 = vmatprep.mubr.msk.bf16.mxu1 %vm446_vm0, %v1090_v47 }
  0x6d   :  { %648 = vmatmul.mubr.bf16.gmra.mxu0 %v1092_v48  ;;  %776 = vmatmul.mubr.bf16.gmra.mxu1 %v1093_v49 }
  0x6e   :  { %984 = vmatprep.mubr.msk.bf16.mxu0 %vm446_vm0, %v1094_v50  ;;  %1000 = vmatprep.mubr.msk.bf16.mxu1 %vm446_vm0, %v1096_v51 }
  0x75   :  { %656 = vmatmul.mubr.bf16.gmra.mxu0 %v1098_v52  ;;  %784 = vmatmul.mubr.bf16.gmra.mxu1 %v1099_v53 }
  0x76   :  { %985 = vmatprep.mubr.msk.bf16.mxu0 %vm446_vm0, %v1100_v54  ;;  %1001 = vmatprep.mubr.msk.bf16.mxu1 %vm446_vm0, %v1102_v55 }
  0x7d   :  { %664 = vmatmul.mubr.bf16.gmra.mxu0 %v1104_v56  ;;  %792 = vmatmul.mubr.bf16.gmra.mxu1 %v1105_v57 }
  0x7e   :  { %986 = vmatprep.mubr.msk.bf16.mxu0 %vm446_vm0, %v1106_v58  ;;  %1002 = vmatprep.mubr.msk.bf16.mxu1 %vm446_vm0, %v1108_v59 }
  0x85   :  { %672 = vmatmul.mubr.bf16.gmra.mxu0 %v1110_v60  ;;  %800 = vmatmul.mubr.bf16.gmra.mxu1 %v1111_v61 }
  0x86   :  { %987 = vmatprep.mubr.msk.bf16.mxu0 %vm446_vm0, %v1112_v62  ;;  %1003 = vmatprep.mubr.msk.bf16.mxu1 %vm446_vm0, %v1114_v63 }
  0x8d   :  { %680 = vmatmul.mubr.bf16.gmra.mxu0 %v1116_v0  ;;  %808 = vmatmul.mubr.bf16.gmra.mxu1 %v1117_v1 }
  0x8e   :  { %988 = vmatprep.mubr.msk.bf16.mxu0 %vm446_vm0, %v1118_v2  ;;  %1004 = vmatprep.mubr.msk.bf16.mxu1 %vm446_vm0, %v1120_v3 }
  0x95   :  { %688 = vmatmul.mubr.bf16.gmra.mxu0 %v1122_v4  ;;  %816 = vmatmul.mubr.bf16.gmra.mxu1 %v1123_v5 }
  0x96   :  { %989 = vmatprep.mubr.msk.bf16.mxu0 %vm446_vm0, %v1124_v6  ;;  %1005 = vmatprep.mubr.msk.bf16.mxu1 %vm446_vm0, %v1126_v7 }
  0x9d   :  { %696 = vmatmul.mubr.bf16.gmra.mxu0 %v1128_v8  ;;  %824 = vmatmul.mubr.bf16.gmra.mxu1 %v1129_v9 }
  0xe5   :  { %v577_v11 = vpop.f32.mrf.mxu0  ;;  %v705_v12 = vpop.f32.mrf.mxu1 }
  0xe6   :  { %v578_v13 = vadd.f32 %v1405_v10, %v577_v11  ;;  %v706_v14 = vadd.f32 %v1405_v10, %v705_v12 }
  0xe7   :  { %v579_v15 = vpop.f32.mrf.mxu0  ;;  %v707_v16 = vpop.f32.mrf.mxu1 }
  0xe8   :  { %832 = vst.msk [vmem:[%s1730_s3] sm:$0xff] %vm446_vm0, %v578_v13  ;;  %864 = vst.msk [vmem:[%s1730_s3 + $0x100] sm:$0xff] %vm446_vm0, %v706_v14 }
  0xe9   :  { %v580_v17 = vpop.f32.mrf.mxu0  ;;  %v708_v18 = vpop.f32.mrf.mxu1 }
  0xea   :  { %v581_v19 = vadd.f32 %v1405_v10, %v580_v17  ;;  %v709_v20 = vadd.f32 %v1405_v10, %v708_v18 }
  0xeb   :  { %v582_v21 = vpop.f32.mrf.mxu0  ;;  %v710_v22 = vpop.f32.mrf.mxu1 }
  0xec   :  { %833 = vst.msk [vmem:[%s1730_s3 + $0x8] sm:$0xff] %vm446_vm0, %v581_v19  ;;  %865 = vst.msk [vmem:[%s1730_s3 + $0x108] sm:$0xff] %vm446_vm0, %v709_v20 }
  0xed   :  { %v585_v23 = vpop.f32.mrf.mxu0  ;;  %v713_v24 = vpop.f32.mrf.mxu1 }
  0xee   :  { %v586_v25 = vadd.f32 %v1405_v10, %v585_v23  ;;  %v714_v26 = vadd.f32 %v1405_v10, %v713_v24 }
  0xef   :  { %v587_v27 = vpop.f32.mrf.mxu0  ;;  %v715_v28 = vpop.f32.mrf.mxu1 }
  0xf0   :  { %834 = vst.msk [vmem:[%s1730_s3 + $0x10] sm:$0xff] %vm446_vm0, %v586_v25  ;;  %866 = vst.msk [vmem:[%s1730_s3 + $0x110] sm:$0xff] %vm446_vm0, %v714_v26 }
  0xf1   :  { %v588_v29 = vpop.f32.mrf.mxu0  ;;  %v716_v30 = vpop.f32.mrf.mxu1 }
  0xf2   :  { %v589_v31 = vadd.f32 %v1405_v10, %v588_v29  ;;  %v717_v32 = vadd.f32 %v1405_v10, %v716_v30 }
  0xf3   :  { %v590_v33 = vpop.f32.mrf.mxu0  ;;  %v718_v34 = vpop.f32.mrf.mxu1 }
  0xf4   :  { %835 = vst.msk [vmem:[%s1730_s3 + $0x18] sm:$0xff] %vm446_vm0, %v589_v31  ;;  %867 = vst.msk [vmem:[%s1730_s3 + $0x118] sm:$0xff] %vm446_vm0, %v717_v32 }
  0xf5   :  { %v593_v35 = vpop.f32.mrf.mxu0  ;;  %v721_v36 = vpop.f32.mrf.mxu1 }
  0xf6   :  { %v594_v37 = vadd.f32 %v1405_v10, %v593_v35  ;;  %v722_v38 = vadd.f32 %v1405_v10, %v721_v36 }
  0xf7   :  { %v595_v39 = vpop.f32.mrf.mxu0  ;;  %v723_v40 = vpop.f32.mrf.mxu1 }
  0xf8   :  { %836 = vst.msk [vmem:[%s1730_s3 + $0x20] sm:$0xff] %vm446_vm0, %v594_v37  ;;  %868 = vst.msk [vmem:[%s1730_s3 + $0x120] sm:$0xff] %vm446_vm0, %v722_v38 }
  0xf9   :  { %v596_v41 = vpop.f32.mrf.mxu0  ;;  %v724_v42 = vpop.f32.mrf.mxu1 }
  0xfa   :  { %v597_v43 = vadd.f32 %v1405_v10, %v596_v41  ;;  %v725_v44 = vadd.f32 %v1405_v10, %v724_v42 }
  0xfb   :  { %v598_v45 = vpop.f32.mrf.mxu0  ;;  %v726_v46 = vpop.f32.mrf.mxu1 }
  0xfc   :  { %837 = vst.msk [vmem:[%s1730_s3 + $0x28] sm:$0xff] %vm446_vm0, %v597_v43  ;;  %869 = vst.msk [vmem:[%s1730_s3 + $0x128] sm:$0xff] %vm446_vm0, %v725_v44 }
  0xfd   :  { %v601_v47 = vpop.f32.mrf.mxu0  ;;  %v729_v48 = vpop.f32.mrf.mxu1 }
  0xfe   :  { %v602_v49 = vadd.f32 %v1405_v10, %v601_v47  ;;  %v730_v50 = vadd.f32 %v1405_v10, %v729_v48 }
  0xff   :  { %v603_v51 = vpop.f32.mrf.mxu0  ;;  %v731_v52 = vpop.f32.mrf.mxu1 }
 0x100   :  { %838 = vst.msk [vmem:[%s1730_s3 + $0x30] sm:$0xff] %vm446_vm0, %v602_v49  ;;  %870 = vst.msk [vmem:[%s1730_s3 + $0x130] sm:$0xff] %vm446_vm0, %v730_v50 }
 0x101   :  { %v604_v53 = vpop.f32.mrf.mxu0  ;;  %v732_v54 = vpop.f32.mrf.mxu1 }
 0x102   :  { %v605_v55 = vadd.f32 %v1405_v10, %v604_v53  ;;  %v733_v56 = vadd.f32 %v1405_v10, %v732_v54 }
 0x103   :  { %v606_v57 = vpop.f32.mrf.mxu0  ;;  %v734_v58 = vpop.f32.mrf.mxu1 }
 0x104   :  { %839 = vst.msk [vmem:[%s1730_s3 + $0x38] sm:$0xff] %vm446_vm0, %v605_v55  ;;  %871 = vst.msk [vmem:[%s1730_s3 + $0x138] sm:$0xff] %vm446_vm0, %v733_v56 }
 0x105   :  { %v609_v59 = vpop.f32.mrf.mxu0  ;;  %v737_v60 = vpop.f32.mrf.mxu1 }
 0x106   :  { %v610_v61 = vadd.f32 %v1405_v10, %v609_v59  ;;  %v738_v62 = vadd.f32 %v1405_v10, %v737_v60 }
 0x107   :  { %v611_v63 = vpop.f32.mrf.mxu0  ;;  %v739_v0 = vpop.f32.mrf.mxu1 }
 0x108   :  { %840 = vst.msk [vmem:[%s1730_s3 + $0x40] sm:$0xff] %vm446_vm0, %v610_v61  ;;  %872 = vst.msk [vmem:[%s1730_s3 + $0x140] sm:$0xff] %vm446_vm0, %v738_v62 }
 0x109   :  { %v612_v1 = vpop.f32.mrf.mxu0  ;;  %v740_v2 = vpop.f32.mrf.mxu1 }
 0x10a   :  { %v613_v3 = vadd.f32 %v1405_v10, %v612_v1  ;;  %v741_v4 = vadd.f32 %v1405_v10, %v740_v2 }
 0x10b   :  { %v614_v5 = vpop.f32.mrf.mxu0  ;;  %v742_v6 = vpop.f32.mrf.mxu1 }
 0x10c   :  { %841 = vst.msk [vmem:[%s1730_s3 + $0x48] sm:$0xff] %vm446_vm0, %v613_v3  ;;  %873 = vst.msk [vmem:[%s1730_s3 + $0x148] sm:$0xff] %vm446_vm0, %v741_v4 }
 0x10d   :  { %v617_v7 = vpop.f32.mrf.mxu0  ;;  %v745_v8 = vpop.f32.mrf.mxu1 }
 0x10e   :  { %v618_v9 = vadd.f32 %v1405_v10, %v617_v7  ;;  %v746_v11 = vadd.f32 %v1405_v10, %v745_v8 }
 0x10f   :  { %v619_v12 = vpop.f32.mrf.mxu0  ;;  %v747_v13 = vpop.f32.mrf.mxu1 }
 0x110   :  { %842 = vst.msk [vmem:[%s1730_s3 + $0x50] sm:$0xff] %vm446_vm0, %v618_v9  ;;  %874 = vst.msk [vmem:[%s1730_s3 + $0x150] sm:$0xff] %vm446_vm0, %v746_v11 }
 0x111   :  { %v620_v14 = vpop.f32.mrf.mxu0  ;;  %v748_v15 = vpop.f32.mrf.mxu1 }
 0x112   :  { %v621_v16 = vadd.f32 %v1405_v10, %v620_v14  ;;  %v749_v17 = vadd.f32 %v1405_v10, %v748_v15 }
 0x113   :  { %v622_v18 = vpop.f32.mrf.mxu0  ;;  %v750_v19 = vpop.f32.mrf.mxu1 }
 0x114   :  { %843 = vst.msk [vmem:[%s1730_s3 + $0x58] sm:$0xff] %vm446_vm0, %v621_v16  ;;  %875 = vst.msk [vmem:[%s1730_s3 + $0x158] sm:$0xff] %vm446_vm0, %v749_v17 }
 0x115   :  { %v625_v20 = vpop.f32.mrf.mxu0  ;;  %v753_v21 = vpop.f32.mrf.mxu1 }
 0x116   :  { %v626_v22 = vadd.f32 %v1405_v10, %v625_v20  ;;  %v754_v23 = vadd.f32 %v1405_v10, %v753_v21 }
 0x117   :  { %v627_v24 = vpop.f32.mrf.mxu0  ;;  %v755_v25 = vpop.f32.mrf.mxu1 }
 0x118   :  { %844 = vst.msk [vmem:[%s1730_s3 + $0x60] sm:$0xff] %vm446_vm0, %v626_v22  ;;  %876 = vst.msk [vmem:[%s1730_s3 + $0x160] sm:$0xff] %vm446_vm0, %v754_v23 }
 0x119   :  { %v628_v26 = vpop.f32.mrf.mxu0  ;;  %v756_v27 = vpop.f32.mrf.mxu1 }
 0x11a   :  { %v629_v28 = vadd.f32 %v1405_v10, %v628_v26  ;;  %v757_v29 = vadd.f32 %v1405_v10, %v756_v27 }
 0x11b   :  { %v630_v30 = vpop.f32.mrf.mxu0  ;;  %v758_v31 = vpop.f32.mrf.mxu1 }
 0x11c   :  { %845 = vst.msk [vmem:[%s1730_s3 + $0x68] sm:$0xff] %vm446_vm0, %v629_v28  ;;  %877 = vst.msk [vmem:[%s1730_s3 + $0x168] sm:$0xff] %vm446_vm0, %v757_v29 }
 0x11d   :  { %v633_v32 = vpop.f32.mrf.mxu0  ;;  %v761_v33 = vpop.f32.mrf.mxu1 }
 0x11e   :  { %v634_v34 = vadd.f32 %v1405_v10, %v633_v32  ;;  %v762_v35 = vadd.f32 %v1405_v10, %v761_v33 }
 0x11f   :  { %v635_v36 = vpop.f32.mrf.mxu0  ;;  %v763_v37 = vpop.f32.mrf.mxu1 }
 0x120   :  { %846 = vst.msk [vmem:[%s1730_s3 + $0x70] sm:$0xff] %vm446_vm0, %v634_v34  ;;  %878 = vst.msk [vmem:[%s1730_s3 + $0x170] sm:$0xff] %vm446_vm0, %v762_v35 }
 0x121   :  { %v636_v38 = vpop.f32.mrf.mxu0  ;;  %v764_v39 = vpop.f32.mrf.mxu1 }
 0x122   :  { %v637_v40 = vadd.f32 %v1405_v10, %v636_v38  ;;  %v765_v41 = vadd.f32 %v1405_v10, %v764_v39 }
 0x123   :  { %v638_v42 = vpop.f32.mrf.mxu0  ;;  %v766_v43 = vpop.f32.mrf.mxu1 }
 0x124   :  { %847 = vst.msk [vmem:[%s1730_s3 + $0x78] sm:$0xff] %vm446_vm0, %v637_v40  ;;  %879 = vst.msk [vmem:[%s1730_s3 + $0x178] sm:$0xff] %vm446_vm0, %v765_v41 }
 0x125   :  { %v641_v44 = vpop.f32.mrf.mxu0  ;;  %v769_v45 = vpop.f32.mrf.mxu1 }
 0x126   :  { %v642_v46 = vadd.f32 %v1405_v10, %v641_v44  ;;  %v770_v47 = vadd.f32 %v1405_v10, %v769_v45 }
 0x127   :  { %v643_v48 = vpop.f32.mrf.mxu0  ;;  %v771_v49 = vpop.f32.mrf.mxu1 }
 0x128   :  { %848 = vst.msk [vmem:[%s1730_s3 + $0x80] sm:$0xff] %vm446_vm0, %v642_v46  ;;  %880 = vst.msk [vmem:[%s1730_s3 + $0x180] sm:$0xff] %vm446_vm0, %v770_v47 }
 0x129   :  { %v644_v50 = vpop.f32.mrf.mxu0  ;;  %v772_v51 = vpop.f32.mrf.mxu1 }
 0x12a   :  { %v645_v52 = vadd.f32 %v1405_v10, %v644_v50  ;;  %v773_v53 = vadd.f32 %v1405_v10, %v772_v51 }
 0x12b   :  { %v646_v54 = vpop.f32.mrf.mxu0  ;;  %v774_v55 = vpop.f32.mrf.mxu1 }
 0x12c   :  { %849 = vst.msk [vmem:[%s1730_s3 + $0x88] sm:$0xff] %vm446_vm0, %v645_v52  ;;  %881 = vst.msk [vmem:[%s1730_s3 + $0x188] sm:$0xff] %vm446_vm0, %v773_v53 }
 0x12d   :  { %v649_v56 = vpop.f32.mrf.mxu0  ;;  %v777_v57 = vpop.f32.mrf.mxu1 }
 0x12e   :  { %v650_v58 = vadd.f32 %v1405_v10, %v649_v56  ;;  %v778_v59 = vadd.f32 %v1405_v10, %v777_v57 }
 0x12f   :  { %v651_v60 = vpop.f32.mrf.mxu0  ;;  %v779_v61 = vpop.f32.mrf.mxu1 }
 0x130   :  { %850 = vst.msk [vmem:[%s1730_s3 + $0x90] sm:$0xff] %vm446_vm0, %v650_v58  ;;  %882 = vst.msk [vmem:[%s1730_s3 + $0x190] sm:$0xff] %vm446_vm0, %v778_v59 }
 0x131   :  { %v652_v62 = vpop.f32.mrf.mxu0  ;;  %v780_v63 = vpop.f32.mrf.mxu1 }
 0x132   :  { %v653_v0 = vadd.f32 %v1405_v10, %v652_v62  ;;  %v781_v1 = vadd.f32 %v1405_v10, %v780_v63 }
 0x133   :  { %v654_v2 = vpop.f32.mrf.mxu0  ;;  %v782_v3 = vpop.f32.mrf.mxu1 }
 0x134   :  { %851 = vst.msk [vmem:[%s1730_s3 + $0x98] sm:$0xff] %vm446_vm0, %v653_v0  ;;  %883 = vst.msk [vmem:[%s1730_s3 + $0x198] sm:$0xff] %vm446_vm0, %v781_v1 }
 0x135   :  { %v657_v4 = vpop.f32.mrf.mxu0  ;;  %v785_v5 = vpop.f32.mrf.mxu1 }
 0x136   :  { %v658_v6 = vadd.f32 %v1405_v10, %v657_v4  ;;  %v786_v7 = vadd.f32 %v1405_v10, %v785_v5 }
 0x137   :  { %v659_v8 = vpop.f32.mrf.mxu0  ;;  %v787_v9 = vpop.f32.mrf.mxu1 }
 0x138   :  { %852 = vst.msk [vmem:[%s1730_s3 + $0xa0] sm:$0xff] %vm446_vm0, %v658_v6  ;;  %884 = vst.msk [vmem:[%s1730_s3 + $0x1a0] sm:$0xff] %vm446_vm0, %v786_v7 }
 0x139   :  { %v660_v11 = vpop.f32.mrf.mxu0  ;;  %v788_v12 = vpop.f32.mrf.mxu1 }
 0x13a   :  { %v661_v13 = vadd.f32 %v1405_v10, %v660_v11  ;;  %v789_v14 = vadd.f32 %v1405_v10, %v788_v12 }
 0x13b   :  { %v662_v15 = vpop.f32.mrf.mxu0  ;;  %v790_v16 = vpop.f32.mrf.mxu1 }
 0x13c   :  { %853 = vst.msk [vmem:[%s1730_s3 + $0xa8] sm:$0xff] %vm446_vm0, %v661_v13  ;;  %885 = vst.msk [vmem:[%s1730_s3 + $0x1a8] sm:$0xff] %vm446_vm0, %v789_v14 }
 0x13d   :  { %v665_v17 = vpop.f32.mrf.mxu0  ;;  %v793_v18 = vpop.f32.mrf.mxu1 }
 0x13e   :  { %v666_v19 = vadd.f32 %v1405_v10, %v665_v17  ;;  %v794_v20 = vadd.f32 %v1405_v10, %v793_v18 }
 0x13f   :  { %v667_v21 = vpop.f32.mrf.mxu0  ;;  %v795_v22 = vpop.f32.mrf.mxu1 }
 0x140   :  { %854 = vst.msk [vmem:[%s1730_s3 + $0xb0] sm:$0xff] %vm446_vm0, %v666_v19  ;;  %886 = vst.msk [vmem:[%s1730_s3 + $0x1b0] sm:$0xff] %vm446_vm0, %v794_v20 }
 0x141   :  { %v668_v23 = vpop.f32.mrf.mxu0  ;;  %v796_v24 = vpop.f32.mrf.mxu1 }
 0x142   :  { %v669_v25 = vadd.f32 %v1405_v10, %v668_v23  ;;  %v797_v26 = vadd.f32 %v1405_v10, %v796_v24 }
 0x143   :  { %v670_v27 = vpop.f32.mrf.mxu0  ;;  %v798_v28 = vpop.f32.mrf.mxu1 }
 0x144   :  { %855 = vst.msk [vmem:[%s1730_s3 + $0xb8] sm:$0xff] %vm446_vm0, %v669_v25  ;;  %887 = vst.msk [vmem:[%s1730_s3 + $0x1b8] sm:$0xff] %vm446_vm0, %v797_v26 }
 0x145   :  { %v673_v29 = vpop.f32.mrf.mxu0  ;;  %v801_v30 = vpop.f32.mrf.mxu1 }
 0x146   :  { %v674_v31 = vadd.f32 %v1405_v10, %v673_v29  ;;  %v802_v32 = vadd.f32 %v1405_v10, %v801_v30 }
 0x147   :  { %v675_v33 = vpop.f32.mrf.mxu0  ;;  %v803_v34 = vpop.f32.mrf.mxu1 }
 0x148   :  { %856 = vst.msk [vmem:[%s1730_s3 + $0xc0] sm:$0xff] %vm446_vm0, %v674_v31  ;;  %888 = vst.msk [vmem:[%s1730_s3 + $0x1c0] sm:$0xff] %vm446_vm0, %v802_v32 }
 0x149   :  { %v676_v35 = vpop.f32.mrf.mxu0  ;;  %v804_v36 = vpop.f32.mrf.mxu1 }
 0x14a   :  { %v677_v37 = vadd.f32 %v1405_v10, %v676_v35  ;;  %v805_v38 = vadd.f32 %v1405_v10, %v804_v36 }
 0x14b   :  { %v678_v39 = vpop.f32.mrf.mxu0  ;;  %v806_v40 = vpop.f32.mrf.mxu1 }
 0x14c   :  { %857 = vst.msk [vmem:[%s1730_s3 + $0xc8] sm:$0xff] %vm446_vm0, %v677_v37  ;;  %889 = vst.msk [vmem:[%s1730_s3 + $0x1c8] sm:$0xff] %vm446_vm0, %v805_v38 }
 0x14d   :  { %v681_v41 = vpop.f32.mrf.mxu0  ;;  %v809_v42 = vpop.f32.mrf.mxu1 }
 0x14e   :  { %v682_v43 = vadd.f32 %v1405_v10, %v681_v41  ;;  %v810_v44 = vadd.f32 %v1405_v10, %v809_v42 }
 0x14f   :  { %v683_v45 = vpop.f32.mrf.mxu0  ;;  %v811_v46 = vpop.f32.mrf.mxu1 }
 0x150   :  { %858 = vst.msk [vmem:[%s1730_s3 + $0xd0] sm:$0xff] %vm446_vm0, %v682_v43  ;;  %890 = vst.msk [vmem:[%s1730_s3 + $0x1d0] sm:$0xff] %vm446_vm0, %v810_v44 }
 0x151   :  { %v684_v47 = vpop.f32.mrf.mxu0  ;;  %v812_v48 = vpop.f32.mrf.mxu1 }
 0x152   :  { %v685_v49 = vadd.f32 %v1405_v10, %v684_v47  ;;  %v813_v50 = vadd.f32 %v1405_v10, %v812_v48 }
 0x153   :  { %v686_v51 = vpop.f32.mrf.mxu0  ;;  %v814_v52 = vpop.f32.mrf.mxu1 }
 0x154   :  { %859 = vst.msk [vmem:[%s1730_s3 + $0xd8] sm:$0xff] %vm446_vm0, %v685_v49  ;;  %891 = vst.msk [vmem:[%s1730_s3 + $0x1d8] sm:$0xff] %vm446_vm0, %v813_v50 }
 0x155   :  { %v689_v53 = vpop.f32.mrf.mxu0  ;;  %v817_v54 = vpop.f32.mrf.mxu1 }
 0x156   :  { %v690_v55 = vadd.f32 %v1405_v10, %v689_v53  ;;  %v818_v56 = vadd.f32 %v1405_v10, %v817_v54 }
 0x157   :  { %v691_v57 = vpop.f32.mrf.mxu0  ;;  %v819_v58 = vpop.f32.mrf.mxu1 }
 0x158   :  { %860 = vst.msk [vmem:[%s1730_s3 + $0xe0] sm:$0xff] %vm446_vm0, %v690_v55  ;;  %892 = vst.msk [vmem:[%s1730_s3 + $0x1e0] sm:$0xff] %vm446_vm0, %v818_v56 }
 0x159   :  { %v692_v59 = vpop.f32.mrf.mxu0  ;;  %v820_v60 = vpop.f32.mrf.mxu1 }
 0x15a   :  { %v693_v61 = vadd.f32 %v1405_v10, %v692_v59  ;;  %v821_v62 = vadd.f32 %v1405_v10, %v820_v60 }
 0x15b   :  { %v694_v63 = vpop.f32.mrf.mxu0  ;;  %v822_v0 = vpop.f32.mrf.mxu1 }
 0x15c   :  { %861 = vst.msk [vmem:[%s1730_s3 + $0xe8] sm:$0xff] %vm446_vm0, %v693_v61  ;;  %893 = vst.msk [vmem:[%s1730_s3 + $0x1e8] sm:$0xff] %vm446_vm0, %v821_v62 }
 0x15d   :  { %v697_v1 = vpop.f32.mrf.mxu0  ;;  %v825_v2 = vpop.f32.mrf.mxu1 }
 0x15e   :  { %v698_v3 = vadd.f32 %v1405_v10, %v697_v1  ;;  %v826_v4 = vadd.f32 %v1405_v10, %v825_v2 }
 0x15f   :  { %v699_v5 = vpop.f32.mrf.mxu0  ;;  %v827_v6 = vpop.f32.mrf.mxu1 }
 0x160   :  { %862 = vst.msk [vmem:[%s1730_s3 + $0xf0] sm:$0xff] %vm446_vm0, %v698_v3  ;;  %894 = vst.msk [vmem:[%s1730_s3 + $0x1f0] sm:$0xff] %vm446_vm0, %v826_v4 }
 0x161   :  { %v700_v7 = vpop.f32.mrf.mxu0  ;;  %v828_v8 = vpop.f32.mrf.mxu1 }
 0x162   :  { %v701_v9 = vadd.f32 %v1405_v10, %v700_v7  ;;  %v829_v11 = vadd.f32 %v1405_v10, %v828_v8 }
 0x163   :  { %v702_v12 = vpop.f32.mrf.mxu0  ;;  %v830_v13 = vpop.f32.mrf.mxu1 }
 0x164   :  { %863 = vst.msk [vmem:[%s1730_s3 + $0xf8] sm:$0xff] %vm446_vm0, %v701_v9  ;;  %895 = vst.msk [vmem:[%s1730_s3 + $0x1f8] sm:$0xff] %vm446_vm0, %v829_v11 }

// kernel: urvos_forward.80
= control target key start
LH: loop header
LB: loop body
LE: loop exit
PB: predicated region body
PF: predicated region fallthrough
CT: control target
= control target key end

     0   :  { %v1131_v0 = vmov 0   ;;  %vm446_vm0 = vcmask 130048   ;;  %vm832_vm1 = vcmask 15360   ;;  %s1728_s1 = inlined_call_operand.vmem [shape: bf16[144,2], index: 1, kind: input, shape index: {}]   ;;  %s1729_s0 = inlined_call_operand.vmem [shape: bf16[512,144], index: 0, kind: input, shape index: {}]   ;;  %s1730_s2 = inlined_call_operand.vmem [shape: f32[1,2], index: 2, kind: input, shape index: {}]   ;;  %s1731_s3 = inlined_call_operand.vmem [shape: f32[512,2], index: 3, kind: output, shape index: {}]  }
   0x1   :  { %543 = vmatprep.subr.bf16.mxu0 %v1131_v0  ;;  %1007 = vmatprep.subr.bf16.mxu1 %v1131_v0  ;;  %v1026_v1 = vld [vmem:[%s1728_s1 + $0x38] sm:$0xff]   ;;  %v1027_v2 = vld [vmem:[%s1728_s1 + $0x30] sm:$0xff]   ;;  %v1028_v3 = vld [vmem:[%s1728_s1 + $0x28] sm:$0xff]  }
   0x2   :  { %544 = vmatpush1.bf16.msra.mxu0 %v1026_v1  ;;  %1016 = vmatpush1.bf16.msra.mxu1 %v1026_v1  ;;  %v1029_v4 = vld [vmem:[%s1728_s1 + $0x20] sm:$0xff]   ;;  %v1030_v7 = vld [vmem:[%s1728_s1 + $0x18] sm:$0xff]   ;;  %v1031_v8 = vld [vmem:[%s1728_s1 + $0x10] sm:$0xff]  }
   0x3   :  { %545 = vmatprep.subr.bf16.mxu0 %v1131_v0  ;;  %1008 = vmatprep.subr.bf16.mxu1 %v1131_v0  ;;  %v1037_v5 = vld [vmem:[%s1729_s0 + $0x4] ss:$8 sps:$4 sm:$0xff]   ;;  %v1035_v12 = vld [vmem:[%s1729_s0] ss:$8 sps:$4 sm:$0xff]   ;;  %v1041_v14 = vld [vmem:[%s1729_s0 + $0x14] ss:$8 sps:$4 sm:$0xff]  }
   0x4   :  { %v1040_v6 = vld [vmem:[%s1729_s0 + $0x104] ss:$8 sps:$4 sm:$0xff]   ;;  %975 = vmatprep.mubr.msk.bf16.mxu0 %vm446_vm0, %v1037_v5  ;;  %v1038_v13 = vld [vmem:[%s1729_s0 + $0x100] ss:$8 sps:$4 sm:$0xff]   ;;  %v1043_v15 = vld [vmem:[%s1729_s0 + $0x114] ss:$8 sps:$4 sm:$0xff]  }
   0x5   :  { %991 = vmatprep.mubr.msk.bf16.mxu1 %vm446_vm0, %v1040_v6  ;;  %v1032_v9 = vld [vmem:[%s1728_s1 + $0x8] sm:$0xff]   ;;  %v1033_v10 = vld [vmem:[%s1728_s1] sm:$0xff]   ;;  %v1045_v16 = vld [vmem:[%s1729_s0 + $0x10] ss:$8 sps:$4 sm:$0xff]  }
   0x6   :  { %546 = vmatpush1.bf16.msra.mxu0 %v1027_v2  ;;  %1017 = vmatpush1.bf16.msra.mxu1 %v1027_v2  ;;  %v1034_v11 = vld [vmem:[%s1728_s1 + $0x40] sm:$0xff]   ;;  %v1046_v17 = vld [vmem:[%s1729_s0 + $0x110] ss:$8 sps:$4 sm:$0xff]   ;;  %v1053_v22 = vld [vmem:[%s1729_s0 + $0x34] ss:$8 sps:$4 sm:$0xff]  }
   0x7   :  { %547 = vmatprep.subr.bf16.mxu0 %v1131_v0  ;;  %1009 = vmatprep.subr.bf16.mxu1 %v1131_v0  ;;  %v1047_v18 = vld [vmem:[%s1729_s0 + $0x24] ss:$8 sps:$4 sm:$0xff]   ;;  %v1051_v20 = vld [vmem:[%s1729_s0 + $0x20] ss:$8 sps:$4 sm:$0xff]   ;;  %v1055_v23 = vld [vmem:[%s1729_s0 + $0x134] ss:$8 sps:$4 sm:$0xff]  }
   0x8   :  { %v1049_v19 = vld [vmem:[%s1729_s0 + $0x124] ss:$8 sps:$4 sm:$0xff]   ;;  %v1052_v21 = vld [vmem:[%s1729_s0 + $0x120] ss:$8 sps:$4 sm:$0xff]   ;;  %v1057_v24 = vld [vmem:[%s1729_s0 + $0x30] ss:$8 sps:$4 sm:$0xff]  }
   0x9   :  { %v1058_v25 = vld [vmem:[%s1729_s0 + $0x130] ss:$8 sps:$4 sm:$0xff]   ;;  %v1059_v26 = vld [vmem:[%s1729_s0 + $0x44] ss:$8 sps:$4 sm:$0xff]   ;;  %v1063_v28 = vld [vmem:[%s1729_s0 + $0x40] ss:$8 sps:$4 sm:$0xff]  }
   0xa   :  { %548 = vmatpush1.bf16.msra.mxu0 %v1028_v3  ;;  %1018 = vmatpush1.bf16.msra.mxu1 %v1028_v3  ;;  %v1061_v27 = vld [vmem:[%s1729_s0 + $0x144] ss:$8 sps:$4 sm:$0xff]   ;;  %v1064_v29 = vld [vmem:[%s1729_s0 + $0x140] ss:$8 sps:$4 sm:$0xff]   ;;  %v1065_v30 = vld [vmem:[%s1729_s0 + $0x54] ss:$8 sps:$4 sm:$0xff]  }
   0xb   :  { %549 = vmatprep.subr.bf16.mxu0 %v1131_v0  ;;  %1010 = vmatprep.subr.bf16.mxu1 %v1131_v0  ;;  %v1067_v31 = vld [vmem:[%s1729_s0 + $0x154] ss:$8 sps:$4 sm:$0xff]   ;;  %v1069_v32 = vld [vmem:[%s1729_s0 + $0x50] ss:$8 sps:$4 sm:$0xff]   ;;  %v1071_v34 = vld [vmem:[%s1729_s0 + $0x64] ss:$8 sps:$4 sm:$0xff]  }
   0xc   :  { %v1070_v33 = vld [vmem:[%s1729_s0 + $0x150] ss:$8 sps:$4 sm:$0xff]   ;;  %v1073_v35 = vld [vmem:[%s1729_s0 + $0x164] ss:$8 sps:$4 sm:$0xff]   ;;  %v1075_v36 = vld [vmem:[%s1729_s0 + $0x60] ss:$8 sps:$4 sm:$0xff]  }
   0xd   :  { %v1076_v37 = vld [vmem:[%s1729_s0 + $0x160] ss:$8 sps:$4 sm:$0xff]   ;;  %v1077_v38 = vld [vmem:[%s1729_s0 + $0x74] ss:$8 sps:$4 sm:$0xff]   ;;  %v1081_v40 = vld [vmem:[%s1729_s0 + $0x70] ss:$8 sps:$4 sm:$0xff]  }
   0xe   :  { %550 = vmatpush1.bf16.msra.mxu0 %v1029_v4  ;;  %1019 = vmatpush1.bf16.msra.mxu1 %v1029_v4  ;;  %v1079_v39 = vld [vmem:[%s1729_s0 + $0x174] ss:$8 sps:$4 sm:$0xff]   ;;  %v1082_v41 = vld [vmem:[%s1729_s0 + $0x170] ss:$8 sps:$4 sm:$0xff]   ;;  %v1083_v42 = vld [vmem:[%s1729_s0 + $0x84] ss:$8 sps:$4 sm:$0xff]  }
   0xf   :  { %551 = vmatprep.subr.bf16.mxu0 %v1131_v0  ;;  %1011 = vmatprep.subr.bf16.mxu1 %v1131_v0  ;;  %v1085_v43 = vld [vmem:[%s1729_s0 + $0x184] ss:$8 sps:$4 sm:$0xff]   ;;  %v1087_v44 = vld [vmem:[%s1729_s0 + $0x80] ss:$8 sps:$4 sm:$0xff]   ;;  %v1089_v46 = vld [vmem:[%s1729_s0 + $0x94] ss:$8 sps:$4 sm:$0xff]  }
  0x10   :  { %v1088_v45 = vld [vmem:[%s1729_s0 + $0x180] ss:$8 sps:$4 sm:$0xff]   ;;  %v1091_v47 = vld [vmem:[%s1729_s0 + $0x194] ss:$8 sps:$4 sm:$0xff]   ;;  %v1093_v48 = vld [vmem:[%s1729_s0 + $0x90] ss:$8 sps:$4 sm:$0xff]  }
  0x11   :  { %v1094_v49 = vld [vmem:[%s1729_s0 + $0x190] ss:$8 sps:$4 sm:$0xff]   ;;  %v1095_v50 = vld [vmem:[%s1729_s0 + $0xa4] ss:$8 sps:$4 sm:$0xff]   ;;  %v1099_v52 = vld [vmem:[%s1729_s0 + $0xa0] ss:$8 sps:$4 sm:$0xff]  }
  0x12   :  { %552 = vmatpush1.bf16.msra.mxu0 %v1030_v7  ;;  %1020 = vmatpush1.bf16.msra.mxu1 %v1030_v7  ;;  %v1097_v51 = vld [vmem:[%s1729_s0 + $0x1a4] ss:$8 sps:$4 sm:$0xff]   ;;  %v1100_v53 = vld [vmem:[%s1729_s0 + $0x1a0] ss:$8 sps:$4 sm:$0xff]   ;;  %v1101_v54 = vld [vmem:[%s1729_s0 + $0xb4] ss:$8 sps:$4 sm:$0xff]  }
  0x13   :  { %553 = vmatprep.subr.bf16.mxu0 %v1131_v0  ;;  %1012 = vmatprep.subr.bf16.mxu1 %v1131_v0  ;;  %v1103_v55 = vld [vmem:[%s1729_s0 + $0x1b4] ss:$8 sps:$4 sm:$0xff]   ;;  %v1105_v56 = vld [vmem:[%s1729_s0 + $0xb0] ss:$8 sps:$4 sm:$0xff]   ;;  %v1107_v58 = vld [vmem:[%s1729_s0 + $0xc4] ss:$8 sps:$4 sm:$0xff]  }
  0x14   :  { %v1106_v57 = vld [vmem:[%s1729_s0 + $0x1b0] ss:$8 sps:$4 sm:$0xff]   ;;  %v1109_v59 = vld [vmem:[%s1729_s0 + $0x1c4] ss:$8 sps:$4 sm:$0xff]   ;;  %v1111_v60 = vld [vmem:[%s1729_s0 + $0xc0] ss:$8 sps:$4 sm:$0xff]  }
  0x15   :  { %v1112_v61 = vld [vmem:[%s1729_s0 + $0x1c0] ss:$8 sps:$4 sm:$0xff]   ;;  %v1113_v62 = vld [vmem:[%s1729_s0 + $0xd4] ss:$8 sps:$4 sm:$0xff]   ;;  %v1118_v1 = vld [vmem:[%s1729_s0 + $0x1d0] ss:$8 sps:$4 sm:$0xff]  }
  0x16   :  { %554 = vmatpush1.bf16.msra.mxu0 %v1031_v8  ;;  %1021 = vmatpush1.bf16.msra.mxu1 %v1031_v8  ;;  %v1115_v63 = vld [vmem:[%s1729_s0 + $0x1d4] ss:$8 sps:$4 sm:$0xff]   ;;  %v1119_v2 = vld [vmem:[%s1729_s0 + $0xe4] ss:$8 sps:$4 sm:$0xff]   ;;  %v1123_v4 = vld [vmem:[%s1729_s0 + $0xe0] ss:$8 sps:$4 sm:$0xff]  }
  0x17   :  { %555 = vmatprep.subr.bf16.mxu0 %v1131_v0  ;;  %1013 = vmatprep.subr.bf16.mxu1 %v1131_v0  ;;  %v1121_v3 = vld [vmem:[%s1729_s0 + $0x1e4] ss:$8 sps:$4 sm:$0xff]   ;;  %v1124_v5 = vld [vmem:[%s1729_s0 + $0x1e0] ss:$8 sps:$4 sm:$0xff]   ;;  %v1125_v6 = vld [vmem:[%s1729_s0 + $0xf4] ss:$8 sps:$4 sm:$0xff]  }
  0x18   :  { %v1127_v7 = vld [vmem:[%s1729_s0 + $0x1f4] ss:$8 sps:$4 sm:$0xff]   ;;  %v1129_v8 = vld [vmem:[%s1729_s0 + $0xf0] ss:$8 sps:$4 sm:$0xff]  }
  0x1a   :  { %556 = vmatpush1.bf16.msra.mxu0 %v1032_v9  ;;  %1022 = vmatpush1.bf16.msra.mxu1 %v1032_v9  ;;  %v1130_v9 = vld [vmem:[%s1729_s0 + $0x1f0] ss:$8 sps:$4 sm:$0xff]  }
  0x1b   :  { %557 = vmatprep.subr.bf16.mxu0 %v1131_v0  ;;  %1014 = vmatprep.subr.bf16.mxu1 %v1131_v0 }
  0x1e   :  { %558 = vmatpush1.bf16.msra.mxu0 %v1033_v10  ;;  %1023 = vmatpush1.bf16.msra.mxu1 %v1033_v10  ;;  %v1406_v10 = vld [vmem:[%s1730_s2] ss:$0 sm:$0xff] }
  0x1f   :  { %573 = vmatprep.subr.bf16.mxu0 %v1131_v0  ;;  %1015 = vmatprep.subr.bf16.mxu1 %v1131_v0  ;;  %v1117_v0 = vld [vmem:[%s1729_s0 + $0xd0] ss:$8 sps:$4 sm:$0xff]  }
  0x22   :  { %574 = vmatpush2.bf16.msra.mxu0 %v1034_v11  ;;  %1024 = vmatpush2.bf16.msra.mxu1 %v1034_v11 }
  0x25   :  { %576 = vmatmul.mubr.bf16.vlgmr.msra.gmra.mxu0 %v1035_v12  ;;  %704 = vmatmul.mubr.bf16.vlgmr.msra.gmra.mxu1 %v1038_v13 }
  0x26   :  { %976 = vmatprep.mubr.msk.bf16.mxu0 %vm446_vm0, %v1041_v14  ;;  %992 = vmatprep.mubr.msk.bf16.mxu1 %vm446_vm0, %v1043_v15 }
  0x2d   :  { %584 = vmatmul.mubr.bf16.gmra.mxu0 %v1045_v16  ;;  %712 = vmatmul.mubr.bf16.gmra.mxu1 %v1046_v17 }
  0x2e   :  { %977 = vmatprep.mubr.msk.bf16.mxu0 %vm446_vm0, %v1047_v18  ;;  %993 = vmatprep.mubr.msk.bf16.mxu1 %vm446_vm0, %v1049_v19 }
  0x35   :  { %592 = vmatmul.mubr.bf16.gmra.mxu0 %v1051_v20  ;;  %720 = vmatmul.mubr.bf16.gmra.mxu1 %v1052_v21 }
  0x36   :  { %978 = vmatprep.mubr.msk.bf16.mxu0 %vm446_vm0, %v1053_v22  ;;  %994 = vmatprep.mubr.msk.bf16.mxu1 %vm446_vm0, %v1055_v23 }
  0x3d   :  { %600 = vmatmul.mubr.bf16.gmra.mxu0 %v1057_v24  ;;  %728 = vmatmul.mubr.bf16.gmra.mxu1 %v1058_v25 }
  0x3e   :  { %979 = vmatprep.mubr.msk.bf16.mxu0 %vm446_vm0, %v1059_v26  ;;  %995 = vmatprep.mubr.msk.bf16.mxu1 %vm446_vm0, %v1061_v27 }
  0x45   :  { %608 = vmatmul.mubr.bf16.gmra.mxu0 %v1063_v28  ;;  %736 = vmatmul.mubr.bf16.gmra.mxu1 %v1064_v29 }
  0x46   :  { %980 = vmatprep.mubr.msk.bf16.mxu0 %vm446_vm0, %v1065_v30  ;;  %996 = vmatprep.mubr.msk.bf16.mxu1 %vm446_vm0, %v1067_v31 }
  0x4d   :  { %616 = vmatmul.mubr.bf16.gmra.mxu0 %v1069_v32  ;;  %744 = vmatmul.mubr.bf16.gmra.mxu1 %v1070_v33 }
  0x4e   :  { %981 = vmatprep.mubr.msk.bf16.mxu0 %vm446_vm0, %v1071_v34  ;;  %997 = vmatprep.mubr.msk.bf16.mxu1 %vm446_vm0, %v1073_v35 }
  0x55   :  { %624 = vmatmul.mubr.bf16.gmra.mxu0 %v1075_v36  ;;  %752 = vmatmul.mubr.bf16.gmra.mxu1 %v1076_v37 }
  0x56   :  { %982 = vmatprep.mubr.msk.bf16.mxu0 %vm446_vm0, %v1077_v38  ;;  %998 = vmatprep.mubr.msk.bf16.mxu1 %vm446_vm0, %v1079_v39 }
  0x5d   :  { %632 = vmatmul.mubr.bf16.gmra.mxu0 %v1081_v40  ;;  %760 = vmatmul.mubr.bf16.gmra.mxu1 %v1082_v41 }
  0x5e   :  { %983 = vmatprep.mubr.msk.bf16.mxu0 %vm446_vm0, %v1083_v42  ;;  %999 = vmatprep.mubr.msk.bf16.mxu1 %vm446_vm0, %v1085_v43 }
  0x65   :  { %640 = vmatmul.mubr.bf16.gmra.mxu0 %v1087_v44  ;;  %768 = vmatmul.mubr.bf16.gmra.mxu1 %v1088_v45 }
  0x66   :  { %984 = vmatprep.mubr.msk.bf16.mxu0 %vm446_vm0, %v1089_v46  ;;  %1000 = vmatprep.mubr.msk.bf16.mxu1 %vm446_vm0, %v1091_v47 }
  0x6d   :  { %648 = vmatmul.mubr.bf16.gmra.mxu0 %v1093_v48  ;;  %776 = vmatmul.mubr.bf16.gmra.mxu1 %v1094_v49 }
  0x6e   :  { %985 = vmatprep.mubr.msk.bf16.mxu0 %vm446_vm0, %v1095_v50  ;;  %1001 = vmatprep.mubr.msk.bf16.mxu1 %vm446_vm0, %v1097_v51 }
  0x75   :  { %656 = vmatmul.mubr.bf16.gmra.mxu0 %v1099_v52  ;;  %784 = vmatmul.mubr.bf16.gmra.mxu1 %v1100_v53 }
  0x76   :  { %986 = vmatprep.mubr.msk.bf16.mxu0 %vm446_vm0, %v1101_v54  ;;  %1002 = vmatprep.mubr.msk.bf16.mxu1 %vm446_vm0, %v1103_v55 }
  0x7d   :  { %664 = vmatmul.mubr.bf16.gmra.mxu0 %v1105_v56  ;;  %792 = vmatmul.mubr.bf16.gmra.mxu1 %v1106_v57 }
  0x7e   :  { %987 = vmatprep.mubr.msk.bf16.mxu0 %vm446_vm0, %v1107_v58  ;;  %1003 = vmatprep.mubr.msk.bf16.mxu1 %vm446_vm0, %v1109_v59 }
  0x85   :  { %672 = vmatmul.mubr.bf16.gmra.mxu0 %v1111_v60  ;;  %800 = vmatmul.mubr.bf16.gmra.mxu1 %v1112_v61 }
  0x86   :  { %988 = vmatprep.mubr.msk.bf16.mxu0 %vm446_vm0, %v1113_v62  ;;  %1004 = vmatprep.mubr.msk.bf16.mxu1 %vm446_vm0, %v1115_v63 }
  0x8d   :  { %680 = vmatmul.mubr.bf16.gmra.mxu0 %v1117_v0  ;;  %808 = vmatmul.mubr.bf16.gmra.mxu1 %v1118_v1 }
  0x8e   :  { %989 = vmatprep.mubr.msk.bf16.mxu0 %vm446_vm0, %v1119_v2  ;;  %1005 = vmatprep.mubr.msk.bf16.mxu1 %vm446_vm0, %v1121_v3 }
  0x95   :  { %688 = vmatmul.mubr.bf16.gmra.mxu0 %v1123_v4  ;;  %816 = vmatmul.mubr.bf16.gmra.mxu1 %v1124_v5 }
  0x96   :  { %990 = vmatprep.mubr.msk.bf16.mxu0 %vm446_vm0, %v1125_v6  ;;  %1006 = vmatprep.mubr.msk.bf16.mxu1 %vm446_vm0, %v1127_v7 }
  0x9d   :  { %696 = vmatmul.mubr.bf16.gmra.mxu0 %v1129_v8  ;;  %824 = vmatmul.mubr.bf16.gmra.mxu1 %v1130_v9 }
  0xe5   :  { %v577_v11 = vpop.f32.mrf.mxu0  ;;  %v705_v12 = vpop.f32.mrf.mxu1 }
  0xe6   :  { %v578_v13 = vadd.f32 %v1406_v10, %v577_v11  ;;  %v706_v14 = vadd.f32 %v1406_v10, %v705_v12 }
  0xe7   :  { %v579_v15 = vpop.f32.mrf.mxu0  ;;  %v707_v16 = vpop.f32.mrf.mxu1 }
  0xe8   :  { %833 = vst.msk [vmem:[%s1731_s3] sm:$0xff] %vm832_vm1, %v578_v13  ;;  %865 = vst.msk [vmem:[%s1731_s3 + $0x100] sm:$0xff] %vm832_vm1, %v706_v14 }
  0xe9   :  { %v580_v17 = vpop.f32.mrf.mxu0  ;;  %v708_v18 = vpop.f32.mrf.mxu1 }
  0xea   :  { %v581_v19 = vadd.f32 %v1406_v10, %v580_v17  ;;  %v709_v20 = vadd.f32 %v1406_v10, %v708_v18 }
  0xeb   :  { %v582_v21 = vpop.f32.mrf.mxu0  ;;  %v710_v22 = vpop.f32.mrf.mxu1 }
  0xec   :  { %834 = vst.msk [vmem:[%s1731_s3 + $0x8] sm:$0xff] %vm832_vm1, %v581_v19  ;;  %866 = vst.msk [vmem:[%s1731_s3 + $0x108] sm:$0xff] %vm832_vm1, %v709_v20 }
  0xed   :  { %v585_v23 = vpop.f32.mrf.mxu0  ;;  %v713_v24 = vpop.f32.mrf.mxu1 }
  0xee   :  { %v586_v25 = vadd.f32 %v1406_v10, %v585_v23  ;;  %v714_v26 = vadd.f32 %v1406_v10, %v713_v24 }
  0xef   :  { %v587_v27 = vpop.f32.mrf.mxu0  ;;  %v715_v28 = vpop.f32.mrf.mxu1 }
  0xf0   :  { %835 = vst.msk [vmem:[%s1731_s3 + $0x10] sm:$0xff] %vm832_vm1, %v586_v25  ;;  %867 = vst.msk [vmem:[%s1731_s3 + $0x110] sm:$0xff] %vm832_vm1, %v714_v26 }
  0xf1   :  { %v588_v29 = vpop.f32.mrf.mxu0  ;;  %v716_v30 = vpop.f32.mrf.mxu1 }
  0xf2   :  { %v589_v31 = vadd.f32 %v1406_v10, %v588_v29  ;;  %v717_v32 = vadd.f32 %v1406_v10, %v716_v30 }
  0xf3   :  { %v590_v33 = vpop.f32.mrf.mxu0  ;;  %v718_v34 = vpop.f32.mrf.mxu1 }
  0xf4   :  { %836 = vst.msk [vmem:[%s1731_s3 + $0x18] sm:$0xff] %vm832_vm1, %v589_v31  ;;  %868 = vst.msk [vmem:[%s1731_s3 + $0x118] sm:$0xff] %vm832_vm1, %v717_v32 }
  0xf5   :  { %v593_v35 = vpop.f32.mrf.mxu0  ;;  %v721_v36 = vpop.f32.mrf.mxu1 }
  0xf6   :  { %v594_v37 = vadd.f32 %v1406_v10, %v593_v35  ;;  %v722_v38 = vadd.f32 %v1406_v10, %v721_v36 }
  0xf7   :  { %v595_v39 = vpop.f32.mrf.mxu0  ;;  %v723_v40 = vpop.f32.mrf.mxu1 }
  0xf8   :  { %837 = vst.msk [vmem:[%s1731_s3 + $0x20] sm:$0xff] %vm832_vm1, %v594_v37  ;;  %869 = vst.msk [vmem:[%s1731_s3 + $0x120] sm:$0xff] %vm832_vm1, %v722_v38 }
  0xf9   :  { %v596_v41 = vpop.f32.mrf.mxu0  ;;  %v724_v42 = vpop.f32.mrf.mxu1 }
  0xfa   :  { %v597_v43 = vadd.f32 %v1406_v10, %v596_v41  ;;  %v725_v44 = vadd.f32 %v1406_v10, %v724_v42 }
  0xfb   :  { %v598_v45 = vpop.f32.mrf.mxu0  ;;  %v726_v46 = vpop.f32.mrf.mxu1 }
  0xfc   :  { %838 = vst.msk [vmem:[%s1731_s3 + $0x28] sm:$0xff] %vm832_vm1, %v597_v43  ;;  %870 = vst.msk [vmem:[%s1731_s3 + $0x128] sm:$0xff] %vm832_vm1, %v725_v44 }
  0xfd   :  { %v601_v47 = vpop.f32.mrf.mxu0  ;;  %v729_v48 = vpop.f32.mrf.mxu1 }
  0xfe   :  { %v602_v49 = vadd.f32 %v1406_v10, %v601_v47  ;;  %v730_v50 = vadd.f32 %v1406_v10, %v729_v48 }
  0xff   :  { %v603_v51 = vpop.f32.mrf.mxu0  ;;  %v731_v52 = vpop.f32.mrf.mxu1 }
 0x100   :  { %839 = vst.msk [vmem:[%s1731_s3 + $0x30] sm:$0xff] %vm832_vm1, %v602_v49  ;;  %871 = vst.msk [vmem:[%s1731_s3 + $0x130] sm:$0xff] %vm832_vm1, %v730_v50 }
 0x101   :  { %v604_v53 = vpop.f32.mrf.mxu0  ;;  %v732_v54 = vpop.f32.mrf.mxu1 }
 0x102   :  { %v605_v55 = vadd.f32 %v1406_v10, %v604_v53  ;;  %v733_v56 = vadd.f32 %v1406_v10, %v732_v54 }
 0x103   :  { %v606_v57 = vpop.f32.mrf.mxu0  ;;  %v734_v58 = vpop.f32.mrf.mxu1 }
 0x104   :  { %840 = vst.msk [vmem:[%s1731_s3 + $0x38] sm:$0xff] %vm832_vm1, %v605_v55  ;;  %872 = vst.msk [vmem:[%s1731_s3 + $0x138] sm:$0xff] %vm832_vm1, %v733_v56 }
 0x105   :  { %v609_v59 = vpop.f32.mrf.mxu0  ;;  %v737_v60 = vpop.f32.mrf.mxu1 }
 0x106   :  { %v610_v61 = vadd.f32 %v1406_v10, %v609_v59  ;;  %v738_v62 = vadd.f32 %v1406_v10, %v737_v60 }
 0x107   :  { %v611_v63 = vpop.f32.mrf.mxu0  ;;  %v739_v0 = vpop.f32.mrf.mxu1 }
 0x108   :  { %841 = vst.msk [vmem:[%s1731_s3 + $0x40] sm:$0xff] %vm832_vm1, %v610_v61  ;;  %873 = vst.msk [vmem:[%s1731_s3 + $0x140] sm:$0xff] %vm832_vm1, %v738_v62 }
 0x109   :  { %v612_v1 = vpop.f32.mrf.mxu0  ;;  %v740_v2 = vpop.f32.mrf.mxu1 }
 0x10a   :  { %v613_v3 = vadd.f32 %v1406_v10, %v612_v1  ;;  %v741_v4 = vadd.f32 %v1406_v10, %v740_v2 }
 0x10b   :  { %v614_v5 = vpop.f32.mrf.mxu0  ;;  %v742_v6 = vpop.f32.mrf.mxu1 }
 0x10c   :  { %842 = vst.msk [vmem:[%s1731_s3 + $0x48] sm:$0xff] %vm832_vm1, %v613_v3  ;;  %874 = vst.msk [vmem:[%s1731_s3 + $0x148] sm:$0xff] %vm832_vm1, %v741_v4 }
 0x10d   :  { %v617_v7 = vpop.f32.mrf.mxu0  ;;  %v745_v8 = vpop.f32.mrf.mxu1 }
 0x10e   :  { %v618_v9 = vadd.f32 %v1406_v10, %v617_v7  ;;  %v746_v11 = vadd.f32 %v1406_v10, %v745_v8 }
 0x10f   :  { %v619_v12 = vpop.f32.mrf.mxu0  ;;  %v747_v13 = vpop.f32.mrf.mxu1 }
 0x110   :  { %843 = vst.msk [vmem:[%s1731_s3 + $0x50] sm:$0xff] %vm832_vm1, %v618_v9  ;;  %875 = vst.msk [vmem:[%s1731_s3 + $0x150] sm:$0xff] %vm832_vm1, %v746_v11 }
 0x111   :  { %v620_v14 = vpop.f32.mrf.mxu0  ;;  %v748_v15 = vpop.f32.mrf.mxu1 }
 0x112   :  { %v621_v16 = vadd.f32 %v1406_v10, %v620_v14  ;;  %v749_v17 = vadd.f32 %v1406_v10, %v748_v15 }
 0x113   :  { %v622_v18 = vpop.f32.mrf.mxu0  ;;  %v750_v19 = vpop.f32.mrf.mxu1 }
 0x114   :  { %844 = vst.msk [vmem:[%s1731_s3 + $0x58] sm:$0xff] %vm832_vm1, %v621_v16  ;;  %876 = vst.msk [vmem:[%s1731_s3 + $0x158] sm:$0xff] %vm832_vm1, %v749_v17 }
 0x115   :  { %v625_v20 = vpop.f32.mrf.mxu0  ;;  %v753_v21 = vpop.f32.mrf.mxu1 }
 0x116   :  { %v626_v22 = vadd.f32 %v1406_v10, %v625_v20  ;;  %v754_v23 = vadd.f32 %v1406_v10, %v753_v21 }
 0x117   :  { %v627_v24 = vpop.f32.mrf.mxu0  ;;  %v755_v25 = vpop.f32.mrf.mxu1 }
 0x118   :  { %845 = vst.msk [vmem:[%s1731_s3 + $0x60] sm:$0xff] %vm832_vm1, %v626_v22  ;;  %877 = vst.msk [vmem:[%s1731_s3 + $0x160] sm:$0xff] %vm832_vm1, %v754_v23 }
 0x119   :  { %v628_v26 = vpop.f32.mrf.mxu0  ;;  %v756_v27 = vpop.f32.mrf.mxu1 }
 0x11a   :  { %v629_v28 = vadd.f32 %v1406_v10, %v628_v26  ;;  %v757_v29 = vadd.f32 %v1406_v10, %v756_v27 }
 0x11b   :  { %v630_v30 = vpop.f32.mrf.mxu0  ;;  %v758_v31 = vpop.f32.mrf.mxu1 }
 0x11c   :  { %846 = vst.msk [vmem:[%s1731_s3 + $0x68] sm:$0xff] %vm832_vm1, %v629_v28  ;;  %878 = vst.msk [vmem:[%s1731_s3 + $0x168] sm:$0xff] %vm832_vm1, %v757_v29 }
 0x11d   :  { %v633_v32 = vpop.f32.mrf.mxu0  ;;  %v761_v33 = vpop.f32.mrf.mxu1 }
 0x11e   :  { %v634_v34 = vadd.f32 %v1406_v10, %v633_v32  ;;  %v762_v35 = vadd.f32 %v1406_v10, %v761_v33 }
 0x11f   :  { %v635_v36 = vpop.f32.mrf.mxu0  ;;  %v763_v37 = vpop.f32.mrf.mxu1 }
 0x120   :  { %847 = vst.msk [vmem:[%s1731_s3 + $0x70] sm:$0xff] %vm832_vm1, %v634_v34  ;;  %879 = vst.msk [vmem:[%s1731_s3 + $0x170] sm:$0xff] %vm832_vm1, %v762_v35 }
 0x121   :  { %v636_v38 = vpop.f32.mrf.mxu0  ;;  %v764_v39 = vpop.f32.mrf.mxu1 }
 0x122   :  { %v637_v40 = vadd.f32 %v1406_v10, %v636_v38  ;;  %v765_v41 = vadd.f32 %v1406_v10, %v764_v39 }
 0x123   :  { %v638_v42 = vpop.f32.mrf.mxu0  ;;  %v766_v43 = vpop.f32.mrf.mxu1 }
 0x124   :  { %848 = vst.msk [vmem:[%s1731_s3 + $0x78] sm:$0xff] %vm832_vm1, %v637_v40  ;;  %880 = vst.msk [vmem:[%s1731_s3 + $0x178] sm:$0xff] %vm832_vm1, %v765_v41 }
 0x125   :  { %v641_v44 = vpop.f32.mrf.mxu0  ;;  %v769_v45 = vpop.f32.mrf.mxu1 }
 0x126   :  { %v642_v46 = vadd.f32 %v1406_v10, %v641_v44  ;;  %v770_v47 = vadd.f32 %v1406_v10, %v769_v45 }
 0x127   :  { %v643_v48 = vpop.f32.mrf.mxu0  ;;  %v771_v49 = vpop.f32.mrf.mxu1 }
 0x128   :  { %849 = vst.msk [vmem:[%s1731_s3 + $0x80] sm:$0xff] %vm832_vm1, %v642_v46  ;;  %881 = vst.msk [vmem:[%s1731_s3 + $0x180] sm:$0xff] %vm832_vm1, %v770_v47 }
 0x129   :  { %v644_v50 = vpop.f32.mrf.mxu0  ;;  %v772_v51 = vpop.f32.mrf.mxu1 }
 0x12a   :  { %v645_v52 = vadd.f32 %v1406_v10, %v644_v50  ;;  %v773_v53 = vadd.f32 %v1406_v10, %v772_v51 }
 0x12b   :  { %v646_v54 = vpop.f32.mrf.mxu0  ;;  %v774_v55 = vpop.f32.mrf.mxu1 }
 0x12c   :  { %850 = vst.msk [vmem:[%s1731_s3 + $0x88] sm:$0xff] %vm832_vm1, %v645_v52  ;;  %882 = vst.msk [vmem:[%s1731_s3 + $0x188] sm:$0xff] %vm832_vm1, %v773_v53 }
 0x12d   :  { %v649_v56 = vpop.f32.mrf.mxu0  ;;  %v777_v57 = vpop.f32.mrf.mxu1 }
 0x12e   :  { %v650_v58 = vadd.f32 %v1406_v10, %v649_v56  ;;  %v778_v59 = vadd.f32 %v1406_v10, %v777_v57 }
 0x12f   :  { %v651_v60 = vpop.f32.mrf.mxu0  ;;  %v779_v61 = vpop.f32.mrf.mxu1 }
 0x130   :  { %851 = vst.msk [vmem:[%s1731_s3 + $0x90] sm:$0xff] %vm832_vm1, %v650_v58  ;;  %883 = vst.msk [vmem:[%s1731_s3 + $0x190] sm:$0xff] %vm832_vm1, %v778_v59 }
 0x131   :  { %v652_v62 = vpop.f32.mrf.mxu0  ;;  %v780_v63 = vpop.f32.mrf.mxu1 }
 0x132   :  { %v653_v0 = vadd.f32 %v1406_v10, %v652_v62  ;;  %v781_v1 = vadd.f32 %v1406_v10, %v780_v63 }
 0x133   :  { %v654_v2 = vpop.f32.mrf.mxu0  ;;  %v782_v3 = vpop.f32.mrf.mxu1 }
 0x134   :  { %852 = vst.msk [vmem:[%s1731_s3 + $0x98] sm:$0xff] %vm832_vm1, %v653_v0  ;;  %884 = vst.msk [vmem:[%s1731_s3 + $0x198] sm:$0xff] %vm832_vm1, %v781_v1 }
 0x135   :  { %v657_v4 = vpop.f32.mrf.mxu0  ;;  %v785_v5 = vpop.f32.mrf.mxu1 }
 0x136   :  { %v658_v6 = vadd.f32 %v1406_v10, %v657_v4  ;;  %v786_v7 = vadd.f32 %v1406_v10, %v785_v5 }
 0x137   :  { %v659_v8 = vpop.f32.mrf.mxu0  ;;  %v787_v9 = vpop.f32.mrf.mxu1 }
 0x138   :  { %853 = vst.msk [vmem:[%s1731_s3 + $0xa0] sm:$0xff] %vm832_vm1, %v658_v6  ;;  %885 = vst.msk [vmem:[%s1731_s3 + $0x1a0] sm:$0xff] %vm832_vm1, %v786_v7 }
 0x139   :  { %v660_v11 = vpop.f32.mrf.mxu0  ;;  %v788_v12 = vpop.f32.mrf.mxu1 }
 0x13a   :  { %v661_v13 = vadd.f32 %v1406_v10, %v660_v11  ;;  %v789_v14 = vadd.f32 %v1406_v10, %v788_v12 }
 0x13b   :  { %v662_v15 = vpop.f32.mrf.mxu0  ;;  %v790_v16 = vpop.f32.mrf.mxu1 }
 0x13c   :  { %854 = vst.msk [vmem:[%s1731_s3 + $0xa8] sm:$0xff] %vm832_vm1, %v661_v13  ;;  %886 = vst.msk [vmem:[%s1731_s3 + $0x1a8] sm:$0xff] %vm832_vm1, %v789_v14 }
 0x13d   :  { %v665_v17 = vpop.f32.mrf.mxu0  ;;  %v793_v18 = vpop.f32.mrf.mxu1 }
 0x13e   :  { %v666_v19 = vadd.f32 %v1406_v10, %v665_v17  ;;  %v794_v20 = vadd.f32 %v1406_v10, %v793_v18 }
 0x13f   :  { %v667_v21 = vpop.f32.mrf.mxu0  ;;  %v795_v22 = vpop.f32.mrf.mxu1 }
 0x140   :  { %855 = vst.msk [vmem:[%s1731_s3 + $0xb0] sm:$0xff] %vm832_vm1, %v666_v19  ;;  %887 = vst.msk [vmem:[%s1731_s3 + $0x1b0] sm:$0xff] %vm832_vm1, %v794_v20 }
 0x141   :  { %v668_v23 = vpop.f32.mrf.mxu0  ;;  %v796_v24 = vpop.f32.mrf.mxu1 }
 0x142   :  { %v669_v25 = vadd.f32 %v1406_v10, %v668_v23  ;;  %v797_v26 = vadd.f32 %v1406_v10, %v796_v24 }
 0x143   :  { %v670_v27 = vpop.f32.mrf.mxu0  ;;  %v798_v28 = vpop.f32.mrf.mxu1 }
 0x144   :  { %856 = vst.msk [vmem:[%s1731_s3 + $0xb8] sm:$0xff] %vm832_vm1, %v669_v25  ;;  %888 = vst.msk [vmem:[%s1731_s3 + $0x1b8] sm:$0xff] %vm832_vm1, %v797_v26 }
 0x145   :  { %v673_v29 = vpop.f32.mrf.mxu0  ;;  %v801_v30 = vpop.f32.mrf.mxu1 }
 0x146   :  { %v674_v31 = vadd.f32 %v1406_v10, %v673_v29  ;;  %v802_v32 = vadd.f32 %v1406_v10, %v801_v30 }
 0x147   :  { %v675_v33 = vpop.f32.mrf.mxu0  ;;  %v803_v34 = vpop.f32.mrf.mxu1 }
 0x148   :  { %857 = vst.msk [vmem:[%s1731_s3 + $0xc0] sm:$0xff] %vm832_vm1, %v674_v31  ;;  %889 = vst.msk [vmem:[%s1731_s3 + $0x1c0] sm:$0xff] %vm832_vm1, %v802_v32 }
 0x149   :  { %v676_v35 = vpop.f32.mrf.mxu0  ;;  %v804_v36 = vpop.f32.mrf.mxu1 }
 0x14a   :  { %v677_v37 = vadd.f32 %v1406_v10, %v676_v35  ;;  %v805_v38 = vadd.f32 %v1406_v10, %v804_v36 }
 0x14b   :  { %v678_v39 = vpop.f32.mrf.mxu0  ;;  %v806_v40 = vpop.f32.mrf.mxu1 }
 0x14c   :  { %858 = vst.msk [vmem:[%s1731_s3 + $0xc8] sm:$0xff] %vm832_vm1, %v677_v37  ;;  %890 = vst.msk [vmem:[%s1731_s3 + $0x1c8] sm:$0xff] %vm832_vm1, %v805_v38 }
 0x14d   :  { %v681_v41 = vpop.f32.mrf.mxu0  ;;  %v809_v42 = vpop.f32.mrf.mxu1 }
 0x14e   :  { %v682_v43 = vadd.f32 %v1406_v10, %v681_v41  ;;  %v810_v44 = vadd.f32 %v1406_v10, %v809_v42 }
 0x14f   :  { %v683_v45 = vpop.f32.mrf.mxu0  ;;  %v811_v46 = vpop.f32.mrf.mxu1 }
 0x150   :  { %859 = vst.msk [vmem:[%s1731_s3 + $0xd0] sm:$0xff] %vm832_vm1, %v682_v43  ;;  %891 = vst.msk [vmem:[%s1731_s3 + $0x1d0] sm:$0xff] %vm832_vm1, %v810_v44 }
 0x151   :  { %v684_v47 = vpop.f32.mrf.mxu0  ;;  %v812_v48 = vpop.f32.mrf.mxu1 }
 0x152   :  { %v685_v49 = vadd.f32 %v1406_v10, %v684_v47  ;;  %v813_v50 = vadd.f32 %v1406_v10, %v812_v48 }
 0x153   :  { %v686_v51 = vpop.f32.mrf.mxu0  ;;  %v814_v52 = vpop.f32.mrf.mxu1 }
 0x154   :  { %860 = vst.msk [vmem:[%s1731_s3 + $0xd8] sm:$0xff] %vm832_vm1, %v685_v49  ;;  %892 = vst.msk [vmem:[%s1731_s3 + $0x1d8] sm:$0xff] %vm832_vm1, %v813_v50 }
 0x155   :  { %v689_v53 = vpop.f32.mrf.mxu0  ;;  %v817_v54 = vpop.f32.mrf.mxu1 }
 0x156   :  { %v690_v55 = vadd.f32 %v1406_v10, %v689_v53  ;;  %v818_v56 = vadd.f32 %v1406_v10, %v817_v54 }
 0x157   :  { %v691_v57 = vpop.f32.mrf.mxu0  ;;  %v819_v58 = vpop.f32.mrf.mxu1 }
 0x158   :  { %861 = vst.msk [vmem:[%s1731_s3 + $0xe0] sm:$0xff] %vm832_vm1, %v690_v55  ;;  %893 = vst.msk [vmem:[%s1731_s3 + $0x1e0] sm:$0xff] %vm832_vm1, %v818_v56 }
 0x159   :  { %v692_v59 = vpop.f32.mrf.mxu0  ;;  %v820_v60 = vpop.f32.mrf.mxu1 }
 0x15a   :  { %v693_v61 = vadd.f32 %v1406_v10, %v692_v59  ;;  %v821_v62 = vadd.f32 %v1406_v10, %v820_v60 }
 0x15b   :  { %v694_v63 = vpop.f32.mrf.mxu0  ;;  %v822_v0 = vpop.f32.mrf.mxu1 }
 0x15c   :  { %862 = vst.msk [vmem:[%s1731_s3 + $0xe8] sm:$0xff] %vm832_vm1, %v693_v61  ;;  %894 = vst.msk [vmem:[%s1731_s3 + $0x1e8] sm:$0xff] %vm832_vm1, %v821_v62 }
 0x15d   :  { %v697_v1 = vpop.f32.mrf.mxu0  ;;  %v825_v2 = vpop.f32.mrf.mxu1 }
 0x15e   :  { %v698_v3 = vadd.f32 %v1406_v10, %v697_v1  ;;  %v826_v4 = vadd.f32 %v1406_v10, %v825_v2 }
 0x15f   :  { %v699_v5 = vpop.f32.mrf.mxu0  ;;  %v827_v6 = vpop.f32.mrf.mxu1 }
 0x160   :  { %863 = vst.msk [vmem:[%s1731_s3 + $0xf0] sm:$0xff] %vm832_vm1, %v698_v3  ;;  %895 = vst.msk [vmem:[%s1731_s3 + $0x1f0] sm:$0xff] %vm832_vm1, %v826_v4 }
 0x161   :  { %v700_v7 = vpop.f32.mrf.mxu0  ;;  %v828_v8 = vpop.f32.mrf.mxu1 }
 0x162   :  { %v701_v9 = vadd.f32 %v1406_v10, %v700_v7  ;;  %v829_v11 = vadd.f32 %v1406_v10, %v828_v8 }
 0x163   :  { %v702_v12 = vpop.f32.mrf.mxu0  ;;  %v830_v13 = vpop.f32.mrf.mxu1 }
 0x164   :  { %864 = vst.msk [vmem:[%s1731_s3 + $0xf8] sm:$0xff] %vm832_vm1, %v701_v9  ;;  %896 = vst.msk [vmem:[%s1731_s3 + $0x1f8] sm:$0xff] %vm832_vm1, %v829_v11 }

// kernel: urvos_forward.81
= control target key start
LH: loop header
LB: loop body
LE: loop exit
PB: predicated region body
PF: predicated region fallthrough
CT: control target
= control target key end

     0   :  { %s1462_s6 = smov 0   ;;  %s2048_s0 = inlined_call_operand.vmem [shape: f32[2,2,4096], index: 0, kind: input, shape index: {}]   ;;  %s2049_s1 = inlined_call_operand.vmem [shape: f32[2,2,4096], index: 1, kind: output, shape index: {}]  }
   0x1 LB: > { %s1381_s7 = sadd.s32 4294967295, %s1449_s6   ;;  %p1385_p0 = scmp.ge.s32.totalorder %s1449_s6, 1  ;;  %s1449_s6 = sphi %s1462_s6, %s11_s6  }
   0x2   : > { %p87_p1 = scmp.lt.s32.totalorder %s1449_s6, 3 }
   0x4   : > { %p88_p2 = pnand %p1385_p0, %p87_p1 }
   0x6   : > { %91 = sbr.rel (%p88_p2) target bundleno = 209 (0xd1), region = 24 }
   0xb   : > { %p107_p3 = scmp.lt.s32.totalorder %s1381_s7, 1  ;;  %v137_v0 = vlaneseq  ;;  %v1451_v1 = vmov 1983009808   ;;  %vm301_vm0 = vcmask 1041408  }
   0xc   : > { %v135_v2 = vunpack.c.l.s4 %v1451_v1 }
   0xd   : > { %s2056_s7 = smov (!%p107_p3, %s1381_s7), 1  ;;  %v138_v3 = vshrl.u32 %v137_v0, 7 }
   0xe   : > { %v136_v4 = vunpack.c.0.s8 %v135_v2  ;;  %s1392_s8 = sshll.u32 %s2056_s7, 6 }
   0xf   : > { %s111_s11 = scalar_lea.vmem %s2048_s0, %s1392_s8  ;;  %s116_s14 = scalar_lea.vmem %s2049_s1, %s1392_s8 }
  0x10   : > { %v1478_v5 = vsub.s32 %v136_v4, %v138_v3  ;;  %v1480_v6 = vld [vmem:[%s111_s11] sm:$0xff]  ;;  %v1482_v7 = vld [vmem:[%s111_s11 + $0x8] sm:$0xff]  ;;  %v1484_v8 = vld [vmem:[%s111_s11 + $0x10] sm:$0xff] }
  0x11   : > { %v1486_v9 = vld [vmem:[%s111_s11 + $0x18] sm:$0xff]  ;;  %v133_v10 = vcombine.high %v1480_v6, %v1480_v6  ;;  %v150_v12 = vcombine.high %v1482_v7, %v1482_v7  ;;  %v1496_v14 = vld [vmem:[%s111_s11 + $0x20] sm:$0xff]  ;;  %v167_v15 = vcombine.high %v1484_v8, %v1484_v8  ;;  %v1510_v19 = vld [vmem:[%s111_s11 + $0x28] sm:$0xff] }
  0x12   : > { %v140_v11 = vrot.slane %v1480_v6, %v1478_v5  ;;  %v157_v13 = vrot.slane %v1482_v7, %v1478_v5  ;;  %v1502_v16 = vrot.slane %v1484_v8, %v1478_v5  ;;  %v184_v17 = vcombine.high %v1486_v9, %v1486_v9  ;;  %v1514_v24 = vld [vmem:[%s111_s11 + $0x30] sm:$0xff]  ;;  %v1526_v29 = vld [vmem:[%s111_s11 + $0x38] sm:$0xff] }
  0x13   : > { %v1508_v18 = vrot.slane %v1486_v9, %v1478_v5  ;;  %v147_v20 = vrot.slane %v133_v10, %v1478_v5  ;;  %v164_v22 = vrot.slane %v150_v12, %v1478_v5  ;;  %v1517_v25 = vrot.slane %v167_v15, %v1478_v5  ;;  %2051 = vst [vmem:[#allocation2_spill] sm:$0xff] %v1526_v29 }
  0x14   : > { %v148_v21 = vcombine.high %v140_v11, %v140_v11  ;;  %v165_v23 = vcombine.high %v157_v13, %v157_v13  ;;  %v182_v26 = vcombine.high %v1502_v16, %v1502_v16  ;;  %v1522_v27 = vrot.slane %v184_v17, %v1478_v5 }
  0x15   : > { %v199_v28 = vcombine.high %v1508_v18, %v1508_v18  ;;  %v149_v30 = vcombine.high %v147_v20, %v147_v20  ;;  %v166_v31 = vcombine.high %v164_v22, %v164_v22  ;;  %v201_v32 = vcombine.high %v1496_v14, %v1496_v14 }
  0x16   : > { %v1532_v33 = vrot.slane %v1496_v14, %v1478_v5  ;;  %v183_v34 = vcombine.high %v1517_v25, %v1517_v25  ;;  %v200_v35 = vcombine.high %v1522_v27, %v1522_v27  ;;  %v218_v36 = vcombine.high %v1510_v19, %v1510_v19 }
  0x17   : > { %v1542_v37 = vrot.slane %v1510_v19, %v1478_v5  ;;  %v1545_v38 = vrot.slane %v201_v32, %v1478_v5  ;;  %v235_v40 = vcombine.high %v1514_v24, %v1514_v24  ;;  %v1553_v41 = vrot.slane %v1514_v24, %v1478_v5 }
  0x18   : > { %v216_v39 = vcombine.high %v1532_v33, %v1532_v33  ;;  %v1556_v42 = vrot.slane %v218_v36, %v1478_v5  ;;  %v252_v44 = vcombine.high %v1526_v29, %v1526_v29  ;;  %v1564_v45 = vrot.slane %v1526_v29, %v1478_v5 }
  0x19   : > { %v233_v43 = vcombine.high %v1542_v37, %v1542_v37  ;;  %v217_v46 = vcombine.high %v1545_v38, %v1545_v38  ;;  %v1569_v47 = vrot.slane %v235_v40, %v1478_v5  ;;  %v250_v48 = vcombine.high %v1553_v41, %v1553_v41 }
  0x1a   : > { %v302_v49 = vsel %vm301_vm0, %v140_v11, -inf  ;;  %v234_v50 = vcombine.high %v1556_v42, %v1556_v42  ;;  %v1577_v51 = vrot.slane %v252_v44, %v1478_v5  ;;  %v267_v52 = vcombine.high %v1564_v45, %v1564_v45 }
  0x1b   : > { %v303_v53 = vrot.slane %v302_v49, 4  ;;  %v251_v54 = vcombine.high %v1569_v47, %v1569_v47  ;;  %v309_v55 = vsel %vm301_vm0, %v148_v21, -inf  ;;  %v316_v56 = vsel %vm301_vm0, %v147_v20, -inf }
  0x1c   : > { %v323_v57 = vsel %vm301_vm0, %v149_v30, -inf  ;;  %v310_v60 = vrot.slane %v309_v55, 4  ;;  %v317_v61 = vrot.slane %v316_v56, 4  ;;  %v330_v63 = vsel %vm301_vm0, %v157_v13, -inf }
  0x1d   : > { %v304_v59 = vmax.f32 %v302_v49, %v303_v53  ;;  %v324_v62 = vrot.slane %v323_v57, 4  ;;  %v337_v0 = vsel %vm301_vm0, %v165_v23, -inf  ;;  %v344_v1 = vsel %vm301_vm0, %v164_v22, -inf }
  0x1e   : > { %v311_v3 = vmax.f32 %v309_v55, %v310_v60  ;;  %v318_v4 = vmax.f32 %v316_v56, %v317_v61  ;;  %v331_v10 = vrot.slane %v330_v63, 4  ;;  %v338_v12 = vrot.slane %v337_v0, 4 }
  0x1f   : > { %v305_v2 = vrot.slane %v304_v59, 2  ;;  %v325_v11 = vmax.f32 %v323_v57, %v324_v62  ;;  %v345_v15 = vrot.slane %v344_v1, 4  ;;  %v351_v17 = vsel %vm301_vm0, %v166_v31, -inf }
  0x20   : > { %v312_v21 = vrot.slane %v311_v3, 2  ;;  %v319_v30 = vrot.slane %v318_v4, 2  ;;  %v332_v32 = vmax.f32 %v330_v63, %v331_v10  ;;  %v339_v40 = vmax.f32 %v337_v0, %v338_v12 }
  0x21   : > { %v306_v20 = vmax.f32 %v304_v59, %v305_v2  ;;  %v326_v36 = vrot.slane %v325_v11, 2  ;;  %v346_v13 = vmax.f32 %v344_v1, %v345_v15  ;;  %v352_v44 = vrot.slane %v351_v17, 4 }
  0x22   : > { %v313_v49 = vmax.f32 %v311_v3, %v312_v21  ;;  %v320_v22 = vmax.f32 %v318_v4, %v319_v30  ;;  %v333_v53 = vrot.slane %v332_v32, 2  ;;  %v340_v56 = vrot.slane %v339_v40, 2 }
  0x23   : > { %v307_v23 = vrot.slane %v306_v20, 1  ;;  %v327_v55 = vmax.f32 %v325_v11, %v326_v36  ;;  %v347_v60 = vrot.slane %v346_v13, 2  ;;  %v353_v57 = vmax.f32 %v351_v17, %v352_v44 }
  0x24   : > { %v314_v62 = vrot.slane %v313_v49, 1  ;;  %v321_v31 = vrot.slane %v320_v22, 1  ;;  %v334_v59 = vmax.f32 %v332_v32, %v333_v53  ;;  %v341_v58 = vmax.f32 %v339_v40, %v340_v56 }
  0x25   : > { %v1592_v61 = vmax.f32 %v306_v20, %v307_v23  ;;  %v328_v2 = vrot.slane %v327_v55, 1  ;;  %v348_v63 = vmax.f32 %v346_v13, %v347_v60  ;;  %v354_v10 = vrot.slane %v353_v57, 2 }
  0x26   : > { %v1594_v0 = vmax.f32 %v313_v49, %v314_v62  ;;  %v1596_v1 = vmax.f32 %v320_v22, %v321_v31  ;;  %v335_v3 = vrot.slane %v334_v59, 1  ;;  %v358_v4 = vsel %vm301_vm0, %v1502_v16, -inf }
  0x27   : > { %v1600_v11 = vmax.f32 %v327_v55, %v328_v2  ;;  %v342_v12 = vrot.slane %v341_v58, 1  ;;  %v349_v15 = vrot.slane %v348_v63, 1  ;;  %v355_v17 = vmax.f32 %v353_v57, %v354_v10 }
  0x28   : > { %v1602_v20 = vmax.f32 %v334_v59, %v335_v3  ;;  %v359_v21 = vrot.slane %v358_v4, 4  ;;  %v365_v30 = vsel %vm301_vm0, %v182_v26, -inf  ;;  %v372_v32 = vsel %vm301_vm0, %v1517_v25, -inf }
  0x29   : > { %v1610_v36 = vmax.f32 %v341_v58, %v342_v12  ;;  %v1612_v40 = vmax.f32 %v348_v63, %v349_v15  ;;  %v356_v13 = vrot.slane %v355_v17, 1  ;;  %v366_v44 = vrot.slane %v365_v30, 4 }
  0x2a   : > { %v360_v23 = vmax.f32 %v358_v4, %v359_v21  ;;  %v373_v49 = vrot.slane %v372_v32, 4  ;;  %v379_v22 = vsel %vm301_vm0, %v183_v34, -inf  ;;  %v386_v16 = vsel %vm301_vm0, %v1508_v18, -inf }
  0x2b   : > { %v1620_v26 = vmax.f32 %v355_v17, %v356_v13  ;;  %v367_v53 = vmax.f32 %v365_v30, %v366_v44  ;;  %v380_v55 = vrot.slane %v379_v22, 4  ;;  %v387_v58 = vrot.slane %v386_v16, 4 }
  0x2c   : > { %v361_v56 = vrot.slane %v360_v23, 2  ;;  %v374_v60 = vmax.f32 %v372_v32, %v373_v49  ;;  %v393_v57 = vsel %vm301_vm0, %v199_v28, -inf  ;;  %v400_v25 = vsel %vm301_vm0, %v1522_v27, -inf }
  0x2d   : > { %v368_v62 = vrot.slane %v367_v53, 2  ;;  %v381_v34 = vmax.f32 %v379_v22, %v380_v55  ;;  %v388_v31 = vmax.f32 %v386_v16, %v387_v58  ;;  %v394_v59 = vrot.slane %v393_v57, 4 }
  0x2e   : > { %v362_v2 = vmax.f32 %v360_v23, %v361_v56  ;;  %v375_v63 = vrot.slane %v374_v60, 2  ;;  %v401_v10 = vrot.slane %v400_v25, 4  ;;  %v407_v3 = vsel %vm301_vm0, %v200_v35, -inf }
  0x2f   : > { %v369_v4 = vmax.f32 %v367_v53, %v368_v62  ;;  %v382_v12 = vrot.slane %v381_v34, 2  ;;  %v389_v18 = vrot.slane %v388_v31, 2  ;;  %v395_v15 = vmax.f32 %v393_v57, %v394_v59 }
  0x30   : > { %v363_v28 = vrot.slane %v362_v2, 1  ;;  %v376_v17 = vmax.f32 %v374_v60, %v375_v63  ;;  %v402_v21 = vmax.f32 %v400_v25, %v401_v10  ;;  %v408_v30 = vrot.slane %v407_v3, 4 }
  0x31   : > { %v370_v32 = vrot.slane %v369_v4, 1  ;;  %v383_v13 = vmax.f32 %v381_v34, %v382_v12  ;;  %v390_v44 = vmax.f32 %v388_v31, %v389_v18  ;;  %v396_v49 = vrot.slane %v395_v15, 2 }
  0x32   : > { %v1632_v23 = vmax.f32 %v362_v2, %v363_v28  ;;  %v377_v22 = vrot.slane %v376_v17, 1  ;;  %v403_v16 = vrot.slane %v402_v21, 2  ;;  %v409_v55 = vmax.f32 %v407_v3, %v408_v30 }
  0x33   : > { %v1634_v27 = vmax.f32 %v369_v4, %v370_v32  ;;  %v384_v35 = vrot.slane %v383_v13, 1  ;;  %v391_v53 = vrot.slane %v390_v44, 1  ;;  %v397_v58 = vmax.f32 %v395_v15, %v396_v49 }
  0x34   : > { %v1636_v56 = vmax.f32 %v376_v17, %v377_v22  ;;  %v404_v57 = vmax.f32 %v402_v21, %v403_v16  ;;  %v410_v60 = vrot.slane %v409_v55, 2  ;;  %v414_v25 = vsel %vm301_vm0, %v1532_v33, -inf }
  0x35   : > { %v1640_v62 = vmax.f32 %v383_v13, %v384_v35  ;;  %v1642_v34 = vmax.f32 %v390_v44, %v391_v53  ;;  %v398_v31 = vrot.slane %v397_v58, 1  ;;  %v415_v59 = vrot.slane %v414_v25, 4 }
  0x36   : > { %v405_v2 = vrot.slane %v404_v57, 1  ;;  %v411_v63 = vmax.f32 %v409_v55, %v410_v60  ;;  %v421_v10 = vsel %vm301_vm0, %v216_v39, -inf  ;;  %v428_v3 = vsel %vm301_vm0, %v1545_v38, -inf }
  0x37   : > { %v1650_v4 = vmax.f32 %v397_v58, %v398_v31  ;;  %v416_v12 = vmax.f32 %v414_v25, %v415_v59  ;;  %v422_v18 = vrot.slane %v421_v10, 4  ;;  %v429_v15 = vrot.slane %v428_v3, 4 }
  0x38   : > { %v1652_v28 = vmax.f32 %v404_v57, %v405_v2  ;;  %v412_v17 = vrot.slane %v411_v63, 1  ;;  %v435_v21 = vsel %vm301_vm0, %v217_v46, -inf  ;;  %v442_v33 = vsel %vm301_vm0, %v1542_v37, -inf }
  0x39   : > { %v417_v39 = vrot.slane %v416_v12, 2  ;;  %v423_v30 = vmax.f32 %v421_v10, %v422_v18  ;;  %v430_v32 = vmax.f32 %v428_v3, %v429_v15  ;;  %v436_v13 = vrot.slane %v435_v21, 4 }
  0x3a   : > { %v1660_v44 = vmax.f32 %v411_v63, %v412_v17  ;;  %v443_v49 = vrot.slane %v442_v33, 4  ;;  %v449_v22 = vsel %vm301_vm0, %v233_v43, -inf  ;;  %v456_v38 = vsel %vm301_vm0, %v1556_v42, -inf }
  0x3b   : > { %v418_v16 = vmax.f32 %v416_v12, %v417_v39  ;;  %v424_v46 = vrot.slane %v423_v30, 2  ;;  %v431_v55 = vrot.slane %v430_v32, 2  ;;  %v437_v35 = vmax.f32 %v435_v21, %v436_v13 }
  0x3c   : > { %v444_v53 = vmax.f32 %v442_v33, %v443_v49  ;;  %v450_v58 = vrot.slane %v449_v22, 4  ;;  %v457_v57 = vrot.slane %v456_v38, 4  ;;  %v463_v60 = vsel %vm301_vm0, %v234_v50, -inf }
  0x3d   : > { %v419_v25 = vrot.slane %v418_v16, 1  ;;  %v425_v31 = vmax.f32 %v423_v30, %v424_v46  ;;  %v432_v37 = vmax.f32 %v430_v32, %v431_v55  ;;  %v438_v59 = vrot.slane %v437_v35, 2 }
  0x3e   : > { %v445_v43 = vrot.slane %v444_v53, 2  ;;  %v451_v2 = vmax.f32 %v449_v22, %v450_v58  ;;  %v458_v63 = vmax.f32 %v456_v38, %v457_v57  ;;  %v464_v10 = vrot.slane %v463_v60, 4 }
  0x3f   : > { %v1672_v3 = vmax.f32 %v418_v16, %v419_v25  ;;  %v426_v12 = vrot.slane %v425_v31, 1  ;;  %v433_v18 = vrot.slane %v432_v37, 1  ;;  %v439_v15 = vmax.f32 %v437_v35, %v438_v59 }
  0x40   : > { %v446_v17 = vmax.f32 %v444_v53, %v445_v43  ;;  %v452_v21 = vrot.slane %v451_v2, 2  ;;  %v459_v33 = vrot.slane %v458_v63, 2  ;;  %v465_v39 = vmax.f32 %v463_v60, %v464_v10 }
  0x41   : > { %v1674_v42 = vmax.f32 %v425_v31, %v426_v12  ;;  %v1676_v50 = vmax.f32 %v432_v37, %v433_v18  ;;  %v440_v30 = vrot.slane %v439_v15, 1  ;;  %v470_v32 = vsel %vm301_vm0, %v1553_v41, -inf }
  0x42   : > { %v447_v13 = vrot.slane %v446_v17, 1  ;;  %v453_v49 = vmax.f32 %v451_v2, %v452_v21  ;;  %v460_v22 = vmax.f32 %v458_v63, %v459_v33  ;;  %v466_v38 = vrot.slane %v465_v39, 2 }
  0x43   : > { %v1680_v16 = vmax.f32 %v439_v15, %v440_v30  ;;  %v471_v46 = vrot.slane %v470_v32, 4  ;;  %v477_v55 = vsel %vm301_vm0, %v250_v48, -inf  ;;  %v484_v35 = vsel %vm301_vm0, %v1569_v47, -inf }
  0x44   : > { %v1688_v53 = vmax.f32 %v446_v17, %v447_v13  ;;  %v454_v58 = vrot.slane %v453_v49, 1  ;;  %v461_v57 = vrot.slane %v460_v22, 1  ;;  %v467_v60 = vmax.f32 %v465_v39, %v466_v38 }
  0x45   : > { %v472_v25 = vmax.f32 %v470_v32, %v471_v46  ;;  %v478_v31 = vrot.slane %v477_v55, 4  ;;  %v485_v37 = vrot.slane %v484_v35, 4  ;;  %v491_v59 = vsel %vm301_vm0, %v251_v54, -inf }
  0x46   : > { %v1694_v43 = vmax.f32 %v453_v49, %v454_v58  ;;  %v1696_v41 = vmax.f32 %v460_v22, %v461_v57  ;;  %v468_v48 = vrot.slane %v467_v60, 1  ;;  %v492_v2 = vrot.slane %v491_v59, 4 }
  0x47   : > { %v473_v63 = vrot.slane %v472_v25, 2  ;;  %v479_v10 = vmax.f32 %v477_v55, %v478_v31  ;;  %v486_v12 = vmax.f32 %v484_v35, %v485_v37  ;;  %v498_v18 = vsel %vm301_vm0, %v1564_v45, -inf }
  0x48   : > { %v1700_v15 = vmax.f32 %v467_v60, %v468_v48  ;;  %v493_v17 = vmax.f32 %v491_v59, %v492_v2  ;;  %v499_v21 = vrot.slane %v498_v18, 4  ;;  %v505_v47 = vsel %vm301_vm0, %v267_v52, -inf }
  0x49   : > { %v474_v54 = vmax.f32 %v472_v25, %v473_v63  ;;  %v480_v33 = vrot.slane %v479_v10, 2  ;;  %v487_v39 = vrot.slane %v486_v12, 2  ;;  %v506_v30 = vrot.slane %v505_v47, 4 }
  0x4a   : > { %v494_v32 = vrot.slane %v493_v17, 2  ;;  %v500_v13 = vmax.f32 %v498_v18, %v499_v21  ;;  %v512_v49 = vsel %vm301_vm0, %v1577_v51, -inf  ;;  %v2052_v22 = vcombine.high %v1577_v51, %v1577_v51 }
  0x4b   : > { %v475_v46 = vrot.slane %v474_v54, 1  ;;  %v481_v55 = vmax.f32 %v479_v10, %v480_v33  ;;  %v488_v35 = vmax.f32 %v486_v12, %v487_v39  ;;  %v507_v45 = vmax.f32 %v505_v47, %v506_v30 }
  0x4c   : > { %v519_v38 = vsel %vm301_vm0, %v2052_v22, -inf  ;;  %v495_v58 = vmax.f32 %v493_v17, %v494_v32  ;;  %v501_v52 = vrot.slane %v500_v13, 2  ;;  %v513_v57 = vrot.slane %v512_v49, 4 }
  0x4d   : > { %v520_v60 = vrot.slane %v519_v38, 4  ;;  %v476_v25 = vmax.f32 %v474_v54, %v475_v46  ;;  %v482_v31 = vrot.slane %v481_v55, 1  ;;  %v489_v37 = vrot.slane %v488_v35, 1 }
  0x4e   : > { %v508_v59 = vrot.slane %v507_v45, 2  ;;  %v496_v48 = vrot.slane %v495_v58, 1  ;;  %v502_v2 = vmax.f32 %v500_v13, %v501_v52  ;;  %v514_v63 = vmax.f32 %v512_v49, %v513_v57 }
  0x4f   : > { %v521_v18 = vmax.f32 %v519_v38, %v520_v60  ;;  %v483_v21 = vmax.f32 %v481_v55, %v482_v31  ;;  %v490_v51 = vmax.f32 %v488_v35, %v489_v37  ;;  %v558_v10 = vcombine.low %v1592_v61, %v1594_v0 }
  0x50   : > { %v509_v29 = vmax.f32 %v507_v45, %v508_v59  ;;  %v497_v12 = vmax.f32 %v495_v58, %v496_v48  ;;  %v503_v47 = vrot.slane %v502_v2, 1  ;;  %v515_v17 = vrot.slane %v514_v63, 2 }
  0x51   : > { %v522_v33 = vrot.slane %v521_v18, 2  ;;  %v559_v54 = vcombine.low %v1596_v1, %v1600_v11  ;;  %v566_v30 = vrot.slane %v558_v10, %v1478_v5  ;;  %v575_v32 = vcombine.low %v1602_v20, %v1610_v36 }
  0x52   : > { %v510_v39 = vrot.slane %v509_v29, 1  ;;  %v504_v13 = vmax.f32 %v502_v2, %v503_v47  ;;  %v516_v49 = vmax.f32 %v514_v63, %v515_v17  ;;  %v576_v38 = vcombine.low %v1612_v40, %v1620_v26 }
  0x53   : > { %v523_v22 = vmax.f32 %v521_v18, %v522_v33  ;;  %v573_v0 = vrot.slane %v559_v54, %v1478_v5  ;;  %v583_v46 = vrot.slane %v575_v32, %v1478_v5  ;;  %v592_v55 = vcombine.low %v1632_v23, %v1634_v27 }
  0x54   : > { %v511_v61 = vmax.f32 %v509_v29, %v510_v39  ;;  %v517_v1 = vrot.slane %v516_v49, 1  ;;  %v590_v35 = vrot.slane %v576_v38, %v1478_v5  ;;  %v593_v20 = vcombine.low %v1636_v56, %v1640_v62 }
  0x55   : > { %v524_v11 = vrot.slane %v523_v22, 1  ;;  %v574_v36 = vcombine.low %v566_v30, %v573_v0  ;;  %v600_v45 = vrot.slane %v592_v55, %v1478_v5  ;;  %v609_v29 = vcombine.low %v1642_v34, %v1650_v4  ;;  %v2053_v30 = vld [vmem:[#allocation2_spill] sm:$0xff] }
  0x56   : > { %v610_v40 = vcombine.low %v1652_v28, %v1660_v44  ;;  %v518_v26 = vmax.f32 %v516_v49, %v517_v1  ;;  %v591_v52 = vcombine.low %v583_v46, %v590_v35  ;;  %v607_v23 = vrot.slane %v593_v20, %v1478_v5 }
  0x57   : > { %v525_v58 = vmax.f32 %v523_v22, %v524_v11  ;;  %v617_v27 = vrot.slane %v609_v29, %v1478_v5  ;;  %v626_v56 = vcombine.low %v1672_v3, %v1674_v42  ;;  %v627_v62 = vcombine.low %v1676_v50, %v1680_v16 }
  0x58   : > { %v624_v57 = vrot.slane %v610_v40, %v1478_v5  ;;  %v608_v60 = vcombine.low %v600_v45, %v607_v23  ;;  %v643_v34 = vcombine.low %v1688_v53, %v1694_v43  ;;  %v644_v4 = vcombine.low %v1696_v41, %v1700_v15 }
  0x59   : > { %v660_v28 = vcombine.low %v476_v25, %v483_v21  ;;  %v634_v31 = vrot.slane %v626_v56, %v1478_v5  ;;  %v641_v37 = vrot.slane %v627_v62, %v1478_v5  ;;  %v661_v59 = vcombine.low %v490_v51, %v497_v12 }
  0x5a   : > { %v625_v44 = vcombine.low %v617_v27, %v624_v57  ;;  %v651_v48 = vrot.slane %v643_v34, %v1478_v5  ;;  %v658_v3 = vrot.slane %v644_v4, %v1478_v5  ;;  %v677_v50 = vcombine.low %v504_v13, %v511_v61 }
  0x5b   : > { %v668_v42 = vrot.slane %v660_v28, %v1478_v5  ;;  %v642_v16 = vcombine.low %v634_v31, %v641_v37  ;;  %v675_v53 = vrot.slane %v661_v59, %v1478_v5  ;;  %v678_v43 = vcombine.low %v518_v26, %v525_v58 }
  0x5c   : > { %v702_v41 = vsub.f32 %v1480_v6, %v574_v36  ;;  %v659_v15 = vcombine.low %v651_v48, %v658_v3  ;;  %v685_v25 = vrot.slane %v677_v50, %v1478_v5  ;;  %v703_v2 = vsub.f32 %v1482_v7, %v591_v52 }
  0x5d   : > { %v704_v63 = vsub.f32 %v1484_v8, %v608_v60  ;;  %v676_v18 = vcombine.low %v668_v42, %v675_v53  ;;  %v692_v21 = vrot.slane %v678_v43, %v1478_v5  ;;  %v705_v51 = vsub.f32 %v1486_v9, %v625_v44 }
  0x5e   : > { %v706_v10 = vsub.f32 %v1496_v14, %v642_v16  ;;  %v707_v12 = vsub.f32 %v1510_v19, %v659_v15  ;;  %v710_v47 = vmul.f32 1.442695, %v702_v41  ;;  %v712_v17 = vmul.f32 1.442695, %v703_v2 }
  0x5f   : > { %v714_v33 = vmul.f32 1.442695, %v704_v63  ;;  %v693_v6 = vcombine.low %v685_v25, %v692_v21  ;;  %v708_v39 = vsub.f32 %v1514_v24, %v676_v18  ;;  %v716_v54 = vmul.f32 1.442695, %v705_v51 }
  0x60   : > { %1411 = vpow2.f32 %v710_v47  ;;  %v718_v7 = vmul.f32 1.442695, %v706_v10  ;;  %v720_v32 = vmul.f32 1.442695, %v707_v12 }
  0x61   : > { %v709_v8 = vsub.f32 %v2053_v30, %v693_v6  ;;  %1413 = vpow2.f32 %v712_v17  ;;  %v722_v13 = vmul.f32 1.442695, %v708_v39 }
  0x62   : > { %1415 = vpow2.f32 %v714_v33 }
  0x63   : > { %1417 = vpow2.f32 %v716_v54  ;;  %v724_v9 = vmul.f32 1.442695, %v709_v8 }
  0x64   : > { %1419 = vpow2.f32 %v718_v7 }
  0x65   : > { %1421 = vpow2.f32 %v720_v32 }
  0x66   : > { %1423 = vpow2.f32 %v722_v13 }
  0x67   : > { %1425 = vpow2.f32 %v724_v9 }
  0x6d   : > { %v1760_v14 = vpop.eup %1411 }
  0x6e   : > { %v1762_v19 = vpop.eup %1413  ;;  %v734_v24 = vcombine.high %v1760_v14, %v1760_v14  ;;  %v741_v49 = vrot.slane %v1760_v14, %v1478_v5 }
  0x6f   : > { %v1768_v22 = vpop.eup %1415  ;;  %v751_v38 = vcombine.high %v1762_v19, %v1762_v19  ;;  %v758_v61 = vrot.slane %v1762_v19, %v1478_v5 }
  0x70   : > { %v1774_v0 = vpop.eup %1417  ;;  %v748_v46 = vrot.slane %v734_v24, %v1478_v5  ;;  %v749_v55 = vcombine.high %v741_v49, %v741_v49  ;;  %v768_v1 = vcombine.high %v1768_v22, %v1768_v22  ;;  %v1781_v11 = vrot.slane %v1768_v22, %v1478_v5 }
  0x71   : > { %v1783_v35 = vpop.eup %1419  ;;  %v765_v20 = vrot.slane %v751_v38, %v1478_v5  ;;  %v766_v36 = vcombine.high %v758_v61, %v758_v61  ;;  %v785_v45 = vcombine.high %v1774_v0, %v1774_v0  ;;  %v1790_v29 = vrot.slane %v1774_v0, %v1478_v5 }
  0x72   : > { %v1792_v40 = vpop.eup %1421  ;;  %v750_v26 = vcombine.high %v748_v46, %v748_v46  ;;  %v1795_v58 = vrot.slane %v768_v1, %v1478_v5  ;;  %v783_v52 = vcombine.high %v1781_v11, %v1781_v11  ;;  %v802_v23 = vcombine.high %v1783_v35, %v1783_v35 }
  0x73   : > { %v1801_v27 = vpop.eup %1423  ;;  %v767_v57 = vcombine.high %v765_v20, %v765_v20  ;;  %v1804_v56 = vrot.slane %v785_v45, %v1478_v5  ;;  %v800_v62 = vcombine.high %v1790_v29, %v1790_v29  ;;  %v1810_v60 = vrot.slane %v1783_v35, %v1478_v5 }
  0x74   : > { %v1812_v34 = vpop.eup %1425  ;;  %v784_v4 = vcombine.high %v1795_v58, %v1795_v58  ;;  %v1817_v28 = vrot.slane %v802_v23, %v1478_v5  ;;  %v819_v44 = vcombine.high %v1792_v40, %v1792_v40  ;;  %v1823_v31 = vrot.slane %v1792_v40, %v1478_v5 }
  0x75   : > { %v801_v37 = vcombine.high %v1804_v56, %v1804_v56  ;;  %v817_v59 = vcombine.high %v1810_v60, %v1810_v60  ;;  %v836_v48 = vcombine.high %v1801_v27, %v1801_v27  ;;  %v1833_v3 = vrot.slane %v1801_v27, %v1478_v5 }
  0x76   : > { %v818_v42 = vcombine.high %v1817_v28, %v1817_v28  ;;  %v1838_v50 = vrot.slane %v819_v44, %v1478_v5  ;;  %v834_v16 = vcombine.high %v1823_v31, %v1823_v31  ;;  %v853_v53 = vcombine.high %v1812_v34, %v1812_v34 }
  0x77   : > { %v1845_v43 = vrot.slane %v836_v48, %v1478_v5  ;;  %v851_v41 = vcombine.high %v1833_v3, %v1833_v3  ;;  %v1851_v15 = vrot.slane %v1812_v34, %v1478_v5  ;;  %v902_v25 = vsel %vm301_vm0, %v741_v49, 0.0 }
  0x78   : > { %v835_v2 = vcombine.high %v1838_v50, %v1838_v50  ;;  %v1857_v63 = vrot.slane %v853_v53, %v1478_v5  ;;  %v903_v18 = vrot.slane %v902_v25, 4  ;;  %v909_v21 = vsel %vm301_vm0, %v749_v55, 0.0 }
  0x79   : > { %v852_v51 = vcombine.high %v1845_v43, %v1845_v43  ;;  %v868_v10 = vcombine.high %v1851_v15, %v1851_v15  ;;  %v910_v12 = vrot.slane %v909_v21, 4  ;;  %v916_v47 = vsel %vm301_vm0, %v748_v46, 0.0 }
  0x7a   : > { %v904_v33 = vadd.f32 %v903_v18, %v902_v25  ;;  %v917_v6 = vrot.slane %v916_v47, 4  ;;  %v923_v39 = vsel %vm301_vm0, %v750_v26, 0.0  ;;  %v930_v30 = vsel %vm301_vm0, %v758_v61, 0.0 }
  0x7b   : > { %v911_v54 = vadd.f32 %v910_v12, %v909_v21  ;;  %v924_v7 = vrot.slane %v923_v39, 4  ;;  %v937_v8 = vsel %vm301_vm0, %v766_v36, 0.0  ;;  %v931_v9 = vrot.slane %v930_v30, 4 }
  0x7c   : > { %v905_v32 = vrot.slane %v904_v33, 2  ;;  %v918_v13 = vadd.f32 %v917_v6, %v916_v47  ;;  %v938_v24 = vrot.slane %v937_v8, 4  ;;  %v944_v46 = vsel %vm301_vm0, %v765_v20, 0.0 }
  0x7d   : > { %v912_v49 = vrot.slane %v911_v54, 2  ;;  %v925_v38 = vadd.f32 %v924_v7, %v923_v39  ;;  %v951_v55 = vsel %vm301_vm0, %v767_v57, 0.0  ;;  %v932_v23 = vadd.f32 %v931_v9, %v930_v30 }
  0x7e   : > { %v906_v1 = vadd.f32 %v905_v32, %v904_v33  ;;  %v919_v45 = vrot.slane %v918_v13, 2  ;;  %v939_v26 = vadd.f32 %v938_v24, %v937_v8  ;;  %v945_v53 = vrot.slane %v944_v46, 4 }
  0x7f   : > { %v913_v44 = vadd.f32 %v912_v49, %v911_v54  ;;  %v926_v48 = vrot.slane %v925_v38, 2  ;;  %v952_v61 = vrot.slane %v951_v55, 4  ;;  %v933_v18 = vrot.slane %v932_v23, 2 }
  0x80   : > { %v907_v25 = vrot.slane %v906_v1, 1  ;;  %v920_v36 = vadd.f32 %v919_v45, %v918_v13  ;;  %v940_v21 = vrot.slane %v939_v26, 2  ;;  %v946_v6 = vadd.f32 %v945_v53, %v944_v46 }
  0x81   : > { %v914_v12 = vrot.slane %v913_v44, 1  ;;  %v927_v47 = vadd.f32 %v926_v48, %v925_v38  ;;  %v953_v39 = vadd.f32 %v952_v61, %v951_v55  ;;  %v934_v57 = vadd.f32 %v933_v18, %v932_v23 }
  0x82   : > { %v1872_v7 = vadd.f32 %v907_v25, %v906_v1  ;;  %v921_v20 = vrot.slane %v920_v36, 1  ;;  %v941_v33 = vadd.f32 %v940_v21, %v939_v26  ;;  %v947_v54 = vrot.slane %v946_v6, 2 }
  0x83   : > { %v1874_v32 = vadd.f32 %v914_v12, %v913_v44  ;;  %v928_v30 = vrot.slane %v927_v47, 1  ;;  %v954_v8 = vrot.slane %v953_v39, 2  ;;  %v935_v24 = vrot.slane %v934_v57, 1 }
  0x84   : > { %v1876_v9 = vadd.f32 %v921_v20, %v920_v36  ;;  %v942_v13 = vrot.slane %v941_v33, 1  ;;  %v958_v49 = vsel %vm301_vm0, %v1781_v11, 0.0  ;;  %v948_v46 = vadd.f32 %v947_v54, %v946_v6 }
  0x85   : > { %v1880_v38 = vadd.f32 %v928_v30, %v927_v47  ;;  %v955_v55 = vadd.f32 %v954_v8, %v953_v39  ;;  %v959_v1 = vrot.slane %v958_v49, 4  ;;  %v1882_v45 = vadd.f32 %v935_v24, %v934_v57 }
  0x86   : > { %v1884_v23 = vadd.f32 %v942_v13, %v941_v33  ;;  %v965_v26 = vsel %vm301_vm0, %v783_v52, 0.0  ;;  %v972_v44 = vsel %vm301_vm0, %v1795_v58, 0.0  ;;  %v949_v48 = vrot.slane %v948_v46, 1 }
  0x87   : > { %v956_v53 = vrot.slane %v955_v55, 1  ;;  %v960_v61 = vadd.f32 %v959_v1, %v958_v49  ;;  %v966_v25 = vrot.slane %v965_v26, 4  ;;  %v973_v36 = vrot.slane %v972_v44, 4 }
  0x88   : > { %v979_v18 = vsel %vm301_vm0, %v784_v4, 0.0  ;;  %v986_v21 = vsel %vm301_vm0, %v1790_v29, 0.0  ;;  %v993_v11 = vsel %vm301_vm0, %v800_v62, 0.0  ;;  %v1902_v52 = vadd.f32 %v949_v48, %v948_v46 }
  0x89   : > { %v1904_v12 = vadd.f32 %v956_v53, %v955_v55  ;;  %v961_v47 = vrot.slane %v960_v61, 2  ;;  %v967_v6 = vadd.f32 %v966_v25, %v965_v26  ;;  %v974_v39 = vadd.f32 %v973_v36, %v972_v44 }
  0x8a   : > { %v980_v20 = vrot.slane %v979_v18, 4  ;;  %v987_v57 = vrot.slane %v986_v21, 4  ;;  %v994_v58 = vrot.slane %v993_v11, 4  ;;  %v1000_v30 = vsel %vm301_vm0, %v1804_v56, 0.0 }
  0x8b   : > { %v962_v33 = vadd.f32 %v961_v47, %v960_v61  ;;  %v968_v4 = vrot.slane %v967_v6, 2  ;;  %v1007_v29 = vsel %vm301_vm0, %v801_v37, 0.0  ;;  %v975_v62 = vrot.slane %v974_v39, 2 }
  0x8c   : > { %v981_v54 = vadd.f32 %v980_v20, %v979_v18  ;;  %v988_v8 = vadd.f32 %v987_v57, %v986_v21  ;;  %v995_v24 = vadd.f32 %v994_v58, %v993_v11  ;;  %v1001_v46 = vrot.slane %v1000_v30, 4 }
  0x8d   : > { %v963_v13 = vrot.slane %v962_v33, 1  ;;  %v969_v49 = vadd.f32 %v968_v4, %v967_v6  ;;  %v1008_v55 = vrot.slane %v1007_v29, 4  ;;  %v976_v1 = vadd.f32 %v975_v62, %v974_v39 }
  0x8e   : > { %v982_v26 = vrot.slane %v981_v54, 2  ;;  %v989_v44 = vrot.slane %v988_v8, 2  ;;  %v996_v48 = vrot.slane %v995_v24, 2  ;;  %v1002_v25 = vadd.f32 %v1001_v46, %v1000_v30 }
  0x8f   : > { %v1912_v53 = vadd.f32 %v963_v13, %v962_v33  ;;  %v970_v61 = vrot.slane %v969_v49, 1  ;;  %v1009_v36 = vadd.f32 %v1008_v55, %v1007_v29  ;;  %v977_v56 = vrot.slane %v976_v1, 1 }
  0x90   : > { %v983_v47 = vadd.f32 %v982_v26, %v981_v54  ;;  %v990_v37 = vadd.f32 %v989_v44, %v988_v8  ;;  %v997_v17 = vadd.f32 %v996_v48, %v995_v24  ;;  %v1003_v21 = vrot.slane %v1002_v25, 2 }
  0x91   : > { %v1914_v18 = vadd.f32 %v970_v61, %v969_v49  ;;  %v1010_v11 = vrot.slane %v1009_v36, 2  ;;  %v1014_v6 = vsel %vm301_vm0, %v1810_v60, 0.0  ;;  %v1918_v39 = vadd.f32 %v977_v56, %v976_v1 }
  0x92   : > { %v984_v20 = vrot.slane %v983_v47, 1  ;;  %v991_v57 = vrot.slane %v990_v37, 1  ;;  %v998_v58 = vrot.slane %v997_v17, 1  ;;  %v1004_v33 = vadd.f32 %v1003_v21, %v1002_v25 }
  0x93   : > { %v1011_v4 = vadd.f32 %v1010_v11, %v1009_v36  ;;  %v1015_v30 = vrot.slane %v1014_v6, 4  ;;  %v1021_v29 = vsel %vm301_vm0, %v817_v59, 0.0  ;;  %v1028_v55 = vsel %vm301_vm0, %v1817_v28, 0.0 }
  0x94   : > { %v1924_v62 = vadd.f32 %v984_v20, %v983_v47  ;;  %v1926_v54 = vadd.f32 %v991_v57, %v990_v37  ;;  %v1928_v8 = vadd.f32 %v998_v58, %v997_v17  ;;  %v1022_v24 = vrot.slane %v1021_v29, 4 }
  0x95   : > { %v1005_v13 = vrot.slane %v1004_v33, 1  ;;  %v1012_v49 = vrot.slane %v1011_v4, 1  ;;  %v1016_v46 = vadd.f32 %v1015_v30, %v1014_v6  ;;  %v1029_v26 = vrot.slane %v1028_v55, 4 }
  0x96   : > { %v1023_v1 = vadd.f32 %v1022_v24, %v1021_v29  ;;  %v1035_v60 = vsel %vm301_vm0, %v818_v42, 0.0  ;;  %v1042_v59 = vsel %vm301_vm0, %v1823_v31, 0.0  ;;  %v1049_v47 = vsel %vm301_vm0, %v834_v16, 0.0 }
  0x97   : > { %v1938_v44 = vadd.f32 %v1005_v13, %v1004_v33  ;;  %v1940_v17 = vadd.f32 %v1012_v49, %v1011_v4  ;;  %v1017_v48 = vrot.slane %v1016_v46, 2  ;;  %v1036_v61 = vrot.slane %v1035_v60, 4 }
  0x98   : > { %v1024_v25 = vrot.slane %v1023_v1, 2  ;;  %v1030_v36 = vadd.f32 %v1029_v26, %v1028_v55  ;;  %v1043_v56 = vrot.slane %v1042_v59, 4  ;;  %v1050_v42 = vrot.slane %v1049_v47, 4 }
  0x99   : > { %v1018_v28 = vadd.f32 %v1017_v48, %v1016_v46  ;;  %v1037_v37 = vadd.f32 %v1036_v61, %v1035_v60  ;;  %v1056_v21 = vsel %vm301_vm0, %v1838_v50, 0.0  ;;  %v1063_v31 = vsel %vm301_vm0, %v835_v2, 0.0 }
  0x9a   : > { %v1025_v11 = vadd.f32 %v1024_v25, %v1023_v1  ;;  %v1031_v6 = vrot.slane %v1030_v36, 2  ;;  %v1044_v20 = vadd.f32 %v1043_v56, %v1042_v59  ;;  %v1057_v57 = vrot.slane %v1056_v21, 4 }
  0x9b   : > { %v1019_v58 = vrot.slane %v1018_v28, 1  ;;  %v1038_v33 = vrot.slane %v1037_v37, 2  ;;  %v1051_v4 = vadd.f32 %v1050_v42, %v1049_v47  ;;  %v1064_v55 = vrot.slane %v1063_v31, 4 }
  0x9c   : > { %v1026_v30 = vrot.slane %v1025_v11, 1  ;;  %v1032_v16 = vadd.f32 %v1031_v6, %v1030_v36  ;;  %v1045_v29 = vrot.slane %v1044_v20, 2  ;;  %v1058_v24 = vadd.f32 %v1057_v57, %v1056_v21 }
  0x9d   : > { %v1952_v13 = vadd.f32 %v1019_v58, %v1018_v28  ;;  %v1039_v49 = vadd.f32 %v1038_v33, %v1037_v37  ;;  %v1052_v46 = vrot.slane %v1051_v4, 2  ;;  %v1065_v25 = vadd.f32 %v1064_v55, %v1063_v31 }
  0x9e   : > { %v1954_v1 = vadd.f32 %v1026_v30, %v1025_v11  ;;  %v1033_v26 = vrot.slane %v1032_v16, 1  ;;  %v1046_v60 = vadd.f32 %v1045_v29, %v1044_v20  ;;  %v1059_v59 = vrot.slane %v1058_v24, 2 }
  0x9f   : > { %v1040_v48 = vrot.slane %v1039_v49, 1  ;;  %v1053_v61 = vadd.f32 %v1052_v46, %v1051_v4  ;;  %v1070_v50 = vsel %vm301_vm0, %v1833_v3, 0.0  ;;  %v1066_v42 = vrot.slane %v1065_v25, 2 }
  0xa0   : > { %v1958_v2 = vadd.f32 %v1033_v26, %v1032_v16  ;;  %v1047_v36 = vrot.slane %v1046_v60, 1  ;;  %v1060_v56 = vadd.f32 %v1059_v59, %v1058_v24  ;;  %v1071_v47 = vrot.slane %v1070_v50, 4 }
  0xa1   : > { %v1960_v28 = vadd.f32 %v1040_v48, %v1039_v49  ;;  %v1054_v37 = vrot.slane %v1053_v61, 1  ;;  %v1077_v21 = vsel %vm301_vm0, %v851_v41, 0.0  ;;  %v1067_v33 = vadd.f32 %v1066_v42, %v1065_v25 }
  0xa2   : > { %v1966_v11 = vadd.f32 %v1047_v36, %v1046_v60  ;;  %v1061_v6 = vrot.slane %v1060_v56, 1  ;;  %v1072_v20 = vadd.f32 %v1071_v47, %v1070_v50  ;;  %v1078_v57 = vrot.slane %v1077_v21, 4 }
  0xa3   : > { %v1968_v58 = vadd.f32 %v1054_v37, %v1053_v61  ;;  %v1084_v4 = vsel %vm301_vm0, %v1845_v43, 0.0  ;;  %v1091_v31 = vsel %vm301_vm0, %v852_v51, 0.0  ;;  %v1068_v29 = vrot.slane %v1067_v33, 1 }
  0xa4   : > { %v1976_v30 = vadd.f32 %v1061_v6, %v1060_v56  ;;  %v1073_v3 = vrot.slane %v1072_v20, 2  ;;  %v1079_v41 = vadd.f32 %v1078_v57, %v1077_v21  ;;  %v1085_v16 = vrot.slane %v1084_v4, 4 }
  0xa5   : > { %v1092_v24 = vrot.slane %v1091_v31, 4  ;;  %v1098_v49 = vsel %vm301_vm0, %v1851_v15, 0.0  ;;  %v1105_v46 = vsel %vm301_vm0, %v868_v10, 0.0  ;;  %v1984_v51 = vadd.f32 %v1068_v29, %v1067_v33 }
  0xa6   : > { %v1074_v55 = vadd.f32 %v1073_v3, %v1072_v20  ;;  %v1080_v26 = vrot.slane %v1079_v41, 2  ;;  %v1086_v43 = vadd.f32 %v1085_v16, %v1084_v4  ;;  %v1099_v60 = vrot.slane %v1098_v49, 4 }
  0xa7   : > { %v1093_v59 = vadd.f32 %v1092_v24, %v1091_v31  ;;  %v1106_v48 = vrot.slane %v1105_v46, 4  ;;  %v1112_v61 = vsel %vm301_vm0, %v1857_v63, 0.0  ;;  %v2054_v10 = vcombine.high %v1857_v63, %v1857_v63 }
  0xa8   : > { %v1075_v25 = vrot.slane %v1074_v55, 1  ;;  %v1081_v50 = vadd.f32 %v1080_v26, %v1079_v41  ;;  %v1087_v36 = vrot.slane %v1086_v43, 2  ;;  %v1100_v56 = vadd.f32 %v1099_v60, %v1098_v49 }
  0xa9   : > { %v1094_v47 = vrot.slane %v1093_v59, 2  ;;  %v1107_v37 = vadd.f32 %v1106_v48, %v1105_v46  ;;  %v1113_v15 = vrot.slane %v1112_v61, 4  ;;  %v1119_v42 = vsel %vm301_vm0, %v2054_v10, 0.0 }
  0xaa   : > { %v1076_v21 = vadd.f32 %v1075_v25, %v1074_v55  ;;  %v1082_v6 = vrot.slane %v1081_v50, 1  ;;  %v1088_v20 = vadd.f32 %v1087_v36, %v1086_v43  ;;  %v1101_v57 = vrot.slane %v1100_v56, 2 }
  0xab   : > { %v1095_v33 = vadd.f32 %v1094_v47, %v1093_v59  ;;  %v1108_v4 = vrot.slane %v1107_v37, 2  ;;  %v1114_v31 = vadd.f32 %v1113_v15, %v1112_v61  ;;  %v1120_v3 = vrot.slane %v1119_v42, 4 }
  0xac   : > { %v1083_v16 = vadd.f32 %v1082_v6, %v1081_v50  ;;  %v1089_v41 = vrot.slane %v1088_v20, 1  ;;  %v1102_v29 = vadd.f32 %v1101_v57, %v1100_v56  ;;  %v1158_v24 = vcombine.low %v1872_v7, %v1874_v32 }
  0xad   : > { %v1096_v49 = vrot.slane %v1095_v33, 1  ;;  %v1109_v46 = vadd.f32 %v1108_v4, %v1107_v37  ;;  %v1115_v26 = vrot.slane %v1114_v31, 2  ;;  %v1121_v63 = vadd.f32 %v1120_v3, %v1119_v42 }
  0xae   : > { %v1090_v60 = vadd.f32 %v1089_v41, %v1088_v20  ;;  %v1103_v48 = vrot.slane %v1102_v29, 1  ;;  %v1159_v55 = vcombine.low %v1876_v9, %v1880_v38  ;;  %v1166_v43 = vrot.slane %v1158_v24, %v1478_v5 }
  0xaf   : > { %v1097_v59 = vadd.f32 %v1096_v49, %v1095_v33  ;;  %v1110_v61 = vrot.slane %v1109_v46, 1  ;;  %v1116_v25 = vadd.f32 %v1115_v26, %v1114_v31  ;;  %v1122_v50 = vrot.slane %v1121_v63, 2 }
  0xb0   : > { %v1104_v36 = vadd.f32 %v1103_v48, %v1102_v29  ;;  %v1173_v56 = vrot.slane %v1159_v55, %v1478_v5  ;;  %v1175_v7 = vcombine.low %v1882_v45, %v1884_v23  ;;  %v1176_v32 = vcombine.low %v1902_v52, %v1904_v12 }
  0xb1   : > { %v1111_v47 = vadd.f32 %v1110_v61, %v1109_v46  ;;  %v1117_v37 = vrot.slane %v1116_v25, 1  ;;  %v1123_v15 = vadd.f32 %v1122_v50, %v1121_v63  ;;  %v1192_v9 = vcombine.low %v1912_v53, %v1914_v18 }
  0xb2   : > { %v1174_v38 = vcombine.low %v1166_v43, %v1173_v56  ;;  %v1183_v10 = vrot.slane %v1175_v7, %v1478_v5  ;;  %v1190_v42 = vrot.slane %v1176_v32, %v1478_v5  ;;  %v1193_v6 = vcombine.low %v1918_v39, %v1924_v62 }
  0xb3   : > { %v1118_v20 = vadd.f32 %v1117_v37, %v1116_v25  ;;  %v1124_v57 = vrot.slane %v1123_v15, 1  ;;  %v1200_v45 = vrot.slane %v1192_v9, %v1478_v5  ;;  %v1209_v23 = vcombine.low %v1926_v54, %v1928_v8 }
  0xb4   : > { %v1191_v52 = vcombine.low %v1183_v10, %v1190_v42  ;;  %v1207_v12 = vrot.slane %v1193_v6, %v1478_v5  ;;  %v1210_v53 = vcombine.low %v1938_v44, %v1940_v17  ;;  %v1226_v18 = vcombine.low %v1952_v13, %v1954_v1 }
  0xb5   : > { %v1125_v33 = vadd.f32 %v1124_v57, %v1123_v15  ;;  %v1217_v4 = vrot.slane %v1209_v23, %v1478_v5  ;;  %v1227_v39 = vcombine.low %v1958_v2, %v1960_v28  ;;  %v1243_v62 = vcombine.low %v1966_v11, %v1968_v58 }
  0xb6   : > { %v1208_v31 = vcombine.low %v1200_v45, %v1207_v12  ;;  %v1224_v54 = vrot.slane %v1210_v53, %v1478_v5  ;;  %v1234_v8 = vrot.slane %v1226_v18, %v1478_v5  ;;  %v1244_v44 = vcombine.low %v1976_v30, %v1984_v51 }
  0xb7   : > { %v1241_v17 = vrot.slane %v1227_v39, %v1478_v5  ;;  %v1251_v13 = vrot.slane %v1243_v62, %v1478_v5  ;;  %v1260_v1 = vcombine.low %v1076_v21, %v1083_v16  ;;  %v1261_v3 = vcombine.low %v1090_v60, %v1097_v59 }
  0xb8   : > { %v1225_v41 = vcombine.low %v1217_v4, %v1224_v54  ;;  %v1258_v2 = vrot.slane %v1244_v44, %v1478_v5  ;;  %v1277_v28 = vcombine.low %v1104_v36, %v1111_v47  ;;  %v1278_v29 = vcombine.low %v1118_v20, %v1125_v33 }
  0xb9   : > { %v1242_v11 = vcombine.low %v1234_v8, %v1241_v17  ;;  %v1268_v58 = vrot.slane %v1260_v1, %v1478_v5  ;;  %v1275_v24 = vrot.slane %v1261_v3, %v1478_v5  ;;  %1427 = vrcp.f32 %v1174_v38 }
  0xba   : > { %v1259_v49 = vcombine.low %v1251_v13, %v1258_v2  ;;  %v1285_v30 = vrot.slane %v1277_v28, %v1478_v5  ;;  %v1292_v51 = vrot.slane %v1278_v29, %v1478_v5  ;;  %1429 = vrcp.f32 %v1191_v52 }
  0xbb   : > { %v1276_v21 = vcombine.low %v1268_v58, %v1275_v24  ;;  %1431 = vrcp.f32 %v1208_v31 }
  0xbc   : > { %v1293_v16 = vcombine.low %v1285_v30, %v1292_v51  ;;  %1433 = vrcp.f32 %v1225_v41 }
  0xbd   : > { %1435 = vrcp.f32 %v1242_v11 }
  0xbe   : > { %1437 = vrcp.f32 %v1259_v49 }
  0xbf   : > { %1439 = vrcp.f32 %v1276_v21 }
  0xc0   : > { %1441 = vrcp.f32 %v1293_v16 }
  0xc6   : > { %v1428_v46 = vpop.eup %1427 }
  0xc7   : > { %v1430_v26 = vpop.eup %1429  ;;  %v1303_v63 = vmul.f32 %v1428_v46, %v1760_v14 }
  0xc8   : > { %v1432_v60 = vpop.eup %1431  ;;  %v1305_v5 = vmul.f32 %v1430_v26, %v1762_v19 }
  0xc9   : > { %v1434_v48 = vpop.eup %1433  ;;  %v1307_v55 = vmul.f32 %v1432_v60, %v1768_v22  ;;  %1318 = vst [vmem:[%s116_s14] sm:$0xff] %v1303_v63 }
  0xca   : > { %v1436_v43 = vpop.eup %1435  ;;  %v1309_v59 = vmul.f32 %v1434_v48, %v1774_v0  ;;  %1319 = vst [vmem:[%s116_s14 + $0x8] sm:$0xff] %v1305_v5 }
  0xcb   : > { %v1438_v61 = vpop.eup %1437  ;;  %v1311_v25 = vmul.f32 %v1436_v43, %v1783_v35  ;;  %1320 = vst [vmem:[%s116_s14 + $0x10] sm:$0xff] %v1307_v55 }
  0xcc   : > { %v1440_v50 = vpop.eup %1439  ;;  %v1313_v36 = vmul.f32 %v1438_v61, %v1792_v40  ;;  %1321 = vst [vmem:[%s116_s14 + $0x18] sm:$0xff] %v1309_v59 }
  0xcd   : > { %v1442_v14 = vpop.eup %1441  ;;  %v1315_v56 = vmul.f32 %v1440_v50, %v1801_v27  ;;  %1322 = vst [vmem:[%s116_s14 + $0x20] sm:$0xff] %v1311_v25 }
  0xce   : > { %v1317_v19 = vmul.f32 %v1442_v14, %v1812_v34  ;;  %1323 = vst [vmem:[%s116_s14 + $0x28] sm:$0xff] %v1313_v36 }
  0xcf   : > { %1324 = vst [vmem:[%s116_s14 + $0x30] sm:$0xff] %v1315_v56 }
  0xd0   : > { %1325 = vst [vmem:[%s116_s14 + $0x38] sm:$0xff] %v1317_v19 }
  0xd1 PF: > { %s11_s6 = sadd.s32 1, %s1449_s6  }
  0xd2   : > { %p8_p4 = scmp.ge.s32.totalorder %s11_s6, 4  }
  0xd4   :  { %10 = sbr.rel (!%p8_p4) target bundleno = 1 (0x1), region = 54 }

</bundles_post_ra>
